<compile_context>
chip_gen: v7x
topology: tpu7x:2x2x1
jax: 0.10.0
libtpu: 0.0.40
codegen_flags: <defaults>
</compile_context>

<pallas_src>
import functools

import numpy as np
import jax
import jax.numpy as jnp
from jax.experimental import pallas as pl
from jax.experimental.pallas import tpu as pltpu

EPS = 1e-5


# --------------------------------------------------------------------------------------
# Helpers
# --------------------------------------------------------------------------------------
def _cp():
    return pltpu.CompilerParams(
        dimension_semantics=("parallel",),          # shard grid steps across v7x's 2 TCs
        vmem_limit_bytes=32 * 1024 * 1024,          # headroom for v7x's 64 MiB physical VMEM
    )


def _pick_row_tile(M):
    # Largest divisor of M that is a multiple of 8, capped so we get >=4 grid steps
    # (pipelining) and a modest per-step VMEM footprint.
    cap = min(1024, M)
    if M >= 32:
        cap = min(cap, max(8, M // 4))
    for t in range(cap, 7, -1):
        if M % t == 0 and t % 8 == 0:
            return t
    return M


def _row_spec(tm, c):
    return pl.BlockSpec((tm, c), lambda i: (i, 0))


def _img_spec(hw, c):
    return pl.BlockSpec((1, hw, c), lambda n: (n, 0, 0))


def _stat_spec(c):
    return pl.BlockSpec((1, 2, c), lambda i: (i, 0, 0))


def _resident(shape):
    # constant index_map => loaded once, stays VMEM-resident across the grid
    nd = len(shape)
    return pl.BlockSpec(shape, lambda i: (0,) * nd)


def _build_masks(H, W):
    # (HW, 8) f32 boundary masks for the 8 non-center 3x3 taps, kh-major order.
    hh, ww = np.divmod(np.arange(H * W), W)
    cols = []
    for kh in range(3):
        for kw in range(3):
            dh, dw = kh - 1, kw - 1
            if dh == 0 and dw == 0:
                continue
            valid = (hh + dh >= 0) & (hh + dh < H) & (ww + dw >= 0) & (ww + dw < W)
            cols.append(valid.astype(np.float32))
    return jnp.asarray(np.stack(cols, axis=1))


def _tile_stats(z):
    # f32 per-tile (sum, mean-centered sum of squares) -> (2, C)
    rows = z.shape[0]
    s = jnp.sum(z, axis=0, keepdims=True)
    c = z - s * (1.0 / rows)
    ss = jnp.sum(c * c, axis=0, keepdims=True)
    return jnp.concatenate([s, ss], axis=0)


def _fold_bn(stats, gamma, beta, rows_per_tile):
    # Parallel-variance combine of per-tile (sum, centered sumsq); fold into scale/shift.
    sums = stats[:, 0, :]                              # (T, C)
    css = stats[:, 1, :]                               # (T, C)
    n = stats.shape[0] * rows_per_tile
    mean = jnp.sum(sums, axis=0) / n
    tmean = sums / rows_per_tile
    var = (jnp.sum(css, axis=0)
           + rows_per_tile * jnp.sum((tmean - mean) ** 2, axis=0)) / n   # biased (training BN)
    scale = gamma.astype(jnp.float32) * jax.lax.rsqrt(var + EPS)
    shift = beta.astype(jnp.float32) - mean * scale
    return scale.reshape(1, -1), shift.reshape(1, -1)


# --------------------------------------------------------------------------------------
# Kernels
# --------------------------------------------------------------------------------------
def _conv1x1_stats_kernel(x_ref, w_ref, y_ref, st_ref):
    # x_ref: (TM, Cin) bf16; w_ref: (Cin, C) bf16 resident; y_ref: (TM, C) bf16;
    # st_ref: (1, 2, C) f32 per-tile stats of the conv output (pre-BN).
    y = jnp.dot(x_ref[...], w_ref[...], preferred_element_type=jnp.float32)
    y_ref[...] = y.astype(y_ref.dtype)
    st_ref[0] = _tile_stats(y)


def _conv3x3_stats_kernel(W, y_in_ref, scale_ref, shift_ref, w_ref, mask_ref, y_ref, st_ref):
    # y_in_ref: (1, HW, C) bf16 raw conv1 output; scale/shift: folded BN1 (1, C) f32;
    # w_ref: (9, C, C) bf16 im2col taps, resident; mask_ref: (HW, 8) f32 boundary masks.
    # 3x3 conv = 9 roll/mask taps accumulated through bf16 dots (no (HW,9C) patches buffer).
    HW = y_in_ref.shape[1]
    C = w_ref.shape[2]
    y32 = jnp.maximum(
        y_in_ref[0].astype(jnp.float32) * scale_ref[...] + shift_ref[...], 0.0)  # bn1+relu
    masks = mask_ref[...]
    acc = jnp.zeros((HW, C), jnp.float32)
    m_idx = 0
    tap = 0
    for kh in range(3):
        for kw in range(3):
            dh, dw = kh - 1, kw - 1
            d = dh * W + dw                          # source row offset along the HW axis
            if d == 0:
                t32 = y32
            else:
                t32 = pltpu.roll(y32, shift=(-d) % HW, axis=0) * masks[:, m_idx:m_idx + 1]
                m_idx += 1
            acc = acc + jnp.dot(t32.astype(jnp.bfloat16), w_ref[tap],
                                preferred_element_type=jnp.float32)
            tap += 1
    y_ref[0] = acc.astype(y_ref.dtype)
    st_ref[0] = _tile_stats(acc)


def _norm_conv1x1_stats_kernel(y_in_ref, scale_ref, shift_ref, w_ref, y_ref, st_ref):
    # bn2 + relu (folded scale/shift, f32), conv3 (1x1, bf16 MXU), per-tile stats (f32).
    y = jnp.maximum(
        y_in_ref[...].astype(jnp.float32) * scale_ref[...] + shift_ref[...], 0.0)
    z = jnp.dot(y.astype(jnp.bfloat16), w_ref[...], preferred_element_type=jnp.float32)
    y_ref[...] = z.astype(y_ref.dtype)
    st_ref[0] = _tile_stats(z)


def _bn_residual_relu_kernel(y_in_ref, x_ref, scale_ref, shift_ref, o_ref):
    # bn3 (folded) + identity add + relu; lane-dense (TM, 4C) tiles, f32 math, f32 out.
    o_ref[...] = jnp.maximum(
        y_in_ref[...].astype(jnp.float32) * scale_ref[...] + shift_ref[...]
        + x_ref[...].astype(jnp.float32), 0.0).astype(o_ref.dtype)


# --------------------------------------------------------------------------------------
# One-time parameter preprocessing (PyTorch OIHW -> kernel-ready bf16 layouts)
# --------------------------------------------------------------------------------------
def prepare_block_params(params):
    conv1_w, g1, b1, conv2_w, g2, b2, conv3_w, g3, b3 = params
    C = conv1_w.shape[0]
    w1 = jnp.asarray(conv1_w[:, :, 0, 0].T, jnp.bfloat16)                           # (Cin, C)
    w2 = jnp.asarray(jnp.transpose(conv2_w, (2, 3, 1, 0)).reshape(9, C, C),
                     jnp.bfloat16)                                                  # (9, C, C)
    w3 = jnp.asarray(conv3_w[:, :, 0, 0].T, jnp.bfloat16)                           # (C, 4C)
    f32 = lambda a: jnp.asarray(a, jnp.float32)
    return (w1, w2, w3, f32(g1), f32(b1), f32(g2), f32(b2), f32(g3), f32(b3))


# --------------------------------------------------------------------------------------
# Forward pass (NHWC-native; keep channels-last end-to-end in a real network)
# --------------------------------------------------------------------------------------
def block_forward_nhwc(x_nhwc, prepared):
    w1, w2, w3, g1, b1, g2, b2, g3, b3 = prepared
    N, H, W, Cin = x_nhwc.shape
    C = w1.shape[1]
    C4 = w3.shape[1]
    assert Cin == C4 == 4 * C, \
        "identity_downsample is None => in_channel must equal out_channel*4"
    HW = H * W
    M = N * HW
    TM = _pick_row_tile(M)
    T = M // TM
    cp = _cp()

    # Lane-dense bf16 slab; reused as conv1 input AND as the residual identity in pass 4.
    x = x_nhwc.reshape(M, Cin).astype(jnp.bfloat16)

    # ---- pass 1: conv1 (1x1) + per-tile stats of its output ---------------------------
    y1, st1 = pl.pallas_call(
        _conv1x1_stats_kernel,
        grid=(T,),
        in_specs=[_row_spec(TM, Cin), _resident((Cin, C))],
        out_specs=(_row_spec(TM, C), _stat_spec(C)),
        out_shape=(jax.ShapeDtypeStruct((M, C), jnp.bfloat16),
                   jax.ShapeDtypeStruct((T, 2, C), jnp.float32)),
        compiler_params=cp,
    )(x, w1)
    scale1, shift1 = _fold_bn(st1, g1, b1, TM)

    # ---- pass 2: bn1+relu, conv2 (3x3) via 9 roll/mask taps, + stats ------------------
    # One full image per grid step (roll+mask im2col needs the whole image in-block).
    # TODO(synk): add HW-halo tiling here for very large H*W*C so pass 2 also gets >=2
    #             steps per TensorCore on v7x.
    masks = _build_masks(H, W)
    y2, st2 = pl.pallas_call(
        functools.partial(_conv3x3_stats_kernel, W),
        grid=(N,),
        in_specs=[_img_spec(HW, C), _resident((1, C)), _resident((1, C)),
                  _resident((9, C, C)), _resident((HW, 8))],
        out_specs=(_img_spec(HW, C), _stat_spec(C)),
        out_shape=(jax.ShapeDtypeStruct((N, HW, C), jnp.bfloat16),
                   jax.ShapeDtypeStruct((N, 2, C), jnp.float32)),
        compiler_params=cp,
    )(y1.reshape(N, HW, C), scale1, shift1, w2, masks)
    scale2, shift2 = _fold_bn(st2, g2, b2, HW)

    # ---- pass 3: bn2+relu, conv3 (1x1), + stats ----------------------------------------
    y3, st3 = pl.pallas_call(
        _norm_conv1x1_stats_kernel,
        grid=(T,),
        in_specs=[_row_spec(TM, C), _resident((1, C)), _resident((1, C)),
                  _resident((C, C4))],
        out_specs=(_row_spec(TM, C4), _stat_spec(C4)),
        out_shape=(jax.ShapeDtypeStruct((M, C4), jnp.bfloat16),
                   jax.ShapeDtypeStruct((T, 2, C4), jnp.float32)),
        compiler_params=cp,
    )(y2.reshape(M, C), scale2, shift2, w3)
    scale3, shift3 = _fold_bn(st3, g3, b3, TM)

    # ---- pass 4: bn3 + identity add + relu (elementwise, row-tiled) --------------------
    out = pl.pallas_call(
        _bn_residual_relu_kernel,
        grid=(T,),
        in_specs=[_row_spec(TM, C4), _row_spec(TM, C4),
                  _resident((1, C4)), _resident((1, C4))],
        out_specs=_row_spec(TM, C4),
        out_shape=jax.ShapeDtypeStruct((M, C4), jnp.float32),
        compiler_params=cp,
    )(y3, x, scale3, shift3)

    return out.reshape(N, H, W, C4)


def block_forward_nchw(x_nchw, prepared):
    # NCHW boundary shim only; keep activations NHWC end-to-end in a real network.
    x_nhwc = jnp.transpose(x_nchw, (0, 2, 3, 1))
    out = block_forward_nhwc(x_nhwc, prepared)
    return jnp.transpose(out, (0, 3, 1, 2))


# --------------------------------------------------------------------------------------
# Pure-JAX f32 reference mirroring the PyTorch module (training-mode BN)
# --------------------------------------------------------------------------------------
def reference_forward(x_nchw, params):
    conv1_w, g1, b1, conv2_w, g2, b2, conv3_w, g3, b3 = params
    x = jnp.transpose(x_nchw, (0, 2, 3, 1)).astype(jnp.float32)

    def bn(y, g, b):
        mean = y.mean(axis=(0, 1, 2), keepdims=True)
        var = ((y - mean) ** 2).mean(axis=(0, 1, 2), keepdims=True)
        return (y - mean) * jax.lax.rsqrt(var + EPS) * g.reshape(1, 1, 1, -1) \
            + b.reshape(1, 1, 1, -1)

    y = jnp.einsum('nhwc,cd->nhwd', x, conv1_w[:, :, 0, 0].T)
    y = jax.nn.relu(bn(y, g1, b1))
    y = jax.lax.conv_general_dilated(
        y, jnp.transpose(conv2_w, (2, 3, 1, 0)), window_strides=(1, 1), padding='SAME',
        dimension_numbers=('NHWC', 'HWIO', 'NHWC'))
    y = jax.nn.relu(bn(y, g2, b2))
    y = jnp.einsum('nhwc,cd->nhwd', y, conv3_w[:, :, 0, 0].T)
    y = bn(y, g3, b3)
    y = jax.nn.relu(y + x)
    return jnp.transpose(y, (0, 3, 1, 2))


if __name__ == "__main__":
    # Small-but-TPU-shaped bottleneck config (a real ResNet stage):
    #   out_channel = 128, in_channel = out_channel * 4 = 512, N = 2, H = W = 16.
    N, H, W = 2, 16, 16
    C_out = 128
    C_in = 4 * C_out

    key = jax.random.PRNGKey(0)
    ks = jax.random.split(key, 10)

    conv1_w = 0.05 * jax.random.normal(ks[0], (C_out, C_in, 1, 1), jnp.float32)       # OIHW
    conv2_w = 0.05 * jax.random.normal(ks[1], (C_out, C_out, 3, 3), jnp.float32)      # OIHW
    conv3_w = 0.05 * jax.random.normal(ks[2], (4 * C_out, C_out, 1, 1), jnp.float32)  # OIHW
    g1 = 1.0 + 0.1 * jax.random.normal(ks[3], (C_out,), jnp.float32)
    b1 = 0.1 * jax.random.normal(ks[4], (C_out,), jnp.float32)
    g2 = 1.0 + 0.1 * jax.random.normal(ks[5], (C_out,), jnp.float32)
    b2 = 0.1 * jax.random.normal(ks[6], (C_out,), jnp.float32)
    g3 = 1.0 + 0.1 * jax.random.normal(ks[7], (4 * C_out,), jnp.float32)
    b3 = 0.1 * jax.random.normal(ks[8], (4 * C_out,), jnp.float32)

    x_nchw = jax.random.normal(ks[9], (N, C_in, H, W), jnp.float32)
    params = (conv1_w, g1, b1, conv2_w, g2, b2, conv3_w, g3, b3)

    prepared = prepare_block_params(params)            # one-time weight preprocessing
    fwd = jax.jit(block_forward_nchw)

    out = jax.block_until_ready(fwd(x_nchw, prepared))
    ref = jax.block_until_ready(reference_forward(x_nchw, params))

    assert out.shape == (N, 4 * C_out, H, W)
    max_err = float(jnp.max(jnp.abs(out - ref)))
    # bf16 MXU operands + bf16 inter-pass slabs vs a full-f32 reference => relaxed tolerance.
    assert jnp.allclose(out, ref, rtol=2e-2, atol=5e-2), f"max abs err = {max_err}"
    print("KERNEL_OK")
</pallas_src>

<mosaic_0001>
module attributes {stable_mosaic.version = 11 : i64} {
  func.func @_conv1x1_stats_kernel(%arg0: i32, %arg1: memref<128x512xbf16, #tpu.memory_space<vmem>>, %arg2: memref<512x128xbf16, #tpu.memory_space<vmem>>, %arg3: memref<128x128xbf16, #tpu.memory_space<vmem>>, %arg4: memref<1x2x128xf32, #tpu.memory_space<vmem>>) attributes {dimension_semantics = [#tpu.dimension_semantics<parallel>], iteration_bounds = array<i64: 4>, scalar_prefetch = 0 : i64, scratch_operands = 0 : i64, tpu.core_type = #tpu.core_type<tc>, window_params = [{transform_indices = @transform_0, window_bounds = array<i64: 128, 512>}, {pipeline_mode = #tpu.pipeline_mode<synchronous>, transform_indices = @transform_1, window_bounds = array<i64: 512, 128>}, {transform_indices = @transform_2, window_bounds = array<i64: 128, 128>}, {transform_indices = @transform_3, window_bounds = array<i64: 1, 2, 128>}]} {
    %c0 = arith.constant 0 : index
    %c0_0 = arith.constant 0 : index
    %0 = vector.load %arg1[%c0, %c0_0] : memref<128x512xbf16, #tpu.memory_space<vmem>>, vector<128x512xbf16>
    %c0_1 = arith.constant 0 : index
    %c0_2 = arith.constant 0 : index
    %1 = vector.load %arg2[%c0_1, %c0_2] : memref<512x128xbf16, #tpu.memory_space<vmem>>, vector<512x128xbf16>
    %cst = arith.constant dense<0.000000e+00> : vector<128x128xf32>
    %2 = tpu.matmul %0, %1, %cst {dimension_numbers = #tpu.dot_dimension_numbers<[1], [0], [0], [1], [0, 0, 1, 1], [], []>} : vector<128x512xbf16>, vector<512x128xbf16>, vector<128x128xf32> -> vector<128x128xf32>
    %3 = arith.truncf %2 : vector<128x128xf32> to vector<128x128xbf16>
    %c0_3 = arith.constant 0 : index
    %c0_4 = arith.constant 0 : index
    %4 = vector.load %arg3[%c0_3, %c0_4] : memref<128x128xbf16, #tpu.memory_space<vmem>>, vector<128x128xbf16>
    tpu.vector_store %arg3[%c0_3, %c0_4], %3 {strides = array<i32>} : memref<128x128xbf16, #tpu.memory_space<vmem>>, vector<128x128xbf16>,
    %cst_5 = arith.constant dense<0.000000e+00> : vector<128xf32>
    %5 = vector.multi_reduction <add>, %2, %cst_5 [0] : vector<128x128xf32> to vector<128xf32>
    %6 = vector.shape_cast %5 : vector<128xf32> to vector<1x128xf32>
    %cst_6 = arith.constant 7.812500e-03 : f32
    %7 = vector.broadcast %cst_6 : f32 to vector<1x128xf32>
    %8 = arith.mulf %6, %7 : vector<1x128xf32>
    %9 = vector.broadcast %8 : vector<1x128xf32> to vector<128x128xf32>
    %10 = arith.subf %2, %9 : vector<128x128xf32>
    %11 = arith.mulf %10, %10 : vector<128x128xf32>
    %cst_7 = arith.constant dense<0.000000e+00> : vector<128xf32>
    %12 = vector.multi_reduction <add>, %11, %cst_7 [0] : vector<128x128xf32> to vector<128xf32>
    %13 = vector.shape_cast %12 : vector<128xf32> to vector<1x128xf32>
    %14 = tpu.concatenate %6, %13 in 0 : vector<1x128xf32>, vector<1x128xf32> -> vector<2x128xf32>
    %c0_8 = arith.constant 0 : index
    %c0_9 = arith.constant 0 : index
    %c0_10 = arith.constant 0 : index
    %15 = vector.load %arg4[%c0_8, %c0_9, %c0_10] : memref<1x2x128xf32, #tpu.memory_space<vmem>>, vector<1x2x128xf32>
    %16 = vector.shape_cast %15 : vector<1x2x128xf32> to vector<2x128xf32>
    %17 = vector.shape_cast %14 : vector<2x128xf32> to vector<1x2x128xf32>
    tpu.vector_store %arg4[%c0_8, %c0_9, %c0_10], %17 {strides = array<i32>} : memref<1x2x128xf32, #tpu.memory_space<vmem>>, vector<1x2x128xf32>,
    return
  }
  func.func @transform_0(%arg0: i32) -> (i32, i32) {
    %c0_i32 = arith.constant 0 : i32
    %c0_i32_0 = arith.constant 0 : i32
    return %arg0, %c0_i32 : i32, i32
  }
  func.func @transform_1(%arg0: i32) -> (i32, i32) {
    %c0_i32 = arith.constant 0 : i32
    %c0_i32_0 = arith.constant 0 : i32
    %c0_i32_1 = arith.constant 0 : i32
    return %c0_i32, %c0_i32_0 : i32, i32
  }
  func.func @transform_2(%arg0: i32) -> (i32, i32) {
    %c0_i32 = arith.constant 0 : i32
    %c0_i32_0 = arith.constant 0 : i32
    return %arg0, %c0_i32 : i32, i32
  }
  func.func @transform_3(%arg0: i32) -> (i32, i32, i32) {
    %c0_i32 = arith.constant 0 : i32
    %c0_i32_0 = arith.constant 0 : i32
    %c0_i32_1 = arith.constant 0 : i32
    return %arg0, %c0_i32, %c0_i32_0 : i32, i32, i32
  }
}

module attributes {stable_mosaic.version = 11 : i64} {
  func.func @_conv3x3_stats_kernel(%arg0: i32, %arg1: memref<1x256x128xbf16, #tpu.memory_space<vmem>>, %arg2: memref<1x128xf32, #tpu.memory_space<vmem>>, %arg3: memref<1x128xf32, #tpu.memory_space<vmem>>, %arg4: memref<9x128x128xbf16, #tpu.memory_space<vmem>>, %arg5: memref<256x8xf32, #tpu.memory_space<vmem>>, %arg6: memref<1x256x128xbf16, #tpu.memory_space<vmem>>, %arg7: memref<1x2x128xf32, #tpu.memory_space<vmem>>) attributes {dimension_semantics = [#tpu.dimension_semantics<parallel>], iteration_bounds = array<i64: 2>, scalar_prefetch = 0 : i64, scratch_operands = 0 : i64, tpu.core_type = #tpu.core_type<tc>, window_params = [{transform_indices = @transform_0, window_bounds = array<i64: 1, 256, 128>}, {pipeline_mode = #tpu.pipeline_mode<synchronous>, transform_indices = @transform_1, window_bounds = array<i64: 1, 128>}, {pipeline_mode = #tpu.pipeline_mode<synchronous>, transform_indices = @transform_2, window_bounds = array<i64: 1, 128>}, {pipeline_mode = #tpu.pipeline_mode<synchronous>, transform_indices = @transform_3, window_bounds = array<i64: 9, 128, 128>}, {pipeline_mode = #tpu.pipeline_mode<synchronous>, transform_indices = @transform_4, window_bounds = array<i64: 256, 8>}, {transform_indices = @transform_5, window_bounds = array<i64: 1, 256, 128>}, {transform_indices = @transform_6, window_bounds = array<i64: 1, 2, 128>}]} {
    %c0 = arith.constant 0 : index
    %c0_0 = arith.constant 0 : index
    %c0_1 = arith.constant 0 : index
    %0 = vector.load %arg1[%c0, %c0_0, %c0_1] : memref<1x256x128xbf16, #tpu.memory_space<vmem>>, vector<1x256x128xbf16>
    %1 = vector.shape_cast %0 : vector<1x256x128xbf16> to vector<256x128xbf16>
    %2 = arith.extf %1 : vector<256x128xbf16> to vector<256x128xf32>
    %c0_2 = arith.constant 0 : index
    %c0_3 = arith.constant 0 : index
    %3 = vector.load %arg2[%c0_2, %c0_3] : memref<1x128xf32, #tpu.memory_space<vmem>>, vector<1x128xf32>
    %4 = vector.broadcast %3 : vector<1x128xf32> to vector<256x128xf32>
    %5 = arith.mulf %2, %4 : vector<256x128xf32>
    %c0_4 = arith.constant 0 : index
    %c0_5 = arith.constant 0 : index
    %6 = vector.load %arg3[%c0_4, %c0_5] : memref<1x128xf32, #tpu.memory_space<vmem>>, vector<1x128xf32>
    %7 = vector.broadcast %6 : vector<1x128xf32> to vector<256x128xf32>
    %8 = arith.addf %5, %7 : vector<256x128xf32>
    %cst = arith.constant 0.000000e+00 : f32
    %9 = vector.broadcast %cst : f32 to vector<256x128xf32>
    %10 = arith.maximumf %8, %9 : vector<256x128xf32>
    %c0_6 = arith.constant 0 : index
    %c0_7 = arith.constant 0 : index
    %11 = vector.load %arg5[%c0_6, %c0_7] : memref<256x8xf32, #tpu.memory_space<vmem>>, vector<256x8xf32>
    %cst_8 = arith.constant 0.000000e+00 : f32
    %12 = vector.broadcast %cst_8 : f32 to vector<256x128xf32>
    %c17_i32 = arith.constant 17 : i32
    %13 = tpu.dynamic_rotate %10 by %c17_i32 dim 0 : vector<256x128xf32>, i32 -> vector<256x128xf32>
    %14 = vector.extract_strided_slice %11 {offsets = [0, 0], sizes = [256, 1], strides = [1, 1]} : vector<256x8xf32> to vector<256x1xf32>
    %15 = vector.broadcast %14 : vector<256x1xf32> to vector<256x128xf32>
    %16 = arith.mulf %13, %15 : vector<256x128xf32>
    %17 = arith.truncf %16 : vector<256x128xf32> to vector<256x128xbf16>
    %c0_9 = arith.constant 0 : index
    %c0_10 = arith.constant 0 : index
    %c0_11 = arith.constant 0 : index
    %18 = vector.load %arg4[%c0_9, %c0_10, %c0_11] : memref<9x128x128xbf16, #tpu.memory_space<vmem>>, vector<1x128x128xbf16>
    %19 = vector.shape_cast %18 : vector<1x128x128xbf16> to vector<128x128xbf16>
    %cst_12 = arith.constant dense<0.000000e+00> : vector<256x128xf32>
    %20 = tpu.matmul %17, %19, %cst_12 {dimension_numbers = #tpu.dot_dimension_numbers<[1], [0], [0], [1], [0, 0, 1, 1], [], []>} : vector<256x128xbf16>, vector<128x128xbf16>, vector<256x128xf32> -> vector<256x128xf32>
    %21 = arith.addf %12, %20 : vector<256x128xf32>
    %c16_i32 = arith.constant 16 : i32
    %22 = tpu.dynamic_rotate %10 by %c16_i32 dim 0 : vector<256x128xf32>, i32 -> vector<256x128xf32>
    %23 = vector.extract_strided_slice %11 {offsets = [0, 1], sizes = [256, 1], strides = [1, 1]} : vector<256x8xf32> to vector<256x1xf32>
    %24 = vector.broadcast %23 : vector<256x1xf32> to vector<256x128xf32>
    %25 = arith.mulf %22, %24 : vector<256x128xf32>
    %26 = arith.truncf %25 : vector<256x128xf32> to vector<256x128xbf16>
    %c1 = arith.constant 1 : index
    %c0_13 = arith.constant 0 : index
    %c0_14 = arith.constant 0 : index
    %27 = vector.load %arg4[%c1, %c0_13, %c0_14] : memref<9x128x128xbf16, #tpu.memory_space<vmem>>, vector<1x128x128xbf16>
    %28 = vector.shape_cast %27 : vector<1x128x128xbf16> to vector<128x128xbf16>
    %cst_15 = arith.constant dense<0.000000e+00> : vector<256x128xf32>
    %29 = tpu.matmul %26, %28, %cst_15 {dimension_numbers = #tpu.dot_dimension_numbers<[1], [0], [0], [1], [0, 0, 1, 1], [], []>} : vector<256x128xbf16>, vector<128x128xbf16>, vector<256x128xf32> -> vector<256x128xf32>
    %30 = arith.addf %21, %29 : vector<256x128xf32>
    %c15_i32 = arith.constant 15 : i32
    %31 = tpu.dynamic_rotate %10 by %c15_i32 dim 0 : vector<256x128xf32>, i32 -> vector<256x128xf32>
    %32 = vector.extract_strided_slice %11 {offsets = [0, 2], sizes = [256, 1], strides = [1, 1]} : vector<256x8xf32> to vector<256x1xf32>
    %33 = vector.broadcast %32 : vector<256x1xf32> to vector<256x128xf32>
    %34 = arith.mulf %31, %33 : vector<256x128xf32>
    %35 = arith.truncf %34 : vector<256x128xf32> to vector<256x128xbf16>
    %c2 = arith.constant 2 : index
    %c0_16 = arith.constant 0 : index
    %c0_17 = arith.constant 0 : index
    %36 = vector.load %arg4[%c2, %c0_16, %c0_17] : memref<9x128x128xbf16, #tpu.memory_space<vmem>>, vector<1x128x128xbf16>
    %37 = vector.shape_cast %36 : vector<1x128x128xbf16> to vector<128x128xbf16>
    %cst_18 = arith.constant dense<0.000000e+00> : vector<256x128xf32>
    %38 = tpu.matmul %35, %37, %cst_18 {dimension_numbers = #tpu.dot_dimension_numbers<[1], [0], [0], [1], [0, 0, 1, 1], [], []>} : vector<256x128xbf16>, vector<128x128xbf16>, vector<256x128xf32> -> vector<256x128xf32>
    %39 = arith.addf %30, %38 : vector<256x128xf32>
    %c1_i32 = arith.constant 1 : i32
    %40 = tpu.dynamic_rotate %10 by %c1_i32 dim 0 : vector<256x128xf32>, i32 -> vector<256x128xf32>
    %41 = vector.extract_strided_slice %11 {offsets = [0, 3], sizes = [256, 1], strides = [1, 1]} : vector<256x8xf32> to vector<256x1xf32>
    %42 = vector.broadcast %41 : vector<256x1xf32> to vector<256x128xf32>
    %43 = arith.mulf %40, %42 : vector<256x128xf32>
    %44 = arith.truncf %43 : vector<256x128xf32> to vector<256x128xbf16>
    %c3 = arith.constant 3 : index
    %c0_19 = arith.constant 0 : index
    %c0_20 = arith.constant 0 : index
    %45 = vector.load %arg4[%c3, %c0_19, %c0_20] : memref<9x128x128xbf16, #tpu.memory_space<vmem>>, vector<1x128x128xbf16>
    %46 = vector.shape_cast %45 : vector<1x128x128xbf16> to vector<128x128xbf16>
    %cst_21 = arith.constant dense<0.000000e+00> : vector<256x128xf32>
    %47 = tpu.matmul %44, %46, %cst_21 {dimension_numbers = #tpu.dot_dimension_numbers<[1], [0], [0], [1], [0, 0, 1, 1], [], []>} : vector<256x128xbf16>, vector<128x128xbf16>, vector<256x128xf32> -> vector<256x128xf32>
    %48 = arith.addf %39, %47 : vector<256x128xf32>
    %49 = arith.truncf %10 : vector<256x128xf32> to vector<256x128xbf16>
    %c4 = arith.constant 4 : index
    %c0_22 = arith.constant 0 : index
    %c0_23 = arith.constant 0 : index
    %50 = vector.load %arg4[%c4, %c0_22, %c0_23] : memref<9x128x128xbf16, #tpu.memory_space<vmem>>, vector<1x128x128xbf16>
    %51 = vector.shape_cast %50 : vector<1x128x128xbf16> to vector<128x128xbf16>
    %cst_24 = arith.constant dense<0.000000e+00> : vector<256x128xf32>
    %52 = tpu.matmul %49, %51, %cst_24 {dimension_numbers = #tpu.dot_dimension_numbers<[1], [0], [0], [1], [0, 0, 1, 1], [], []>} : vector<256x128xbf16>, vector<128x128xbf16>, vector<256x128xf32> -> vector<256x128xf32>
    %53 = arith.addf %48, %52 : vector<256x128xf32>
    %c255_i32 = arith.constant 255 : i32
    %54 = tpu.dynamic_rotate %10 by %c255_i32 dim 0 : vector<256x128xf32>, i32 -> vector<256x128xf32>
    %55 = vector.extract_strided_slice %11 {offsets = [0, 4], sizes = [256, 1], strides = [1, 1]} : vector<256x8xf32> to vector<256x1xf32>
    %56 = vector.broadcast %55 : vector<256x1xf32> to vector<256x128xf32>
    %57 = arith.mulf %54, %56 : vector<256x128xf32>
    %58 = arith.truncf %57 : vector<256x128xf32> to vector<256x128xbf16>
    %c5 = arith.constant 5 : index
    %c0_25 = arith.constant 0 : index
    %c0_26 = arith.constant 0 : index
    %59 = vector.load %arg4[%c5, %c0_25, %c0_26] : memref<9x128x128xbf16, #tpu.memory_space<vmem>>, vector<1x128x128xbf16>
    %60 = vector.shape_cast %59 : vector<1x128x128xbf16> to vector<128x128xbf16>
    %cst_27 = arith.constant dense<0.000000e+00> : vector<256x128xf32>
    %61 = tpu.matmul %58, %60, %cst_27 {dimension_numbers = #tpu.dot_dimension_numbers<[1], [0], [0], [1], [0, 0, 1, 1], [], []>} : vector<256x128xbf16>, vector<128x128xbf16>, vector<256x128xf32> -> vector<256x128xf32>
    %62 = arith.addf %53, %61 : vector<256x128xf32>
    %c241_i32 = arith.constant 241 : i32
    %63 = tpu.dynamic_rotate %10 by %c241_i32 dim 0 : vector<256x128xf32>, i32 -> vector<256x128xf32>
    %64 = vector.extract_strided_slice %11 {offsets = [0, 5], sizes = [256, 1], strides = [1, 1]} : vector<256x8xf32> to vector<256x1xf32>
    %65 = vector.broadcast %64 : vector<256x1xf32> to vector<256x128xf32>
    %66 = arith.mulf %63, %65 : vector<256x128xf32>
    %67 = arith.truncf %66 : vector<256x128xf32> to vector<256x128xbf16>
    %c6 = arith.constant 6 : index
    %c0_28 = arith.constant 0 : index
    %c0_29 = arith.constant 0 : index
    %68 = vector.load %arg4[%c6, %c0_28, %c0_29] : memref<9x128x128xbf16, #tpu.memory_space<vmem>>, vector<1x128x128xbf16>
    %69 = vector.shape_cast %68 : vector<1x128x128xbf16> to vector<128x128xbf16>
    %cst_30 = arith.constant dense<0.000000e+00> : vector<256x128xf32>
    %70 = tpu.matmul %67, %69, %cst_30 {dimension_numbers = #tpu.dot_dimension_numbers<[1], [0], [0], [1], [0, 0, 1, 1], [], []>} : vector<256x128xbf16>, vector<128x128xbf16>, vector<256x128xf32> -> vector<256x128xf32>
    %71 = arith.addf %62, %70 : vector<256x128xf32>
    %c240_i32 = arith.constant 240 : i32
    %72 = tpu.dynamic_rotate %10 by %c240_i32 dim 0 : vector<256x128xf32>, i32 -> vector<256x128xf32>
    %73 = vector.extract_strided_slice %11 {offsets = [0, 6], sizes = [256, 1], strides = [1, 1]} : vector<256x8xf32> to vector<256x1xf32>
    %74 = vector.broadcast %73 : vector<256x1xf32> to vector<256x128xf32>
    %75 = arith.mulf %72, %74 : vector<256x128xf32>
    %76 = arith.truncf %75 : vector<256x128xf32> to vector<256x128xbf16>
    %c7 = arith.constant 7 : index
    %c0_31 = arith.constant 0 : index
    %c0_32 = arith.constant 0 : index
    %77 = vector.load %arg4[%c7, %c0_31, %c0_32] : memref<9x128x128xbf16, #tpu.memory_space<vmem>>, vector<1x128x128xbf16>
    %78 = vector.shape_cast %77 : vector<1x128x128xbf16> to vector<128x128xbf16>
    %cst_33 = arith.constant dense<0.000000e+00> : vector<256x128xf32>
    %79 = tpu.matmul %76, %78, %cst_33 {dimension_numbers = #tpu.dot_dimension_numbers<[1], [0], [0], [1], [0, 0, 1, 1], [], []>} : vector<256x128xbf16>, vector<128x128xbf16>, vector<256x128xf32> -> vector<256x128xf32>
    %80 = arith.addf %71, %79 : vector<256x128xf32>
    %c239_i32 = arith.constant 239 : i32
    %81 = tpu.dynamic_rotate %10 by %c239_i32 dim 0 : vector<256x128xf32>, i32 -> vector<256x128xf32>
    %82 = vector.extract_strided_slice %11 {offsets = [0, 7], sizes = [256, 1], strides = [1, 1]} : vector<256x8xf32> to vector<256x1xf32>
    %83 = vector.broadcast %82 : vector<256x1xf32> to vector<256x128xf32>
    %84 = arith.mulf %81, %83 : vector<256x128xf32>
    %85 = arith.truncf %84 : vector<256x128xf32> to vector<256x128xbf16>
    %c8 = arith.constant 8 : index
    %c0_34 = arith.constant 0 : index
    %c0_35 = arith.constant 0 : index
    %86 = vector.load %arg4[%c8, %c0_34, %c0_35] : memref<9x128x128xbf16, #tpu.memory_space<vmem>>, vector<1x128x128xbf16>
    %87 = vector.shape_cast %86 : vector<1x128x128xbf16> to vector<128x128xbf16>
    %cst_36 = arith.constant dense<0.000000e+00> : vector<256x128xf32>
    %88 = tpu.matmul %85, %87, %cst_36 {dimension_numbers = #tpu.dot_dimension_numbers<[1], [0], [0], [1], [0, 0, 1, 1], [], []>} : vector<256x128xbf16>, vector<128x128xbf16>, vector<256x128xf32> -> vector<256x128xf32>
    %89 = arith.addf %80, %88 : vector<256x128xf32>
    %90 = arith.truncf %89 : vector<256x128xf32> to vector<256x128xbf16>
    %c0_37 = arith.constant 0 : index
    %c0_38 = arith.constant 0 : index
    %c0_39 = arith.constant 0 : index
    %91 = vector.load %arg6[%c0_37, %c0_38, %c0_39] : memref<1x256x128xbf16, #tpu.memory_space<vmem>>, vector<1x256x128xbf16>
    %92 = vector.shape_cast %91 : vector<1x256x128xbf16> to vector<256x128xbf16>
    %93 = vector.shape_cast %90 : vector<256x128xbf16> to vector<1x256x128xbf16>
    tpu.vector_store %arg6[%c0_37, %c0_38, %c0_39], %93 {strides = array<i32>} : memref<1x256x128xbf16, #tpu.memory_space<vmem>>, vector<1x256x128xbf16>,
    %cst_40 = arith.constant dense<0.000000e+00> : vector<128xf32>
    %94 = vector.multi_reduction <add>, %89, %cst_40 [0] : vector<256x128xf32> to vector<128xf32>
    %95 = vector.shape_cast %94 : vector<128xf32> to vector<1x128xf32>
    %cst_41 = arith.constant 3.906250e-03 : f32
    %96 = vector.broadcast %cst_41 : f32 to vector<1x128xf32>
    %97 = arith.mulf %95, %96 : vector<1x128xf32>
    %98 = vector.broadcast %97 : vector<1x128xf32> to vector<256x128xf32>
    %99 = arith.subf %89, %98 : vector<256x128xf32>
    %100 = arith.mulf %99, %99 : vector<256x128xf32>
    %cst_42 = arith.constant dense<0.000000e+00> : vector<128xf32>
    %101 = vector.multi_reduction <add>, %100, %cst_42 [0] : vector<256x128xf32> to vector<128xf32>
    %102 = vector.shape_cast %101 : vector<128xf32> to vector<1x128xf32>
    %103 = tpu.concatenate %95, %102 in 0 : vector<1x128xf32>, vector<1x128xf32> -> vector<2x128xf32>
    %c0_43 = arith.constant 0 : index
    %c0_44 = arith.constant 0 : index
    %c0_45 = arith.constant 0 : index
    %104 = vector.load %arg7[%c0_43, %c0_44, %c0_45] : memref<1x2x128xf32, #tpu.memory_space<vmem>>, vector<1x2x128xf32>
    %105 = vector.shape_cast %104 : vector<1x2x128xf32> to vector<2x128xf32>
    %106 = vector.shape_cast %103 : vector<2x128xf32> to vector<1x2x128xf32>
    tpu.vector_store %arg7[%c0_43, %c0_44, %c0_45], %106 {strides = array<i32>} : memref<1x2x128xf32, #tpu.memory_space<vmem>>, vector<1x2x128xf32>,
    return
  }
  func.func @transform_0(%arg0: i32) -> (i32, i32, i32) {
    %c0_i32 = arith.constant 0 : i32
    %c0_i32_0 = arith.constant 0 : i32
    %c0_i32_1 = arith.constant 0 : i32
    return %arg0, %c0_i32, %c0_i32_0 : i32, i32, i32
  }
  func.func @transform_1(%arg0: i32) -> (i32, i32) {
    %c0_i32 = arith.constant 0 : i32
    %c0_i32_0 = arith.constant 0 : i32
    %c0_i32_1 = arith.constant 0 : i32
    return %c0_i32, %c0_i32_0 : i32, i32
  }
  func.func @transform_2(%arg0: i32) -> (i32, i32) {
    %c0_i32 = arith.constant 0 : i32
    %c0_i32_0 = arith.constant 0 : i32
    %c0_i32_1 = arith.constant 0 : i32
    return %c0_i32, %c0_i32_0 : i32, i32
  }
  func.func @transform_3(%arg0: i32) -> (i32, i32, i32) {
    %c0_i32 = arith.constant 0 : i32
    %c0_i32_0 = arith.constant 0 : i32
    %c0_i32_1 = arith.constant 0 : i32
    %c0_i32_2 = arith.constant 0 : i32
    return %c0_i32, %c0_i32_0, %c0_i32_1 : i32, i32, i32
  }
  func.func @transform_4(%arg0: i32) -> (i32, i32) {
    %c0_i32 = arith.constant 0 : i32
    %c0_i32_0 = arith.constant 0 : i32
    %c0_i32_1 = arith.constant 0 : i32
    return %c0_i32, %c0_i32_0 : i32, i32
  }
  func.func @transform_5(%arg0: i32) -> (i32, i32, i32) {
    %c0_i32 = arith.constant 0 : i32
    %c0_i32_0 = arith.constant 0 : i32
    %c0_i32_1 = arith.constant 0 : i32
    return %arg0, %c0_i32, %c0_i32_0 : i32, i32, i32
  }
  func.func @transform_6(%arg0: i32) -> (i32, i32, i32) {
    %c0_i32 = arith.constant 0 : i32
    %c0_i32_0 = arith.constant 0 : i32
    %c0_i32_1 = arith.constant 0 : i32
    return %arg0, %c0_i32, %c0_i32_0 : i32, i32, i32
  }
}

module attributes {stable_mosaic.version = 11 : i64} {
  func.func @_norm_conv1x1_stats_kernel(%arg0: i32, %arg1: memref<128x128xbf16, #tpu.memory_space<vmem>>, %arg2: memref<1x128xf32, #tpu.memory_space<vmem>>, %arg3: memref<1x128xf32, #tpu.memory_space<vmem>>, %arg4: memref<128x512xbf16, #tpu.memory_space<vmem>>, %arg5: memref<128x512xbf16, #tpu.memory_space<vmem>>, %arg6: memref<1x2x512xf32, #tpu.memory_space<vmem>>) attributes {dimension_semantics = [#tpu.dimension_semantics<parallel>], iteration_bounds = array<i64: 4>, scalar_prefetch = 0 : i64, scratch_operands = 0 : i64, tpu.core_type = #tpu.core_type<tc>, window_params = [{transform_indices = @transform_0, window_bounds = array<i64: 128, 128>}, {pipeline_mode = #tpu.pipeline_mode<synchronous>, transform_indices = @transform_1, window_bounds = array<i64: 1, 128>}, {pipeline_mode = #tpu.pipeline_mode<synchronous>, transform_indices = @transform_2, window_bounds = array<i64: 1, 128>}, {pipeline_mode = #tpu.pipeline_mode<synchronous>, transform_indices = @transform_3, window_bounds = array<i64: 128, 512>}, {transform_indices = @transform_4, window_bounds = array<i64: 128, 512>}, {transform_indices = @transform_5, window_bounds = array<i64: 1, 2, 512>}]} {
    %c0 = arith.constant 0 : index
    %c0_0 = arith.constant 0 : index
    %0 = vector.load %arg1[%c0, %c0_0] : memref<128x128xbf16, #tpu.memory_space<vmem>>, vector<128x128xbf16>
    %1 = arith.extf %0 : vector<128x128xbf16> to vector<128x128xf32>
    %c0_1 = arith.constant 0 : index
    %c0_2 = arith.constant 0 : index
    %2 = vector.load %arg2[%c0_1, %c0_2] : memref<1x128xf32, #tpu.memory_space<vmem>>, vector<1x128xf32>
    %3 = vector.broadcast %2 : vector<1x128xf32> to vector<128x128xf32>
    %4 = arith.mulf %1, %3 : vector<128x128xf32>
    %c0_3 = arith.constant 0 : index
    %c0_4 = arith.constant 0 : index
    %5 = vector.load %arg3[%c0_3, %c0_4] : memref<1x128xf32, #tpu.memory_space<vmem>>, vector<1x128xf32>
    %6 = vector.broadcast %5 : vector<1x128xf32> to vector<128x128xf32>
    %7 = arith.addf %4, %6 : vector<128x128xf32>
    %cst = arith.constant 0.000000e+00 : f32
    %8 = vector.broadcast %cst : f32 to vector<128x128xf32>
    %9 = arith.maximumf %7, %8 : vector<128x128xf32>
    %10 = arith.truncf %9 : vector<128x128xf32> to vector<128x128xbf16>
    %c0_5 = arith.constant 0 : index
    %c0_6 = arith.constant 0 : index
    %11 = vector.load %arg4[%c0_5, %c0_6] : memref<128x512xbf16, #tpu.memory_space<vmem>>, vector<128x512xbf16>
    %cst_7 = arith.constant dense<0.000000e+00> : vector<128x512xf32>
    %12 = tpu.matmul %10, %11, %cst_7 {dimension_numbers = #tpu.dot_dimension_numbers<[1], [0], [0], [1], [0, 0, 1, 1], [], []>} : vector<128x128xbf16>, vector<128x512xbf16>, vector<128x512xf32> -> vector<128x512xf32>
    %13 = arith.truncf %12 : vector<128x512xf32> to vector<128x512xbf16>
    %c0_8 = arith.constant 0 : index
    %c0_9 = arith.constant 0 : index
    %14 = vector.load %arg5[%c0_8, %c0_9] : memref<128x512xbf16, #tpu.memory_space<vmem>>, vector<128x512xbf16>
    tpu.vector_store %arg5[%c0_8, %c0_9], %13 {strides = array<i32>} : memref<128x512xbf16, #tpu.memory_space<vmem>>, vector<128x512xbf16>,
    %cst_10 = arith.constant dense<0.000000e+00> : vector<512xf32>
    %15 = vector.multi_reduction <add>, %12, %cst_10 [0] : vector<128x512xf32> to vector<512xf32>
    %16 = vector.shape_cast %15 : vector<512xf32> to vector<1x512xf32>
    %cst_11 = arith.constant 7.812500e-03 : f32
    %17 = vector.broadcast %cst_11 : f32 to vector<1x512xf32>
    %18 = arith.mulf %16, %17 : vector<1x512xf32>
    %19 = vector.broadcast %18 : vector<1x512xf32> to vector<128x512xf32>
    %20 = arith.subf %12, %19 : vector<128x512xf32>
    %21 = arith.mulf %20, %20 : vector<128x512xf32>
    %cst_12 = arith.constant dense<0.000000e+00> : vector<512xf32>
    %22 = vector.multi_reduction <add>, %21, %cst_12 [0] : vector<128x512xf32> to vector<512xf32>
    %23 = vector.shape_cast %22 : vector<512xf32> to vector<1x512xf32>
    %24 = tpu.concatenate %16, %23 in 0 : vector<1x512xf32>, vector<1x512xf32> -> vector<2x512xf32>
    %c0_13 = arith.constant 0 : index
    %c0_14 = arith.constant 0 : index
    %c0_15 = arith.constant 0 : index
    %25 = vector.load %arg6[%c0_13, %c0_14, %c0_15] : memref<1x2x512xf32, #tpu.memory_space<vmem>>, vector<1x2x512xf32>
    %26 = vector.shape_cast %25 : vector<1x2x512xf32> to vector<2x512xf32>
    %27 = vector.shape_cast %24 : vector<2x512xf32> to vector<1x2x512xf32>
    tpu.vector_store %arg6[%c0_13, %c0_14, %c0_15], %27 {strides = array<i32>} : memref<1x2x512xf32, #tpu.memory_space<vmem>>, vector<1x2x512xf32>,
    return
  }
  func.func @transform_0(%arg0: i32) -> (i32, i32) {
    %c0_i32 = arith.constant 0 : i32
    %c0_i32_0 = arith.constant 0 : i32
    return %arg0, %c0_i32 : i32, i32
  }
  func.func @transform_1(%arg0: i32) -> (i32, i32) {
    %c0_i32 = arith.constant 0 : i32
    %c0_i32_0 = arith.constant 0 : i32
    %c0_i32_1 = arith.constant 0 : i32
    return %c0_i32, %c0_i32_0 : i32, i32
  }
  func.func @transform_2(%arg0: i32) -> (i32, i32) {
    %c0_i32 = arith.constant 0 : i32
    %c0_i32_0 = arith.constant 0 : i32
    %c0_i32_1 = arith.constant 0 : i32
    return %c0_i32, %c0_i32_0 : i32, i32
  }
  func.func @transform_3(%arg0: i32) -> (i32, i32) {
    %c0_i32 = arith.constant 0 : i32
    %c0_i32_0 = arith.constant 0 : i32
    %c0_i32_1 = arith.constant 0 : i32
    return %c0_i32, %c0_i32_0 : i32, i32
  }
  func.func @transform_4(%arg0: i32) -> (i32, i32) {
    %c0_i32 = arith.constant 0 : i32
    %c0_i32_0 = arith.constant 0 : i32
    return %arg0, %c0_i32 : i32, i32
  }
  func.func @transform_5(%arg0: i32) -> (i32, i32, i32) {
    %c0_i32 = arith.constant 0 : i32
    %c0_i32_0 = arith.constant 0 : i32
    %c0_i32_1 = arith.constant 0 : i32
    return %arg0, %c0_i32, %c0_i32_0 : i32, i32, i32
  }
}

module attributes {stable_mosaic.version = 11 : i64} {
  func.func @_bn_residual_relu_kernel(%arg0: i32, %arg1: memref<128x512xbf16, #tpu.memory_space<vmem>>, %arg2: memref<128x512xbf16, #tpu.memory_space<vmem>>, %arg3: memref<1x512xf32, #tpu.memory_space<vmem>>, %arg4: memref<1x512xf32, #tpu.memory_space<vmem>>, %arg5: memref<128x512xf32, #tpu.memory_space<vmem>>) attributes {dimension_semantics = [#tpu.dimension_semantics<parallel>], iteration_bounds = array<i64: 4>, scalar_prefetch = 0 : i64, scratch_operands = 0 : i64, tpu.core_type = #tpu.core_type<tc>, window_params = [{transform_indices = @transform_0, window_bounds = array<i64: 128, 512>}, {transform_indices = @transform_1, window_bounds = array<i64: 128, 512>}, {pipeline_mode = #tpu.pipeline_mode<synchronous>, transform_indices = @transform_2, window_bounds = array<i64: 1, 512>}, {pipeline_mode = #tpu.pipeline_mode<synchronous>, transform_indices = @transform_3, window_bounds = array<i64: 1, 512>}, {transform_indices = @transform_4, window_bounds = array<i64: 128, 512>}]} {
    %c0 = arith.constant 0 : index
    %c0_0 = arith.constant 0 : index
    %0 = vector.load %arg1[%c0, %c0_0] : memref<128x512xbf16, #tpu.memory_space<vmem>>, vector<128x512xbf16>
    %1 = arith.extf %0 : vector<128x512xbf16> to vector<128x512xf32>
    %c0_1 = arith.constant 0 : index
    %c0_2 = arith.constant 0 : index
    %2 = vector.load %arg3[%c0_1, %c0_2] : memref<1x512xf32, #tpu.memory_space<vmem>>, vector<1x512xf32>
    %3 = vector.broadcast %2 : vector<1x512xf32> to vector<128x512xf32>
    %4 = arith.mulf %1, %3 : vector<128x512xf32>
    %c0_3 = arith.constant 0 : index
    %c0_4 = arith.constant 0 : index
    %5 = vector.load %arg4[%c0_3, %c0_4] : memref<1x512xf32, #tpu.memory_space<vmem>>, vector<1x512xf32>
    %6 = vector.broadcast %5 : vector<1x512xf32> to vector<128x512xf32>
    %7 = arith.addf %4, %6 : vector<128x512xf32>
    %c0_5 = arith.constant 0 : index
    %c0_6 = arith.constant 0 : index
    %8 = vector.load %arg2[%c0_5, %c0_6] : memref<128x512xbf16, #tpu.memory_space<vmem>>, vector<128x512xbf16>
    %9 = arith.extf %8 : vector<128x512xbf16> to vector<128x512xf32>
    %10 = arith.addf %7, %9 : vector<128x512xf32>
    %cst = arith.constant 0.000000e+00 : f32
    %11 = vector.broadcast %cst : f32 to vector<128x512xf32>
    %12 = arith.maximumf %10, %11 : vector<128x512xf32>
    %c0_7 = arith.constant 0 : index
    %c0_8 = arith.constant 0 : index
    %13 = vector.load %arg5[%c0_7, %c0_8] : memref<128x512xf32, #tpu.memory_space<vmem>>, vector<128x512xf32>
    tpu.vector_store %arg5[%c0_7, %c0_8], %12 {strides = array<i32>} : memref<128x512xf32, #tpu.memory_space<vmem>>, vector<128x512xf32>,
    return
  }
  func.func @transform_0(%arg0: i32) -> (i32, i32) {
    %c0_i32 = arith.constant 0 : i32
    %c0_i32_0 = arith.constant 0 : i32
    return %arg0, %c0_i32 : i32, i32
  }
  func.func @transform_1(%arg0: i32) -> (i32, i32) {
    %c0_i32 = arith.constant 0 : i32
    %c0_i32_0 = arith.constant 0 : i32
    return %arg0, %c0_i32 : i32, i32
  }
  func.func @transform_2(%arg0: i32) -> (i32, i32) {
    %c0_i32 = arith.constant 0 : i32
    %c0_i32_0 = arith.constant 0 : i32
    %c0_i32_1 = arith.constant 0 : i32
    return %c0_i32, %c0_i32_0 : i32, i32
  }
  func.func @transform_3(%arg0: i32) -> (i32, i32) {
    %c0_i32 = arith.constant 0 : i32
    %c0_i32_0 = arith.constant 0 : i32
    %c0_i32_1 = arith.constant 0 : i32
    return %c0_i32, %c0_i32_0 : i32, i32
  }
  func.func @transform_4(%arg0: i32) -> (i32, i32) {
    %c0_i32 = arith.constant 0 : i32
    %c0_i32_0 = arith.constant 0 : i32
    return %arg0, %c0_i32 : i32, i32
  }
}

</mosaic_0001>

<bundles_post_ra>
// kernel: block_forward_nchw.4
= control target key start
LH: loop header
LB: loop body
LE: loop exit
PB: predicated region body
PF: predicated region fallthrough
CT: control target
= control target key end

     0   :  { %s1477_s12 = smov 0   ;;  %s1696_s0 = inlined_call_operand.vmem [shape: bf16[512,512], index: 0, kind: input, shape index: {}]   ;;  %s1697_s1 = inlined_call_operand.vmem [shape: bf16[512,128], index: 1, kind: input, shape index: {}]   ;;  %s1698_s2 = inlined_call_operand.vmem [shape: bf16[512,128], index: 2, kind: output, shape index: {0}]   ;;  %s1699_s3 = inlined_call_operand.vmem [shape: f32[4,2,128], index: 3, kind: output, shape index: {1}]  }
   0x1 LB: > { %s1483_s13 = sadd.s32 4294967295, %s1455_s12   ;;  %p1080_p0 = scmp.ge.s32.totalorder %s1455_s12, 1  ;;  %s1455_s12 = sphi %s1477_s12, %s14_s12  }
   0x2   : > { %p142_p1 = scmp.lt.s32.totalorder %s1455_s12, 5 }
   0x4   : > { %p143_p2 = pnand %p1080_p0, %p142_p1 }
   0x5   : > { %v1369_v0 = vld [vmem:[%s1697_s1 + $0x40] sm:$0xff] (!%p143_p2)   ;;  %v1373_v4 = vld [vmem:[%s1697_s1 + $0x48] sm:$0xff] (!%p143_p2)   ;;  %v1377_v8 = vld [vmem:[%s1697_s1 + $0x50] sm:$0xff] (!%p143_p2)   ;;  %s1081_s21 = sshll.u32 (!%p143_p2), %s1483_s13, 4  ;;  %p184_p4 = scmp.lt.s32.totalorder (!%p143_p2), %s1483_s13, 3  ;;  %vm986_vm0 = vcmask (!%p143_p2), 1040384  }
   0x6   : > { %146 = sbr.rel (%p143_p2) target bundleno = 381 (0x17d), region = 28  ;;  %v1370_v1 = vld [vmem:[%s1697_s1 + $0xc0] sm:$0xff] (!%p143_p2)   ;;  %1233 = vmatprep.subr.bf16.mxu0 (!%p143_p2), %v1369_v0  ;;  %v1374_v5 = vld [vmem:[%s1697_s1 + $0xc8] sm:$0xff] (!%p143_p2)   ;;  %v1378_v9 = vld [vmem:[%s1697_s1 + $0xd0] sm:$0xff] (!%p143_p2)   ;;  %p172_p3 = scmp.lt.s32.totalorder (!%p143_p2), %s1081_s21, 63 }
   0x7   : > { %v1371_v2 = vld [vmem:[%s1697_s1] sm:$0xff] (!%p143_p2)   ;;  %1297 = vmatprep.subr.bf16.mxu1 (!%p143_p2), %v1370_v1  ;;  %v1375_v6 = vld [vmem:[%s1697_s1 + $0x8] sm:$0xff] (!%p143_p2)   ;;  %v1379_v10 = vld [vmem:[%s1697_s1 + $0x10] sm:$0xff] (!%p143_p2)  }
   0x8   : > { %v1372_v3 = vld [vmem:[%s1697_s1 + $0x80] sm:$0xff] (!%p143_p2)   ;;  %1234 = vmatpush3.bf16.msra.mxu0 (!%p143_p2), %v1371_v2  ;;  %v1376_v7 = vld [vmem:[%s1697_s1 + $0x88] sm:$0xff] (!%p143_p2)   ;;  %v1380_v11 = vld [vmem:[%s1697_s1 + $0x90] sm:$0xff] (!%p143_p2)  }
   0x9   : > { %1298 = vmatpush3.bf16.msra.mxu1 (!%p143_p2), %v1372_v3  ;;  %1235 = vmatprep.subr.bf16.mxu0 (!%p143_p2), %v1373_v4  ;;  %v1381_v12 = vld [vmem:[%s1697_s1 + $0x58] sm:$0xff] (!%p143_p2)   ;;  %v1385_v16 = vld [vmem:[%s1697_s1 + $0x60] sm:$0xff] (!%p143_p2)   ;;  %v1389_v20 = vld [vmem:[%s1697_s1 + $0x68] sm:$0xff] (!%p143_p2)  }
   0xa   : > { %1299 = vmatprep.subr.bf16.mxu1 (!%p143_p2), %v1374_v5  ;;  %v1382_v13 = vld [vmem:[%s1697_s1 + $0xd8] sm:$0xff] (!%p143_p2)   ;;  %v1386_v17 = vld [vmem:[%s1697_s1 + $0xe0] sm:$0xff] (!%p143_p2)   ;;  %v1390_v21 = vld [vmem:[%s1697_s1 + $0xe8] sm:$0xff] (!%p143_p2)  }
   0xb   : > { %v1383_v14 = vld [vmem:[%s1697_s1 + $0x18] sm:$0xff] (!%p143_p2)   ;;  %v1387_v18 = vld [vmem:[%s1697_s1 + $0x20] sm:$0xff] (!%p143_p2)   ;;  %v1391_v22 = vld [vmem:[%s1697_s1 + $0x28] sm:$0xff] (!%p143_p2)  }
   0xc   : > { %1236 = vmatpush3.bf16.msra.mxu0 (!%p143_p2), %v1375_v6  ;;  %v1384_v15 = vld [vmem:[%s1697_s1 + $0x98] sm:$0xff] (!%p143_p2)   ;;  %v1388_v19 = vld [vmem:[%s1697_s1 + $0xa0] sm:$0xff] (!%p143_p2)   ;;  %v1392_v23 = vld [vmem:[%s1697_s1 + $0xa8] sm:$0xff] (!%p143_p2)  }
   0xd   : > { %1300 = vmatpush3.bf16.msra.mxu1 %v1376_v7  ;;  %1237 = vmatprep.subr.bf16.mxu0 %v1377_v8  ;;  %s1701_s21 = smov (!%p172_p3, %s1081_s21), 63  ;;  %v1393_v24 = vld [vmem:[%s1697_s1 + $0x70] sm:$0xff]   ;;  %v1397_v28 = vld [vmem:[%s1697_s1 + $0x78] sm:$0xff]   ;;  %s1703_s13 = smov (!%p184_p4, %s1483_s13), 3 }
   0xe   : > { %1301 = vmatprep.subr.bf16.mxu1 %v1378_v9  ;;  %v1394_v25 = vld [vmem:[%s1697_s1 + $0xf0] sm:$0xff]   ;;  %s1169_s19 = sshll.u32 %s1701_s21, 4  ;;  %v1398_v29 = vld [vmem:[%s1697_s1 + $0xf8] sm:$0xff]   ;;  %s1085_s7 = sshll.u32 %s1701_s21, 2 }
   0xf   : > { %v1395_v26 = vld [vmem:[%s1697_s1 + $0x30] sm:$0xff]   ;;  %s1584_s29 = scalar_lea.vmem %s1696_s0, %s1169_s19  ;;  %v1399_v30 = vld [vmem:[%s1697_s1 + $0x38] sm:$0xff]   ;;  %s1632_s10 = scalar_lea.vmem %s1698_s2, %s1085_s7 }
  0x10   : > { %1238 = vmatpush3.bf16.msra.mxu0 %v1379_v10  ;;  %v1396_v27 = vld [vmem:[%s1697_s1 + $0xb0] sm:$0xff]   ;;  %v1400_v31 = vld [vmem:[%s1697_s1 + $0xb8] sm:$0xff]   ;;  %s1086_s21 = sshll.u32 %s1703_s13, 1 }
  0x11   : > { %1302 = vmatpush3.bf16.msra.mxu1 %v1380_v11  ;;  %1239 = vmatprep.subr.bf16.mxu0 %v1381_v12  ;;  %v1401_v32 = vld [vmem:[%s1584_s29] ss:$16 sps:$4 sm:$0xff]   ;;  %v1403_v33 = vld [vmem:[%s1584_s29 + $0x4] ss:$16 sps:$4 sm:$0xff]   ;;  %v1404_v34 = vld [vmem:[%s1584_s29 + $0x8] ss:$16 sps:$4 sm:$0xff]   ;;  %s187_s15 = scalar_lea.vmem %s1699_s3, %s1086_s21 }
  0x12   : > { %1303 = vmatprep.subr.bf16.mxu1 %v1382_v13  ;;  %v1406_v35 = vld [vmem:[%s1584_s29 + $0xc] ss:$16 sps:$4 sm:$0xff]   ;;  %669 = vmatprep.mubr.bf16.mxu0 %v1403_v33  ;;  %v1407_v36 = vld [vmem:[%s1584_s29 + $0x24] ss:$16 sps:$4 sm:$0xff]   ;;  %v1411_v38 = vld [vmem:[%s1584_s29 + $0x20] ss:$16 sps:$4 sm:$0xff]  }
  0x13   : > { %766 = vmatprep.mubr.bf16.mxu1 %v1406_v35  ;;  %v1409_v37 = vld [vmem:[%s1584_s29 + $0x2c] ss:$16 sps:$4 sm:$0xff]   ;;  %v1412_v39 = vld [vmem:[%s1584_s29 + $0x28] ss:$16 sps:$4 sm:$0xff]   ;;  %v1413_v40 = vld [vmem:[%s1584_s29 + $0x44] ss:$16 sps:$4 sm:$0xff]  }
  0x14   : > { %1240 = vmatpush3.bf16.msra.mxu0 %v1383_v14  ;;  %v1415_v41 = vld [vmem:[%s1584_s29 + $0x4c] ss:$16 sps:$4 sm:$0xff]   ;;  %v1417_v42 = vld [vmem:[%s1584_s29 + $0x40] ss:$16 sps:$4 sm:$0xff]   ;;  %v1418_v43 = vld [vmem:[%s1584_s29 + $0x48] ss:$16 sps:$4 sm:$0xff]  }
  0x15   : > { %1304 = vmatpush3.bf16.msra.mxu1 %v1384_v15  ;;  %1241 = vmatprep.subr.bf16.mxu0 %v1385_v16  ;;  %v1419_v44 = vld [vmem:[%s1584_s29 + $0x64] ss:$16 sps:$4 sm:$0xff]   ;;  %v1421_v45 = vld [vmem:[%s1584_s29 + $0x6c] ss:$16 sps:$4 sm:$0xff]   ;;  %v1423_v46 = vld [vmem:[%s1584_s29 + $0x60] ss:$16 sps:$4 sm:$0xff]  }
  0x16   : > { %1305 = vmatprep.subr.bf16.mxu1 %v1386_v17  ;;  %v1424_v47 = vld [vmem:[%s1584_s29 + $0x68] ss:$16 sps:$4 sm:$0xff]   ;;  %v1425_v48 = vld [vmem:[%s1584_s29 + $0x84] ss:$16 sps:$4 sm:$0xff]   ;;  %v1427_v49 = vld [vmem:[%s1584_s29 + $0x8c] ss:$16 sps:$4 sm:$0xff]  }
  0x17   : > { %v1429_v50 = vld [vmem:[%s1584_s29 + $0x80] ss:$16 sps:$4 sm:$0xff]   ;;  %v1430_v51 = vld [vmem:[%s1584_s29 + $0x88] ss:$16 sps:$4 sm:$0xff]   ;;  %v1431_v52 = vld [vmem:[%s1584_s29 + $0xa4] ss:$16 sps:$4 sm:$0xff]  }
  0x18   : > { %1242 = vmatpush3.bf16.msra.mxu0 %v1387_v18  ;;  %v1433_v53 = vld [vmem:[%s1584_s29 + $0xac] ss:$16 sps:$4 sm:$0xff]   ;;  %v1435_v54 = vld [vmem:[%s1584_s29 + $0xa0] ss:$16 sps:$4 sm:$0xff]   ;;  %v1436_v55 = vld [vmem:[%s1584_s29 + $0xa8] ss:$16 sps:$4 sm:$0xff]  }
  0x19   : > { %1306 = vmatpush3.bf16.msra.mxu1 %v1388_v19  ;;  %1243 = vmatprep.subr.bf16.mxu0 %v1389_v20  ;;  %v1437_v56 = vld [vmem:[%s1584_s29 + $0xc4] ss:$16 sps:$4 sm:$0xff]   ;;  %v1439_v57 = vld [vmem:[%s1584_s29 + $0xcc] ss:$16 sps:$4 sm:$0xff]   ;;  %v1441_v58 = vld [vmem:[%s1584_s29 + $0xc0] ss:$16 sps:$4 sm:$0xff]  }
  0x1a   : > { %1307 = vmatprep.subr.bf16.mxu1 %v1390_v21  ;;  %v1442_v59 = vld [vmem:[%s1584_s29 + $0xc8] ss:$16 sps:$4 sm:$0xff]   ;;  %v1443_v60 = vld [vmem:[%s1584_s29 + $0xe4] ss:$16 sps:$4 sm:$0xff]   ;;  %v1445_v61 = vld [vmem:[%s1584_s29 + $0xec] ss:$16 sps:$4 sm:$0xff]  }
  0x1b   : > { %v1447_v62 = vld [vmem:[%s1584_s29 + $0xe0] ss:$16 sps:$4 sm:$0xff]   ;;  %v1448_v63 = vld [vmem:[%s1584_s29 + $0xe8] ss:$16 sps:$4 sm:$0xff]  }
  0x1c   : > { %1244 = vmatpush3.bf16.msra.mxu0 %v1391_v22 }
  0x1d   : > { %1308 = vmatpush3.bf16.msra.mxu1 %v1392_v23  ;;  %1245 = vmatprep.subr.bf16.mxu0 %v1393_v24 }
  0x1e   : > { %1309 = vmatprep.subr.bf16.mxu1 %v1394_v25 }
  0x20   : > { %1246 = vmatpush3.bf16.msra.mxu0 %v1395_v26 }
  0x21   : > { %1310 = vmatpush3.bf16.msra.mxu1 %v1396_v27  ;;  %1247 = vmatprep.subr.bf16.mxu0 %v1397_v28 }
  0x22   : > { %1311 = vmatprep.subr.bf16.mxu1 %v1398_v29 }
  0x24   : > { %1248 = vmatpush3.bf16.msra.mxu0 %v1399_v30 }
  0x25   : > { %1312 = vmatpush3.bf16.msra.mxu1 %v1400_v31 }
  0x27   : > { %670 = vmatmul.mubr.bf16.vlgmr.msra.gmra.mrb[0].mxu0 %v1401_v32 }
  0x28   : > { %767 = vmatmul.mubr.bf16.vlgmr.msra.gmra.mrb[0].mxu1 %v1404_v34  ;;  %677 = vmatprep.mubr.bf16.mxu0 %v1407_v36 }
  0x29   : > { %774 = vmatprep.mubr.bf16.mxu1 %v1409_v37 }
  0x2f   : > { %678 = vmatmul.mubr.bf16.gmra.mrb[4].mxu0 %v1411_v38 }
  0x30   : > { %775 = vmatmul.mubr.bf16.gmra.mrb[4].mxu1 %v1412_v39  ;;  %685 = vmatprep.mubr.bf16.mxu0 %v1413_v40 }
  0x31   : > { %782 = vmatprep.mubr.bf16.mxu1 %v1415_v41 }
  0x37   : > { %686 = vmatmul.mubr.bf16.gmra.mrb[8].mxu0 %v1417_v42 }
  0x38   : > { %783 = vmatmul.mubr.bf16.gmra.mrb[8].mxu1 %v1418_v43  ;;  %693 = vmatprep.mubr.bf16.mxu0 %v1419_v44 }
  0x39   : > { %790 = vmatprep.mubr.bf16.mxu1 %v1421_v45 }
  0x3f   : > { %694 = vmatmul.mubr.bf16.gmra.mrb[12].mxu0 %v1423_v46 }
  0x40   : > { %791 = vmatmul.mubr.bf16.gmra.mrb[12].mxu1 %v1424_v47  ;;  %701 = vmatprep.mubr.bf16.mxu0 %v1425_v48 }
  0x41   : > { %798 = vmatprep.mubr.bf16.mxu1 %v1427_v49 }
  0x47   : > { %702 = vmatmul.mubr.bf16.gmra.mrb[16].mxu0 %v1429_v50 }
  0x48   : > { %799 = vmatmul.mubr.bf16.gmra.mrb[16].mxu1 %v1430_v51  ;;  %709 = vmatprep.mubr.bf16.mxu0 %v1431_v52 }
  0x49   : > { %806 = vmatprep.mubr.bf16.mxu1 %v1433_v53 }
  0x4f   : > { %710 = vmatmul.mubr.bf16.gmra.mrb[20].mxu0 %v1435_v54 }
  0x50   : > { %807 = vmatmul.mubr.bf16.gmra.mrb[20].mxu1 %v1436_v55  ;;  %717 = vmatprep.mubr.bf16.mxu0 %v1437_v56 }
  0x51   : > { %814 = vmatprep.mubr.bf16.mxu1 %v1439_v57 }
  0x57   : > { %718 = vmatmul.mubr.bf16.gmra.mrb[24].mxu0 %v1441_v58 }
  0x58   : > { %815 = vmatmul.mubr.bf16.gmra.mrb[24].mxu1 %v1442_v59  ;;  %725 = vmatprep.mubr.bf16.mxu0 %v1443_v60 }
  0x59   : > { %822 = vmatprep.mubr.bf16.mxu1 %v1445_v61 }
  0x5f   : > { %726 = vmatmul.mubr.bf16.gmra.mrb[28].mxu0 %v1447_v62 }
  0x60   : > { %823 = vmatmul.mubr.bf16.gmra.mrb[28].mxu1 %v1448_v63 }
  0xfa   : > { %v1249_v0 = vpop.f32.mrb[0].mxu0 }
  0xfb   : > { %v1313_v1 = vpop.f32.mrb[0].mxu1  ;;  %v1250_v2 = vpop.f32.mrb[1].mxu0 }
  0xfc   : > { %v1251_v3 = vadd.f32 %v1250_v2, %v1249_v0  ;;  %v1314_v4 = vpop.f32.mrb[1].mxu1  ;;  %v1252_v5 = vpop.f32.mrb[2].mxu0 }
  0xfd   : > { %v1315_v6 = vadd.f32 %v1314_v4, %v1313_v1  ;;  %v1316_v7 = vpop.f32.mrb[2].mxu1  ;;  %v1253_v8 = vpop.f32.mrb[3].mxu0 }
  0xfe   : > { %v1254_v9 = vadd.f32 %v1253_v8, %v1252_v5  ;;  %v1317_v10 = vpop.f32.mrb[3].mxu1 }
  0xff   : > { %v1624_v11 = vadd.f32 %v1315_v6, %v1251_v3  ;;  %v1318_v12 = vadd.f32 %v1317_v10, %v1316_v7 }
 0x101   : > { %v1627_v13 = vadd.f32 %v1318_v12, %v1254_v9 }
 0x102   : > { %v1255_v14 = vpop.f32.mrb[4].mxu0 }
 0x103   : > { %v1189_v15 = vpack.c.bf16 %v1627_v13, %v1624_v11  ;;  %v1319_v16 = vpop.f32.mrb[4].mxu1  ;;  %v1256_v17 = vpop.f32.mrb[5].mxu0  ;;  %v911_v28 = vadd.f32 %v1627_v13, %v1624_v11 }
 0x104   : > { %v1257_v18 = vadd.f32 %v1256_v17, %v1255_v14  ;;  %v1320_v19 = vpop.f32.mrb[5].mxu1  ;;  %v1258_v20 = vpop.f32.mrb[6].mxu0 }
 0x105   : > { %1190 = vst [vmem:[%s1632_s10] sm:$0xff] %v1189_v15   ;;  %v1321_v21 = vadd.f32 %v1320_v19, %v1319_v16  ;;  %v1322_v22 = vpop.f32.mrb[6].mxu1  ;;  %v1259_v23 = vpop.f32.mrb[7].mxu0 }
 0x106   : > { %v1260_v24 = vadd.f32 %v1259_v23, %v1258_v20  ;;  %v1323_v25 = vpop.f32.mrb[7].mxu1 }
 0x107   : > { %v1637_v26 = vadd.f32 %v1321_v21, %v1257_v18  ;;  %v1324_v27 = vadd.f32 %v1323_v25, %v1322_v22 }
 0x109   : > { %v1641_v29 = vadd.f32 %v1324_v27, %v1260_v24  ;;  %v912_v31 = vadd.f32 %v911_v28, %v1637_v26 }
 0x10a   : > { %v1261_v30 = vpop.f32.mrb[8].mxu0 }
 0x10b   : > { %v1194_v32 = vpack.c.bf16 %v1641_v29, %v1637_v26  ;;  %v1325_v33 = vpop.f32.mrb[8].mxu1  ;;  %v1262_v34 = vpop.f32.mrb[9].mxu0  ;;  %v913_v43 = vadd.f32 %v912_v31, %v1641_v29 }
 0x10c   : > { %v1263_v35 = vadd.f32 %v1262_v34, %v1261_v30  ;;  %v1326_v36 = vpop.f32.mrb[9].mxu1  ;;  %v1264_v37 = vpop.f32.mrb[10].mxu0 }
 0x10d   : > { %1226 = vst [vmem:[%s1632_s10 + $0x8] sm:$0xff] %v1194_v32   ;;  %v1327_v38 = vadd.f32 %v1326_v36, %v1325_v33  ;;  %v1328_v39 = vpop.f32.mrb[10].mxu1  ;;  %v1265_v40 = vpop.f32.mrb[11].mxu0 }
 0x10e   : > { %v1266_v41 = vadd.f32 %v1265_v40, %v1264_v37  ;;  %v1329_v42 = vpop.f32.mrb[11].mxu1 }
 0x10f   : > { %v1648_v44 = vadd.f32 %v1327_v38, %v1263_v35  ;;  %v1330_v45 = vadd.f32 %v1329_v42, %v1328_v39 }
 0x111   : > { %v914_v46 = vadd.f32 %v913_v43, %v1648_v44  ;;  %v1651_v47 = vadd.f32 %v1330_v45, %v1266_v41 }
 0x112   : > { %v1267_v48 = vpop.f32.mrb[12].mxu0 }
 0x113   : > { %v1199_v49 = vpack.c.bf16 %v1651_v47, %v1648_v44  ;;  %v915_v50 = vadd.f32 %v914_v46, %v1651_v47  ;;  %v1331_v51 = vpop.f32.mrb[12].mxu1  ;;  %v1268_v52 = vpop.f32.mrb[13].mxu0 }
 0x114   : > { %v1269_v53 = vadd.f32 %v1268_v52, %v1267_v48  ;;  %v1332_v54 = vpop.f32.mrb[13].mxu1  ;;  %v1270_v55 = vpop.f32.mrb[14].mxu0 }
 0x115   : > { %1227 = vst [vmem:[%s1632_s10 + $0x10] sm:$0xff] %v1199_v49   ;;  %v1333_v56 = vadd.f32 %v1332_v54, %v1331_v51  ;;  %v1334_v57 = vpop.f32.mrb[14].mxu1  ;;  %v1271_v58 = vpop.f32.mrb[15].mxu0 }
 0x116   : > { %v1272_v59 = vadd.f32 %v1271_v58, %v1270_v55  ;;  %v1335_v60 = vpop.f32.mrb[15].mxu1 }
 0x117   : > { %v1657_v61 = vadd.f32 %v1333_v56, %v1269_v53  ;;  %v1336_v62 = vadd.f32 %v1335_v60, %v1334_v57 }
 0x119   : > { %v916_v63 = vadd.f32 %v915_v50, %v1657_v61  ;;  %v1660_v0 = vadd.f32 %v1336_v62, %v1272_v59 }
 0x11a   : > { %v1273_v1 = vpop.f32.mrb[16].mxu0 }
 0x11b   : > { %v1204_v2 = vpack.c.bf16 %v1660_v0, %v1657_v61  ;;  %v917_v3 = vadd.f32 %v916_v63, %v1660_v0  ;;  %v1337_v4 = vpop.f32.mrb[16].mxu1  ;;  %v1274_v5 = vpop.f32.mrb[17].mxu0 }
 0x11c   : > { %v1275_v6 = vadd.f32 %v1274_v5, %v1273_v1  ;;  %v1338_v7 = vpop.f32.mrb[17].mxu1  ;;  %v1276_v8 = vpop.f32.mrb[18].mxu0 }
 0x11d   : > { %1228 = vst [vmem:[%s1632_s10 + $0x18] sm:$0xff] %v1204_v2   ;;  %v1339_v9 = vadd.f32 %v1338_v7, %v1337_v4  ;;  %v1340_v10 = vpop.f32.mrb[18].mxu1  ;;  %v1277_v12 = vpop.f32.mrb[19].mxu0 }
 0x11e   : > { %v1278_v14 = vadd.f32 %v1277_v12, %v1276_v8  ;;  %v1341_v15 = vpop.f32.mrb[19].mxu1 }
 0x11f   : > { %v1666_v16 = vadd.f32 %v1339_v9, %v1275_v6  ;;  %v1342_v17 = vadd.f32 %v1341_v15, %v1340_v10 }
 0x121   : > { %v918_v18 = vadd.f32 %v917_v3, %v1666_v16  ;;  %v1669_v19 = vadd.f32 %v1342_v17, %v1278_v14 }
 0x122   : > { %v1279_v20 = vpop.f32.mrb[20].mxu0 }
 0x123   : > { %v1209_v21 = vpack.c.bf16 %v1669_v19, %v1666_v16  ;;  %v919_v22 = vadd.f32 %v918_v18, %v1669_v19  ;;  %v1343_v23 = vpop.f32.mrb[20].mxu1  ;;  %v1280_v24 = vpop.f32.mrb[21].mxu0 }
 0x124   : > { %v1281_v25 = vadd.f32 %v1280_v24, %v1279_v20  ;;  %v1344_v27 = vpop.f32.mrb[21].mxu1  ;;  %v1282_v28 = vpop.f32.mrb[22].mxu0 }
 0x125   : > { %1229 = vst [vmem:[%s1632_s10 + $0x20] sm:$0xff] %v1209_v21   ;;  %v1345_v30 = vadd.f32 %v1344_v27, %v1343_v23  ;;  %v1346_v31 = vpop.f32.mrb[22].mxu1  ;;  %v1283_v32 = vpop.f32.mrb[23].mxu0 }
 0x126   : > { %v1284_v33 = vadd.f32 %v1283_v32, %v1282_v28  ;;  %v1347_v34 = vpop.f32.mrb[23].mxu1 }
 0x127   : > { %v809_v35 = vadd.f32 %v1345_v30, %v1281_v25  ;;  %v1348_v36 = vadd.f32 %v1347_v34, %v1346_v31 }
 0x129   : > { %v920_v37 = vadd.f32 %v919_v22, %v809_v35  ;;  %v812_v38 = vadd.f32 %v1348_v36, %v1284_v33 }
 0x12a   : > { %v1285_v39 = vpop.f32.mrb[24].mxu0 }
 0x12b   : > { %v1214_v40 = vpack.c.bf16 %v812_v38, %v809_v35  ;;  %v921_v41 = vadd.f32 %v920_v37, %v812_v38  ;;  %v1349_v42 = vpop.f32.mrb[24].mxu1  ;;  %v1286_v43 = vpop.f32.mrb[25].mxu0 }
 0x12c   : > { %v1287_v45 = vadd.f32 %v1286_v43, %v1285_v39  ;;  %v1350_v46 = vpop.f32.mrb[25].mxu1  ;;  %v1288_v48 = vpop.f32.mrb[26].mxu0 }
 0x12d   : > { %1230 = vst [vmem:[%s1632_s10 + $0x28] sm:$0xff] %v1214_v40   ;;  %v1351_v49 = vadd.f32 %v1350_v46, %v1349_v42  ;;  %v1352_v50 = vpop.f32.mrb[26].mxu1  ;;  %v1289_v51 = vpop.f32.mrb[27].mxu0 }
 0x12e   : > { %v1290_v52 = vadd.f32 %v1289_v51, %v1288_v48  ;;  %v1353_v53 = vpop.f32.mrb[27].mxu1 }
 0x12f   : > { %v817_v54 = vadd.f32 %v1351_v49, %v1287_v45  ;;  %v1354_v55 = vadd.f32 %v1353_v53, %v1352_v50 }
 0x131   : > { %v922_v56 = vadd.f32 %v921_v41, %v817_v54  ;;  %v820_v57 = vadd.f32 %v1354_v55, %v1290_v52 }
 0x132   : > { %v1291_v58 = vpop.f32.mrb[28].mxu0 }
 0x133   : > { %v1219_v59 = vpack.c.bf16 %v820_v57, %v817_v54  ;;  %v923_v60 = vadd.f32 %v922_v56, %v820_v57  ;;  %v1355_v62 = vpop.f32.mrb[28].mxu1  ;;  %v1292_v63 = vpop.f32.mrb[29].mxu0 }
 0x134   : > { %v1293_v1 = vadd.f32 %v1292_v63, %v1291_v58  ;;  %v1356_v2 = vpop.f32.mrb[29].mxu1  ;;  %v1294_v3 = vpop.f32.mrb[30].mxu0 }
 0x135   : > { %1231 = vst [vmem:[%s1632_s10 + $0x30] sm:$0xff] %v1219_v59   ;;  %v1357_v4 = vadd.f32 %v1356_v2, %v1355_v62  ;;  %v1358_v5 = vpop.f32.mrb[30].mxu1  ;;  %v1295_v6 = vpop.f32.mrb[31].mxu0 }
 0x136   : > { %v1296_v7 = vadd.f32 %v1295_v6, %v1294_v3  ;;  %v1359_v8 = vpop.f32.mrb[31].mxu1 }
 0x137   : > { %v825_v9 = vadd.f32 %v1357_v4, %v1293_v1  ;;  %v1360_v10 = vadd.f32 %v1359_v8, %v1358_v5 }
 0x139   : > { %v924_v12 = vadd.f32 %v923_v60, %v825_v9  ;;  %v828_v14 = vadd.f32 %v1360_v10, %v1296_v7 }
 0x13b   : > { %v1224_v15 = vpack.c.bf16 %v828_v14, %v825_v9  ;;  %v925_v17 = vadd.f32 %v924_v12, %v828_v14 }
 0x13d   : > { %1232 = vst [vmem:[%s1632_s10 + $0x38] sm:$0xff] %v1224_v15   ;;  %v926_v18 = vrot.slane %v925_v17, 4 }
 0x13f   : > { %v927_v20 = vadd.f32 %v926_v18, %v925_v17 }
 0x141   : > { %v928_v21 = vrot.slane %v927_v20, 2 }
 0x143   : > { %v929_v22 = vadd.f32 %v928_v21, %v927_v20 }
 0x145   : > { %v930_v23 = vrot.slane %v929_v22, 1 }
 0x147   : > { %v931_v24 = vadd.f32 %v930_v23, %v929_v22 }
 0x149   : > { %v932_v25 = vmul.f32 0.0078125, %v931_v24 }
 0x14b   : > { %v933_v27 = vsub.f32 %v1624_v11, %v932_v25  ;;  %v934_v28 = vsub.f32 %v1627_v13, %v932_v25  ;;  %v936_v30 = vsub.f32 %v1641_v29, %v932_v25  ;;  %v937_v31 = vsub.f32 %v1648_v44, %v932_v25 }
 0x14c   : > { %v938_v32 = vsub.f32 %v1651_v47, %v932_v25  ;;  %v939_v33 = vsub.f32 %v1657_v61, %v932_v25  ;;  %v940_v34 = vsub.f32 %v1660_v0, %v932_v25  ;;  %v941_v36 = vsub.f32 %v1666_v16, %v932_v25 }
 0x14d   : > { %v942_v37 = vsub.f32 %v1669_v19, %v932_v25  ;;  %v943_v39 = vsub.f32 %v809_v35, %v932_v25  ;;  %v944_v40 = vsub.f32 %v812_v38, %v932_v25  ;;  %v945_v41 = vsub.f32 %v817_v54, %v932_v25 }
 0x14e   : > { %v946_v11 = vsub.f32 %v820_v57, %v932_v25  ;;  %v947_v42 = vsub.f32 %v825_v9, %v932_v25  ;;  %v948_v13 = vsub.f32 %v828_v14, %v932_v25  ;;  %v935_v29 = vsub.f32 %v1637_v26, %v932_v25 }
 0x14f   : > { %v949_v43 = vmul.f32 %v933_v27, %v933_v27  ;;  %v950_v44 = vmul.f32 %v934_v28, %v934_v28  ;;  %v952_v46 = vmul.f32 %v936_v30, %v936_v30  ;;  %v953_v48 = vmul.f32 %v937_v31, %v937_v31 }
 0x150   : > { %v951_v45 = vmul.f32 %v935_v29, %v935_v29  ;;  %v954_v49 = vmul.f32 %v938_v32, %v938_v32  ;;  %v955_v50 = vmul.f32 %v939_v33, %v939_v33  ;;  %v956_v35 = vmul.f32 %v940_v34, %v940_v34 }
 0x151   : > { %v965_v47 = vadd.f32 %v950_v44, %v949_v43  ;;  %v957_v51 = vmul.f32 %v941_v36, %v941_v36  ;;  %v958_v53 = vmul.f32 %v942_v37, %v942_v37  ;;  %v959_v26 = vmul.f32 %v943_v39, %v943_v39 }
 0x152   : > { %v960_v56 = vmul.f32 %v944_v40, %v944_v40  ;;  %v961_v58 = vmul.f32 %v945_v41, %v945_v41  ;;  %v962_v60 = vmul.f32 %v946_v11, %v946_v11  ;;  %v963_v63 = vmul.f32 %v947_v42, %v947_v42 }
 0x153   : > { %v966_v61 = vadd.f32 %v965_v47, %v951_v45  ;;  %v964_v2 = vmul.f32 %v948_v13, %v948_v13 }
 0x155   : > { %v967_v0 = vadd.f32 %v966_v61, %v952_v46 }
 0x157   : > { %v968_v16 = vadd.f32 %v967_v0, %v953_v48 }
 0x159   : > { %v969_v19 = vadd.f32 %v968_v16, %v954_v49 }
 0x15b   : > { %v970_v38 = vadd.f32 %v969_v19, %v955_v50 }
 0x15d   : > { %v971_v52 = vadd.f32 %v970_v38, %v956_v35 }
 0x15f   : > { %v972_v54 = vadd.f32 %v971_v52, %v957_v51 }
 0x161   : > { %v973_v55 = vadd.f32 %v972_v54, %v958_v53 }
 0x163   : > { %v974_v57 = vadd.f32 %v973_v55, %v959_v26 }
 0x165   : > { %v975_v59 = vadd.f32 %v974_v57, %v960_v56 }
 0x167   : > { %v976_v62 = vadd.f32 %v975_v59, %v961_v58 }
 0x169   : > { %v977_v1 = vadd.f32 %v976_v62, %v962_v60 }
 0x16b   : > { %v978_v3 = vadd.f32 %v977_v1, %v963_v63 }
 0x16d   : > { %v979_v4 = vadd.f32 %v978_v3, %v964_v2 }
 0x16f   : > { %v980_v5 = vrot.slane %v979_v4, 4 }
 0x171   : > { %v981_v6 = vadd.f32 %v980_v5, %v979_v4 }
 0x173   : > { %v982_v7 = vrot.slane %v981_v6, 2 }
 0x175   : > { %v983_v8 = vadd.f32 %v982_v7, %v981_v6 }
 0x177   : > { %v984_v9 = vrot.slane %v983_v8, 1 }
 0x179   : > { %v985_v10 = vadd.f32 %v984_v9, %v983_v8 }
 0x17b   : > { %v987_v12 = vsel %vm986_vm0, %v931_v24, %v985_v10 }
 0x17c   : > { %988 = vst [vmem:[%s187_s15] sm:$0x3] %v987_v12 }
 0x17d PF: > { %s14_s12 = sadd.s32 1, %s1455_s12  }
 0x17e   : > { %p11_p5 = scmp.ge.s32.totalorder %s14_s12, 6  }
 0x180   :  { %13 = sbr.rel (!%p11_p5) target bundleno = 1 (0x1), region = 70 }

// kernel: block_forward_nchw.6
= control target key start
LH: loop header
LB: loop body
LE: loop exit
PB: predicated region body
PF: predicated region fallthrough
CT: control target
= control target key end

     0   :  { %s1658_s18 = smov 0   ;;  %s2349_s0 = inlined_call_operand.vmem [shape: bf16[512,128], index: 0, kind: input, shape index: {}]   ;;  %s2350_s1 = inlined_call_operand.vmem [shape: f32[1,128], index: 1, kind: input, shape index: {}]   ;;  %s2351_s2 = inlined_call_operand.vmem [shape: f32[1,128], index: 2, kind: input, shape index: {}]   ;;  %s2352_s3 = inlined_call_operand.vmem [shape: bf16[128,512], index: 3, kind: input, shape index: {}]   ;;  %s2353_s4 = inlined_call_operand.vmem [shape: bf16[512,512], index: 4, kind: output, shape index: {0}]   ;;  %s2354_s5 = inlined_call_operand.vmem [shape: f32[4,2,512], index: 5, kind: output, shape index: {1}]  }
   0x1 LB: > { %s1664_s19 = sadd.s32 4294967295, %s1624_s18   ;;  %p1411_p0 = scmp.ge.s32.totalorder %s1624_s18, 1  ;;  %s1624_s18 = sphi %s1658_s18, %s16_s18  }
   0x2   : > { %p191_p1 = scmp.lt.s32.totalorder %s1624_s18, 5 }
   0x4   : > { %p192_p2 = pnand %p1411_p0, %p191_p1 }
   0x6   : > { %195 = sbr.rel (%p192_p2) target bundleno = 419 (0x1a3), region = 36 }
   0xd   : > { %v1570_v0 = vld [vmem:[%s2352_s3 + $0x4] ss:$16 sps:$4 sm:$0xff]   ;;  %v1572_v1 = vld [vmem:[%s2352_s3 + $0xc] ss:$16 sps:$4 sm:$0xff]   ;;  %v1626_v2 = vmov 0   ;;  %s1412_s30 = sshll.u32 %s1664_s19, 4 }
   0xe   : > { %570 = vmatprep.mubr.bf16.mxu0 %v1626_v2  ;;  %683 = vmatprep.mubr.bf16.mxu1 %v1626_v2  ;;  %v1574_v3 = vld [vmem:[%s2352_s3] ss:$16 sps:$4 sm:$0xff]   ;;  %v1575_v4 = vld [vmem:[%s2352_s3 + $0x8] ss:$16 sps:$4 sm:$0xff]   ;;  %v1576_v5 = vld [vmem:[%s2352_s3 + $0x24] ss:$16 sps:$4 sm:$0xff]  }
   0xf   : > { %538 = vmatprep.subr.bf16.mxu0 %v1570_v0  ;;  %651 = vmatprep.subr.bf16.mxu1 %v1572_v1  ;;  %v1578_v6 = vld [vmem:[%s2352_s3 + $0x2c] ss:$16 sps:$4 sm:$0xff]   ;;  %v1580_v7 = vld [vmem:[%s2352_s3 + $0x20] ss:$16 sps:$4 sm:$0xff]   ;;  %v1581_v8 = vld [vmem:[%s2352_s3 + $0x28] ss:$16 sps:$4 sm:$0xff]  }
  0x10   : > { %539 = vmatpush1.bf16.msra.mxu0 %v1574_v3  ;;  %652 = vmatpush1.bf16.msra.mxu1 %v1575_v4  ;;  %v1582_v9 = vld [vmem:[%s2352_s3 + $0x44] ss:$16 sps:$4 sm:$0xff]   ;;  %p226_p3 = scmp.lt.s32.totalorder %s1412_s30, 63  ;;  %v1584_v10 = vld [vmem:[%s2352_s3 + $0x4c] ss:$16 sps:$4 sm:$0xff]   ;;  %vm1288_vm0 = vcmask 1040384  }
  0x11   : > { %540 = vmatprep.subr.bf16.mxu0 %v1576_v5  ;;  %653 = vmatprep.subr.bf16.mxu1 %v1578_v6  ;;  %v1586_v11 = vld [vmem:[%s2352_s3 + $0x40] ss:$16 sps:$4 sm:$0xff]   ;;  %v1587_v12 = vld [vmem:[%s2352_s3 + $0x48] ss:$16 sps:$4 sm:$0xff]   ;;  %v1588_v13 = vld [vmem:[%s2352_s3 + $0x64] ss:$16 sps:$4 sm:$0xff]  }
  0x12   : > { %v1590_v14 = vld [vmem:[%s2352_s3 + $0x6c] ss:$16 sps:$4 sm:$0xff]   ;;  %v1592_v15 = vld [vmem:[%s2352_s3 + $0x60] ss:$16 sps:$4 sm:$0xff]   ;;  %s2431_s30 = smov (!%p226_p3, %s1412_s30), 63  ;;  %p238_p4 = scmp.lt.s32.totalorder %s1664_s19, 3 }
  0x13   : > { %v1593_v16 = vld [vmem:[%s2352_s3 + $0x68] ss:$16 sps:$4 sm:$0xff]   ;;  %v1594_v17 = vld [vmem:[%s2352_s3 + $0x84] ss:$16 sps:$4 sm:$0xff]   ;;  %v1596_v18 = vld [vmem:[%s2352_s3 + $0x8c] ss:$16 sps:$4 sm:$0xff]  }
  0x14   : > { %541 = vmatpush1.bf16.msra.mxu0 %v1580_v7  ;;  %654 = vmatpush1.bf16.msra.mxu1 %v1581_v8  ;;  %v1598_v19 = vld [vmem:[%s2352_s3 + $0x80] ss:$16 sps:$4 sm:$0xff]   ;;  %v1599_v20 = vld [vmem:[%s2352_s3 + $0x88] ss:$16 sps:$4 sm:$0xff]   ;;  %s1413_s14 = sshll.u32 %s2431_s30, 2  ;;  %s2433_s19 = smov (!%p238_p4, %s1664_s19), 3 }
  0x15   : > { %542 = vmatprep.subr.bf16.mxu0 %v1582_v9  ;;  %655 = vmatprep.subr.bf16.mxu1 %v1584_v10  ;;  %v1600_v21 = vld [vmem:[%s2352_s3 + $0xa4] ss:$16 sps:$4 sm:$0xff]   ;;  %v1602_v22 = vld [vmem:[%s2352_s3 + $0xac] ss:$16 sps:$4 sm:$0xff]   ;;  %s1743_s23 = scalar_lea.vmem %s2349_s0, %s1413_s14  ;;  %v1604_v23 = vld [vmem:[%s2352_s3 + $0xa0] ss:$16 sps:$4 sm:$0xff]  }
  0x16   : > { %v1605_v24 = vld [vmem:[%s2352_s3 + $0xa8] ss:$16 sps:$4 sm:$0xff]   ;;  %v1606_v25 = vld [vmem:[%s2352_s3 + $0xc4] ss:$16 sps:$4 sm:$0xff]   ;;  %v1608_v26 = vld [vmem:[%s2352_s3 + $0xcc] ss:$16 sps:$4 sm:$0xff]  }
  0x17   : > { %v1522_v27 = vld [vmem:[%s1743_s23] sm:$0xff]   ;;  %v1553_v31 = vld [vmem:[%s1743_s23 + $0x8] sm:$0xff]   ;;  %v1554_v45 = vld [vmem:[%s1743_s23 + $0x10] sm:$0xff]  }
  0x18   : > { %543 = vmatpush1.bf16.msra.mxu0 %v1586_v11  ;;  %656 = vmatpush1.bf16.msra.mxu1 %v1587_v12  ;;  %v1761_v28 = vld [vmem:[%s2350_s1] ss:$0 sm:$0xff]  ;;  %v1523_v29 = vunpack.c.l.bf16 %v1522_v27  ;;  %v1524_v30 = vunpack.c.h.bf16 %v1522_v27  ;;  %v1527_v33 = vunpack.c.l.bf16 %v1553_v31  ;;  %v1528_v34 = vunpack.c.h.bf16 %v1553_v31  ;;  %v1611_v36 = vld [vmem:[%s2352_s3 + $0xc8] ss:$16 sps:$4 sm:$0xff]   ;;  %v1612_v39 = vld [vmem:[%s2352_s3 + $0xe4] ss:$16 sps:$4 sm:$0xff]  }
  0x19   : > { %544 = vmatprep.subr.bf16.mxu0 %v1588_v13  ;;  %657 = vmatprep.subr.bf16.mxu1 %v1590_v14  ;;  %v1767_v32 = vld [vmem:[%s2351_s2] ss:$0 sm:$0xff]  ;;  %v1614_v40 = vld [vmem:[%s2352_s3 + $0xec] ss:$16 sps:$4 sm:$0xff]   ;;  %v1617_v47 = vld [vmem:[%s2352_s3 + $0xe8] ss:$16 sps:$4 sm:$0xff]   ;;  %v1531_v50 = vunpack.c.l.bf16 %v1554_v45  ;;  %v1532_v54 = vunpack.c.h.bf16 %v1554_v45 }
  0x1a   : > { %v1610_v35 = vld [vmem:[%s2352_s3 + $0xc0] ss:$16 sps:$4 sm:$0xff]   ;;  %v283_v37 = vmul.f32 %v1523_v29, %v1761_v28  ;;  %v284_v38 = vmul.f32 %v1524_v30, %v1761_v28  ;;  %v285_v43 = vmul.f32 %v1527_v33, %v1761_v28  ;;  %v286_v44 = vmul.f32 %v1528_v34, %v1761_v28  ;;  %v1555_v59 = vld [vmem:[%s1743_s23 + $0x18] sm:$0xff]  }
  0x1b   : > { %v1616_v46 = vld [vmem:[%s2352_s3 + $0xe0] ss:$16 sps:$4 sm:$0xff]   ;;  %v287_v57 = vmul.f32 %v1531_v50, %v1761_v28  ;;  %v288_v58 = vmul.f32 %v1532_v54, %v1761_v28  ;;  %v1535_v60 = vunpack.c.l.bf16 %v1555_v59  ;;  %v1536_v0 = vunpack.c.h.bf16 %v1555_v59 }
  0x1c   : > { %545 = vmatpush1.bf16.msra.mxu0 %v1592_v15  ;;  %658 = vmatpush1.bf16.msra.mxu1 %v1593_v16  ;;  %v306_v41 = vadd.f32 %v1767_v32, %v283_v37  ;;  %v307_v42 = vadd.f32 %v1767_v32, %v284_v38  ;;  %v308_v52 = vadd.f32 %v1767_v32, %v285_v43  ;;  %v1556_v6 = vld [vmem:[%s1743_s23 + $0x20] sm:$0xff]   ;;  %v1557_v16 = vld [vmem:[%s1743_s23 + $0x28] sm:$0xff]   ;;  %v1559_v38 = vld [vmem:[%s1743_s23 + $0x38] sm:$0xff]  }
  0x1d   : > { %546 = vmatprep.subr.bf16.mxu0 %v1594_v17  ;;  %659 = vmatprep.subr.bf16.mxu1 %v1596_v18  ;;  %v309_v53 = vadd.f32 %v1767_v32, %v286_v44  ;;  %v310_v62 = vadd.f32 %v1767_v32, %v287_v57  ;;  %v311_v63 = vadd.f32 %v1767_v32, %v288_v58  ;;  %v1539_v7 = vunpack.c.l.bf16 %v1556_v6 }
  0x1e   : > { %v322_v48 = vmax.f32 %v306_v41, 0.0  ;;  %v323_v49 = vmax.f32 %v307_v42, 0.0  ;;  %v324_v55 = vmax.f32 %v308_v52, 0.0  ;;  %v289_v4 = vmul.f32 %v1535_v60, %v1761_v28 }
  0x1f   : > { %v325_v56 = vmax.f32 %v309_v53, 0.0  ;;  %v326_v1 = vmax.f32 %v310_v62, 0.0  ;;  %v327_v3 = vmax.f32 %v311_v63, 0.0  ;;  %v290_v5 = vmul.f32 %v1536_v0, %v1761_v28 }
  0x20   : > { %547 = vmatpush1.bf16.msra.mxu0 %v1598_v19  ;;  %660 = vmatpush1.bf16.msra.mxu1 %v1599_v20  ;;  %v338_v51 = vpack.c.bf16 %v323_v49, %v322_v48  ;;  %v312_v9 = vadd.f32 %v1767_v32, %v289_v4  ;;  %v1540_v11 = vunpack.c.h.bf16 %v1556_v6  ;;  %v291_v14 = vmul.f32 %v1539_v7, %v1761_v28 }
  0x21   : > { %548 = vmatprep.subr.bf16.mxu0 %v1600_v21  ;;  %661 = vmatprep.subr.bf16.mxu1 %v1602_v22  ;;  %v339_v61 = vpack.c.bf16 %v325_v56, %v324_v55  ;;  %v340_v8 = vpack.c.bf16 %v327_v3, %v326_v1  ;;  %v313_v10 = vadd.f32 %v1767_v32, %v290_v5  ;;  %v1543_v17 = vunpack.c.l.bf16 %v1557_v16 }
  0x22   : > { %v328_v12 = vmax.f32 %v312_v9, 0.0  ;;  %v292_v15 = vmul.f32 %v1540_v11, %v1761_v28  ;;  %v314_v19 = vadd.f32 %v1767_v32, %v291_v14  ;;  %v1544_v21 = vunpack.c.h.bf16 %v1557_v16 }
  0x23   : > { %v329_v13 = vmax.f32 %v313_v10, 0.0  ;;  %v1552_v43 = vunpack.c.h.bf16 %v1559_v38 }
  0x24   : > { %549 = vmatpush1.bf16.msra.mxu0 %v1604_v23  ;;  %662 = vmatpush1.bf16.msra.mxu1 %v1605_v24  ;;  %v315_v20 = vadd.f32 %v1767_v32, %v292_v15  ;;  %v330_v22 = vmax.f32 %v314_v19, 0.0  ;;  %v293_v24 = vmul.f32 %v1543_v17, %v1761_v28 }
  0x25   : > { %550 = vmatprep.subr.bf16.mxu0 %v1606_v25  ;;  %663 = vmatprep.subr.bf16.mxu1 %v1608_v26  ;;  %v341_v18 = vpack.c.bf16 %v329_v13, %v328_v12  ;;  %v294_v25 = vmul.f32 %v1544_v21, %v1761_v28  ;;  %v1558_v26 = vld [vmem:[%s1743_s23 + $0x30] sm:$0xff]   ;;  %s1487_s23 = sshll.u32 %s2431_s30, 4  ;;  %s1488_s30 = sshll.u32 %s2433_s19, 3 }
  0x26   : > { %v331_v23 = vmax.f32 %v315_v20, 0.0  ;;  %v1547_v27 = vunpack.c.l.bf16 %v1558_v26  ;;  %v316_v30 = vadd.f32 %v1767_v32, %v293_v24  ;;  %v1548_v33 = vunpack.c.h.bf16 %v1558_v26  ;;  %s1847_s29 = scalar_lea.vmem %s2353_s4, %s1487_s23  ;;  %s242_s8 = scalar_lea.vmem %s2354_s5, %s1488_s30 }
  0x27   : > { %v317_v31 = vadd.f32 %v1767_v32, %v294_v25 }
  0x28   : > { %551 = vmatpush1.bf16.msra.mxu0 %v1610_v35  ;;  %664 = vmatpush1.bf16.msra.mxu1 %v1611_v36  ;;  %v342_v29 = vpack.c.bf16 %v331_v23, %v330_v22  ;;  %v332_v34 = vmax.f32 %v316_v30, 0.0  ;;  %v295_v36 = vmul.f32 %v1547_v27, %v1761_v28  ;;  %v296_v37 = vmul.f32 %v1548_v33, %v1761_v28 }
  0x29   : > { %552 = vmatprep.subr.bf16.mxu0 %v1612_v39  ;;  %665 = vmatprep.subr.bf16.mxu1 %v1614_v40  ;;  %v333_v35 = vmax.f32 %v317_v31, 0.0  ;;  %v1551_v39 = vunpack.c.l.bf16 %v1559_v38 }
  0x2a   : > { %v318_v41 = vadd.f32 %v1767_v32, %v295_v36  ;;  %v319_v42 = vadd.f32 %v1767_v32, %v296_v37 }
  0x2b   : > { %v343_v40 = vpack.c.bf16 %v333_v35, %v332_v34 }
  0x2c   : > { %553 = vmatpush1.bf16.msra.mxu0 %v1616_v46  ;;  %666 = vmatpush1.bf16.msra.mxu1 %v1617_v47  ;;  %v334_v44 = vmax.f32 %v318_v41, 0.0  ;;  %v335_v45 = vmax.f32 %v319_v42, 0.0  ;;  %v297_v46 = vmul.f32 %v1551_v39, %v1761_v28  ;;  %v298_v47 = vmul.f32 %v1552_v43, %v1761_v28 }
  0x2e   : > { %v344_v48 = vpack.c.bf16 %v335_v45, %v334_v44  ;;  %v320_v49 = vadd.f32 %v1767_v32, %v297_v46  ;;  %v321_v50 = vadd.f32 %v1767_v32, %v298_v47 }
  0x2f   : > { %571 = vmatmul.mubr.bf16.vlgmr.msra.gmra.mrb[0].mxu0 %v338_v51  ;;  %684 = vmatmul.mubr.bf16.vlgmr.msra.gmra.mrb[0].mxu1 %v338_v51 }
  0x30   : > { %580 = vmatprep.mubr.bf16.mxu0 %v1626_v2  ;;  %693 = vmatprep.mubr.bf16.mxu1 %v1626_v2  ;;  %v336_v51 = vmax.f32 %v320_v49, 0.0  ;;  %v337_v52 = vmax.f32 %v321_v50, 0.0 }
  0x32   : > { %v345_v53 = vpack.c.bf16 %v337_v52, %v336_v51 }
  0x37   : > { %581 = vmatmul.mubr.bf16.gmra.mrb[4].mxu0 %v339_v61  ;;  %694 = vmatmul.mubr.bf16.gmra.mrb[4].mxu1 %v339_v61 }
  0x38   : > { %590 = vmatprep.mubr.bf16.mxu0 %v1626_v2  ;;  %703 = vmatprep.mubr.bf16.mxu1 %v1626_v2 }
  0x3f   : > { %591 = vmatmul.mubr.bf16.gmra.mrb[8].mxu0 %v340_v8  ;;  %704 = vmatmul.mubr.bf16.gmra.mrb[8].mxu1 %v340_v8 }
  0x40   : > { %600 = vmatprep.mubr.bf16.mxu0 %v1626_v2  ;;  %713 = vmatprep.mubr.bf16.mxu1 %v1626_v2 }
  0x47   : > { %601 = vmatmul.mubr.bf16.gmra.mrb[12].mxu0 %v341_v18  ;;  %714 = vmatmul.mubr.bf16.gmra.mrb[12].mxu1 %v341_v18 }
  0x48   : > { %610 = vmatprep.mubr.bf16.mxu0 %v1626_v2  ;;  %723 = vmatprep.mubr.bf16.mxu1 %v1626_v2 }
  0x4f   : > { %611 = vmatmul.mubr.bf16.gmra.mrb[16].mxu0 %v342_v29  ;;  %724 = vmatmul.mubr.bf16.gmra.mrb[16].mxu1 %v342_v29 }
  0x50   : > { %620 = vmatprep.mubr.bf16.mxu0 %v1626_v2  ;;  %733 = vmatprep.mubr.bf16.mxu1 %v1626_v2 }
  0x57   : > { %621 = vmatmul.mubr.bf16.gmra.mrb[20].mxu0 %v343_v40  ;;  %734 = vmatmul.mubr.bf16.gmra.mrb[20].mxu1 %v343_v40 }
  0x58   : > { %630 = vmatprep.mubr.bf16.mxu0 %v1626_v2  ;;  %743 = vmatprep.mubr.bf16.mxu1 %v1626_v2 }
  0x5f   : > { %631 = vmatmul.mubr.bf16.gmra.mrb[24].mxu0 %v344_v48  ;;  %744 = vmatmul.mubr.bf16.gmra.mrb[24].mxu1 %v344_v48 }
  0x60   : > { %640 = vmatprep.mubr.bf16.mxu0 %v1626_v2  ;;  %753 = vmatprep.mubr.bf16.mxu1 %v1626_v2 }
  0x67   : > { %641 = vmatmul.mubr.bf16.gmra.mrb[28].mxu0 %v345_v53  ;;  %754 = vmatmul.mubr.bf16.gmra.mrb[28].mxu1 %v345_v53 }
 0x102   : > { %v1840_v28 = vpop.f32.mrb[0].mxu0  ;;  %v1842_v54 = vpop.f32.mrb[0].mxu1 }
 0x103   : > { %v1849_v32 = vpop.f32.mrb[1].mxu0  ;;  %v1851_v55 = vpop.f32.mrb[1].mxu1 }
 0x104   : > { %2380 = vst [vmem:[#allocation2_spill] sm:$0xff] %v1851_v55  ;;  %v1489_v2 = vpack.c.bf16 %v1849_v32, %v1840_v28  ;;  %v1490_v56 = vpack.c.bf16 %v1851_v55, %v1842_v54  ;;  %v1857_v57 = vpop.f32.mrb[2].mxu0  ;;  %v1859_v58 = vpop.f32.mrb[2].mxu1 }
 0x105   : > { %v988_v59 = vadd.f32 %v1857_v57, %v1840_v28  ;;  %v1030_v60 = vadd.f32 %v1859_v58, %v1842_v54  ;;  %v1865_v61 = vpop.f32.mrb[3].mxu0  ;;  %v1867_v62 = vpop.f32.mrb[3].mxu1 }
 0x106   : > { %2381 = vst [vmem:[#allocation3_spill] sm:$0xff] %v1867_v62  ;;  %956 = vst [vmem:[%s1847_s29] sm:$0xff] %v1489_v2  ;;  %v1491_v63 = vpack.c.bf16 %v1865_v61, %v1857_v57  ;;  %v1009_v0 = vadd.f32 %v1865_v61, %v1849_v32  ;;  %v1492_v1 = vpack.c.bf16 %v1867_v62, %v1859_v58 }
 0x107   : > { %957 = vst [vmem:[%s1847_s29 + $0x8] sm:$0xff] %v1490_v56  ;;  %v1051_v3 = vadd.f32 %v1867_v62, %v1851_v55 }
 0x108   : > { %958 = vst [vmem:[%s1847_s29 + $0x10] sm:$0xff] %v1491_v63  ;;  %959 = vst [vmem:[%s1847_s29 + $0x18] sm:$0xff] %v1492_v1 }
 0x10a   : > { %v1881_v4 = vpop.f32.mrb[4].mxu0  ;;  %v1883_v5 = vpop.f32.mrb[4].mxu1 }
 0x10b   : > { %v989_v6 = vadd.f32 %v988_v59, %v1881_v4  ;;  %v1031_v7 = vadd.f32 %v1030_v60, %v1883_v5  ;;  %v1887_v8 = vpop.f32.mrb[5].mxu0  ;;  %v1889_v9 = vpop.f32.mrb[5].mxu1 }
 0x10c   : > { %2382 = vst [vmem:[#allocation4_spill] sm:$0xff] %v1889_v9  ;;  %v1493_v10 = vpack.c.bf16 %v1887_v8, %v1881_v4  ;;  %v1010_v11 = vadd.f32 %v1009_v0, %v1887_v8  ;;  %v1494_v12 = vpack.c.bf16 %v1889_v9, %v1883_v5  ;;  %v1052_v13 = vadd.f32 %v1051_v3, %v1889_v9  ;;  %v1897_v14 = vpop.f32.mrb[6].mxu0  ;;  %v1899_v15 = vpop.f32.mrb[6].mxu1 }
 0x10d   : > { %v990_v16 = vadd.f32 %v989_v6, %v1897_v14  ;;  %v1032_v17 = vadd.f32 %v1031_v7, %v1899_v15  ;;  %v1903_v18 = vpop.f32.mrb[7].mxu0  ;;  %v1905_v19 = vpop.f32.mrb[7].mxu1 }
 0x10e   : > { %2383 = vst [vmem:[#allocation5_spill] sm:$0xff] %v1905_v19  ;;  %960 = vst [vmem:[%s1847_s29 + $0x20] sm:$0xff] %v1493_v10  ;;  %v1495_v20 = vpack.c.bf16 %v1903_v18, %v1897_v14  ;;  %v1011_v21 = vadd.f32 %v1010_v11, %v1903_v18  ;;  %v1496_v22 = vpack.c.bf16 %v1905_v19, %v1899_v15 }
 0x10f   : > { %961 = vst [vmem:[%s1847_s29 + $0x28] sm:$0xff] %v1494_v12  ;;  %v1053_v23 = vadd.f32 %v1052_v13, %v1905_v19 }
 0x110   : > { %962 = vst [vmem:[%s1847_s29 + $0x30] sm:$0xff] %v1495_v20  ;;  %963 = vst [vmem:[%s1847_s29 + $0x38] sm:$0xff] %v1496_v22 }
 0x112   : > { %v1917_v24 = vpop.f32.mrb[8].mxu0  ;;  %v1919_v25 = vpop.f32.mrb[8].mxu1 }
 0x113   : > { %v991_v26 = vadd.f32 %v990_v16, %v1917_v24  ;;  %v1033_v27 = vadd.f32 %v1032_v17, %v1919_v25  ;;  %v1923_v29 = vpop.f32.mrb[9].mxu0  ;;  %v1925_v30 = vpop.f32.mrb[9].mxu1 }
 0x114   : > { %2384 = vst [vmem:[#allocation6_spill] sm:$0xff] %v1925_v30  ;;  %v1497_v31 = vpack.c.bf16 %v1923_v29, %v1917_v24  ;;  %v1012_v33 = vadd.f32 %v1011_v21, %v1923_v29  ;;  %v1498_v34 = vpack.c.bf16 %v1925_v30, %v1919_v25  ;;  %v1054_v35 = vadd.f32 %v1053_v23, %v1925_v30  ;;  %v1933_v36 = vpop.f32.mrb[10].mxu0  ;;  %v1935_v37 = vpop.f32.mrb[10].mxu1 }
 0x115   : > { %v992_v38 = vadd.f32 %v991_v26, %v1933_v36  ;;  %v1034_v39 = vadd.f32 %v1033_v27, %v1935_v37  ;;  %v1939_v40 = vpop.f32.mrb[11].mxu0  ;;  %v1941_v41 = vpop.f32.mrb[11].mxu1 }
 0x116   : > { %2385 = vst [vmem:[#allocation7_spill] sm:$0xff] %v1941_v41  ;;  %964 = vst [vmem:[%s1847_s29 + $0x40] sm:$0xff] %v1497_v31  ;;  %v1499_v42 = vpack.c.bf16 %v1939_v40, %v1933_v36  ;;  %v1013_v43 = vadd.f32 %v1012_v33, %v1939_v40  ;;  %v1500_v44 = vpack.c.bf16 %v1941_v41, %v1935_v37 }
 0x117   : > { %965 = vst [vmem:[%s1847_s29 + $0x48] sm:$0xff] %v1498_v34  ;;  %v1055_v45 = vadd.f32 %v1054_v35, %v1941_v41 }
 0x118   : > { %966 = vst [vmem:[%s1847_s29 + $0x50] sm:$0xff] %v1499_v42  ;;  %967 = vst [vmem:[%s1847_s29 + $0x58] sm:$0xff] %v1500_v44 }
 0x11a   : > { %v1953_v46 = vpop.f32.mrb[12].mxu0  ;;  %v1955_v47 = vpop.f32.mrb[12].mxu1 }
 0x11b   : > { %v993_v48 = vadd.f32 %v992_v38, %v1953_v46  ;;  %v1035_v49 = vadd.f32 %v1034_v39, %v1955_v47  ;;  %v1959_v50 = vpop.f32.mrb[13].mxu0  ;;  %v1961_v51 = vpop.f32.mrb[13].mxu1 }
 0x11c   : > { %2386 = vst [vmem:[#allocation8_spill] sm:$0xff] %v1961_v51  ;;  %v1501_v52 = vpack.c.bf16 %v1959_v50, %v1953_v46  ;;  %v1014_v53 = vadd.f32 %v1013_v43, %v1959_v50  ;;  %v1502_v2 = vpack.c.bf16 %v1961_v51, %v1955_v47  ;;  %v1056_v56 = vadd.f32 %v1055_v45, %v1961_v51  ;;  %v1969_v59 = vpop.f32.mrb[14].mxu0  ;;  %v1971_v60 = vpop.f32.mrb[14].mxu1 }
 0x11d   : > { %v994_v63 = vadd.f32 %v993_v48, %v1969_v59  ;;  %v1036_v0 = vadd.f32 %v1035_v49, %v1971_v60  ;;  %v1975_v1 = vpop.f32.mrb[15].mxu0  ;;  %v1977_v3 = vpop.f32.mrb[15].mxu1 }
 0x11e   : > { %2387 = vst [vmem:[#allocation9_spill] sm:$0xff] %v1975_v1  ;;  %2388 = vst [vmem:[#allocation10_spill] sm:$0xff] %v1977_v3  ;;  %v1503_v6 = vpack.c.bf16 %v1975_v1, %v1969_v59  ;;  %v1015_v7 = vadd.f32 %v1014_v53, %v1975_v1  ;;  %v1504_v10 = vpack.c.bf16 %v1977_v3, %v1971_v60 }
 0x11f   : > { %968 = vst [vmem:[%s1847_s29 + $0x60] sm:$0xff] %v1501_v52  ;;  %969 = vst [vmem:[%s1847_s29 + $0x68] sm:$0xff] %v1502_v2  ;;  %v1057_v11 = vadd.f32 %v1056_v56, %v1977_v3 }
 0x120   : > { %970 = vst [vmem:[%s1847_s29 + $0x70] sm:$0xff] %v1503_v6  ;;  %971 = vst [vmem:[%s1847_s29 + $0x78] sm:$0xff] %v1504_v10 }
 0x122   : > { %v1989_v12 = vpop.f32.mrb[16].mxu0  ;;  %v1991_v13 = vpop.f32.mrb[16].mxu1 }
 0x123   : > { %v995_v16 = vadd.f32 %v994_v63, %v1989_v12  ;;  %v1037_v17 = vadd.f32 %v1036_v0, %v1991_v13  ;;  %v1995_v20 = vpop.f32.mrb[17].mxu0  ;;  %v1997_v21 = vpop.f32.mrb[17].mxu1 }
 0x124   : > { %2389 = vst [vmem:[#allocation11_spill] sm:$0xff] %v1995_v20  ;;  %2390 = vst [vmem:[#allocation12_spill] sm:$0xff] %v1997_v21  ;;  %v1505_v22 = vpack.c.bf16 %v1995_v20, %v1989_v12  ;;  %v1016_v23 = vadd.f32 %v1015_v7, %v1995_v20  ;;  %v1506_v26 = vpack.c.bf16 %v1997_v21, %v1991_v13  ;;  %v2005_v31 = vpop.f32.mrb[18].mxu0  ;;  %v2007_v33 = vpop.f32.mrb[18].mxu1 }
 0x125   : > { %v1058_v27 = vadd.f32 %v1057_v11, %v1997_v21  ;;  %v996_v34 = vadd.f32 %v995_v16, %v2005_v31  ;;  %v1038_v35 = vadd.f32 %v1037_v17, %v2007_v33  ;;  %v2011_v38 = vpop.f32.mrb[19].mxu0  ;;  %v2013_v39 = vpop.f32.mrb[19].mxu1 }
 0x126   : > { %2391 = vst [vmem:[#allocation13_spill] sm:$0xff] %v2011_v38  ;;  %2392 = vst [vmem:[#allocation14_spill] sm:$0xff] %v2013_v39  ;;  %v1507_v42 = vpack.c.bf16 %v2011_v38, %v2005_v31  ;;  %v1017_v43 = vadd.f32 %v1016_v23, %v2011_v38  ;;  %v1508_v44 = vpack.c.bf16 %v2013_v39, %v2007_v33 }
 0x127   : > { %972 = vst [vmem:[%s1847_s29 + $0x80] sm:$0xff] %v1505_v22  ;;  %973 = vst [vmem:[%s1847_s29 + $0x88] sm:$0xff] %v1506_v26  ;;  %v1059_v45 = vadd.f32 %v1058_v27, %v2013_v39 }
 0x128   : > { %974 = vst [vmem:[%s1847_s29 + $0x90] sm:$0xff] %v1507_v42  ;;  %975 = vst [vmem:[%s1847_s29 + $0x98] sm:$0xff] %v1508_v44 }
 0x12a   : > { %v2025_v48 = vpop.f32.mrb[20].mxu0  ;;  %v2027_v49 = vpop.f32.mrb[20].mxu1 }
 0x12b   : > { %v997_v52 = vadd.f32 %v996_v34, %v2025_v48  ;;  %v1039_v53 = vadd.f32 %v1038_v35, %v2027_v49  ;;  %v2031_v2 = vpop.f32.mrb[21].mxu0  ;;  %v2033_v56 = vpop.f32.mrb[21].mxu1 }
 0x12c   : > { %2393 = vst [vmem:[#allocation15_spill] sm:$0xff] %v2031_v2  ;;  %2394 = vst [vmem:[#allocation16_spill] sm:$0xff] %v2033_v56  ;;  %v1509_v63 = vpack.c.bf16 %v2031_v2, %v2025_v48  ;;  %v1018_v0 = vadd.f32 %v1017_v43, %v2031_v2  ;;  %v1510_v6 = vpack.c.bf16 %v2033_v56, %v2027_v49  ;;  %v2041_v10 = vpop.f32.mrb[22].mxu0  ;;  %v2043_v11 = vpop.f32.mrb[22].mxu1 }
 0x12d   : > { %v1060_v7 = vadd.f32 %v1059_v45, %v2033_v56  ;;  %v998_v16 = vadd.f32 %v997_v52, %v2041_v10  ;;  %v1040_v17 = vadd.f32 %v1039_v53, %v2043_v11  ;;  %v2047_v22 = vpop.f32.mrb[23].mxu0  ;;  %v2049_v23 = vpop.f32.mrb[23].mxu1 }
 0x12e   : > { %2395 = vst [vmem:[#allocation17_spill] sm:$0xff] %v2047_v22  ;;  %2396 = vst [vmem:[#allocation18_spill] sm:$0xff] %v2049_v23  ;;  %v1511_v26 = vpack.c.bf16 %v2047_v22, %v2041_v10  ;;  %v1019_v27 = vadd.f32 %v1018_v0, %v2047_v22  ;;  %v1512_v34 = vpack.c.bf16 %v2049_v23, %v2043_v11 }
 0x12f   : > { %976 = vst [vmem:[%s1847_s29 + $0xa0] sm:$0xff] %v1509_v63  ;;  %977 = vst [vmem:[%s1847_s29 + $0xa8] sm:$0xff] %v1510_v6  ;;  %v1061_v35 = vadd.f32 %v1060_v7, %v2049_v23 }
 0x130   : > { %978 = vst [vmem:[%s1847_s29 + $0xb0] sm:$0xff] %v1511_v26  ;;  %979 = vst [vmem:[%s1847_s29 + $0xb8] sm:$0xff] %v1512_v34 }
 0x132   : > { %v2061_v42 = vpop.f32.mrb[24].mxu0  ;;  %v2063_v43 = vpop.f32.mrb[24].mxu1 }
 0x133   : > { %v999_v44 = vadd.f32 %v998_v16, %v2061_v42  ;;  %v1041_v45 = vadd.f32 %v1040_v17, %v2063_v43  ;;  %v2067_v52 = vpop.f32.mrb[25].mxu0  ;;  %v2069_v53 = vpop.f32.mrb[25].mxu1 }
 0x134   : > { %2397 = vst [vmem:[#allocation19_spill] sm:$0xff] %v2067_v52  ;;  %2398 = vst [vmem:[#allocation20_spill] sm:$0xff] %v2069_v53  ;;  %v1513_v63 = vpack.c.bf16 %v2067_v52, %v2061_v42  ;;  %v1020_v0 = vadd.f32 %v1019_v27, %v2067_v52  ;;  %v1514_v6 = vpack.c.bf16 %v2069_v53, %v2063_v43  ;;  %v2077_v26 = vpop.f32.mrb[26].mxu0  ;;  %v2079_v16 = vpop.f32.mrb[26].mxu1 }
 0x135   : > { %v1062_v7 = vadd.f32 %v1061_v35, %v2069_v53  ;;  %v1000_v17 = vadd.f32 %v999_v44, %v2077_v26  ;;  %v1042_v34 = vadd.f32 %v1041_v45, %v2079_v16  ;;  %v2083_v23 = vpop.f32.mrb[27].mxu0  ;;  %v2085_v56 = vpop.f32.mrb[27].mxu1 }
 0x136   : > { %2399 = vst [vmem:[#allocation21_spill] sm:$0xff] %v2083_v23  ;;  %2400 = vst [vmem:[#allocation22_spill] sm:$0xff] %v2085_v56  ;;  %v1515_v27 = vpack.c.bf16 %v2083_v23, %v2077_v26  ;;  %v1021_v39 = vadd.f32 %v1020_v0, %v2083_v23  ;;  %v1516_v35 = vpack.c.bf16 %v2085_v56, %v2079_v16 }
 0x137   : > { %980 = vst [vmem:[%s1847_s29 + $0xc0] sm:$0xff] %v1513_v63  ;;  %981 = vst [vmem:[%s1847_s29 + $0xc8] sm:$0xff] %v1514_v6  ;;  %v1063_v53 = vadd.f32 %v1062_v7, %v2085_v56 }
 0x138   : > { %982 = vst [vmem:[%s1847_s29 + $0xd0] sm:$0xff] %v1515_v27  ;;  %983 = vst [vmem:[%s1847_s29 + $0xd8] sm:$0xff] %v1516_v35 }
 0x13a   : > { %v642_v44 = vpop.f32.mrb[28].mxu0  ;;  %v2097_v45 = vpop.f32.mrb[28].mxu1 }
 0x13b   : > { %v1001_v21 = vadd.f32 %v1000_v17, %v642_v44  ;;  %v1043_v63 = vadd.f32 %v1042_v34, %v2097_v45  ;;  %v2100_v6 = vpop.f32.mrb[29].mxu0  ;;  %v2102_v3 = vpop.f32.mrb[29].mxu1 }
 0x13c   : > { %2401 = vst [vmem:[#allocation23_spill] sm:$0xff] %v2100_v6  ;;  %2402 = vst [vmem:[#allocation24_spill] sm:$0xff] %v2102_v3  ;;  %v1517_v0 = vpack.c.bf16 %v2100_v6, %v642_v44  ;;  %v1022_v51 = vadd.f32 %v1021_v39, %v2100_v6  ;;  %v1518_v7 = vpack.c.bf16 %v2102_v3, %v2097_v45  ;;  %v646_v35 = vpop.f32.mrb[30].mxu0  ;;  %v2109_v56 = vpop.f32.mrb[30].mxu1 }
 0x13d   : > { %v1064_v27 = vadd.f32 %v1063_v53, %v2102_v3  ;;  %v1002_v17 = vadd.f32 %v1001_v21, %v646_v35  ;;  %v1044_v34 = vadd.f32 %v1043_v63, %v2109_v56  ;;  %v2112_v41 = vpop.f32.mrb[31].mxu0  ;;  %v2114_v30 = vpop.f32.mrb[31].mxu1 }
 0x13e   : > { %2403 = vst [vmem:[#allocation25_spill] sm:$0xff] %v2112_v41  ;;  %2404 = vst [vmem:[#allocation26_spill] sm:$0xff] %v2114_v30  ;;  %v1519_v39 = vpack.c.bf16 %v2112_v41, %v646_v35  ;;  %v1023_v19 = vadd.f32 %v1022_v51, %v2112_v41  ;;  %v1520_v53 = vpack.c.bf16 %v2114_v30, %v2109_v56 }
 0x13f   : > { %984 = vst [vmem:[%s1847_s29 + $0xe0] sm:$0xff] %v1517_v0  ;;  %985 = vst [vmem:[%s1847_s29 + $0xe8] sm:$0xff] %v1518_v7  ;;  %v1065_v3 = vadd.f32 %v1064_v27, %v2114_v30  ;;  %v1003_v9 = vrot.slane %v1002_v17, 4  ;;  %v1045_v62 = vrot.slane %v1044_v34, 4 }
 0x140   : > { %986 = vst [vmem:[%s1847_s29 + $0xf0] sm:$0xff] %v1519_v39  ;;  %v1024_v21 = vrot.slane %v1023_v19, 4  ;;  %987 = vst [vmem:[%s1847_s29 + $0xf8] sm:$0xff] %v1520_v53 }
 0x141   : > { %v1066_v63 = vrot.slane %v1065_v3, 4  ;;  %v1004_v55 = vadd.f32 %v1003_v9, %v1002_v17  ;;  %v1046_v6 = vadd.f32 %v1045_v62, %v1044_v34 }
 0x142   : > { %v1025_v23 = vadd.f32 %v1024_v21, %v1023_v19 }
 0x143   : > { %v1067_v0 = vadd.f32 %v1066_v63, %v1065_v3  ;;  %v1005_v7 = vrot.slane %v1004_v55, 2  ;;  %v1047_v52 = vrot.slane %v1046_v6, 2 }
 0x144   : > { %v1026_v22 = vrot.slane %v1025_v23, 2 }
 0x145   : > { %v1068_v2 = vrot.slane %v1067_v0, 2  ;;  %v1006_v51 = vadd.f32 %v1005_v7, %v1004_v55  ;;  %v1048_v41 = vadd.f32 %v1047_v52, %v1046_v6 }
 0x146   : > { %v1027_v1 = vadd.f32 %v1026_v22, %v1025_v23 }
 0x147   : > { %v1007_v38 = vrot.slane %v1006_v51, 1  ;;  %v1049_v20 = vrot.slane %v1048_v41, 1  ;;  %v1069_v27 = vadd.f32 %v1068_v2, %v1067_v0 }
 0x148   : > { %v1028_v9 = vrot.slane %v1027_v1, 1 }
 0x149   : > { %v2125_v30 = vadd.f32 %v1007_v38, %v1006_v51  ;;  %v2128_v53 = vadd.f32 %v1049_v20, %v1048_v41  ;;  %v1070_v62 = vrot.slane %v1069_v27, 1 }
 0x14b   : > { %v1072_v39 = vmul.f32 0.0078125, %v2125_v30 }
 0x14d   : > { %v1076_v19 = vsub.f32 %v1840_v28, %v1072_v39  ;;  %v1080_v3 = vsub.f32 %v1857_v57, %v1072_v39  ;;  %v1084_v17 = vsub.f32 %v1881_v4, %v1072_v39  ;;  %v1088_v55 = vsub.f32 %v1897_v14, %v1072_v39 }
 0x14e   : > { %v1092_v52 = vsub.f32 %v1917_v24, %v1072_v39  ;;  %v1096_v2 = vsub.f32 %v1933_v36, %v1072_v39  ;;  %v1100_v38 = vsub.f32 %v1953_v46, %v1072_v39  ;;  %v1104_v22 = vsub.f32 %v1969_v59, %v1072_v39 }
 0x14f   : > { %v1108_v41 = vsub.f32 %v1989_v12, %v1072_v39  ;;  %v1112_v20 = vsub.f32 %v2005_v31, %v1072_v39  ;;  %v1116_v28 = vsub.f32 %v2025_v48, %v1072_v39  ;;  %v2142_v57 = vsub.f32 %v2041_v10, %v1072_v39 }
 0x150   : > { %v2145_v4 = vsub.f32 %v2061_v42, %v1072_v39  ;;  %v2148_v14 = vsub.f32 %v2077_v26, %v1072_v39  ;;  %v2150_v24 = vsub.f32 %v642_v44, %v1072_v39  ;;  %v2152_v36 = vsub.f32 %v646_v35, %v1072_v39 }
 0x151   : > { %v1140_v46 = vmul.f32 %v1076_v19, %v1076_v19  ;;  %v1144_v59 = vmul.f32 %v1080_v3, %v1080_v3  ;;  %v1074_v12 = vmul.f32 0.0078125, %v2128_v53  ;;  %v1148_v31 = vmul.f32 %v1084_v17, %v1084_v17 }
 0x152   : > { %v1152_v23 = vmul.f32 %v1088_v55, %v1088_v55  ;;  %v2155_v48 = vadd.f32 %v1028_v9, %v1027_v1  ;;  %v2157_v10 = vadd.f32 %v1070_v62, %v1069_v27  ;;  %v1164_v39 = vmul.f32 %v1100_v38, %v1100_v38 }
 0x153   : > { %v1204_v6 = vadd.f32 %v1144_v59, %v1140_v46  ;;  %v1078_v42 = vsub.f32 %v1842_v54, %v1074_v12  ;;  %v1082_v26 = vsub.f32 %v1859_v58, %v1074_v12  ;;  %v1086_v44 = vsub.f32 %v1883_v5, %v1074_v12 }
 0x154   : > { %v1090_v35 = vsub.f32 %v1899_v15, %v1074_v12  ;;  %v1094_v34 = vsub.f32 %v1919_v25, %v1074_v12  ;;  %v1098_v21 = vsub.f32 %v1935_v37, %v1074_v12  ;;  %v1102_v63 = vsub.f32 %v1955_v47, %v1074_v12 }
 0x155   : > { %v1205_v0 = vadd.f32 %v1204_v6, %v1148_v31  ;;  %v1106_v1 = vsub.f32 %v1971_v60, %v1074_v12  ;;  %v1110_v7 = vsub.f32 %v1991_v13, %v1074_v12  ;;  %v1114_v51 = vsub.f32 %v2007_v33, %v1074_v12 }
 0x156   : > { %v1118_v54 = vsub.f32 %v2027_v49, %v1074_v12  ;;  %v2171_v58 = vsub.f32 %v2043_v11, %v1074_v12  ;;  %v2174_v5 = vsub.f32 %v2063_v43, %v1074_v12  ;;  %v2177_v15 = vsub.f32 %v2079_v16, %v1074_v12 }
 0x157   : > { %v1156_v25 = vmul.f32 %v1092_v52, %v1092_v52  ;;  %v1206_v37 = vadd.f32 %v1205_v0, %v1152_v23  ;;  %v2180_v47 = vsub.f32 %v2097_v45, %v1074_v12  ;;  %v2183_v60 = vsub.f32 %v2109_v56, %v1074_v12 }
 0x158   : > { %v1142_v13 = vmul.f32 %v1078_v42, %v1078_v42  ;;  %v1146_v33 = vmul.f32 %v1082_v26, %v1082_v26  ;;  %v1073_v49 = vmul.f32 0.0078125, %v2155_v48  ;;  %v1160_v11 = vmul.f32 %v1096_v2, %v1096_v2  ;;  %v2409_v26 = vld [vmem:[#allocation17_spill] sm:$0xff] }
 0x159   : > { %v1207_v27 = vadd.f32 %v1206_v37, %v1156_v25  ;;  %v2187_v43 = vmul.f32 0.0078125, %v2157_v10  ;;  %v1168_v16 = vmul.f32 %v1104_v22, %v1104_v22  ;;  %v1172_v9 = vmul.f32 %v1108_v41, %v1108_v41  ;;  %v2412_v37 = vld [vmem:[#allocation23_spill] sm:$0xff] }
 0x15a   : > { %v1176_v62 = vmul.f32 %v1112_v20, %v1112_v20  ;;  %v1180_v19 = vmul.f32 %v1116_v28, %v1116_v28  ;;  %v1150_v45 = vmul.f32 %v1086_v44, %v1086_v44  ;;  %v1154_v17 = vmul.f32 %v1090_v35, %v1090_v35  ;;  %v2405_v28 = vld [vmem:[#allocation9_spill] sm:$0xff] }
 0x15b   : > { %v1208_v3 = vadd.f32 %v1207_v27, %v1160_v11  ;;  %v1158_v55 = vmul.f32 %v1094_v34, %v1094_v34  ;;  %v1246_v56 = vadd.f32 %v1146_v33, %v1142_v13  ;;  %v1077_v52 = vsub.f32 %v1849_v32, %v1073_v49  ;;  %v2406_v32 = vld [vmem:[#allocation11_spill] sm:$0xff]  ;;  %v2411_v35 = vld [vmem:[#allocation21_spill] sm:$0xff] }
 0x15c   : > { %v1081_v46 = vsub.f32 %v1865_v61, %v1073_v49  ;;  %v1085_v2 = vsub.f32 %v1887_v8, %v1073_v49  ;;  %v1089_v12 = vsub.f32 %v1903_v18, %v1073_v49  ;;  %v1093_v38 = vsub.f32 %v1923_v29, %v1073_v49  ;;  %v2407_v61 = vld [vmem:[#allocation13_spill] sm:$0xff]  ;;  %v2408_v8 = vld [vmem:[#allocation15_spill] sm:$0xff] }
 0x15d   : > { %v1209_v59 = vadd.f32 %v1208_v3, %v1164_v39  ;;  %v1247_v22 = vadd.f32 %v1246_v56, %v1150_v45  ;;  %v1097_v41 = vsub.f32 %v1939_v40, %v1073_v49  ;;  %v2196_v20 = vsub.f32 %v1959_v50, %v1073_v49  ;;  %v2410_v40 = vld [vmem:[#allocation19_spill] sm:$0xff]  ;;  %v2413_v33 = vld [vmem:[#allocation25_spill] sm:$0xff] }
 0x15e   : > { %v2199_v31 = vsub.f32 %v2405_v28, %v1073_v49  ;;  %v2202_v6 = vsub.f32 %v2406_v32, %v1073_v49  ;;  %v2205_v42 = vsub.f32 %v2407_v61, %v1073_v49  ;;  %v2208_v18 = vsub.f32 %v2408_v8, %v1073_v49 }
 0x15f   : > { %v1210_v23 = vadd.f32 %v1209_v59, %v1168_v16  ;;  %v1248_v29 = vadd.f32 %v1247_v22, %v1154_v17  ;;  %v2211_v44 = vsub.f32 %v2409_v26, %v1073_v49  ;;  %v2214_v50 = vsub.f32 %v2410_v40, %v1073_v49  ;;  %v2420_v40 = vld [vmem:[#allocation8_spill] sm:$0xff] }
 0x160   : > { %v2217_v34 = vsub.f32 %v2411_v35, %v1073_v49  ;;  %v1184_v0 = vmul.f32 %v2142_v57, %v2142_v57  ;;  %v2222_v13 = vsub.f32 %v2412_v37, %v1073_v49  ;;  %v2225_v11 = vsub.f32 %v2413_v33, %v1073_v49  ;;  %v2422_v33 = vld [vmem:[#allocation12_spill] sm:$0xff] }
 0x161   : > { %v1211_v25 = vadd.f32 %v1210_v23, %v1172_v9  ;;  %v1188_v27 = vmul.f32 %v2145_v4, %v2145_v4  ;;  %v1192_v39 = vmul.f32 %v2148_v14, %v2148_v14  ;;  %v1162_v16 = vmul.f32 %v1098_v21, %v1098_v21 }
 0x162   : > { %v1249_v3 = vadd.f32 %v1248_v29, %v1158_v55  ;;  %v1196_v45 = vmul.f32 %v2150_v24, %v2150_v24  ;;  %v1141_v57 = vmul.f32 %v1077_v52, %v1077_v52  ;;  %v1145_v9 = vmul.f32 %v1081_v46, %v1081_v46  ;;  %v2414_v24 = vld [vmem:[#allocation2_spill] sm:$0xff]  ;;  %v2415_v52 = vld [vmem:[#allocation3_spill] sm:$0xff] }
 0x163   : > { %v1212_v17 = vadd.f32 %v1211_v25, %v1176_v62  ;;  %v1200_v56 = vmul.f32 %v2152_v36, %v2152_v36  ;;  %v1166_v59 = vmul.f32 %v1102_v63, %v1102_v63  ;;  %v1170_v49 = vmul.f32 %v1106_v1, %v1106_v1  ;;  %v2416_v63 = vld [vmem:[#allocation4_spill] sm:$0xff]  ;;  %v2421_v25 = vld [vmem:[#allocation10_spill] sm:$0xff] }
 0x164   : > { %v1250_v22 = vadd.f32 %v1249_v3, %v1162_v16  ;;  %v1174_v23 = vmul.f32 %v1110_v7, %v1110_v7  ;;  %v1178_v4 = vmul.f32 %v1114_v51, %v1114_v51  ;;  %v1182_v32 = vmul.f32 %v1118_v54, %v1118_v54  ;;  %v2417_v7 = vld [vmem:[#allocation5_spill] sm:$0xff]  ;;  %v2418_v54 = vld [vmem:[#allocation6_spill] sm:$0xff] }
 0x165   : > { %v1213_v28 = vadd.f32 %v1212_v17, %v1180_v19  ;;  %v1149_v14 = vmul.f32 %v1085_v2, %v1085_v2  ;;  %v1153_v21 = vmul.f32 %v1089_v12, %v1089_v12  ;;  %v1157_v55 = vmul.f32 %v1093_v38, %v1093_v38  ;;  %v2419_v38 = vld [vmem:[#allocation7_spill] sm:$0xff]  ;;  %v2423_v3 = vld [vmem:[#allocation14_spill] sm:$0xff] }
 0x166   : > { %v1251_v61 = vadd.f32 %v1250_v22, %v1166_v59  ;;  %v1225_v29 = vadd.f32 %v1145_v9, %v1141_v57  ;;  %v1079_v62 = vsub.f32 %v2414_v24, %v2187_v43  ;;  %v1083_v46 = vsub.f32 %v2415_v52, %v2187_v43  ;;  %v2424_v9 = vld [vmem:[#allocation16_spill] sm:$0xff] }
 0x167   : > { %v1214_v8 = vadd.f32 %v1213_v28, %v1184_v0  ;;  %v1087_v1 = vsub.f32 %v2416_v63, %v2187_v43  ;;  %v1091_v51 = vsub.f32 %v2417_v7, %v2187_v43  ;;  %v1095_v19 = vsub.f32 %v2418_v54, %v2187_v43 }
 0x168   : > { %v1252_v36 = vadd.f32 %v1251_v61, %v1170_v49  ;;  %v1226_v12 = vadd.f32 %v1225_v29, %v1149_v14  ;;  %v1099_v26 = vsub.f32 %v2419_v38, %v2187_v43  ;;  %v1103_v35 = vsub.f32 %v2420_v40, %v2187_v43  ;;  %v2425_v49 = vld [vmem:[#allocation18_spill] sm:$0xff] }
 0x169   : > { %v1215_v2 = vadd.f32 %v1214_v8, %v1188_v27  ;;  %v2251_v37 = vsub.f32 %v2421_v25, %v2187_v43  ;;  %v2255_v16 = vsub.f32 %v2422_v33, %v2187_v43  ;;  %v2259_v17 = vsub.f32 %v2423_v3, %v2187_v43  ;;  %v2427_v14 = vld [vmem:[#allocation22_spill] sm:$0xff] }
 0x16a   : > { %v1253_v0 = vadd.f32 %v1252_v36, %v1174_v23  ;;  %v1227_v57 = vadd.f32 %v1226_v12, %v1153_v21  ;;  %v2263_v59 = vsub.f32 %v2424_v9, %v2187_v43  ;;  %v2267_v22 = vsub.f32 %v2425_v49, %v2187_v43  ;;  %v2426_v23 = vld [vmem:[#allocation20_spill] sm:$0xff]  ;;  %v2429_v36 = vld [vmem:[#allocation26_spill] sm:$0xff] }
 0x16b   : > { %v1216_v27 = vadd.f32 %v1215_v2, %v1192_v39  ;;  %v2271_v61 = vsub.f32 %v2426_v23, %v2187_v43  ;;  %v2275_v8 = vsub.f32 %v2427_v14, %v2187_v43  ;;  %v2428_v39 = vld [vmem:[#allocation24_spill] sm:$0xff]  ;;  %v1161_v24 = vmul.f32 %v1097_v41, %v1097_v41 }
 0x16c   : > { %v1254_v28 = vadd.f32 %v1253_v0, %v1178_v4  ;;  %v2279_v21 = vsub.f32 %v2428_v39, %v2187_v43  ;;  %v1228_v52 = vadd.f32 %v1227_v57, %v1157_v55  ;;  %v2283_v63 = vsub.f32 %v2429_v36, %v2187_v43 }
 0x16d   : > { %v1217_v29 = vadd.f32 %v1216_v27, %v1196_v45  ;;  %v1186_v4 = vmul.f32 %v2171_v58, %v2171_v58  ;;  %v1165_v2 = vmul.f32 %v2196_v20, %v2196_v20  ;;  %v1190_v38 = vmul.f32 %v2174_v5, %v2174_v5 }
 0x16e   : > { %v1255_v7 = vadd.f32 %v1254_v28, %v1182_v32  ;;  %v1229_v12 = vadd.f32 %v1228_v52, %v1161_v24  ;;  %v1143_v45 = vmul.f32 %v1079_v62, %v1079_v62  ;;  %v1147_v41 = vmul.f32 %v1083_v46, %v1083_v46 }
 0x16f   : > { %v1218_v54 = vadd.f32 %v1217_v29, %v1200_v56  ;;  %v1169_v43 = vmul.f32 %v2199_v31, %v2199_v31  ;;  %v1194_v58 = vmul.f32 %v2177_v15, %v2177_v15  ;;  %v1173_v20 = vmul.f32 %v2202_v6, %v2202_v6 }
 0x170   : > { %v1256_v40 = vadd.f32 %v1255_v7, %v1186_v4  ;;  %v1230_v0 = vadd.f32 %v1229_v12, %v1165_v2  ;;  %v1198_v5 = vmul.f32 %v2180_v47, %v2180_v47  ;;  %v1151_v62 = vmul.f32 %v1087_v1, %v1087_v1 }
 0x171   : > { %v1219_v55 = vrot.slane %v1218_v54, 4  ;;  %v1267_v46 = vadd.f32 %v1147_v41, %v1143_v45  ;;  %v1177_v31 = vmul.f32 %v2205_v42, %v2205_v42  ;;  %v1202_v15 = vmul.f32 %v2183_v60, %v2183_v60 }
 0x172   : > { %v1257_v32 = vadd.f32 %v1256_v40, %v1190_v38  ;;  %v1231_v25 = vadd.f32 %v1230_v0, %v1169_v43  ;;  %v1155_v9 = vmul.f32 %v1091_v51, %v1091_v51  ;;  %v1181_v6 = vmul.f32 %v2208_v18, %v2208_v18 }
 0x173   : > { %v1220_v56 = vadd.f32 %v1219_v55, %v1218_v54  ;;  %v1268_v49 = vadd.f32 %v1267_v46, %v1151_v62  ;;  %v1159_v14 = vmul.f32 %v1095_v19, %v1095_v19  ;;  %v1185_v29 = vmul.f32 %v2211_v44, %v2211_v44 }
 0x174   : > { %v1258_v33 = vadd.f32 %v1257_v32, %v1194_v58  ;;  %v1232_v27 = vadd.f32 %v1231_v25, %v1173_v20  ;;  %v1163_v52 = vmul.f32 %v1099_v26, %v1099_v26  ;;  %v1189_v51 = vmul.f32 %v2214_v50, %v2214_v50 }
 0x175   : > { %v1221_v3 = vrot.slane %v1220_v56, 2  ;;  %v1269_v1 = vadd.f32 %v1268_v49, %v1155_v9  ;;  %v1167_v18 = vmul.f32 %v1103_v35, %v1103_v35  ;;  %v1193_v2 = vmul.f32 %v2217_v34, %v2217_v34 }
 0x176   : > { %v1259_v57 = vadd.f32 %v1258_v33, %v1198_v5  ;;  %v1233_v23 = vadd.f32 %v1232_v27, %v1177_v31  ;;  %v1171_v26 = vmul.f32 %v2251_v37, %v2251_v37  ;;  %v1197_v40 = vmul.f32 %v2222_v13, %v2222_v13 }
 0x177   : > { %v1222_v28 = vadd.f32 %v1221_v3, %v1220_v56  ;;  %v1270_v60 = vadd.f32 %v1269_v1, %v1159_v14  ;;  %v1175_v35 = vmul.f32 %v2255_v16, %v2255_v16  ;;  %v1179_v43 = vmul.f32 %v2259_v17, %v2259_v17 }
 0x178   : > { %v1260_v47 = vadd.f32 %v1259_v57, %v1202_v15  ;;  %v1234_v42 = vadd.f32 %v1233_v23, %v1181_v6  ;;  %v1183_v13 = vmul.f32 %v2263_v59, %v2263_v59  ;;  %v1187_v20 = vmul.f32 %v2267_v22, %v2267_v22 }
 0x179   : > { %v1223_v39 = vrot.slane %v1222_v28, 1  ;;  %v1271_v54 = vadd.f32 %v1270_v60, %v1163_v52  ;;  %v1191_v5 = vmul.f32 %v2271_v61, %v2271_v61  ;;  %v1195_v62 = vmul.f32 %v2275_v8, %v2275_v8 }
 0x17a   : > { %v1261_v24 = vrot.slane %v1260_v47, 4  ;;  %v1235_v4 = vadd.f32 %v1234_v42, %v1185_v29  ;;  %v1199_v3 = vmul.f32 %v2279_v21, %v2279_v21  ;;  %v1203_v22 = vmul.f32 %v2283_v63, %v2283_v63 }
 0x17b   : > { %v1224_v36 = vadd.f32 %v1223_v39, %v1222_v28  ;;  %v1272_v38 = vadd.f32 %v1271_v54, %v1167_v18  ;;  %v1627_v49 = vmov 1983009808   ;;  %v1302_v6 = vlaneseq }
 0x17c   : > { %v1262_v7 = vadd.f32 %v1261_v24, %v1260_v47  ;;  %v1236_v44 = vadd.f32 %v1235_v4, %v1189_v51  ;;  %v1300_v28 = vunpack.c.l.s4 %v1627_v49 }
 0x17d   : > { %v1289_v19 = vsel %vm1288_vm0, %v2125_v30, %v1224_v36  ;;  %v1273_v41 = vadd.f32 %v1272_v38, %v1171_v26  ;;  %v1201_v30 = vmul.f32 %v2225_v11, %v2225_v11  ;;  %v1303_v14 = vshrl.u32 %v1302_v6, 7 }
 0x17e   : > { %v1263_v12 = vrot.slane %v1262_v7, 2  ;;  %v1237_v50 = vadd.f32 %v1236_v44, %v1193_v2  ;;  %v1301_v47 = vunpack.c.0.s8 %v1300_v28 }
 0x17f   : > { %v1274_v0 = vadd.f32 %v1273_v41, %v1175_v35 }
 0x180   : > { %v1264_v45 = vadd.f32 %v1263_v12, %v1262_v7  ;;  %v1238_v55 = vadd.f32 %v1237_v50, %v1197_v40  ;;  %v1304_v63 = vsub.s32 %v1301_v47, %v1303_v14 }
 0x181   : > { %v1275_v32 = vadd.f32 %v1274_v0, %v1179_v43 }
 0x182   : > { %v1265_v34 = vrot.slane %v1264_v45, 1  ;;  %v1239_v37 = vadd.f32 %v1238_v55, %v1201_v30 }
 0x183   : > { %v1276_v11 = vadd.f32 %v1275_v32, %v1183_v13 }
 0x184   : > { %v1266_v58 = vadd.f32 %v1265_v34, %v1264_v45  ;;  %v1240_v56 = vrot.slane %v1239_v37, 4 }
 0x185   : > { %v1277_v17 = vadd.f32 %v1276_v11, %v1187_v20 }
 0x186   : > { %v1291_v16 = vsel %vm1288_vm0, %v2128_v53, %v1266_v58  ;;  %v1241_v25 = vadd.f32 %v1240_v56, %v1239_v37 }
 0x187   : > { %v1278_v46 = vadd.f32 %v1277_v17, %v1191_v5 }
 0x188   : > { %v1242_v33 = vrot.slane %v1241_v25, 2 }
 0x189   : > { %v1279_v31 = vadd.f32 %v1278_v46, %v1195_v62 }
 0x18a   : > { %v1243_v59 = vadd.f32 %v1242_v33, %v1241_v25 }
 0x18b   : > { %v1280_v27 = vadd.f32 %v1279_v31, %v1199_v3 }
 0x18c   : > { %v1244_v53 = vrot.slane %v1243_v59, 1 }
 0x18d   : > { %v1281_v61 = vadd.f32 %v1280_v27, %v1203_v22 }
 0x18e   : > { %v1245_v15 = vadd.f32 %v1244_v53, %v1243_v59 }
 0x18f   : > { %v1282_v8 = vrot.slane %v1281_v61, 4 }
 0x190   : > { %v1290_v57 = vsel %vm1288_vm0, %v2155_v48, %v1245_v15 }
 0x191   : > { %v1297_v9 = vcombine.low %v1289_v19, %v1290_v57  ;;  %v1283_v23 = vadd.f32 %v1282_v8, %v1281_v61 }
 0x193   : > { %v1284_v21 = vrot.slane %v1283_v23, 2  ;;  %v1305_v24 = vrot.slane %v1297_v9, %v1304_v63 }
 0x195   : > { %v1285_v1 = vadd.f32 %v1284_v21, %v1283_v23 }
 0x197   : > { %v1286_v39 = vrot.slane %v1285_v1, 1 }
 0x199   : > { %v1287_v29 = vadd.f32 %v1286_v39, %v1285_v1 }
 0x19b   : > { %v1292_v42 = vsel %vm1288_vm0, %v2157_v10, %v1287_v29 }
 0x19c   : > { %v1298_v48 = vcombine.low %v1291_v16, %v1292_v42 }
 0x19e   : > { %v1312_v52 = vrot.slane %v1298_v48, %v1304_v63 }
 0x1a0   : > { %v1313_v60 = vcombine.low %v1305_v24, %v1312_v52 }
 0x1a2   : > { %1315 = vst [vmem:[%s242_s8] sm:$0xff] %v1313_v60 }
 0x1a3 PF: > { %s16_s18 = sadd.s32 1, %s1624_s18  }
 0x1a4   : > { %p13_p5 = scmp.ge.s32.totalorder %s16_s18, 6  }
 0x1a6   :  { %15 = sbr.rel (!%p13_p5) target bundleno = 1 (0x1), region = 78 }

// kernel: block_forward_nchw.7
= control target key start
LH: loop header
LB: loop body
LE: loop exit
PB: predicated region body
PF: predicated region fallthrough
CT: control target
= control target key end

     0   :  { %9 = vsyncpa [#allocation3], 0  ;;  %s1420_s0 = inlined_call_operand.vmem [shape: bf16[512,512], index: 0, kind: input, shape index: {}]   ;;  %s1421_s1 = inlined_call_operand.vmem [shape: bf16[512,512], index: 1, kind: input, shape index: {}]   ;;  %s1422_s2 = inlined_call_operand.vmem [shape: f32[1,512], index: 2, kind: input, shape index: {}]   ;;  %s1423_s3 = inlined_call_operand.vmem [shape: f32[1,512], index: 3, kind: input, shape index: {}]   ;;  %s1424_s4 = inlined_call_operand.hbm [shape: f32[512,512], index: 4, kind: output, shape index: {}]  }
   0x1   :  { %11 = vsyncpa [#allocation3 + $0x1], 0  ;;  %s1026_s15 = smov 0   ;;  %s1028_s16 = smov 0  }
   0x2   :  { %s1030_s17 = smov 0   ;;  %s1032_s18 = smov 0  }
   0x3 LB: > { %s1047_s19 = sadd.s32 4294967295, %s996_s18   ;;  %s872_s20 = sadd.s32 4294967294, %s996_s18   ;;  %s996_s18 = sphi %s1032_s18, %s1430_s18   ;;  %s992_s17 = sphi %s1030_s17, %s1429_s17   ;;  %s988_s16 = sphi %s1028_s16, %s1428_s16   ;;  %s984_s15 = sphi %s1026_s15, %s1427_s15  }
   0x4   : > { %s1051_s21 = sadd.s32 1, %s996_s18   ;;  %s118_s22 = sadd.s32 1, %s992_s17 }
   0x5   : > { %s115_s23 = ssub.s32 %s996_s18, %s1051_s21  ;;  %p128_p0 = scmp.ne.s32.totalorder %s992_s17, %s988_s16 }
   0x6   : > { %p116_p1 = scmp.eq.s32.totalorder %s115_s23, 0  ;;  %p129_p2 = scmp.eq.s32.totalorder %s1047_s19, 3 }
   0x7   : > { %p134_p3 = scmp.ne.s32.totalorder %s988_s16, %s984_s15  ;;  %p135_p4 = scmp.eq.s32.totalorder %s872_s20, 3 }
   0x8   : > { %s1062_s24 = scalar_select %p116_p1, %s992_s17, %s118_s22  }
   0x9   : > { %p1064_p5 = por %p129_p2, %p128_p0  ;;  %p1068_p6 = por %p135_p4, %p134_p3 }
   0xa   : > { %p875_p7 = scmp.ge.s32.totalorder %s996_s18, 1  ;;  %p179_p8 = scmp.lt.s32.totalorder %s996_s18, 5 }
   0xc   : > { %p180_p9 = pnand %p875_p7, %p179_p8 }
   0xd   : > { %s877_s27 = sshll.u32 (!%p180_p9), %s1047_s19, 4  ;;  %v325_v0 = vlaneseq (!%p180_p9)  ;;  %v323_v2 = vld [vmem:[%s1422_s2] sm:$0xf] (!%p180_p9)  ;;  %s209_s13 = sand.u32 (!%p180_p9), 1, %s988_s16  }
   0xe   : > { %183 = sbr.rel (%p180_p9) target bundleno = 141 (0x8d), region = 36  ;;  %p213_p10 = scmp.lt.s32.totalorder (!%p180_p9), %s877_s27, 63  ;;  %v409_v3 = vld [vmem:[%s1423_s3] sm:$0xf] (!%p180_p9) }
   0xf   : > { %v326_v1 = vshrl.u32 (!%p180_p9), %v325_v0, 7  ;;  %s876_s14 = sshll.u32 (!%p180_p9), %s209_s13, 9  ;;  %s892_s22 = sshll.u32 (!%p180_p9), %s1047_s19, 13 }
  0x10   : > { %s1136_s20 = scalar_lea.vmem (!%p180_p9), [#allocation2], %s876_s14  ;;  %s1371_s29 = scalar_lea.hbm (!%p180_p9), %s1424_s4, %s892_s22 }
  0x11   : > { %v327_v4 = vsub.s32 (!%p180_p9), 0, %v326_v1  ;;  %v331_v5 = vsub.s32 (!%p180_p9), 1, %v326_v1  ;;  %v335_v6 = vsub.s32 (!%p180_p9), 2, %v326_v1  ;;  %v339_v7 = vsub.s32 (!%p180_p9), 3, %v326_v1  ;;  %s798_s23 = sshll.u32 (!%p180_p9), %s1136_s20, 4  ;;  %s1379_s19 = scalar_lea.sflag (!%p180_p9), [#allocation3], %s209_s13  ;;  %s1373_s23 = int_to_ptr.vmem [resolvable:$true] %s798_s23 }
  0x12   : > { %s934_s30 = scalar_lea.vmem (!%p180_p9), %s1373_s23, 8192  ;;  %s998_s5 = smov (!%p180_p9), [#allocation2]  }
  0x13   : > { %v1091_v8 = vrot.slane (!%p180_p9), %v323_v2, %v327_v4  ;;  %v1093_v9 = vrot.slane (!%p180_p9), %v409_v3, %v327_v4  ;;  %v1095_v10 = vrot.slane (!%p180_p9), %v323_v2, %v331_v5  ;;  %v1097_v11 = vrot.slane (!%p180_p9), %v409_v3, %v331_v5  ;;  %p935_p11 = scmp.ne.s32.totalorder (!%p180_p9), %s1373_s23, %s934_s30 }
  0x14   : > { %v1102_v15 = vrot.slane (!%p180_p9), %v323_v2, %v335_v6  ;;  %v1104_v16 = vrot.slane (!%p180_p9), %v409_v3, %v335_v6  ;;  %v1106_v17 = vrot.slane (!%p180_p9), %v323_v2, %v339_v7  ;;  %v1108_v18 = vrot.slane (!%p180_p9), %v409_v3, %v339_v7 }
  0x15   : > { %s1432_s27 = smov (!%p213_p10, %s877_s27), 63  ;;  %p936_p12 = pnand %p935_p11, %p1064_p5 }
  0x16   : > { %s889_s6 = sshll.u32 %s1432_s27, 4 }
  0x17   : > { %s1084_s9 = scalar_lea.vmem %s1420_s0, %s889_s6  ;;  %s1089_s12 = scalar_lea.vmem %s1421_s1, %s889_s6 }
  0x18   : > { %v227_v12 = vld [vmem:[%s1084_s9] sm:$0xff]  ;;  %v228_v14 = vld [vmem:[%s1084_s9 + $0x8] sm:$0xff]  ;;  %v229_v24 = vld [vmem:[%s1084_s9 + $0x10] sm:$0xff]  ;;  %p937_p13 = pneg %p936_p12  ;;  %s938_s6 = sshll.u32 %s998_s5, 4  ;;  %s939_s6 = int_to_ptr.vmem [resolvable:$false] %s938_s6 }
  0x19   : > { %v495_v13 = vld [vmem:[%s1089_s12] sm:$0xff]  ;;  %v259_v19 = vunpack.c.l.bf16 %v227_v12  ;;  %v260_v21 = vunpack.c.h.bf16 %v227_v12  ;;  %v496_v23 = vld [vmem:[%s1089_s12 + $0x8] sm:$0xff]  ;;  %v497_v25 = vld [vmem:[%s1089_s12 + $0x10] sm:$0xff]  ;;  %v261_v26 = vunpack.c.l.bf16 %v228_v14  ;;  %v262_v28 = vunpack.c.h.bf16 %v228_v14  ;;  %s940_s7 = scalar_lea.vmem %s939_s6, 16384  ;;  %p941_p0 = scmp.lt.s32.totalorder %s1373_s23, %s939_s6 }
  0x1a   : > { %v527_v20 = vunpack.c.l.bf16 %v495_v13  ;;  %v528_v22 = vunpack.c.h.bf16 %v495_v13  ;;  %v529_v27 = vunpack.c.l.bf16 %v496_v23  ;;  %v530_v29 = vunpack.c.h.bf16 %v496_v23  ;;  %v230_v30 = vld [vmem:[%s1084_s9 + $0x18] sm:$0xff]  ;;  %v231_v56 = vld [vmem:[%s1084_s9 + $0x20] sm:$0xff]  ;;  %v232_v2 = vld [vmem:[%s1084_s9 + $0x28] sm:$0xff]  ;;  %p942_p1 = scmp.lt.s32.totalorder %s940_s7, %s934_s30 }
  0x1b   : > { %v345_v31 = vmul.f32 %v1091_v8, %v259_v19  ;;  %v346_v32 = vmul.f32 %v1095_v10, %v260_v21  ;;  %v263_v33 = vunpack.c.l.bf16 %v229_v24  ;;  %v531_v34 = vunpack.c.l.bf16 %v497_v25  ;;  %v498_v35 = vld [vmem:[%s1089_s12 + $0x18] sm:$0xff]  ;;  %v499_v61 = vld [vmem:[%s1089_s12 + $0x20] sm:$0xff]  ;;  %v500_v7 = vld [vmem:[%s1089_s12 + $0x28] sm:$0xff] }
  0x1c   : > { %v347_v36 = vmul.f32 %v1102_v15, %v261_v26  ;;  %v348_v37 = vmul.f32 %v1106_v17, %v262_v28  ;;  %v264_v38 = vunpack.c.h.bf16 %v229_v24  ;;  %v532_v39 = vunpack.c.h.bf16 %v497_v25  ;;  %v501_v25 = vld [vmem:[%s1089_s12 + $0x30] sm:$0xff]  ;;  %p943_p2 = por %p942_p1, %p941_p0 }
  0x1d   : > { %v431_v40 = vadd.f32 %v1093_v9, %v345_v31  ;;  %v432_v41 = vadd.f32 %v1097_v11, %v346_v32  ;;  %v349_v42 = vmul.f32 %v1091_v8, %v263_v33  ;;  %v265_v43 = vunpack.c.l.bf16 %v230_v30 }
  0x1e   : > { %v433_v44 = vadd.f32 %v1104_v16, %v347_v36  ;;  %v434_v45 = vadd.f32 %v1108_v18, %v348_v37  ;;  %v350_v46 = vmul.f32 %v1095_v10, %v264_v38  ;;  %v533_v47 = vunpack.c.l.bf16 %v498_v35  ;;  %p944_p3 = pnand %p943_p2, %p937_p13 }
  0x1f   : > { %v591_v48 = vadd.f32 %v527_v20, %v431_v40  ;;  %v592_v49 = vadd.f32 %v528_v22, %v432_v41  ;;  %v435_v50 = vadd.f32 %v1093_v9, %v349_v42  ;;  %v351_v51 = vmul.f32 %v1102_v15, %v265_v43  ;;  %v233_v20 = vld [vmem:[%s1084_s9 + $0x30] sm:$0xff]  ;;  %v502_v43 = vld [vmem:[%s1089_s12 + $0x38] sm:$0xff] }
  0x20   : > { %v593_v52 = vadd.f32 %v529_v27, %v433_v44  ;;  %v594_v53 = vadd.f32 %v530_v29, %v434_v45  ;;  %v436_v54 = vadd.f32 %v1097_v11, %v350_v46  ;;  %v266_v55 = vunpack.c.h.bf16 %v230_v30 }
  0x21   : > { %v655_v57 = vmax.f32 %v591_v48, 0.0  ;;  %v656_v58 = vmax.f32 %v592_v49, 0.0  ;;  %v595_v59 = vadd.f32 %v531_v34, %v435_v50  ;;  %v437_v60 = vadd.f32 %v1104_v16, %v351_v51  ;;  %v234_v34 = vld [vmem:[%s1084_s9 + $0x38] sm:$0xff] }
  0x22   : > { %v657_v62 = vmax.f32 %v593_v52, 0.0  ;;  %v658_v63 = vmax.f32 %v594_v53, 0.0  ;;  %v596_v0 = vadd.f32 %v532_v39, %v436_v54  ;;  %v352_v1 = vmul.f32 %v1106_v17, %v266_v55  ;;  %v235_v52 = vld [vmem:[%s1084_s9 + $0x40] sm:$0xff] }
  0x23   : > { %719 = vst [vmem:[%s1136_s20] sm:$0xff] %v655_v57  ;;  %720 = vst [vmem:[%s1136_s20 + $0x8] sm:$0xff] %v656_v58  ;;  %v659_v3 = vmax.f32 %v595_v59, 0.0  ;;  %v597_v4 = vadd.f32 %v533_v47, %v437_v60  ;;  %v534_v5 = vunpack.c.h.bf16 %v498_v35  ;;  %v267_v6 = vunpack.c.l.bf16 %v231_v56  ;;  %v503_v57 = vld [vmem:[%s1089_s12 + $0x40] sm:$0xff] }
  0x24   : > { %721 = vst [vmem:[%s1136_s20 + $0x10] sm:$0xff] %v657_v62  ;;  %722 = vst [vmem:[%s1136_s20 + $0x18] sm:$0xff] %v658_v63  ;;  %v660_v12 = vmax.f32 %v596_v0, 0.0  ;;  %v438_v13 = vadd.f32 %v1108_v18, %v352_v1  ;;  %v535_v14 = vunpack.c.l.bf16 %v499_v61  ;;  %v268_v19 = vunpack.c.h.bf16 %v231_v56 }
  0x25   : > { %723 = vst [vmem:[%s1136_s20 + $0x20] sm:$0xff] %v659_v3  ;;  %v661_v21 = vmax.f32 %v597_v4, 0.0  ;;  %v353_v22 = vmul.f32 %v1091_v8, %v267_v6  ;;  %v536_v23 = vunpack.c.h.bf16 %v499_v61  ;;  %v269_v24 = vunpack.c.l.bf16 %v232_v2  ;;  %v504_v3 = vld [vmem:[%s1089_s12 + $0x48] sm:$0xff] }
  0x26   : > { %724 = vst [vmem:[%s1136_s20 + $0x28] sm:$0xff] %v660_v12  ;;  %v598_v26 = vadd.f32 %v534_v5, %v438_v13  ;;  %v354_v27 = vmul.f32 %v1095_v10, %v268_v19  ;;  %v537_v28 = vunpack.c.l.bf16 %v500_v7  ;;  %v270_v29 = vunpack.c.h.bf16 %v232_v2  ;;  %v236_v2 = vld [vmem:[%s1084_s9 + $0x48] sm:$0xff] }
  0x27   : > { %725 = vst [vmem:[%s1136_s20 + $0x30] sm:$0xff] %v661_v21  ;;  %v439_v30 = vadd.f32 %v1093_v9, %v353_v22  ;;  %v355_v31 = vmul.f32 %v1102_v15, %v269_v24  ;;  %v538_v32 = vunpack.c.h.bf16 %v500_v7  ;;  %v271_v33 = vunpack.c.l.bf16 %v233_v20 }
  0x28   : > { %v662_v35 = vmax.f32 %v598_v26, 0.0  ;;  %v440_v36 = vadd.f32 %v1097_v11, %v354_v27  ;;  %v356_v37 = vmul.f32 %v1106_v17, %v270_v29  ;;  %v539_v38 = vunpack.c.l.bf16 %v501_v25 }
  0x29   : > { %v599_v39 = vadd.f32 %v535_v14, %v439_v30  ;;  %v441_v40 = vadd.f32 %v1104_v16, %v355_v31  ;;  %v357_v41 = vmul.f32 %v1091_v8, %v271_v33  ;;  %v272_v42 = vunpack.c.h.bf16 %v233_v20  ;;  %v237_v20 = vld [vmem:[%s1084_s9 + $0x50] sm:$0xff] }
  0x2a   : > { %726 = vst [vmem:[%s1136_s20 + $0x38] sm:$0xff] %v662_v35  ;;  %v600_v44 = vadd.f32 %v536_v23, %v440_v36  ;;  %v442_v45 = vadd.f32 %v1108_v18, %v356_v37  ;;  %v540_v46 = vunpack.c.h.bf16 %v501_v25  ;;  %v273_v47 = vunpack.c.l.bf16 %v234_v34  ;;  %v505_v25 = vld [vmem:[%s1089_s12 + $0x50] sm:$0xff] }
  0x2b   : > { %v663_v48 = vmax.f32 %v599_v39, 0.0  ;;  %v601_v49 = vadd.f32 %v537_v28, %v441_v40  ;;  %v443_v50 = vadd.f32 %v1093_v9, %v357_v41  ;;  %v358_v51 = vmul.f32 %v1095_v10, %v272_v42 }
  0x2c   : > { %v664_v53 = vmax.f32 %v600_v44, 0.0  ;;  %v602_v54 = vadd.f32 %v538_v32, %v442_v45  ;;  %v359_v55 = vmul.f32 %v1102_v15, %v273_v47  ;;  %v541_v56 = vunpack.c.l.bf16 %v502_v43 }
  0x2d   : > { %727 = vst [vmem:[%s1136_s20 + $0x40] sm:$0xff] %v663_v48  ;;  %v665_v58 = vmax.f32 %v601_v49, 0.0  ;;  %v603_v59 = vadd.f32 %v539_v38, %v443_v50  ;;  %v444_v60 = vadd.f32 %v1097_v11, %v358_v51  ;;  %v274_v61 = vunpack.c.h.bf16 %v234_v34  ;;  %v238_v38 = vld [vmem:[%s1084_s9 + $0x58] sm:$0xff] }
  0x2e   : > { %728 = vst [vmem:[%s1136_s20 + $0x48] sm:$0xff] %v664_v53  ;;  %v666_v62 = vmax.f32 %v602_v54, 0.0  ;;  %v445_v63 = vadd.f32 %v1104_v16, %v359_v55  ;;  %v542_v0 = vunpack.c.h.bf16 %v502_v43  ;;  %v275_v1 = vunpack.c.l.bf16 %v235_v52  ;;  %v506_v43 = vld [vmem:[%s1089_s12 + $0x58] sm:$0xff] }
  0x2f   : > { %729 = vst [vmem:[%s1136_s20 + $0x50] sm:$0xff] %v665_v58  ;;  %v667_v4 = vmax.f32 %v603_v59, 0.0  ;;  %v604_v5 = vadd.f32 %v540_v46, %v444_v60  ;;  %v360_v6 = vmul.f32 %v1106_v17, %v274_v61  ;;  %v543_v7 = vunpack.c.l.bf16 %v503_v57 }
  0x30   : > { %730 = vst [vmem:[%s1136_s20 + $0x58] sm:$0xff] %v666_v62  ;;  %v605_v12 = vadd.f32 %v541_v56, %v445_v63  ;;  %v361_v13 = vmul.f32 %v1091_v8, %v275_v1  ;;  %v276_v14 = vunpack.c.h.bf16 %v235_v52  ;;  %v544_v19 = vunpack.c.h.bf16 %v503_v57  ;;  %v239_v52 = vld [vmem:[%s1084_s9 + $0x60] sm:$0xff] }
  0x31   : > { %731 = vst [vmem:[%s1136_s20 + $0x60] sm:$0xff] %v667_v4  ;;  %v668_v21 = vmax.f32 %v604_v5, 0.0  ;;  %v446_v22 = vadd.f32 %v1108_v18, %v360_v6  ;;  %v277_v23 = vunpack.c.l.bf16 %v236_v2  ;;  %v545_v24 = vunpack.c.l.bf16 %v504_v3  ;;  %v507_v57 = vld [vmem:[%s1089_s12 + $0x60] sm:$0xff] }
  0x32   : > { %v669_v26 = vmax.f32 %v605_v12, 0.0  ;;  %v447_v27 = vadd.f32 %v1093_v9, %v361_v13  ;;  %v362_v28 = vmul.f32 %v1095_v10, %v276_v14  ;;  %v278_v29 = vunpack.c.h.bf16 %v236_v2  ;;  %v240_v2 = vld [vmem:[%s1084_s9 + $0x68] sm:$0xff] }
  0x33   : > { %732 = vst [vmem:[%s1136_s20 + $0x68] sm:$0xff] %v668_v21  ;;  %v606_v30 = vadd.f32 %v542_v0, %v446_v22  ;;  %v363_v31 = vmul.f32 %v1102_v15, %v277_v23  ;;  %v546_v32 = vunpack.c.h.bf16 %v504_v3  ;;  %v279_v33 = vunpack.c.l.bf16 %v237_v20  ;;  %v508_v3 = vld [vmem:[%s1089_s12 + $0x68] sm:$0xff] }
  0x34   : > { %733 = vst [vmem:[%s1136_s20 + $0x70] sm:$0xff] %v669_v26  ;;  %v607_v34 = vadd.f32 %v543_v7, %v447_v27  ;;  %v448_v35 = vadd.f32 %v1097_v11, %v362_v28  ;;  %v364_v36 = vmul.f32 %v1106_v17, %v278_v29  ;;  %v547_v37 = vunpack.c.l.bf16 %v505_v25  ;;  %v509_v29 = vld [vmem:[%s1089_s12 + $0x70] sm:$0xff] }
  0x35   : > { %v670_v39 = vmax.f32 %v606_v30, 0.0  ;;  %v449_v40 = vadd.f32 %v1104_v16, %v363_v31  ;;  %v365_v41 = vmul.f32 %v1091_v8, %v279_v33  ;;  %v280_v42 = vunpack.c.h.bf16 %v237_v20  ;;  %v241_v20 = vld [vmem:[%s1084_s9 + $0x70] sm:$0xff] }
  0x36   : > { %v671_v44 = vmax.f32 %v607_v34, 0.0  ;;  %v608_v45 = vadd.f32 %v544_v19, %v448_v35  ;;  %v450_v46 = vadd.f32 %v1108_v18, %v364_v36  ;;  %v548_v47 = vunpack.c.h.bf16 %v505_v25 }
  0x37   : > { %734 = vst [vmem:[%s1136_s20 + $0x78] sm:$0xff] %v670_v39  ;;  %v609_v48 = vadd.f32 %v545_v24, %v449_v40  ;;  %v451_v49 = vadd.f32 %v1093_v9, %v365_v41  ;;  %v366_v50 = vmul.f32 %v1095_v10, %v280_v42  ;;  %v281_v51 = vunpack.c.l.bf16 %v238_v38 }
  0x38   : > { %735 = vst [vmem:[%s1136_s20 + $0x80] sm:$0xff] %v671_v44  ;;  %v672_v53 = vmax.f32 %v608_v45, 0.0  ;;  %v610_v54 = vadd.f32 %v546_v32, %v450_v46  ;;  %v549_v55 = vunpack.c.l.bf16 %v506_v43  ;;  %v282_v56 = vunpack.c.h.bf16 %v238_v38  ;;  %v242_v38 = vld [vmem:[%s1084_s9 + $0x78] sm:$0xff] }
  0x39   : > { %v673_v58 = vmax.f32 %v609_v48, 0.0  ;;  %v611_v59 = vadd.f32 %v547_v37, %v451_v49  ;;  %v452_v60 = vadd.f32 %v1097_v11, %v366_v50  ;;  %v367_v61 = vmul.f32 %v1102_v15, %v281_v51 }
  0x3a   : > { %736 = vst [vmem:[%s1136_s20 + $0x88] sm:$0xff] %v672_v53  ;;  %v674_v62 = vmax.f32 %v610_v54, 0.0  ;;  %v368_v63 = vmul.f32 %v1106_v17, %v282_v56  ;;  %v550_v0 = vunpack.c.h.bf16 %v506_v43  ;;  %v283_v1 = vunpack.c.l.bf16 %v239_v52  ;;  %v510_v43 = vld [vmem:[%s1089_s12 + $0x78] sm:$0xff] }
  0x3b   : > { %737 = vst [vmem:[%s1136_s20 + $0x90] sm:$0xff] %v673_v58  ;;  %v675_v4 = vmax.f32 %v611_v59, 0.0  ;;  %v612_v5 = vadd.f32 %v548_v47, %v452_v60  ;;  %v453_v6 = vadd.f32 %v1104_v16, %v367_v61  ;;  %v551_v7 = vunpack.c.l.bf16 %v507_v57 }
  0x3c   : > { %738 = vst [vmem:[%s1136_s20 + $0x98] sm:$0xff] %v674_v62  ;;  %v454_v12 = vadd.f32 %v1108_v18, %v368_v63  ;;  %v369_v13 = vmul.f32 %v1091_v8, %v283_v1  ;;  %v284_v14 = vunpack.c.h.bf16 %v239_v52  ;;  %v552_v19 = vunpack.c.h.bf16 %v507_v57  ;;  %v243_v52 = vld [vmem:[%s1084_s9 + $0x80] sm:$0xff] }
  0x3d   : > { %739 = vst [vmem:[%s1136_s20 + $0xa0] sm:$0xff] %v675_v4  ;;  %v676_v21 = vmax.f32 %v612_v5, 0.0  ;;  %v613_v22 = vadd.f32 %v549_v55, %v453_v6  ;;  %v285_v23 = vunpack.c.l.bf16 %v240_v2  ;;  %v553_v24 = vunpack.c.l.bf16 %v508_v3  ;;  %v511_v57 = vld [vmem:[%s1089_s12 + $0x80] sm:$0xff] }
  0x3e   : > { %v614_v25 = vadd.f32 %v550_v0, %v454_v12  ;;  %v455_v26 = vadd.f32 %v1093_v9, %v369_v13  ;;  %v370_v27 = vmul.f32 %v1095_v10, %v284_v14  ;;  %v286_v28 = vunpack.c.h.bf16 %v240_v2  ;;  %v244_v2 = vld [vmem:[%s1084_s9 + $0x88] sm:$0xff] }
  0x3f   : > { %740 = vst [vmem:[%s1136_s20 + $0xa8] sm:$0xff] %v676_v21  ;;  %v677_v30 = vmax.f32 %v613_v22, 0.0  ;;  %v371_v31 = vmul.f32 %v1102_v15, %v285_v23  ;;  %v554_v32 = vunpack.c.h.bf16 %v508_v3  ;;  %v287_v33 = vunpack.c.l.bf16 %v241_v20  ;;  %v512_v3 = vld [vmem:[%s1089_s12 + $0x88] sm:$0xff] }
  0x40   : > { %v678_v34 = vmax.f32 %v614_v25, 0.0  ;;  %v615_v35 = vadd.f32 %v551_v7, %v455_v26  ;;  %v456_v36 = vadd.f32 %v1097_v11, %v370_v27  ;;  %v372_v37 = vmul.f32 %v1106_v17, %v286_v28 }
  0x41   : > { %741 = vst [vmem:[%s1136_s20 + $0xb0] sm:$0xff] %v677_v30  ;;  %v457_v39 = vadd.f32 %v1104_v16, %v371_v31  ;;  %v373_v40 = vmul.f32 %v1091_v8, %v287_v33  ;;  %v555_v41 = vunpack.c.l.bf16 %v509_v29  ;;  %v288_v42 = vunpack.c.h.bf16 %v241_v20  ;;  %v245_v20 = vld [vmem:[%s1084_s9 + $0x90] sm:$0xff] }
  0x42   : > { %742 = vst [vmem:[%s1136_s20 + $0xb8] sm:$0xff] %v678_v34  ;;  %v679_v44 = vmax.f32 %v615_v35, 0.0  ;;  %v616_v45 = vadd.f32 %v552_v19, %v456_v36  ;;  %v458_v46 = vadd.f32 %v1108_v18, %v372_v37  ;;  %v556_v47 = vunpack.c.h.bf16 %v509_v29  ;;  %v513_v29 = vld [vmem:[%s1089_s12 + $0x90] sm:$0xff] }
  0x43   : > { %v617_v48 = vadd.f32 %v553_v24, %v457_v39  ;;  %v459_v49 = vadd.f32 %v1093_v9, %v373_v40  ;;  %v374_v50 = vmul.f32 %v1095_v10, %v288_v42  ;;  %v289_v51 = vunpack.c.l.bf16 %v242_v38 }
  0x44   : > { %743 = vst [vmem:[%s1136_s20 + $0xc0] sm:$0xff] %v679_v44  ;;  %v680_v53 = vmax.f32 %v616_v45, 0.0  ;;  %v618_v54 = vadd.f32 %v554_v32, %v458_v46  ;;  %v557_v55 = vunpack.c.l.bf16 %v510_v43  ;;  %v290_v56 = vunpack.c.h.bf16 %v242_v38  ;;  %v246_v38 = vld [vmem:[%s1084_s9 + $0x98] sm:$0xff] }
  0x45   : > { %v681_v58 = vmax.f32 %v617_v48, 0.0  ;;  %v619_v59 = vadd.f32 %v555_v41, %v459_v49  ;;  %v460_v60 = vadd.f32 %v1097_v11, %v374_v50  ;;  %v375_v61 = vmul.f32 %v1102_v15, %v289_v51 }
  0x46   : > { %744 = vst [vmem:[%s1136_s20 + $0xc8] sm:$0xff] %v680_v53  ;;  %v682_v62 = vmax.f32 %v618_v54, 0.0  ;;  %v376_v63 = vmul.f32 %v1106_v17, %v290_v56  ;;  %v558_v0 = vunpack.c.h.bf16 %v510_v43  ;;  %v291_v1 = vunpack.c.l.bf16 %v243_v52  ;;  %v514_v43 = vld [vmem:[%s1089_s12 + $0x98] sm:$0xff] }
  0x47   : > { %745 = vst [vmem:[%s1136_s20 + $0xd0] sm:$0xff] %v681_v58  ;;  %v683_v4 = vmax.f32 %v619_v59, 0.0  ;;  %v620_v5 = vadd.f32 %v556_v47, %v460_v60  ;;  %v461_v6 = vadd.f32 %v1104_v16, %v375_v61  ;;  %v559_v7 = vunpack.c.l.bf16 %v511_v57 }
  0x48   : > { %746 = vst [vmem:[%s1136_s20 + $0xd8] sm:$0xff] %v682_v62  ;;  %v462_v12 = vadd.f32 %v1108_v18, %v376_v63  ;;  %v377_v13 = vmul.f32 %v1091_v8, %v291_v1  ;;  %v292_v14 = vunpack.c.h.bf16 %v243_v52  ;;  %v560_v19 = vunpack.c.h.bf16 %v511_v57  ;;  %v247_v52 = vld [vmem:[%s1084_s9 + $0xa0] sm:$0xff] }
  0x49   : > { %747 = vst [vmem:[%s1136_s20 + $0xe0] sm:$0xff] %v683_v4  ;;  %v684_v21 = vmax.f32 %v620_v5, 0.0  ;;  %v621_v22 = vadd.f32 %v557_v55, %v461_v6  ;;  %v293_v23 = vunpack.c.l.bf16 %v244_v2  ;;  %v561_v24 = vunpack.c.l.bf16 %v512_v3  ;;  %v515_v57 = vld [vmem:[%s1089_s12 + $0xa0] sm:$0xff] }
  0x4a   : > { %v622_v25 = vadd.f32 %v558_v0, %v462_v12  ;;  %v463_v26 = vadd.f32 %v1093_v9, %v377_v13  ;;  %v378_v27 = vmul.f32 %v1095_v10, %v292_v14  ;;  %v294_v28 = vunpack.c.h.bf16 %v244_v2  ;;  %v248_v2 = vld [vmem:[%s1084_s9 + $0xa8] sm:$0xff] }
  0x4b   : > { %748 = vst [vmem:[%s1136_s20 + $0xe8] sm:$0xff] %v684_v21  ;;  %v685_v30 = vmax.f32 %v621_v22, 0.0  ;;  %v379_v31 = vmul.f32 %v1102_v15, %v293_v23  ;;  %v562_v32 = vunpack.c.h.bf16 %v512_v3  ;;  %v295_v33 = vunpack.c.l.bf16 %v245_v20  ;;  %v516_v3 = vld [vmem:[%s1089_s12 + $0xa8] sm:$0xff] }
  0x4c   : > { %v686_v34 = vmax.f32 %v622_v25, 0.0  ;;  %v623_v35 = vadd.f32 %v559_v7, %v463_v26  ;;  %v464_v36 = vadd.f32 %v1097_v11, %v378_v27  ;;  %v380_v37 = vmul.f32 %v1106_v17, %v294_v28 }
  0x4d   : > { %749 = vst [vmem:[%s1136_s20 + $0xf0] sm:$0xff] %v685_v30  ;;  %v465_v39 = vadd.f32 %v1104_v16, %v379_v31  ;;  %v381_v40 = vmul.f32 %v1091_v8, %v295_v33  ;;  %v563_v41 = vunpack.c.l.bf16 %v513_v29  ;;  %v296_v42 = vunpack.c.h.bf16 %v245_v20  ;;  %v249_v20 = vld [vmem:[%s1084_s9 + $0xb0] sm:$0xff] }
  0x4e   : > { %750 = vst [vmem:[%s1136_s20 + $0xf8] sm:$0xff] %v686_v34  ;;  %v687_v44 = vmax.f32 %v623_v35, 0.0  ;;  %v624_v45 = vadd.f32 %v560_v19, %v464_v36  ;;  %v466_v46 = vadd.f32 %v1108_v18, %v380_v37  ;;  %v564_v47 = vunpack.c.h.bf16 %v513_v29  ;;  %v517_v29 = vld [vmem:[%s1089_s12 + $0xb0] sm:$0xff] }
  0x4f   : > { %v625_v48 = vadd.f32 %v561_v24, %v465_v39  ;;  %v467_v49 = vadd.f32 %v1093_v9, %v381_v40  ;;  %v382_v50 = vmul.f32 %v1095_v10, %v296_v42  ;;  %v297_v51 = vunpack.c.l.bf16 %v246_v38 }
  0x50   : > { %751 = vst [vmem:[%s1136_s20 + $0x100] sm:$0xff] %v687_v44  ;;  %v688_v53 = vmax.f32 %v624_v45, 0.0  ;;  %v626_v54 = vadd.f32 %v562_v32, %v466_v46  ;;  %v565_v55 = vunpack.c.l.bf16 %v514_v43  ;;  %v298_v56 = vunpack.c.h.bf16 %v246_v38  ;;  %v250_v38 = vld [vmem:[%s1084_s9 + $0xb8] sm:$0xff] }
  0x51   : > { %v689_v58 = vmax.f32 %v625_v48, 0.0  ;;  %v627_v59 = vadd.f32 %v563_v41, %v467_v49  ;;  %v468_v60 = vadd.f32 %v1097_v11, %v382_v50  ;;  %v383_v61 = vmul.f32 %v1102_v15, %v297_v51 }
  0x52   : > { %752 = vst [vmem:[%s1136_s20 + $0x108] sm:$0xff] %v688_v53  ;;  %v690_v62 = vmax.f32 %v626_v54, 0.0  ;;  %v384_v63 = vmul.f32 %v1106_v17, %v298_v56  ;;  %v566_v0 = vunpack.c.h.bf16 %v514_v43  ;;  %v299_v1 = vunpack.c.l.bf16 %v247_v52  ;;  %v518_v43 = vld [vmem:[%s1089_s12 + $0xb8] sm:$0xff] }
  0x53   : > { %753 = vst [vmem:[%s1136_s20 + $0x110] sm:$0xff] %v689_v58  ;;  %v691_v4 = vmax.f32 %v627_v59, 0.0  ;;  %v628_v5 = vadd.f32 %v564_v47, %v468_v60  ;;  %v469_v6 = vadd.f32 %v1104_v16, %v383_v61  ;;  %v567_v7 = vunpack.c.l.bf16 %v515_v57 }
  0x54   : > { %754 = vst [vmem:[%s1136_s20 + $0x118] sm:$0xff] %v690_v62  ;;  %v470_v12 = vadd.f32 %v1108_v18, %v384_v63  ;;  %v385_v13 = vmul.f32 %v1091_v8, %v299_v1  ;;  %v300_v14 = vunpack.c.h.bf16 %v247_v52  ;;  %v568_v19 = vunpack.c.h.bf16 %v515_v57  ;;  %v251_v52 = vld [vmem:[%s1084_s9 + $0xc0] sm:$0xff] }
  0x55   : > { %755 = vst [vmem:[%s1136_s20 + $0x120] sm:$0xff] %v691_v4  ;;  %v692_v21 = vmax.f32 %v628_v5, 0.0  ;;  %v629_v22 = vadd.f32 %v565_v55, %v469_v6  ;;  %v301_v23 = vunpack.c.l.bf16 %v248_v2  ;;  %v569_v24 = vunpack.c.l.bf16 %v516_v3  ;;  %v519_v57 = vld [vmem:[%s1089_s12 + $0xc0] sm:$0xff] }
  0x56   : > { %v630_v25 = vadd.f32 %v566_v0, %v470_v12  ;;  %v471_v26 = vadd.f32 %v1093_v9, %v385_v13  ;;  %v386_v27 = vmul.f32 %v1095_v10, %v300_v14  ;;  %v302_v28 = vunpack.c.h.bf16 %v248_v2  ;;  %v252_v2 = vld [vmem:[%s1084_s9 + $0xc8] sm:$0xff] }
  0x57   : > { %756 = vst [vmem:[%s1136_s20 + $0x128] sm:$0xff] %v692_v21  ;;  %v693_v30 = vmax.f32 %v629_v22, 0.0  ;;  %v387_v31 = vmul.f32 %v1102_v15, %v301_v23  ;;  %v570_v32 = vunpack.c.h.bf16 %v516_v3  ;;  %v303_v33 = vunpack.c.l.bf16 %v249_v20  ;;  %v520_v3 = vld [vmem:[%s1089_s12 + $0xc8] sm:$0xff] }
  0x58   : > { %v694_v34 = vmax.f32 %v630_v25, 0.0  ;;  %v631_v35 = vadd.f32 %v567_v7, %v471_v26  ;;  %v472_v36 = vadd.f32 %v1097_v11, %v386_v27  ;;  %v388_v37 = vmul.f32 %v1106_v17, %v302_v28 }
  0x59   : > { %757 = vst [vmem:[%s1136_s20 + $0x130] sm:$0xff] %v693_v30  ;;  %v473_v39 = vadd.f32 %v1104_v16, %v387_v31  ;;  %v389_v40 = vmul.f32 %v1091_v8, %v303_v33  ;;  %v571_v41 = vunpack.c.l.bf16 %v517_v29  ;;  %v304_v42 = vunpack.c.h.bf16 %v249_v20  ;;  %v253_v20 = vld [vmem:[%s1084_s9 + $0xd0] sm:$0xff] }
  0x5a   : > { %758 = vst [vmem:[%s1136_s20 + $0x138] sm:$0xff] %v694_v34  ;;  %v695_v44 = vmax.f32 %v631_v35, 0.0  ;;  %v632_v45 = vadd.f32 %v568_v19, %v472_v36  ;;  %v474_v46 = vadd.f32 %v1108_v18, %v388_v37  ;;  %v572_v47 = vunpack.c.h.bf16 %v517_v29  ;;  %v521_v29 = vld [vmem:[%s1089_s12 + $0xd0] sm:$0xff] }
  0x5b   : > { %v633_v48 = vadd.f32 %v569_v24, %v473_v39  ;;  %v475_v49 = vadd.f32 %v1093_v9, %v389_v40  ;;  %v390_v50 = vmul.f32 %v1095_v10, %v304_v42  ;;  %v305_v51 = vunpack.c.l.bf16 %v250_v38 }
  0x5c   : > { %759 = vst [vmem:[%s1136_s20 + $0x140] sm:$0xff] %v695_v44  ;;  %v696_v53 = vmax.f32 %v632_v45, 0.0  ;;  %v634_v54 = vadd.f32 %v570_v32, %v474_v46  ;;  %v573_v55 = vunpack.c.l.bf16 %v518_v43  ;;  %v306_v56 = vunpack.c.h.bf16 %v250_v38  ;;  %v254_v38 = vld [vmem:[%s1084_s9 + $0xd8] sm:$0xff] }
  0x5d   : > { %v697_v58 = vmax.f32 %v633_v48, 0.0  ;;  %v635_v59 = vadd.f32 %v571_v41, %v475_v49  ;;  %v476_v60 = vadd.f32 %v1097_v11, %v390_v50  ;;  %v391_v61 = vmul.f32 %v1102_v15, %v305_v51 }
  0x5e   : > { %760 = vst [vmem:[%s1136_s20 + $0x148] sm:$0xff] %v696_v53  ;;  %v698_v62 = vmax.f32 %v634_v54, 0.0  ;;  %v392_v63 = vmul.f32 %v1106_v17, %v306_v56  ;;  %v574_v0 = vunpack.c.h.bf16 %v518_v43  ;;  %v307_v1 = vunpack.c.l.bf16 %v251_v52  ;;  %v522_v43 = vld [vmem:[%s1089_s12 + $0xd8] sm:$0xff] }
  0x5f   : > { %761 = vst [vmem:[%s1136_s20 + $0x150] sm:$0xff] %v697_v58  ;;  %v699_v4 = vmax.f32 %v635_v59, 0.0  ;;  %v636_v5 = vadd.f32 %v572_v47, %v476_v60  ;;  %v477_v6 = vadd.f32 %v1104_v16, %v391_v61  ;;  %v575_v7 = vunpack.c.l.bf16 %v519_v57 }
  0x60   : > { %762 = vst [vmem:[%s1136_s20 + $0x158] sm:$0xff] %v698_v62  ;;  %v478_v12 = vadd.f32 %v1108_v18, %v392_v63  ;;  %v393_v13 = vmul.f32 %v1091_v8, %v307_v1  ;;  %v308_v14 = vunpack.c.h.bf16 %v251_v52  ;;  %v576_v19 = vunpack.c.h.bf16 %v519_v57  ;;  %v255_v52 = vld [vmem:[%s1084_s9 + $0xe0] sm:$0xff] }
  0x61   : > { %763 = vst [vmem:[%s1136_s20 + $0x160] sm:$0xff] %v699_v4  ;;  %v700_v21 = vmax.f32 %v636_v5, 0.0  ;;  %v637_v22 = vadd.f32 %v573_v55, %v477_v6  ;;  %v309_v23 = vunpack.c.l.bf16 %v252_v2  ;;  %v577_v24 = vunpack.c.l.bf16 %v520_v3  ;;  %v523_v57 = vld [vmem:[%s1089_s12 + $0xe0] sm:$0xff] }
  0x62   : > { %v638_v25 = vadd.f32 %v574_v0, %v478_v12  ;;  %v479_v26 = vadd.f32 %v1093_v9, %v393_v13  ;;  %v394_v27 = vmul.f32 %v1095_v10, %v308_v14  ;;  %v310_v28 = vunpack.c.h.bf16 %v252_v2  ;;  %v256_v2 = vld [vmem:[%s1084_s9 + $0xe8] sm:$0xff] }
  0x63   : > { %764 = vst [vmem:[%s1136_s20 + $0x168] sm:$0xff] %v700_v21  ;;  %v701_v30 = vmax.f32 %v637_v22, 0.0  ;;  %v395_v31 = vmul.f32 %v1102_v15, %v309_v23  ;;  %v578_v32 = vunpack.c.h.bf16 %v520_v3  ;;  %v311_v33 = vunpack.c.l.bf16 %v253_v20  ;;  %v524_v3 = vld [vmem:[%s1089_s12 + $0xe8] sm:$0xff] }
  0x64   : > { %v702_v34 = vmax.f32 %v638_v25, 0.0  ;;  %v639_v35 = vadd.f32 %v575_v7, %v479_v26  ;;  %v480_v36 = vadd.f32 %v1097_v11, %v394_v27  ;;  %v396_v37 = vmul.f32 %v1106_v17, %v310_v28 }
  0x65   : > { %765 = vst [vmem:[%s1136_s20 + $0x170] sm:$0xff] %v701_v30  ;;  %v481_v39 = vadd.f32 %v1104_v16, %v395_v31  ;;  %v397_v40 = vmul.f32 %v1091_v8, %v311_v33  ;;  %v579_v41 = vunpack.c.l.bf16 %v521_v29  ;;  %v312_v42 = vunpack.c.h.bf16 %v253_v20  ;;  %v257_v20 = vld [vmem:[%s1084_s9 + $0xf0] sm:$0xff] }
  0x66   : > { %766 = vst [vmem:[%s1136_s20 + $0x178] sm:$0xff] %v702_v34  ;;  %v703_v44 = vmax.f32 %v639_v35, 0.0  ;;  %v640_v45 = vadd.f32 %v576_v19, %v480_v36  ;;  %v482_v46 = vadd.f32 %v1108_v18, %v396_v37  ;;  %v580_v47 = vunpack.c.h.bf16 %v521_v29  ;;  %v525_v29 = vld [vmem:[%s1089_s12 + $0xf0] sm:$0xff] }
  0x67   : > { %v641_v48 = vadd.f32 %v577_v24, %v481_v39  ;;  %v483_v49 = vadd.f32 %v1093_v9, %v397_v40  ;;  %v398_v50 = vmul.f32 %v1095_v10, %v312_v42  ;;  %v313_v51 = vunpack.c.l.bf16 %v254_v38 }
  0x68   : > { %767 = vst [vmem:[%s1136_s20 + $0x180] sm:$0xff] %v703_v44  ;;  %v704_v53 = vmax.f32 %v640_v45, 0.0  ;;  %v642_v54 = vadd.f32 %v578_v32, %v482_v46  ;;  %v581_v55 = vunpack.c.l.bf16 %v522_v43  ;;  %v314_v56 = vunpack.c.h.bf16 %v254_v38  ;;  %v258_v38 = vld [vmem:[%s1084_s9 + $0xf8] sm:$0xff] }
  0x69   : > { %v705_v58 = vmax.f32 %v641_v48, 0.0  ;;  %v643_v59 = vadd.f32 %v579_v41, %v483_v49  ;;  %v484_v60 = vadd.f32 %v1097_v11, %v398_v50  ;;  %v399_v61 = vmul.f32 %v1102_v15, %v313_v51 }
  0x6a   : > { %768 = vst [vmem:[%s1136_s20 + $0x188] sm:$0xff] %v704_v53  ;;  %v706_v62 = vmax.f32 %v642_v54, 0.0  ;;  %v400_v63 = vmul.f32 %v1106_v17, %v314_v56  ;;  %v582_v0 = vunpack.c.h.bf16 %v522_v43  ;;  %v315_v1 = vunpack.c.l.bf16 %v255_v52  ;;  %v526_v43 = vld [vmem:[%s1089_s12 + $0xf8] sm:$0xff] }
  0x6b   : > { %769 = vst [vmem:[%s1136_s20 + $0x190] sm:$0xff] %v705_v58  ;;  %v707_v4 = vmax.f32 %v643_v59, 0.0  ;;  %v644_v5 = vadd.f32 %v580_v47, %v484_v60  ;;  %v485_v6 = vadd.f32 %v1104_v16, %v399_v61  ;;  %v583_v7 = vunpack.c.l.bf16 %v523_v57 }
  0x6c   : > { %770 = vst [vmem:[%s1136_s20 + $0x198] sm:$0xff] %v706_v62  ;;  %v486_v12 = vadd.f32 %v1108_v18, %v400_v63  ;;  %v401_v13 = vmul.f32 %v1091_v8, %v315_v1  ;;  %v316_v14 = vunpack.c.h.bf16 %v255_v52  ;;  %v584_v19 = vunpack.c.h.bf16 %v523_v57 }
  0x6d   : > { %771 = vst [vmem:[%s1136_s20 + $0x1a0] sm:$0xff] %v707_v4  ;;  %v708_v21 = vmax.f32 %v644_v5, 0.0  ;;  %v645_v22 = vadd.f32 %v581_v55, %v485_v6  ;;  %v317_v23 = vunpack.c.l.bf16 %v256_v2  ;;  %v585_v24 = vunpack.c.l.bf16 %v524_v3 }
  0x6e   : > { %v646_v25 = vadd.f32 %v582_v0, %v486_v12  ;;  %v487_v26 = vadd.f32 %v1093_v9, %v401_v13  ;;  %v402_v27 = vmul.f32 %v1095_v10, %v316_v14  ;;  %v318_v28 = vunpack.c.h.bf16 %v256_v2 }
  0x6f   : > { %772 = vst [vmem:[%s1136_s20 + $0x1a8] sm:$0xff] %v708_v21  ;;  %v709_v30 = vmax.f32 %v645_v22, 0.0  ;;  %v403_v31 = vmul.f32 %v1102_v15, %v317_v23  ;;  %v586_v32 = vunpack.c.h.bf16 %v524_v3  ;;  %v319_v33 = vunpack.c.l.bf16 %v257_v20 }
  0x70   : > { %v710_v34 = vmax.f32 %v646_v25, 0.0  ;;  %v647_v35 = vadd.f32 %v583_v7, %v487_v26  ;;  %v488_v36 = vadd.f32 %v1097_v11, %v402_v27  ;;  %v404_v37 = vmul.f32 %v1106_v17, %v318_v28 }
  0x71   : > { %773 = vst [vmem:[%s1136_s20 + $0x1b0] sm:$0xff] %v709_v30  ;;  %v489_v39 = vadd.f32 %v1104_v16, %v403_v31  ;;  %v405_v40 = vmul.f32 %v1091_v8, %v319_v33  ;;  %v587_v41 = vunpack.c.l.bf16 %v525_v29  ;;  %v320_v42 = vunpack.c.h.bf16 %v257_v20 }
  0x72   : > { %774 = vst [vmem:[%s1136_s20 + $0x1b8] sm:$0xff] %v710_v34  ;;  %v711_v44 = vmax.f32 %v647_v35, 0.0  ;;  %v648_v45 = vadd.f32 %v584_v19, %v488_v36  ;;  %v490_v46 = vadd.f32 %v1108_v18, %v404_v37  ;;  %v588_v47 = vunpack.c.h.bf16 %v525_v29 }
  0x73   : > { %v649_v48 = vadd.f32 %v585_v24, %v489_v39  ;;  %v491_v49 = vadd.f32 %v1093_v9, %v405_v40  ;;  %v406_v50 = vmul.f32 %v1095_v10, %v320_v42  ;;  %v321_v51 = vunpack.c.l.bf16 %v258_v38 }
  0x74   : > { %775 = vst [vmem:[%s1136_s20 + $0x1c0] sm:$0xff] %v711_v44  ;;  %v712_v52 = vmax.f32 %v648_v45, 0.0  ;;  %v650_v8 = vadd.f32 %v586_v32, %v490_v46  ;;  %v589_v53 = vunpack.c.l.bf16 %v526_v43  ;;  %v322_v54 = vunpack.c.h.bf16 %v258_v38 }
  0x75   : > { %v713_v55 = vmax.f32 %v649_v48, 0.0  ;;  %v651_v56 = vadd.f32 %v587_v41, %v491_v49  ;;  %v492_v57 = vadd.f32 %v1097_v11, %v406_v50  ;;  %v407_v58 = vmul.f32 %v1102_v15, %v321_v51 }
  0x76   : > { %776 = vst [vmem:[%s1136_s20 + $0x1c8] sm:$0xff] %v712_v52  ;;  %v714_v9 = vmax.f32 %v650_v8, 0.0  ;;  %v408_v10 = vmul.f32 %v1106_v17, %v322_v54  ;;  %v590_v59 = vunpack.c.h.bf16 %v526_v43 }
  0x77   : > { %777 = vst [vmem:[%s1136_s20 + $0x1d0] sm:$0xff] %v713_v55  ;;  %v715_v60 = vmax.f32 %v651_v56, 0.0  ;;  %v652_v61 = vadd.f32 %v588_v47, %v492_v57  ;;  %v493_v62 = vadd.f32 %v1104_v16, %v407_v58 }
  0x78   : > { %778 = vst [vmem:[%s1136_s20 + $0x1d8] sm:$0xff] %v714_v9  ;;  %v494_v63 = vadd.f32 %v1108_v18, %v408_v10 }
  0x79   : > { %779 = vst [vmem:[%s1136_s20 + $0x1e0] sm:$0xff] %v715_v60  ;;  %v716_v11 = vmax.f32 %v652_v61, 0.0  ;;  %v653_v15 = vadd.f32 %v589_v53, %v493_v62 }
  0x7a   : > { %v654_v0 = vadd.f32 %v590_v59, %v494_v63 }
  0x7b   : > { %780 = vst [vmem:[%s1136_s20 + $0x1e8] sm:$0xff] %v716_v11  ;;  %v717_v17 = vmax.f32 %v653_v15, 0.0 }
  0x7c   : > { %v718_v16 = vmax.f32 %v654_v0, 0.0 }
  0x7d   : > { %781 = vst [vmem:[%s1136_s20 + $0x1f0] sm:$0xff] %v717_v17 }
  0x7e   : > { %782 = vst [vmem:[%s1136_s20 + $0x1f8] sm:$0xff] %v718_v16 }
  0x7f   : > { %947 = shalt.err (!%p944_p3)
}
  0x80   : > { %s948_s8 = scalar_lea.hbm %s1371_s29, 8192  ;;  %s952_s11 = scalar_lea.hbm %s1424_s4, 32768 }
  0x81   : > { %p949_p4 = scmp.ne.s32.totalorder %s1371_s29, %s948_s8  ;;  %p953_p9 = scmp.lt.u32.totalorder %s1371_s29, %s1424_s4 }
  0x82   : > { %p954_p10 = scmp.lt.u32.totalorder %s952_s11, %s948_s8  ;;  %p956_p12 = scmp.lt.u32.totalorder %s948_s8, %s1371_s29 }
  0x83   : > { %p950_p7 = pnand %p949_p4, %p1064_p5 }
  0x84   : > { %p955_p11 = por %p954_p10, %p953_p9 }
  0x85   : > { %p951_p8 = pneg %p950_p7 }
  0x86   : > { %p957_p13 = por %p956_p12, %p955_p11 }
  0x88   : > { %p958_p0 = pnand %p957_p13, %p951_p8 }
  0x8a   : > { %961 = shalt.err (!%p958_p0)
}
  0x8b   : > { %s999_s14 = smov 512   ;;  %s1000_s20 = smov 32  }
  0x8c   : > { %893 = dma.vmem_to_hbm [thread:$0]  (%p1064_p5), %s1373_s23, 8192, %s1371_s29, %s1379_s19, %s999_s14, %s999_s14, %s1000_s20  }
  0x8d PF: > { %p899_p1 = scmp.ge.s32.totalorder %s996_s18, 2  ;;  %s813_s22 = sand.u32 1, %s984_s15  }
  0x8e   : > { %s814_s27 = scalar_lea.sflag [#allocation3], %s813_s22 }
  0x8f   : > { %p896_p2 = pnand %p899_p1, %p1068_p6 }
  0x91   : > { %979 = dma.done.wait (!%p896_p2), %s814_s27, 8192  }
  0x92   : > { %981 = vsyncadd (!%p896_p2), %s814_s27, 4294959104  ;;  %p14_p3 = scmp.ge.s32.totalorder %s1051_s21, 6   ;;  %s1427_s15 = smov %s988_s16 }
  0x93   : > { %s1428_s16 = smov %s992_s17  ;;  %s1429_s17 = smov %s1062_s24 }
  0x94   : > { %s1430_s18 = smov %s1051_s21  ;;  %16 = sbr.rel (!%p14_p3) target bundleno = 3 (0x3), region = 74 }
  0x9b   :  { %819 = vsyncpa [#allocation3], 1 }
  0x9c   :  { %821 = vsyncpa [#allocation3 + $0x1], 1 }

// kernel: block_forward_nchw.5
= control target key start
LH: loop header
LB: loop body
LE: loop exit
PB: predicated region body
PF: predicated region fallthrough
CT: control target
= control target key end

     0   :  { %s6334_s21 = smov 0   ;;  %s8635_s0 = inlined_call_operand.vmem [shape: bf16[2,256,128], index: 0, kind: input, shape index: {}]   ;;  %s8636_s1 = inlined_call_operand.vmem [shape: f32[1,128], index: 1, kind: input, shape index: {}]   ;;  %s8637_s2 = inlined_call_operand.vmem [shape: f32[1,128], index: 2, kind: input, shape index: {}]   ;;  %s8638_s3 = inlined_call_operand.vmem [shape: bf16[9,128,128], index: 3, kind: input, shape index: {}]   ;;  %s8639_s4 = inlined_call_operand.vmem [shape: f32[256,8], index: 4, kind: input, shape index: {}]   ;;  %s8640_s5 = inlined_call_operand.vmem [shape: bf16[2,256,128], index: 5, kind: output, shape index: {0}]   ;;  %s8641_s6 = inlined_call_operand.vmem [shape: f32[2,2,128], index: 6, kind: output, shape index: {1}]  }
   0x1 LB: > { %s4703_s22 = sadd.s32 4294967295, %s6289_s21   ;;  %p4707_p0 = scmp.ge.s32.totalorder %s6289_s21, 1  ;;  %s6289_s21 = sphi %s6334_s21, %s17_s21  }
   0x2   : > { %p215_p1 = scmp.lt.s32.totalorder %s6289_s21, 3 }
   0x4   : > { %p216_p2 = pnand %p4707_p0, %p215_p1 }
   0x6   : > { %219 = sbr.rel (%p216_p2) target bundleno = 1052 (0x41c), region = 40 }
   0xd   : > { %v6345_v0 = vld [vmem:[%s8639_s4 + $0x10] sm:$0xff]  ;;  %v6350_v1 = vld [vmem:[%s8639_s4] sm:$0xff]  ;;  %p249_p3 = scmp.lt.s32.totalorder %s4703_s22, 1  ;;  %v6291_v2 = vmov 0   ;;  %v6357_v3 = vld [vmem:[%s8639_s4 + $0x18] sm:$0xff]  ;;  %v6292_v63 = vmov 1  }
   0xe   : > { %6094 = vset.pattern.permute.xlu1 %v6291_v2  ;;  %6093 = vset.pattern.permute.xlu0 %v6291_v2  ;;  %v6362_v4 = vld [vmem:[%s8639_s4 + $0x8] sm:$0xff]  ;;  %v6376_v6 = vld [vmem:[%s8639_s4 + $0x20] sm:$0xff]  ;;  %v6384_v7 = vld [vmem:[%s8639_s4 + $0x38] sm:$0xff]  ;;  %vm4614_vm2 = vcmask 1040384  }
   0xf   : > { %549 = vperm.xlu1 %6094, %v6345_v0   ;;  %539 = vperm.xlu0 %6093, %v6350_v1   ;;  %s9164_s22 = smov (!%p249_p3, %s4703_s22), 1  ;;  %v6371_v5 = vld [vmem:[%s8639_s4 + $0x28] sm:$0xff]  ;;  %v6389_v8 = vld [vmem:[%s8639_s4 + $0x30] sm:$0xff]  ;;  %v6409_v11 = vld [vmem:[%s8639_s4 + $0x40] sm:$0xff] }
  0x10   : > { %s4949_s11 = sshll.u32 %s9164_s22, 7  ;;  %v6404_v10 = vld [vmem:[%s8639_s4 + $0x48] sm:$0xff]  ;;  %v6414_v12 = vld [vmem:[%s8636_s1] ss:$0 sm:$0xff]  ;;  %v6433_v17 = vld [vmem:[%s8639_s4 + $0x58] sm:$0xff] }
  0x11   : > { %s6396_s18 = scalar_lea.vmem %s8635_s0, %s4949_s11  ;;  %v6422_v14 = vld [vmem:[%s8637_s2] ss:$0 sm:$0xff]  ;;  %v6438_v18 = vld [vmem:[%s8639_s4 + $0x50] sm:$0xff]  ;;  %v6445_v19 = vld [vmem:[%s8639_s4 + $0x68] sm:$0xff]  ;;  %s8418_s7 = scalar_lea.vmem %s8640_s5, %s4949_s11 }
  0x12   : > { %v6399_v9 = vld [vmem:[%s6396_s18 + $0x70] sm:$0xff]   ;;  %v6450_v20 = vld [vmem:[%s8639_s4 + $0x60] sm:$0xff]  ;;  %v6455_v21 = vld [vmem:[%s8639_s4 + $0x78] sm:$0xff]  ;;  %s4712_s11 = sshll.u32 %s9164_s22, 1 }
  0x13   : > { %554 = vperm.xlu1 %6094, %v6357_v3   ;;  %544 = vperm.xlu0 %6093, %v6362_v4   ;;  %v5042_v13 = vunpack.c.h.bf16 %v6399_v9  ;;  %v6462_v22 = vld [vmem:[%s8639_s4 + $0x70] sm:$0xff]  ;;  %v6469_v23 = vld [vmem:[%s8639_s4 + $0x88] sm:$0xff]  ;;  %v6474_v24 = vld [vmem:[%s8639_s4 + $0x80] sm:$0xff]  ;;  %v5041_v52 = vunpack.c.l.bf16 %v6399_v9  ;;  %s262_s10 = scalar_lea.vmem %s8641_s6, %s4712_s11 }
  0x14   : > { %v6481_v25 = vld [vmem:[%s8639_s4 + $0x98] sm:$0xff]  ;;  %v6486_v26 = vld [vmem:[%s8639_s4 + $0x90] sm:$0xff]  ;;  %v6491_v27 = vld [vmem:[%s8639_s4 + $0xa8] sm:$0xff] }
  0x15   : > { %v364_v15 = vmul.f32 %v5042_v13, %v6414_v12  ;;  %v6498_v28 = vld [vmem:[%s8639_s4 + $0xa0] sm:$0xff]  ;;  %v6508_v30 = vld [vmem:[%s8639_s4 + $0xb8] sm:$0xff]  ;;  %v6513_v31 = vld [vmem:[%s8639_s4 + $0xb0] sm:$0xff]  ;;  %v363_v56 = vmul.f32 %v5041_v52, %v6414_v12 }
  0x16   : > { %v6140_v29 = vld [vmem:[%s8638_s3 + $0x40] sm:$0xff]   ;;  %v6518_v32 = vld [vmem:[%s8639_s4 + $0xc8] sm:$0xff]  ;;  %v6535_v38 = vld [vmem:[%s8639_s4 + $0xd8] sm:$0xff] }
  0x17   : > { %564 = vperm.xlu1 %6094, %v6371_v5   ;;  %559 = vperm.xlu0 %6093, %v6376_v6   ;;  %v6426_v16 = vadd.f32 %v6422_v14, %v364_v15  ;;  %v6141_v33 = vld [vmem:[%s8638_s3 + $0x48] sm:$0xff]   ;;  %v5138_v34 = vld [vmem:[%s6396_s18 + $0x60] sm:$0xff]   ;;  %v6142_v39 = vld [vmem:[%s8638_s3 + $0x50] sm:$0xff]   ;;  %v6584_v58 = vadd.f32 %v6422_v14, %v363_v56 }
  0x18   : > { %5373 = vmatprep.subr.bf16.mxu1 %v6140_v29  ;;  %v5139_v35 = vld [vmem:[%s6396_s18 + $0x68] sm:$0xff]   ;;  %v6530_v36 = vld [vmem:[%s8639_s4 + $0xc0] sm:$0xff]  ;;  %v5033_v37 = vunpack.c.l.bf16 %v5138_v34  ;;  %v5034_v40 = vunpack.c.h.bf16 %v5138_v34  ;;  %v6545_v42 = vld [vmem:[%s8639_s4 + $0xd0] sm:$0xff] }
  0x19   : > { %5374 = vmatpush3.bf16.msra.mxu1 %v6140_v29  ;;  %v5037_v41 = vunpack.c.l.bf16 %v5139_v35  ;;  %v5038_v44 = vunpack.c.h.bf16 %v5139_v35  ;;  %v6143_v50 = vld [vmem:[%s8638_s3 + $0x58] sm:$0xff]   ;;  %v6572_v54 = vld [vmem:[%s8639_s4 + $0xe8] sm:$0xff]  ;;  %v6577_v55 = vld [vmem:[%s8639_s4 + $0xe0] sm:$0xff]  ;;  %v6293_v29 = vmov 2  }
  0x1a   : > { %5375 = vmatprep.subr.bf16.mxu1 %v6141_v33  ;;  %v359_v43 = vmul.f32 %v5033_v37, %v6414_v12  ;;  %v360_v45 = vmul.f32 %v5034_v40, %v6414_v12  ;;  %v6144_v57 = vld [vmem:[%s8638_s3 + $0x60] sm:$0xff]   ;;  %v6591_v59 = vld [vmem:[%s8639_s4 + $0xf8] sm:$0xff]  ;;  %v6596_v60 = vld [vmem:[%s8639_s4 + $0xf0] sm:$0xff] }
  0x1b   : > { %574 = vperm.xlu1 %6094, %v6384_v7   ;;  %569 = vperm.xlu0 %6093, %v6389_v8   ;;  %v361_v46 = vmul.f32 %v5037_v41, %v6414_v12  ;;  %v362_v48 = vmul.f32 %v5038_v44, %v6414_v12  ;;  %v6145_v61 = vld [vmem:[%s8638_s3 + $0x68] sm:$0xff]   ;;  %v6146_v62 = vld [vmem:[%s8638_s3 + $0x70] sm:$0xff]   ;;  %v6147_v2 = vld [vmem:[%s8638_s3 + $0x78] sm:$0xff]  }
  0x1c   : > { %v6551_v47 = vadd.f32 %v6422_v14, %v359_v43  ;;  %v6555_v49 = vadd.f32 %v6422_v14, %v360_v45  ;;  %v6632_v9 = vld [vmem:[%s8638_s3] sm:$0xff]  }
  0x1d   : > { %5376 = vmatpush3.bf16.msra.mxu1 %v6141_v33  ;;  %v6561_v51 = vadd.f32 %v6422_v14, %v361_v46  ;;  %v6567_v53 = vadd.f32 %v6422_v14, %v362_v48  ;;  %v6156_v43 = vld [vmem:[%s8638_s3 + $0x100] sm:$0xff]   ;;  %v6158_v46 = vld [vmem:[%s8638_s3 + $0x110] sm:$0xff]  }
  0x1e   : > { %5377 = vmatprep.subr.bf16.mxu1 %v6142_v39  ;;  %5565 = vmatprep.subr.bf16.mxu0 %v6156_v43  ;;  %v6160_v56 = vld [vmem:[%s8638_s3 + $0x120] sm:$0xff]  }
  0x1f   : > { %584 = vperm.xlu1 %6094, %v6404_v10   ;;  %579 = vperm.xlu0 %6093, %v6409_v11  }
  0x20   : > { %5566 = vmatpush3.bf16.msra.mxu0 %v6156_v43 }
  0x21   : > { %5378 = vmatpush3.bf16.msra.mxu1 %v6142_v39 }
  0x22   : > { %5379 = vmatprep.subr.bf16.mxu1 %v6143_v50 }
  0x23   : > { %594 = vperm.xlu1 %6094, %v6433_v17   ;;  %589 = vperm.xlu0 %6093, %v6438_v18  }
  0x25   : > { %5380 = vmatpush3.bf16.msra.mxu1 %v6143_v50  ;;  %v4984_v50 = vld [vmem:[%s6396_s18] sm:$0xff]  }
  0x26   : > { %5381 = vmatprep.subr.bf16.mxu1 %v6144_v57 }
  0x27   : > { %604 = vperm.xlu1 %6094, %v6445_v19   ;;  %599 = vperm.xlu0 %6093, %v6450_v20  }
  0x29   : > { %5382 = vmatpush3.bf16.msra.mxu1 %v6144_v57  ;;  %v4985_v57 = vunpack.c.l.bf16 %v4984_v50 }
  0x2a   : > { %5383 = vmatprep.subr.bf16.mxu1 %v6145_v61 }
  0x2b   : > { %614 = vperm.xlu1 %6094, %v6455_v21   ;;  %609 = vperm.xlu0 %6093, %v6462_v22  }
  0x2d   : > { %5384 = vmatpush3.bf16.msra.mxu1 %v6145_v61  ;;  %v4986_v61 = vunpack.c.h.bf16 %v4984_v50  ;;  %v5129_v50 = vld [vmem:[%s6396_s18 + $0x18] sm:$0xff]  }
  0x2e   : > { %5385 = vmatprep.subr.bf16.mxu1 %v6146_v62 }
  0x2f   : > { %624 = vperm.xlu1 %6094, %v6469_v23   ;;  %619 = vperm.xlu0 %6093, %v6474_v24  }
  0x31   : > { %5386 = vmatpush3.bf16.msra.mxu1 %v6146_v62 }
  0x32   : > { %5387 = vmatprep.subr.bf16.mxu1 %v6147_v2 }
  0x33   : > { %634 = vperm.xlu1 %6094, %v6481_v25   ;;  %629 = vperm.xlu0 %6093, %v6486_v26  }
  0x35   : > { %5388 = vmatpush3.bf16.msra.mxu1 %v6147_v2  ;;  %v6162_v2 = vld [vmem:[%s8638_s3 + $0x128] sm:$0xff]  }
  0x36   : > { %5421 = vmatprep.subr.bf16.mxu1 %v6632_v9 }
  0x37   : > { %644 = vperm.xlu1 %6094, %v6491_v27   ;;  %639 = vperm.xlu0 %6093, %v6498_v28  }
  0x3b   : > { %654 = vperm.xlu1 %6094, %v6508_v30   ;;  %649 = vperm.xlu0 %6093, %v6513_v31  }
  0x3f   : > { %664 = vperm.xlu1 %6094, %v6518_v32   ;;  %659 = vperm.xlu0 %6093, %v6530_v36  }
  0x43   : > { %674 = vperm.xlu1 %6094, %v6535_v38   ;;  %669 = vperm.xlu0 %6093, %v6545_v42  }
  0x47   : > { %684 = vperm.xlu1 %6094, %v6572_v54   ;;  %679 = vperm.xlu0 %6093, %v6577_v55  }
  0x4b   : > { %694 = vperm.xlu1 %6094, %v6591_v59   ;;  %689 = vperm.xlu0 %6093, %v6596_v60  }
  0x4f   : > { %6096 = vset.pattern.permute.xlu1 %v6292_v63  ;;  %6095 = vset.pattern.permute.xlu0 %v6292_v63 }
  0x50   : > { %766 = vperm.xlu1 %6096, %v6362_v4   ;;  %762 = vperm.xlu0 %6095, %v6350_v1  }
  0x54   : > { %770 = vperm.xlu1 %6096, %v6345_v0   ;;  %774 = vperm.xlu0 %6095, %v6357_v3  }
  0x58   : > { %778 = vperm.xlu1 %6096, %v6376_v6   ;;  %782 = vperm.xlu0 %6095, %v6371_v5  }
  0x5c   : > { %786 = vperm.xlu1 %6096, %v6389_v8   ;;  %790 = vperm.xlu0 %6095, %v6384_v7  }
  0x60   : > { %794 = vperm.xlu1 %6096, %v6409_v11   ;;  %798 = vperm.xlu0 %6095, %v6404_v10  }
  0x64   : > { %802 = vperm.xlu1 %6096, %v6438_v18   ;;  %806 = vperm.xlu0 %6095, %v6433_v17  }
  0x68   : > { %810 = vperm.xlu1 %6096, %v6450_v20   ;;  %814 = vperm.xlu0 %6095, %v6445_v19  }
  0x6c   : > { %818 = vperm.xlu1 %6096, %v6462_v22   ;;  %822 = vperm.xlu0 %6095, %v6455_v21  }
  0x70   : > { %826 = vperm.xlu1 %6096, %v6474_v24   ;;  %830 = vperm.xlu0 %6095, %v6469_v23  }
  0x74   : > { %834 = vperm.xlu1 %6096, %v6486_v26   ;;  %838 = vperm.xlu0 %6095, %v6481_v25  }
  0x78   : > { %842 = vperm.xlu1 %6096, %v6498_v28   ;;  %846 = vperm.xlu0 %6095, %v6491_v27  }
  0x7c   : > { %850 = vperm.xlu1 %6096, %v6513_v31   ;;  %854 = vperm.xlu0 %6095, %v6508_v30  }
  0x80   : > { %858 = vperm.xlu1 %6096, %v6530_v36   ;;  %862 = vperm.xlu0 %6095, %v6518_v32  }
  0x84   : > { %866 = vperm.xlu1 %6096, %v6545_v42   ;;  %870 = vperm.xlu0 %6095, %v6535_v38  }
  0x88   : > { %874 = vperm.xlu1 %6096, %v6577_v55   ;;  %878 = vperm.xlu0 %6095, %v6572_v54  }
  0x8c   : > { %882 = vperm.xlu1 %6096, %v6596_v60   ;;  %886 = vperm.xlu0 %6095, %v6591_v59  }
  0x8e   : > { %v6647_v13 = vpop.permute.xlu1 %549  ;;  %v6649_v15 = vpop.permute.xlu0 %539 }
  0x90   : > { %6097 = vset.pattern.permute.xlu1 %v6293_v29  ;;  %6098 = vset.pattern.permute.xlu0 %v6293_v29  ;;  %v335_v29 = vmul.f32 %v4985_v57, %v6414_v12 }
  0x91   : > { %1438 = vperm.xlu1 %6097, %v6350_v1   ;;  %1442 = vperm.xlu0 %6098, %v6362_v4  }
  0x92   : > { %v6653_v33 = vpop.permute.xlu1 %554  ;;  %v6655_v34 = vpop.permute.xlu0 %544 }
  0x95   : > { %1446 = vperm.xlu1 %6097, %v6345_v0   ;;  %1454 = vperm.xlu0 %6098, %v6376_v6  }
  0x96   : > { %v6659_v35 = vpop.permute.xlu1 %564  ;;  %v6661_v37 = vpop.permute.xlu0 %559 }
  0x99   : > { %1450 = vperm.xlu1 %6097, %v6357_v3   ;;  %1462 = vperm.xlu0 %6098, %v6389_v8  }
  0x9a   : > { %v6665_v39 = vpop.permute.xlu1 %574  ;;  %v6667_v1 = vpop.permute.xlu0 %569 }
  0x9d   : > { %1458 = vperm.xlu1 %6097, %v6371_v5   ;;  %1470 = vperm.xlu0 %6098, %v6409_v11  }
  0x9e   : > { %v6671_v40 = vpop.permute.xlu1 %584  ;;  %v6673_v0 = vpop.permute.xlu0 %579 }
  0xa1   : > { %1466 = vperm.xlu1 %6097, %v6384_v7   ;;  %1478 = vperm.xlu0 %6098, %v6438_v18   ;;  %v6157_v7 = vld [vmem:[%s8638_s3 + $0x108] sm:$0xff]  }
  0xa2   : > { %v6677_v41 = vpop.permute.xlu1 %594  ;;  %v6679_v3 = vpop.permute.xlu0 %589  ;;  %5567 = vmatprep.subr.bf16.mxu0 %v6157_v7 }
  0xa3   : > { %8827 = vst [vmem:[#allocation2_spill] sm:$0xff] %v6677_v41  ;;  %8828 = vst [vmem:[#allocation3_spill] sm:$0xff] %v6679_v3  ;;  %5568 = vmatpush3.bf16.msra.mxu0 %v6157_v7  ;;  %v5128_v7 = vld [vmem:[%s6396_s18 + $0x10] sm:$0xff]  }
  0xa4   : > { %5569 = vmatprep.subr.bf16.mxu0 %v6158_v46  ;;  %v4993_v57 = vunpack.c.l.bf16 %v5128_v7 }
  0xa5   : > { %1474 = vperm.xlu1 %6097, %v6404_v10   ;;  %1486 = vperm.xlu0 %6098, %v6450_v20  }
  0xa6   : > { %v6686_v5 = vpop.permute.xlu1 %604  ;;  %v6688_v44 = vpop.permute.xlu0 %599 }
  0xa7   : > { %8829 = vst [vmem:[#allocation4_spill] sm:$0xff] %v6686_v5  ;;  %8830 = vst [vmem:[#allocation5_spill] sm:$0xff] %v6688_v44  ;;  %5570 = vmatpush3.bf16.msra.mxu0 %v6158_v46 }
  0xa9   : > { %1482 = vperm.xlu1 %6097, %v6433_v17   ;;  %1494 = vperm.xlu0 %6098, %v6462_v22   ;;  %v6159_v22 = vld [vmem:[%s8638_s3 + $0x118] sm:$0xff]  }
  0xaa   : > { %v6695_v45 = vpop.permute.xlu1 %614  ;;  %v6697_v10 = vpop.permute.xlu0 %609  ;;  %5571 = vmatprep.subr.bf16.mxu0 %v6159_v22 }
  0xab   : > { %8831 = vst [vmem:[#allocation6_spill] sm:$0xff] %v6695_v45  ;;  %8832 = vst [vmem:[#allocation7_spill] sm:$0xff] %v6697_v10  ;;  %5572 = vmatpush3.bf16.msra.mxu0 %v6159_v22 }
  0xac   : > { %5573 = vmatprep.subr.bf16.mxu0 %v6160_v56 }
  0xad   : > { %1490 = vperm.xlu1 %6097, %v6445_v19   ;;  %1502 = vperm.xlu0 %6098, %v6474_v24   ;;  %v5127_v24 = vld [vmem:[%s6396_s18 + $0x8] sm:$0xff]  }
  0xae   : > { %v6704_v48 = vpop.permute.xlu1 %624  ;;  %v6706_v17 = vpop.permute.xlu0 %619 }
  0xaf   : > { %8833 = vst [vmem:[#allocation8_spill] sm:$0xff] %v6704_v48  ;;  %8834 = vst [vmem:[#allocation9_spill] sm:$0xff] %v6706_v17  ;;  %5574 = vmatpush3.bf16.msra.mxu0 %v6160_v56  ;;  %v5141_v56 = vld [vmem:[%s6396_s18 + $0x78] sm:$0xff]   ;;  %v8642_v17 = vmov 4  }
  0xb0   : > { %5575 = vmatprep.subr.bf16.mxu0 %v6162_v2 }
  0xb1   : > { %1498 = vperm.xlu1 %6097, %v6455_v21   ;;  %1510 = vperm.xlu0 %6098, %v6486_v26   ;;  %v4989_v21 = vunpack.c.l.bf16 %v5127_v24  ;;  %v4990_v26 = vunpack.c.h.bf16 %v5127_v24  ;;  %v6164_v24 = vld [vmem:[%s8638_s3 + $0x130] sm:$0xff]  }
  0xb2   : > { %v6714_v52 = vpop.permute.xlu1 %634  ;;  %v6716_v19 = vpop.permute.xlu0 %629 }
  0xb3   : > { %8835 = vst [vmem:[#allocation10_spill] sm:$0xff] %v6714_v52  ;;  %8836 = vst [vmem:[#allocation11_spill] sm:$0xff] %v6716_v19  ;;  %v338_v43 = vmul.f32 %v4990_v26, %v6414_v12  ;;  %5576 = vmatpush3.bf16.msra.mxu0 %v6162_v2  ;;  %v4997_v2 = vunpack.c.l.bf16 %v5129_v50 }
  0xb4   : > { %5577 = vmatprep.subr.bf16.mxu0 %v6164_v24 }
  0xb5   : > { %1506 = vperm.xlu1 %6097, %v6469_v23   ;;  %1518 = vperm.xlu0 %6098, %v6498_v28   ;;  %v336_v23 = vmul.f32 %v4986_v61, %v6414_v12  ;;  %v337_v28 = vmul.f32 %v4989_v21, %v6414_v12  ;;  %v4994_v61 = vunpack.c.h.bf16 %v5128_v7  ;;  %v377_v26 = vadd.f32 %v6422_v14, %v338_v43  ;;  %v5130_v7 = vld [vmem:[%s6396_s18 + $0x20] sm:$0xff]  }
  0xb6   : > { %v6724_v62 = vpop.permute.xlu1 %644  ;;  %v6726_v63 = vpop.permute.xlu0 %639  ;;  %v339_v43 = vmul.f32 %v4993_v57, %v6414_v12  ;;  %v5001_v57 = vunpack.c.l.bf16 %v5130_v7 }
  0xb7   : > { %8837 = vst [vmem:[#allocation12_spill] sm:$0xff] %v6724_v62  ;;  %8838 = vst [vmem:[#allocation13_spill] sm:$0xff] %v6726_v63  ;;  %v376_v21 = vadd.f32 %v6422_v14, %v337_v28  ;;  %5578 = vmatpush3.bf16.msra.mxu0 %v6164_v24 }
  0xb9   : > { %1514 = vperm.xlu1 %6097, %v6481_v25   ;;  %1526 = vperm.xlu0 %6098, %v6513_v31   ;;  %v374_v25 = vadd.f32 %v6422_v14, %v335_v29  ;;  %v375_v31 = vadd.f32 %v6422_v14, %v336_v23  ;;  %v5046_v29 = vunpack.c.h.bf16 %v5141_v56  ;;  %v5045_v23 = vunpack.c.l.bf16 %v5141_v56 }
  0xba   : > { %v6738_v46 = vpop.permute.xlu1 %654  ;;  %v6740_v22 = vpop.permute.xlu0 %649  ;;  %v6769_v24 = vmax.f32 %v376_v21, 0.0  ;;  %v6771_v56 = vmax.f32 %v377_v26, 0.0  ;;  %v5002_v21 = vunpack.c.h.bf16 %v5130_v7 }
  0xbb   : > { %8839 = vst [vmem:[#allocation14_spill] sm:$0xff] %v6738_v46  ;;  %8840 = vst [vmem:[#allocation15_spill] sm:$0xff] %v6740_v22  ;;  %v4998_v22 = vunpack.c.h.bf16 %v5129_v50  ;;  %v6763_v28 = vmax.f32 %v375_v31, 0.0  ;;  %v340_v50 = vmul.f32 %v4994_v61, %v6414_v12  ;;  %v365_v61 = vmul.f32 %v5045_v23, %v6414_v12 }
  0xbc   : > { %8845 = vst [vmem:[#allocation20_spill] sm:$0xff] %v6769_v24  ;;  %8846 = vst [vmem:[#allocation21_spill] sm:$0xff] %v6771_v56  ;;  %v2306_v26 = vpack.c.bf16 %v6771_v56, %v6769_v24  ;;  %v344_v52 = vmul.f32 %v5002_v21, %v6414_v12 }
  0xbd   : > { %1522 = vperm.xlu1 %6097, %v6491_v27   ;;  %1534 = vperm.xlu0 %6098, %v6530_v36   ;;  %v6166_v27 = vld [vmem:[%s8638_s3 + $0x138] sm:$0xff]   ;;  %v6761_v36 = vmax.f32 %v374_v25, 0.0  ;;  %8844 = vst [vmem:[#allocation19_spill] sm:$0xff] %v6763_v28  ;;  %v5131_v25 = vld [vmem:[%s6396_s18 + $0x28] sm:$0xff]  }
  0xbe   : > { %v6753_v46 = vpop.permute.xlu1 %664  ;;  %v6755_v63 = vpop.permute.xlu0 %659  ;;  %5579 = vmatprep.subr.bf16.mxu0 %v6166_v27 }
  0xbf   : > { %8841 = vst [vmem:[#allocation16_spill] sm:$0xff] %v6753_v46  ;;  %8842 = vst [vmem:[#allocation17_spill] sm:$0xff] %v6755_v63  ;;  %v341_v63 = vmul.f32 %v4997_v2, %v6414_v12  ;;  %v342_v46 = vmul.f32 %v4998_v22, %v6414_v12  ;;  %5580 = vmatpush3.bf16.msra.mxu0 %v6166_v27  ;;  %v378_v22 = vadd.f32 %v6422_v14, %v339_v43  ;;  %v502_v43 = vlaneseq }
  0xc0   : > { %8843 = vst [vmem:[#allocation18_spill] sm:$0xff] %v6761_v36  ;;  %v379_v2 = vadd.f32 %v6422_v14, %v340_v50  ;;  %v343_v50 = vmul.f32 %v5001_v57, %v6414_v12  ;;  %v6170_v57 = vld [vmem:[%s8638_s3 + $0x148] sm:$0xff]  }
  0xc1   : > { %1530 = vperm.xlu1 %6097, %v6508_v30   ;;  %1542 = vperm.xlu0 %6098, %v6545_v42   ;;  %v2305_v30 = vpack.c.bf16 %v6763_v28, %v6761_v36  ;;  %v366_v42 = vmul.f32 %v5046_v29, %v6414_v12  ;;  %v6168_v29 = vld [vmem:[%s8638_s3 + $0x140] sm:$0xff]   ;;  %v380_v23 = vadd.f32 %v6422_v14, %v341_v63  ;;  %v6803_v63 = vmax.f32 %v378_v22, 0.0 }
  0xc2   : > { %v6776_v62 = vpop.permute.xlu1 %674  ;;  %v6778_v31 = vpop.permute.xlu0 %669  ;;  %v381_v7 = vadd.f32 %v6422_v14, %v342_v46  ;;  %5613 = vmatprep.subr.bf16.mxu0 %v6168_v29  ;;  %v6805_v46 = vmax.f32 %v379_v2, 0.0  ;;  %v5133_v2 = vld [vmem:[%s6396_s18 + $0x38] sm:$0xff]  }
  0xc3   : > { %8847 = vst [vmem:[#allocation22_spill] sm:$0xff] %v6776_v62  ;;  %8848 = vst [vmem:[#allocation23_spill] sm:$0xff] %v6778_v31  ;;  %v5005_v62 = vunpack.c.l.bf16 %v5131_v25  ;;  %v5006_v31 = vunpack.c.h.bf16 %v5131_v25  ;;  %5581 = vmatprep.mubr.bf16.mxu0 %v2305_v30  ;;  %v404_v25 = vadd.f32 %v6422_v14, %v365_v61  ;;  %v6817_v61 = vmax.f32 %v380_v23, 0.0 }
  0xc4   : > { %5582 = vmatmul.mubr.bf16.vlgmr.msra.gmra.mrb[0].mxu0 %v2306_v26  ;;  %8851 = vst [vmem:[#allocation26_spill] sm:$0xff] %v6803_v63  ;;  %8852 = vst [vmem:[#allocation27_spill] sm:$0xff] %v6805_v46  ;;  %v6819_v21 = vmax.f32 %v381_v7, 0.0  ;;  %v5132_v26 = vld [vmem:[%s6396_s18 + $0x30] sm:$0xff]   ;;  %v383_v23 = vadd.f32 %v6422_v14, %v344_v52  ;;  %v5014_v7 = vunpack.c.h.bf16 %v5133_v2 }
  0xc5   : > { %1538 = vperm.xlu1 %6097, %v6518_v32   ;;  %1550 = vperm.xlu0 %6098, %v6577_v55   ;;  %v405_v32 = vadd.f32 %v6422_v14, %v366_v42  ;;  %v345_v30 = vmul.f32 %v5005_v62, %v6414_v12  ;;  %v6815_v42 = vmax.f32 %v6426_v16, 0.0  ;;  %8854 = vst [vmem:[#allocation29_spill] sm:$0xff] %v6817_v61  ;;  %v6832_v16 = vmax.f32 %v404_v25, 0.0  ;;  %v6172_v52 = vld [vmem:[%s8638_s3 + $0x150] sm:$0xff]  }
  0xc6   : > { %v6795_v27 = vpop.permute.xlu1 %684  ;;  %v6797_v19 = vpop.permute.xlu0 %679  ;;  %5614 = vmatpush3.bf16.msra.mxu0 %v6168_v29  ;;  %8855 = vst [vmem:[#allocation30_spill] sm:$0xff] %v6819_v21  ;;  %v2307_v29 = vpack.c.bf16 %v6805_v46, %v6803_v63 }
  0xc7   : > { %8849 = vst [vmem:[#allocation24_spill] sm:$0xff] %v6795_v27  ;;  %8850 = vst [vmem:[#allocation25_spill] sm:$0xff] %v6797_v19  ;;  %v346_v19 = vmul.f32 %v5006_v31, %v6414_v12  ;;  %v6826_v31 = vshrl.u32 %v502_v43, 7  ;;  %5615 = vmatprep.subr.bf16.mxu0 %v6170_v57  ;;  %v384_v43 = vadd.f32 %v6422_v14, %v345_v30  ;;  %v5010_v27 = vunpack.c.h.bf16 %v5132_v26 }
  0xc8   : > { %8853 = vst [vmem:[#allocation28_spill] sm:$0xff] %v6815_v42  ;;  %8858 = vst [vmem:[#allocation33_spill] sm:$0xff] %v6832_v16  ;;  %v6845_v25 = vmax.f32 %v405_v32, 0.0  ;;  %v8645_v30 = vrot.slane %v6832_v16, 1  ;;  %5585 = vmatprep.mubr.bf16.mxu0 %v2307_v29 }
  0xc9   : > { %1546 = vperm.xlu1 %6097, %v6535_v38   ;;  %1558 = vperm.xlu0 %6098, %v6596_v60   ;;  %v382_v38 = vadd.f32 %v6422_v14, %v343_v50  ;;  %v5009_v50 = vunpack.c.l.bf16 %v5132_v26  ;;  %vm1404_vm0 = vcmp.lt.s32.totalorder %v6826_v31, 7  ;;  %v6864_v29 = vmax.f32 %v384_v43, 0.0 }
  0xca   : > { %v6822_v22 = vpop.permute.xlu1 %694  ;;  %v6824_v62 = vpop.permute.xlu0 %689  ;;  %5616 = vmatpush3.bf16.msra.mxu0 %v6170_v57  ;;  %8859 = vst [vmem:[#allocation34_spill] sm:$0xff] %v6845_v25  ;;  %v5013_v57 = vunpack.c.l.bf16 %v5133_v2  ;;  %v8862_v2 = vrot.slane %v6815_v42, 1  ;;  %vm504_vm1 = vcmp.lt.s32.totalorder %v6826_v31, 1 }
  0xcb   : > { %8856 = vst [vmem:[#allocation31_spill] sm:$0xff] %v6822_v22  ;;  %8857 = vst [vmem:[#allocation32_spill] sm:$0xff] %v6824_v62  ;;  %v2308_v22 = vpack.c.bf16 %v6819_v21, %v6817_v61  ;;  %v385_v62 = vadd.f32 %v6422_v14, %v346_v19  ;;  %v6849_v19 = vmax.f32 %v382_v38, 0.0  ;;  %5617 = vmatprep.subr.bf16.mxu0 %v6172_v52 }
  0xcc   : > { %v6862_v38 = vsel %vm1404_vm0, %v8862_v2, %v8645_v30  ;;  %8864 = vst [vmem:[#allocation38_spill] sm:$0xff] %v6864_v29  ;;  %v350_v2 = vmul.f32 %v5014_v7, %v6414_v12  ;;  %v6176_v7 = vld [vmem:[%s8638_s3 + $0x160] sm:$0xff]  }
  0xcd   : > { %1554 = vperm.xlu1 %6097, %v6572_v54   ;;  %6101 = vset.pattern.permute.xlu0 %v8642_v17  ;;  %8860 = vst [vmem:[#allocation35_spill] sm:$0xff] %v6849_v19  ;;  %v6852_v17 = vmax.f32 %v383_v23, 0.0  ;;  %8863 = vst [vmem:[#allocation37_spill] sm:$0xff] %v6862_v38  ;;  %v6866_v10 = vmax.f32 %v385_v62, 0.0  ;;  %v348_v23 = vmul.f32 %v5010_v27, %v6414_v12  ;;  %v5136_v38 = vld [vmem:[%s6396_s18 + $0x50] sm:$0xff]  }
  0xce   : > { %2584 = vperm.xlu0 %6101, %v6362_v4   ;;  %5586 = vmatmul.mubr.bf16.gmra.mrb[4].mxu0 %v2308_v22  ;;  %v347_v22 = vmul.f32 %v5009_v50, %v6414_v12  ;;  %v5025_v45 = vunpack.c.l.bf16 %v5136_v38 }
  0xcf   : > { %v767_v26 = vpop.permute.xlu1 %766  ;;  %v763_v54 = vpop.permute.xlu0 %762  ;;  %8861 = vst [vmem:[#allocation36_spill] sm:$0xff] %v6852_v17  ;;  %5618 = vmatpush3.bf16.msra.mxu0 %v6172_v52  ;;  %8865 = vst [vmem:[#allocation39_spill] sm:$0xff] %v6866_v10  ;;  %v2309_v50 = vpack.c.bf16 %v6852_v17, %v6849_v19 }
  0xd0   : > { %v890_v32 = vmul.f32 %v767_v26, %v6845_v25  ;;  %v889_v48 = vmul.f32 %v763_v54, %v6832_v16  ;;  %v6174_v26 = vld [vmem:[%s8638_s3 + $0x158] sm:$0xff]   ;;  %v349_v54 = vmul.f32 %v5013_v57, %v6414_v12  ;;  %v2310_v57 = vpack.c.bf16 %v6866_v10, %v6864_v29 }
  0xd1   : > { %1562 = vperm.xlu1 %6097, %v6591_v59   ;;  %5619 = vmatprep.subr.bf16.mxu0 %v6174_v26  ;;  %v386_v12 = vadd.f32 %v6422_v14, %v347_v22 }
  0xd2   : > { %2596 = vperm.xlu0 %6101, %v6376_v6   ;;  %v921_v43 = vpack.c.bf16 %v890_v32, %v889_v48  ;;  %v387_v6 = vadd.f32 %v6422_v14, %v348_v23  ;;  %v8643_v48 = vmov 3   ;;  %5589 = vmatprep.mubr.bf16.mxu0 %v2309_v50  ;;  %v388_v32 = vadd.f32 %v6422_v14, %v349_v54  ;;  %v6149_v23 = vld [vmem:[%s8638_s3 + $0x8] sm:$0xff]  }
  0xd3   : > { %v771_v52 = vpop.permute.xlu1 %770  ;;  %v775_v62 = vpop.permute.xlu0 %774  ;;  %5620 = vmatpush3.bf16.msra.mxu0 %v6174_v26 }
  0xd4   : > { %v891_v27 = vmul.f32 %v771_v52, %v6761_v36  ;;  %v892_v59 = vmul.f32 %v775_v62, %v6763_v28  ;;  %5389 = vmatprep.mubr.bf16.mxu1 %v921_v43  ;;  %v389_v43 = vadd.f32 %v6422_v14, %v350_v2  ;;  %5621 = vmatprep.subr.bf16.mxu0 %v6176_v7  ;;  %v6898_v14 = vmax.f32 %v386_v12, 0.0 }
  0xd5   : > { %6099 = vset.pattern.permute.xlu1 %v8643_v48  ;;  %v6900_v54 = vmax.f32 %v387_v6, 0.0 }
  0xd6   : > { %v922_v26 = vpack.c.bf16 %v892_v59, %v891_v27  ;;  %1876 = vperm.xlu1 %6099, %v6362_v4   ;;  %2604 = vperm.xlu0 %6101, %v6389_v8   ;;  %8866 = vst [vmem:[#allocation40_spill] sm:$0xff] %v6898_v14  ;;  %v6177_v4 = vld [vmem:[%s8638_s3 + $0x168] sm:$0xff]   ;;  %v6906_v8 = vmax.f32 %v388_v32, 0.0  ;;  %v6908_v2 = vmax.f32 %v389_v43, 0.0  ;;  %v8870_v59 = vmov 4  }
  0xd7   : > { %v779_v22 = vpop.permute.xlu1 %778  ;;  %v783_v52 = vpop.permute.xlu0 %782  ;;  %5590 = vmatmul.mubr.bf16.gmra.mrb[8].mxu0 %v2310_v57  ;;  %8867 = vst [vmem:[#allocation41_spill] sm:$0xff] %v6900_v54  ;;  %v6150_v57 = vld [vmem:[%s8638_s3 + $0x10] sm:$0xff]  }
  0xd8   : > { %v893_v62 = vmul.f32 %v779_v22, %v6769_v24  ;;  %v894_v50 = vmul.f32 %v783_v52, %v6771_v56  ;;  %5390 = vmatmul.mubr.bf16.vlgmr.msra.gmra.mrb[0].mxu1 %v922_v26  ;;  %5622 = vmatpush3.bf16.msra.mxu0 %v6176_v7  ;;  %8868 = vst [vmem:[#allocation42_spill] sm:$0xff] %v6906_v8  ;;  %8869 = vst [vmem:[#allocation43_spill] sm:$0xff] %v6908_v2  ;;  %v6178_v26 = vld [vmem:[%s8638_s3 + $0x170] sm:$0xff]   ;;  %v6151_v52 = vld [vmem:[%s8638_s3 + $0x18] sm:$0xff]  }
  0xd9   : > { %5422 = vmatpush3.bf16.msra.mxu1 %v6632_v9  ;;  %v6918_v9 = vld [vmem:[%s8639_s4] sm:$0xff]  ;;  %v2311_v7 = vpack.c.bf16 %v6900_v54, %v6898_v14  ;;  %5623 = vmatprep.subr.bf16.mxu0 %v6177_v4  ;;  %v2312_v43 = vpack.c.bf16 %v6908_v2, %v6906_v8 }
  0xda   : > { %v923_v27 = vpack.c.bf16 %v894_v50, %v893_v62  ;;  %6100 = vset.pattern.permute.xlu1 %v8870_v59  ;;  %2612 = vperm.xlu0 %6101, %v6409_v11   ;;  %v6937_v50 = vld [vmem:[%s8639_s4 + $0x10] sm:$0xff]  ;;  %v5134_v59 = vld [vmem:[%s6396_s18 + $0x40] sm:$0xff]  }
  0xdb   : > { %v787_v12 = vpop.permute.xlu1 %786  ;;  %2580 = vperm.xlu1 %6100, %v6918_v9   ;;  %v791_v6 = vpop.permute.xlu0 %790  ;;  %5423 = vmatprep.subr.bf16.mxu1 %v6149_v23  ;;  %8871 = vst [vmem:[#allocation44_spill] sm:$0xff] %v6937_v50 }
  0xdc   : > { %v895_v32 = vmul.f32 %v787_v12, %v6803_v63  ;;  %v896_v11 = vmul.f32 %v791_v6, %v6805_v46  ;;  %5393 = vmatprep.mubr.bf16.mxu1 %v923_v27  ;;  %5624 = vmatpush3.bf16.msra.mxu0 %v6177_v4  ;;  %v6152_v6 = vld [vmem:[%s8638_s3 + $0x20] sm:$0xff]  }
  0xdd   : > { %5424 = vmatpush3.bf16.msra.mxu1 %v6149_v23  ;;  %5593 = vmatprep.mubr.bf16.mxu0 %v2311_v7 }
  0xde   : > { %v924_v22 = vpack.c.bf16 %v896_v11, %v895_v32  ;;  %2620 = vperm.xlu0 %6101, %v6438_v18   ;;  %5425 = vmatprep.subr.bf16.mxu1 %v6150_v57  ;;  %v6179_v18 = vld [vmem:[%s8638_s3 + $0x178] sm:$0xff]  }
  0xdf   : > { %v795_v62 = vpop.permute.xlu1 %794  ;;  %2588 = vperm.xlu1 %6100, %v6937_v50   ;;  %v799_v23 = vpop.permute.xlu0 %798  ;;  %5594 = vmatmul.mubr.bf16.gmra.mrb[12].mxu0 %v2312_v43  ;;  %v5026_v50 = vunpack.c.h.bf16 %v5136_v38  ;;  %v7019_v38 = vld [vmem:[%s8639_s4 + $0x48] sm:$0xff] }
  0xe0   : > { %v897_v4 = vmul.f32 %v795_v62, %v6817_v61  ;;  %v898_v27 = vmul.f32 %v799_v23, %v6819_v21  ;;  %5394 = vmatmul.mubr.bf16.gmra.mrb[4].mxu1 %v924_v22  ;;  %5625 = vmatprep.subr.bf16.mxu0 %v6178_v26  ;;  %v5135_v22 = vld [vmem:[%s6396_s18 + $0x48] sm:$0xff]   ;;  %v5018_v62 = vunpack.c.h.bf16 %v5134_v59  ;;  %8878 = vst [vmem:[#allocation51_spill] sm:$0xff] %v7019_v38 }
  0xe1   : > { %5426 = vmatpush3.bf16.msra.mxu1 %v6150_v57  ;;  %v6953_v57 = vld [vmem:[%s8639_s4 + $0x18] sm:$0xff]  ;;  %5626 = vmatpush3.bf16.msra.mxu0 %v6178_v26  ;;  %v6153_v26 = vld [vmem:[%s8638_s3 + $0x28] sm:$0xff]   ;;  %v5022_v48 = vunpack.c.h.bf16 %v5135_v22 }
  0xe2   : > { %v925_v12 = vpack.c.bf16 %v898_v27, %v897_v4  ;;  %2628 = vperm.xlu0 %6101, %v6450_v20   ;;  %5427 = vmatprep.subr.bf16.mxu1 %v6151_v52  ;;  %8872 = vst [vmem:[#allocation45_spill] sm:$0xff] %v6953_v57  ;;  %v5017_v20 = vunpack.c.l.bf16 %v5134_v59  ;;  %v6962_v4 = vld [vmem:[%s8639_s4 + $0x70] sm:$0xff] }
  0xe3   : > { %v803_v7 = vpop.permute.xlu1 %802  ;;  %2592 = vperm.xlu1 %6100, %v6953_v57   ;;  %v807_v32 = vpop.permute.xlu0 %806  ;;  %5627 = vmatprep.subr.bf16.mxu0 %v6179_v18  ;;  %8873 = vst [vmem:[#allocation46_spill] sm:$0xff] %v6962_v4 }
  0xe4   : > { %v899_v11 = vmul.f32 %v803_v7, %v6849_v19  ;;  %v900_v43 = vmul.f32 %v807_v32, %v6852_v17  ;;  %5397 = vmatprep.mubr.bf16.mxu1 %v925_v12  ;;  %v5021_v12 = vunpack.c.l.bf16 %v5135_v22 }
  0xe5   : > { %5428 = vmatpush3.bf16.msra.mxu1 %v6151_v52  ;;  %v6971_v52 = vld [vmem:[%s8639_s4 + $0x28] sm:$0xff]  ;;  %5628 = vmatpush3.bf16.msra.mxu0 %v6179_v18  ;;  %v6987_v18 = vld [vmem:[%s8639_s4 + $0x80] sm:$0xff] }
  0xe6   : > { %v926_v23 = vpack.c.bf16 %v900_v43, %v899_v11  ;;  %2636 = vperm.xlu0 %6101, %v6962_v4   ;;  %5429 = vmatprep.subr.bf16.mxu1 %v6152_v6  ;;  %8874 = vst [vmem:[#allocation47_spill] sm:$0xff] %v6971_v52  ;;  %v6979_v11 = vld [vmem:[%s8636_s1] ss:$0 sm:$0xff]  ;;  %8875 = vst [vmem:[#allocation48_spill] sm:$0xff] %v6987_v18 }
  0xe7   : > { %v811_v27 = vpop.permute.xlu1 %810  ;;  %2600 = vperm.xlu1 %6100, %v6971_v52   ;;  %v815_v59 = vpop.permute.xlu0 %814  ;;  %v351_v43 = vmul.f32 %v6979_v11, %v5017_v20  ;;  %v352_v30 = vmul.f32 %v6979_v11, %v5018_v62  ;;  %v353_v22 = vmul.f32 %v6979_v11, %v5021_v12  ;;  %v7009_v12 = vld [vmem:[%s8639_s4 + $0x90] sm:$0xff] }
  0xe8   : > { %v901_v7 = vmul.f32 %v811_v27, %v6864_v29  ;;  %v902_v32 = vmul.f32 %v815_v59, %v6866_v10  ;;  %5398 = vmatmul.mubr.bf16.gmra.mrb[8].mxu1 %v926_v23  ;;  %v6154_v23 = vld [vmem:[%s8638_s3 + $0x30] sm:$0xff]   ;;  %8877 = vst [vmem:[#allocation50_spill] sm:$0xff] %v7009_v12 }
  0xe9   : > { %5430 = vmatpush3.bf16.msra.mxu1 %v6152_v6  ;;  %v6996_v6 = vld [vmem:[%s8639_s4 + $0x38] sm:$0xff] }
  0xea   : > { %v927_v4 = vpack.c.bf16 %v902_v32, %v901_v7  ;;  %2644 = vperm.xlu0 %6101, %v6987_v18   ;;  %5431 = vmatprep.subr.bf16.mxu1 %v6153_v26  ;;  %8876 = vst [vmem:[#allocation49_spill] sm:$0xff] %v6996_v6  ;;  %v6220_v7 = vld [vmem:[%s8637_s2] ss:$0 sm:$0xff]  ;;  %v354_v18 = vmul.f32 %v6979_v11, %v5022_v48 }
  0xeb   : > { %v819_v27 = vpop.permute.xlu1 %818  ;;  %2608 = vperm.xlu1 %6100, %v6996_v6   ;;  %v823_v20 = vpop.permute.xlu0 %822  ;;  %v390_v32 = vadd.f32 %v6220_v7, %v351_v43  ;;  %v391_v44 = vadd.f32 %v6220_v7, %v352_v30  ;;  %v5137_v43 = vld [vmem:[%s6396_s18 + $0x58] sm:$0xff]   ;;  %v392_v48 = vadd.f32 %v6220_v7, %v353_v22  ;;  %v7033_v22 = vld [vmem:[%s8639_s4 + $0xa0] sm:$0xff] }
  0xec   : > { %v903_v62 = vmul.f32 %v819_v27, %v6898_v14  ;;  %v904_v59 = vmul.f32 %v823_v20, %v6900_v54  ;;  %5401 = vmatprep.mubr.bf16.mxu1 %v927_v4  ;;  %v6155_v4 = vld [vmem:[%s8638_s3 + $0x38] sm:$0xff]   ;;  %v356_v54 = vmul.f32 %v6979_v11, %v5026_v50  ;;  %v5029_v3 = vunpack.c.l.bf16 %v5137_v43  ;;  %8880 = vst [vmem:[#allocation53_spill] sm:$0xff] %v7033_v22 }
  0xed   : > { %5432 = vmatpush3.bf16.msra.mxu1 %v6153_v26  ;;  %v7028_v14 = vmax.f32 %v391_v44, 0.0  ;;  %v5030_v41 = vunpack.c.h.bf16 %v5137_v43  ;;  %v7044_v44 = vld [vmem:[%s8639_s4 + $0x58] sm:$0xff] }
  0xee   : > { %v928_v5 = vpack.c.bf16 %v904_v59, %v903_v62  ;;  %2652 = vperm.xlu0 %6101, %v7009_v12   ;;  %5433 = vmatprep.subr.bf16.mxu1 %v6154_v23  ;;  %v7024_v62 = vmax.f32 %v390_v32, 0.0  ;;  %v393_v59 = vadd.f32 %v6220_v7, %v354_v18  ;;  %v355_v12 = vmul.f32 %v6979_v11, %v5025_v45 }
  0xef   : > { %v827_v27 = vpop.permute.xlu1 %826  ;;  %2616 = vperm.xlu1 %6100, %v7019_v38   ;;  %v831_v30 = vpop.permute.xlu0 %830  ;;  %8879 = vst [vmem:[#allocation52_spill] sm:$0xff] %v7028_v14  ;;  %8881 = vst [vmem:[#allocation54_spill] sm:$0xff] %v7044_v44  ;;  %v7049_v32 = vmax.f32 %v392_v48, 0.0 }
  0xf0   : > { %v905_v26 = vmul.f32 %v827_v27, %v6906_v8  ;;  %v906_v20 = vmul.f32 %v831_v30, %v6908_v2  ;;  %5402 = vmatmul.mubr.bf16.gmra.mrb[12].mxu1 %v928_v5  ;;  %v7039_v5 = vld [vmem:[%s8638_s3 + $0x80] sm:$0xff]   ;;  %v394_v43 = vadd.f32 %v6220_v7, %v355_v12  ;;  %v395_v27 = vadd.f32 %v6220_v7, %v356_v54  ;;  %v7058_v2 = vld [vmem:[%s8639_s4 + $0xb0] sm:$0xff]  ;;  %v7065_v54 = vld [vmem:[%s8639_s4 + $0x68] sm:$0xff] }
  0xf1   : > { %5434 = vmatpush3.bf16.msra.mxu1 %v6154_v23  ;;  %8882 = vst [vmem:[#allocation55_spill] sm:$0xff] %v7049_v32  ;;  %v7051_v30 = vmax.f32 %v393_v59, 0.0  ;;  %8884 = vst [vmem:[#allocation57_spill] sm:$0xff] %v7058_v2 }
  0xf2   : > { %v929_v10 = vpack.c.bf16 %v906_v20, %v905_v26  ;;  %2660 = vperm.xlu0 %6101, %v7033_v22   ;;  %5435 = vmatprep.subr.bf16.mxu1 %v6155_v4  ;;  %v357_v26 = vmul.f32 %v6979_v11, %v5029_v3  ;;  %v358_v20 = vmul.f32 %v6979_v11, %v5030_v41  ;;  %v7070_v12 = vmax.f32 %v394_v43, 0.0 }
  0xf3   : > { %v835_v45 = vpop.permute.xlu1 %834  ;;  %2624 = vperm.xlu1 %6100, %v7044_v44   ;;  %v839_v50 = vpop.permute.xlu0 %838  ;;  %8883 = vst [vmem:[#allocation56_spill] sm:$0xff] %v7051_v30  ;;  %8885 = vst [vmem:[#allocation58_spill] sm:$0xff] %v7065_v54 }
  0xf4   : > { %v907_v18 = vmul.f32 %v835_v45, %v7024_v62  ;;  %v908_v23 = vmul.f32 %v839_v50, %v7028_v14  ;;  %5405 = vmatprep.mubr.bf16.mxu1 %v929_v10  ;;  %v396_v48 = vadd.f32 %v6220_v7, %v357_v26  ;;  %v397_v59 = vadd.f32 %v6220_v7, %v358_v20  ;;  %v7077_v50 = vld [vmem:[%s8639_s4 + $0xc0] sm:$0xff] }
  0xf5   : > { %5436 = vmatpush3.bf16.msra.mxu1 %v6155_v4  ;;  %v7072_v4 = vmax.f32 %v395_v27, 0.0  ;;  %8886 = vst [vmem:[#allocation59_spill] sm:$0xff] %v7077_v50 }
  0xf6   : > { %v930_v22 = vpack.c.bf16 %v908_v23, %v907_v18  ;;  %2668 = vperm.xlu0 %6101, %v7058_v2   ;;  %5469 = vmatprep.subr.bf16.mxu1 %v7039_v5  ;;  %v7083_v23 = vld [vmem:[%s8639_s4 + $0x78] sm:$0xff]  ;;  %v7088_v27 = vmax.f32 %v396_v48, 0.0  ;;  %v7090_v26 = vmax.f32 %v397_v59, 0.0 }
  0xf7   : > { %v843_v10 = vpop.permute.xlu1 %842  ;;  %2632 = vperm.xlu1 %6100, %v7065_v54   ;;  %v847_v3 = vpop.permute.xlu0 %846  ;;  %8887 = vst [vmem:[#allocation60_spill] sm:$0xff] %v7083_v23 }
  0xf8   : > { %v909_v41 = vmul.f32 %v843_v10, %v7049_v32  ;;  %v910_v11 = vmul.f32 %v847_v3, %v7051_v30  ;;  %5406 = vmatmul.mubr.bf16.gmra.mrb[16].mxu1 %v930_v22  ;;  %8888 = vst [vmem:[#allocation61_spill] sm:$0xff] %v7088_v27  ;;  %8889 = vst [vmem:[#allocation62_spill] sm:$0xff] %v7090_v26  ;;  %v7095_v10 = vld [vmem:[%s8639_s4 + $0xd0] sm:$0xff] }
  0xf9   : > { %8890 = vst [vmem:[#allocation63_spill] sm:$0xff] %v7095_v10 }
  0xfa   : > { %v931_v45 = vpack.c.bf16 %v910_v11, %v909_v41  ;;  %2676 = vperm.xlu0 %6101, %v7077_v50   ;;  %v7101_v41 = vld [vmem:[%s8639_s4 + $0x88] sm:$0xff]  ;;  %v7157_v50 = vmax.f32 %v6584_v58, 0.0 }
  0xfb   : > { %v851_v18 = vpop.permute.xlu1 %850  ;;  %2640 = vperm.xlu1 %6100, %v7083_v23   ;;  %v855_v22 = vpop.permute.xlu0 %854  ;;  %8891 = vst [vmem:[#allocation64_spill] sm:$0xff] %v7101_v41 }
  0xfc   : > { %v911_v43 = vmul.f32 %v851_v18, %v7070_v12  ;;  %v912_v7 = vmul.f32 %v855_v22, %v7072_v4  ;;  %5409 = vmatprep.mubr.bf16.mxu1 %v931_v45  ;;  %v7107_v45 = vmax.f32 %v6551_v47, 0.0  ;;  %v7110_v18 = vmax.f32 %v6555_v49, 0.0  ;;  %8898 = vst [vmem:[#allocation71_spill] sm:$0xff] %v7157_v50 }
  0xfd   : > { %v501_v49 = vrot.slane %v6845_v25, 7 }
  0xfe   : > { %v932_v20 = vpack.c.bf16 %v912_v7, %v911_v43  ;;  %2684 = vperm.xlu0 %6101, %v7095_v10   ;;  %v500_v43 = vrot.slane %v6832_v16, 7  ;;  %v7117_v10 = vld [vmem:[%s8639_s4 + $0x98] sm:$0xff]  ;;  %v8669_v16 = vmov 5  }
  0xff   : > { %v859_v3 = vpop.permute.xlu1 %858  ;;  %2648 = vperm.xlu1 %6100, %v7101_v41   ;;  %v863_v11 = vpop.permute.xlu0 %862  ;;  %8892 = vst [vmem:[#allocation65_spill] sm:$0xff] %v7117_v10 }
 0x100   : > { %v913_v48 = vmul.f32 %v859_v3, %v7088_v27  ;;  %v914_v59 = vmul.f32 %v863_v11, %v7090_v26  ;;  %5410 = vmatmul.mubr.bf16.gmra.mrb[20].mxu1 %v932_v20  ;;  %v7126_v11 = vmax.f32 %v6561_v51, 0.0  ;;  %v7144_v51 = vld [vmem:[%s8639_s4 + $0xa8] sm:$0xff] }
 0x102   : > { %v933_v22 = vpack.c.bf16 %v914_v59, %v913_v48  ;;  %2692 = vperm.xlu0 %6101, %v6577_v55   ;;  %v8668_v55 = vrot.slane %v6815_v42, 7  ;;  %8893 = vst [vmem:[#allocation66_spill] sm:$0xff] %v7126_v11  ;;  %v7129_v48 = vmax.f32 %v6567_v53, 0.0 }
 0x103   : > { %v867_v7 = vpop.permute.xlu1 %866  ;;  %2656 = vperm.xlu1 %6100, %v7117_v10   ;;  %v871_v20 = vpop.permute.xlu0 %870 }
 0x104   : > { %v915_v47 = vmul.f32 %v867_v7, %v7107_v45  ;;  %v916_v3 = vmul.f32 %v871_v20, %v7110_v18  ;;  %5413 = vmatprep.mubr.bf16.mxu1 %v933_v22  ;;  %8894 = vst [vmem:[#allocation67_spill] sm:$0xff] %v7129_v48  ;;  %v7135_v7 = vld [vmem:[%s8638_s3 + $0x180] sm:$0xff]   ;;  %v7139_v22 = vsel %vm504_vm1, %v500_v43, %v501_v49 }
 0x105   : > { %8895 = vst [vmem:[#allocation68_spill] sm:$0xff] %v7135_v7  ;;  %8896 = vst [vmem:[#allocation69_spill] sm:$0xff] %v7139_v22  ;;  %5661 = vmatprep.subr.bf16.mxu0 %v7135_v7  ;;  %v7184_v7 = vld [vmem:[%s8639_s4 + $0xc8] sm:$0xff] }
 0x106   : > { %v934_v59 = vpack.c.bf16 %v916_v3, %v915_v47  ;;  %2700 = vperm.xlu0 %6101, %v6596_v60   ;;  %v7151_v60 = vsel %vm504_vm1, %v8668_v55, %v500_v43  ;;  %v471_v43 = vrot.slane %v6763_v28, 7 }
 0x107   : > { %v875_v20 = vpop.permute.xlu1 %874  ;;  %2664 = vperm.xlu1 %6100, %v7144_v51   ;;  %v879_v53 = vpop.permute.xlu0 %878  ;;  %8897 = vst [vmem:[#allocation70_spill] sm:$0xff] %v7151_v60  ;;  %v697_v25 = vmul.f32 %v6649_v15, %v7151_v60  ;;  %v473_v15 = vrot.slane %v6771_v56, 7 }
 0x108   : > { %v917_v47 = vmul.f32 %v875_v20, %v7126_v11  ;;  %v918_v3 = vmul.f32 %v879_v53, %v7129_v48  ;;  %5414 = vmatmul.mubr.bf16.gmra.mrb[24].mxu1 %v934_v59  ;;  %v698_v20 = vmul.f32 %v6655_v34, %v7139_v22  ;;  %v7168_v59 = vld [vmem:[%s8639_s4 + $0xb8] sm:$0xff]  ;;  %v472_v53 = vrot.slane %v6769_v24, 7 }
 0x109   : > { %8899 = vst [vmem:[#allocation72_spill] sm:$0xff] %v7168_v59  ;;  %v470_v34 = vrot.slane %v6761_v36, 7 }
 0x10a   : > { %v935_v2 = vpack.c.bf16 %v918_v3, %v917_v47  ;;  %6102 = vset.pattern.permute.xlu0 %v8669_v16  ;;  %v729_v22 = vpack.c.bf16 %v698_v20, %v697_v25 }
 0x10b   : > { %v883_v55 = vpop.permute.xlu1 %882  ;;  %2672 = vperm.xlu1 %6100, %v7168_v59   ;;  %3014 = vperm.xlu0 %6102, %v6918_v9   ;;  %v887_v58 = vpop.permute.xlu0 %886  ;;  %v7179_v60 = vsel %vm504_vm1, %v470_v34, %v471_v43  ;;  %v7202_v20 = vsel %vm504_vm1, %v501_v49, %v470_v34 }
 0x10c   : > { %v919_v47 = vmul.f32 %v883_v55, %v7157_v50  ;;  %v920_v3 = vmul.f32 %v887_v58, %v6815_v42  ;;  %5417 = vmatprep.mubr.bf16.mxu1 %v935_v2  ;;  %8900 = vst [vmem:[#allocation73_spill] sm:$0xff] %v7179_v60  ;;  %v7190_v2 = vsel %vm504_vm1, %v472_v53, %v473_v15  ;;  %8903 = vst [vmem:[#allocation76_spill] sm:$0xff] %v7202_v20 }
 0x10d   : > { %8901 = vst [vmem:[#allocation74_spill] sm:$0xff] %v7190_v2  ;;  %v7194_v55 = vsel %vm504_vm1, %v471_v43, %v472_v53  ;;  %v474_v53 = vrot.slane %v6803_v63, 7 }
 0x10e   : > { %v936_v16 = vpack.c.bf16 %v920_v3, %v919_v47  ;;  %8902 = vst [vmem:[#allocation75_spill] sm:$0xff] %v7194_v55  ;;  %v700_v47 = vmul.f32 %v6653_v33, %v7179_v60  ;;  %v702_v3 = vmul.f32 %v6659_v35, %v7190_v2  ;;  %v701_v43 = vmul.f32 %v6661_v37, %v7194_v55  ;;  %v6163_v60 = vld [vmem:[%s8638_s3 + $0x88] sm:$0xff]  }
 0x10f   : > { %2680 = vperm.xlu1 %6100, %v7184_v7   ;;  %3026 = vperm.xlu0 %6102, %v6953_v57   ;;  %v475_v57 = vrot.slane %v6805_v46, 7  ;;  %v699_v33 = vmul.f32 %v6647_v13, %v7202_v20  ;;  %v476_v35 = vrot.slane %v6817_v61, 7  ;;  %v477_v37 = vrot.slane %v6819_v21, 7  ;;  %v7241_v20 = vld [vmem:[%s8639_s4 + $0xe8] sm:$0xff] }
 0x110   : > { %v7196_v58 = vpop.permute.xlu1 %1438  ;;  %v7198_v25 = vpop.permute.xlu0 %1442  ;;  %5418 = vmatmul.mubr.bf16.gmra.mrb[28].mxu1 %v936_v16  ;;  %v7215_v16 = vld [vmem:[%s8639_s4 + $0xd8] sm:$0xff]  ;;  %v731_v2 = vpack.c.bf16 %v702_v3, %v701_v43  ;;  %v7236_v13 = vsel %vm504_vm1, %v473_v15, %v474_v53 }
 0x111   : > { %5437 = vmatprep.mubr.bf16.mxu1 %v729_v22  ;;  %8904 = vst [vmem:[#allocation77_spill] sm:$0xff] %v7215_v16  ;;  %v730_v34 = vpack.c.bf16 %v700_v47, %v699_v33  ;;  %v7232_v55 = vsel %vm504_vm1, %v474_v53, %v475_v57  ;;  %8906 = vst [vmem:[#allocation79_spill] sm:$0xff] %v7236_v13  ;;  %v7247_v47 = vsel %vm504_vm1, %v476_v35, %v477_v37 }
 0x112   : > { %8905 = vst [vmem:[#allocation78_spill] sm:$0xff] %v7232_v55  ;;  %8907 = vst [vmem:[#allocation80_spill] sm:$0xff] %v7247_v47  ;;  %v7251_v3 = vsel %vm504_vm1, %v475_v57, %v476_v35  ;;  %v704_v53 = vmul.f32 %v6665_v39, %v7232_v55  ;;  %v703_v33 = vmul.f32 %v6667_v1, %v7236_v13  ;;  %v6165_v57 = vld [vmem:[%s8638_s3 + $0x90] sm:$0xff]   ;;  %v7274_v39 = vld [vmem:[%s8639_s4 + $0xf8] sm:$0xff]  ;;  %v480_v1 = vrot.slane %v6864_v29, 7 }
 0x113   : > { %2688 = vperm.xlu1 %6100, %v7215_v16   ;;  %3034 = vperm.xlu0 %6102, %v6971_v52   ;;  %8908 = vst [vmem:[#allocation81_spill] sm:$0xff] %v7251_v3  ;;  %v706_v35 = vmul.f32 %v6671_v40, %v7247_v47  ;;  %8909 = vst [vmem:[#allocation82_spill] sm:$0xff] %v7274_v39  ;;  %v8910_v13 = vld [vmem:[#allocation39_spill] sm:$0xff]  ;;  %v6167_v55 = vld [vmem:[%s8638_s3 + $0x98] sm:$0xff]  }
 0x114   : > { %v7223_v49 = vpop.permute.xlu1 %1446  ;;  %v7225_v22 = vpop.permute.xlu0 %1454  ;;  %v481_v40 = vrot.slane %v8910_v13, 7  ;;  %v8914_v13 = vmov 5  }
 0x117   : > { %2696 = vperm.xlu1 %6100, %v7241_v20   ;;  %3042 = vperm.xlu0 %6102, %v6996_v6  }
 0x118   : > { %v7253_v43 = vpop.permute.xlu1 %1450  ;;  %5438 = vmatmul.mubr.bf16.vlgmr.msra.gmra.mrb[0].mxu1 %v730_v34  ;;  %v7255_v15 = vpop.permute.xlu0 %1462  ;;  %v705_v34 = vmul.f32 %v6673_v0, %v7251_v3  ;;  %v732_v3 = vpack.c.bf16 %v704_v53, %v703_v33  ;;  %v7308_v33 = vld [vmem:[%s8639_s4 + $0x8] sm:$0xff] }
 0x119   : > { %5441 = vmatprep.mubr.bf16.mxu1 %v731_v2  ;;  %5470 = vmatpush3.bf16.msra.mxu1 %v7039_v5  ;;  %v478_v2 = vrot.slane %v6849_v19, 7  ;;  %v479_v5 = vrot.slane %v6852_v17, 7  ;;  %8917 = vst [vmem:[#allocation88_spill] sm:$0xff] %v7308_v33 }
 0x11a   : > { %5471 = vmatprep.subr.bf16.mxu1 %v6163_v60  ;;  %v733_v6 = vpack.c.bf16 %v706_v35, %v705_v34  ;;  %v8920_v35 = vld [vmem:[#allocation2_spill] sm:$0xff] }
 0x11b   : > { %2704 = vperm.xlu1 %6100, %v7274_v39   ;;  %3050 = vperm.xlu0 %6102, %v7019_v38   ;;  %v7289_v52 = vsel %vm504_vm1, %v478_v2, %v479_v5  ;;  %v7293_v38 = vsel %vm504_vm1, %v477_v37, %v478_v2  ;;  %v7303_v53 = vsel %vm504_vm1, %v479_v5, %v480_v1  ;;  %v8921_v2 = vld [vmem:[#allocation3_spill] sm:$0xff] }
 0x11c   : > { %v7280_v47 = vpop.permute.xlu1 %1458  ;;  %v7282_v0 = vpop.permute.xlu0 %1470  ;;  %8912 = vst [vmem:[#allocation84_spill] sm:$0xff] %v7289_v52  ;;  %8913 = vst [vmem:[#allocation85_spill] sm:$0xff] %v7293_v38  ;;  %v708_v34 = vmul.f32 %v8920_v35, %v7289_v52  ;;  %v707_v5 = vmul.f32 %v8921_v2, %v7293_v38  ;;  %v484_v35 = vrot.slane %v6906_v8, 7  ;;  %v8926_v2 = vld [vmem:[#allocation43_spill] sm:$0xff]  ;;  %v8927_v52 = vld [vmem:[#allocation44_spill] sm:$0xff] }
 0x11d   : > { %8911 = vst [vmem:[#allocation83_spill] sm:$0xff] %v7282_v0  ;;  %5472 = vmatpush3.bf16.msra.mxu1 %v6163_v60  ;;  %v7299_v60 = vsel %vm504_vm1, %v480_v1, %v481_v40  ;;  %8916 = vst [vmem:[#allocation87_spill] sm:$0xff] %v7303_v53  ;;  %v6169_v1 = vld [vmem:[%s8638_s3 + $0xa0] sm:$0xff]   ;;  %v485_v38 = vrot.slane %v8926_v2, 7  ;;  %v8936_v2 = vld [vmem:[#allocation8_spill] sm:$0xff] }
 0x11e   : > { %5473 = vmatprep.subr.bf16.mxu1 %v6165_v57  ;;  %8915 = vst [vmem:[#allocation86_spill] sm:$0xff] %v7299_v60 }
 0x11f   : > { %6103 = vset.pattern.permute.xlu1 %v8914_v13  ;;  %3058 = vperm.xlu0 %6102, %v7044_v44   ;;  %v8922_v44 = vld [vmem:[#allocation4_spill] sm:$0xff] }
 0x120   : > { %3018 = vperm.xlu1 %6103, %v7308_v33   ;;  %v7311_v37 = vpop.permute.xlu1 %1466  ;;  %5442 = vmatmul.mubr.bf16.gmra.mrb[4].mxu1 %v732_v3  ;;  %v7313_v13 = vpop.permute.xlu0 %1478  ;;  %v710_v33 = vmul.f32 %v8922_v44, %v7299_v60  ;;  %v8923_v3 = vld [vmem:[#allocation5_spill] sm:$0xff]  ;;  %v734_v44 = vpack.c.bf16 %v708_v34, %v707_v5  ;;  %v8934_v5 = vld [vmem:[#allocation6_spill] sm:$0xff] }
 0x121   : > { %8918 = vst [vmem:[#allocation89_spill] sm:$0xff] %v7311_v37  ;;  %8919 = vst [vmem:[#allocation90_spill] sm:$0xff] %v7313_v13  ;;  %5445 = vmatprep.mubr.bf16.mxu1 %v733_v6  ;;  %5474 = vmatpush3.bf16.msra.mxu1 %v6165_v57  ;;  %v709_v29 = vmul.f32 %v8923_v3, %v7303_v53  ;;  %v8924_v13 = vld [vmem:[#allocation40_spill] sm:$0xff]  ;;  %v8925_v57 = vld [vmem:[#allocation41_spill] sm:$0xff] }
 0x122   : > { %5475 = vmatprep.subr.bf16.mxu1 %v6167_v55  ;;  %v482_v6 = vrot.slane %v8924_v13, 7  ;;  %v483_v0 = vrot.slane %v8925_v57, 7  ;;  %v6171_v3 = vld [vmem:[%s8638_s3 + $0xa8] sm:$0xff]  }
 0x123   : > { %3066 = vperm.xlu0 %6102, %v7065_v54   ;;  %v735_v53 = vpack.c.bf16 %v710_v33, %v709_v29  ;;  %v7359_v29 = vld [vmem:[%s8639_s4 + $0x20] sm:$0xff] }
 0x124   : > { %3022 = vperm.xlu1 %6103, %v8927_v52   ;;  %v7332_v17 = vpop.permute.xlu1 %1474  ;;  %v7334_v37 = vpop.permute.xlu0 %1486  ;;  %v7341_v60 = vsel %vm504_vm1, %v482_v6, %v483_v0  ;;  %v7345_v54 = vsel %vm504_vm1, %v481_v40, %v482_v6  ;;  %v7354_v34 = vsel %vm504_vm1, %v483_v0, %v484_v35  ;;  %8933 = vst [vmem:[#allocation91_spill] sm:$0xff] %v7359_v29  ;;  %v8935_v0 = vld [vmem:[#allocation7_spill] sm:$0xff] }
 0x125   : > { %8928 = vst [vmem:[#allocation2_spill] sm:$0xff] %v7334_v37  ;;  %5476 = vmatpush3.bf16.msra.mxu1 %v6167_v55  ;;  %8929 = vst [vmem:[#allocation3_spill] sm:$0xff] %v7341_v60  ;;  %v7350_v55 = vsel %vm504_vm1, %v484_v35, %v485_v38  ;;  %v712_v6 = vmul.f32 %v8934_v5, %v7341_v60  ;;  %v711_v35 = vmul.f32 %v8935_v0, %v7345_v54 }
 0x126   : > { %5477 = vmatprep.subr.bf16.mxu1 %v6169_v1  ;;  %8930 = vst [vmem:[#allocation4_spill] sm:$0xff] %v7345_v54  ;;  %8931 = vst [vmem:[#allocation5_spill] sm:$0xff] %v7350_v55  ;;  %v714_v37 = vmul.f32 %v8936_v2, %v7350_v55  ;;  %v488_v5 = vrot.slane %v7049_v32, 7  ;;  %v489_v0 = vrot.slane %v7051_v30, 7  ;;  %v7385_v54 = vld [vmem:[%s8639_s4 + $0x30] sm:$0xff]  ;;  %v6175_v55 = vld [vmem:[%s8638_s3 + $0xb8] sm:$0xff]  }
 0x127   : > { %3074 = vperm.xlu0 %6102, %v7083_v23   ;;  %8932 = vst [vmem:[#allocation44_spill] sm:$0xff] %v7354_v34  ;;  %v6173_v23 = vld [vmem:[%s8638_s3 + $0xb0] sm:$0xff]  }
 0x128   : > { %3030 = vperm.xlu1 %6103, %v7359_v29   ;;  %v7362_v33 = vpop.permute.xlu1 %1482  ;;  %5446 = vmatmul.mubr.bf16.gmra.mrb[8].mxu1 %v734_v44  ;;  %v7364_v40 = vpop.permute.xlu0 %1494  ;;  %v8937_v44 = vld [vmem:[#allocation9_spill] sm:$0xff] }
 0x129   : > { %5449 = vmatprep.mubr.bf16.mxu1 %v735_v53  ;;  %5478 = vmatpush3.bf16.msra.mxu1 %v6169_v1  ;;  %v713_v29 = vmul.f32 %v8937_v44, %v7354_v34  ;;  %v486_v53 = vrot.slane %v7024_v62, 7  ;;  %v487_v1 = vrot.slane %v7028_v14, 7  ;;  %v736_v34 = vpack.c.bf16 %v712_v6, %v711_v35  ;;  %v8944_v35 = vld [vmem:[#allocation10_spill] sm:$0xff] }
 0x12a   : > { %5479 = vmatprep.subr.bf16.mxu1 %v6171_v3  ;;  %v490_v14 = vrot.slane %v7070_v12, 7 }
 0x12b   : > { %3082 = vperm.xlu0 %6102, %v7101_v41   ;;  %v737_v60 = vpack.c.bf16 %v714_v37, %v713_v29  ;;  %v7397_v41 = vsel %vm504_vm1, %v486_v53, %v487_v1  ;;  %v7401_v30 = vsel %vm504_vm1, %v485_v38, %v486_v53  ;;  %v7410_v6 = vsel %vm504_vm1, %v487_v1, %v488_v5  ;;  %v7415_v37 = vld [vmem:[%s8639_s4 + $0x40] sm:$0xff]  ;;  %v8945_v1 = vld [vmem:[#allocation11_spill] sm:$0xff] }
 0x12c   : > { %3038 = vperm.xlu1 %6103, %v7385_v54   ;;  %v7388_v2 = vpop.permute.xlu1 %1490  ;;  %v7390_v44 = vpop.permute.xlu0 %1502  ;;  %8939 = vst [vmem:[#allocation7_spill] sm:$0xff] %v7397_v41  ;;  %8940 = vst [vmem:[#allocation8_spill] sm:$0xff] %v7401_v30  ;;  %v716_v53 = vmul.f32 %v8944_v35, %v7397_v41  ;;  %v7438_v35 = vld [vmem:[%s8639_s4 + $0x50] sm:$0xff] }
 0x12d   : > { %8938 = vst [vmem:[#allocation6_spill] sm:$0xff] %v7390_v44  ;;  %5480 = vmatpush3.bf16.msra.mxu1 %v6171_v3  ;;  %v7406_v3 = vsel %vm504_vm1, %v488_v5, %v489_v0  ;;  %8942 = vst [vmem:[#allocation92_spill] sm:$0xff] %v7410_v6  ;;  %v715_v5 = vmul.f32 %v8945_v1, %v7401_v30  ;;  %v8947_v44 = vld [vmem:[#allocation13_spill] sm:$0xff] }
 0x12e   : > { %5481 = vmatprep.subr.bf16.mxu1 %v6173_v23  ;;  %8941 = vst [vmem:[#allocation9_spill] sm:$0xff] %v7406_v3  ;;  %8943 = vst [vmem:[#allocation93_spill] sm:$0xff] %v7415_v37 }
 0x12f   : > { %3090 = vperm.xlu0 %6102, %v7117_v10   ;;  %v8946_v10 = vld [vmem:[#allocation12_spill] sm:$0xff]  ;;  %v738_v1 = vpack.c.bf16 %v716_v53, %v715_v5  ;;  %v8954_v53 = vld [vmem:[#allocation15_spill] sm:$0xff] }
 0x130   : > { %3046 = vperm.xlu1 %6103, %v7415_v37   ;;  %v7418_v29 = vpop.permute.xlu1 %1498  ;;  %5450 = vmatmul.mubr.bf16.gmra.mrb[12].mxu1 %v736_v34  ;;  %v7420_v38 = vpop.permute.xlu0 %1510  ;;  %v718_v32 = vmul.f32 %v8946_v10, %v7406_v3  ;;  %v717_v37 = vmul.f32 %v8947_v44, %v7410_v6  ;;  %v491_v34 = vrot.slane %v7072_v4, 7  ;;  %v7451_v3 = vsel %vm504_vm1, %v489_v0, %v490_v14  ;;  %v8953_v0 = vld [vmem:[#allocation14_spill] sm:$0xff] }
 0x131   : > { %5453 = vmatprep.mubr.bf16.mxu1 %v737_v60  ;;  %5482 = vmatpush3.bf16.msra.mxu1 %v6173_v23  ;;  %v492_v23 = vrot.slane %v7088_v27, 7  ;;  %v493_v60 = vrot.slane %v7090_v26, 7  ;;  %8950 = vst [vmem:[#allocation12_spill] sm:$0xff] %v7451_v3  ;;  %v719_v5 = vmul.f32 %v8954_v53, %v7451_v3  ;;  %v494_v27 = vrot.slane %v7107_v45, 7 }
 0x132   : > { %5483 = vmatprep.subr.bf16.mxu1 %v6175_v55  ;;  %v739_v6 = vpack.c.bf16 %v718_v32, %v717_v37  ;;  %v7465_v32 = vld [vmem:[%s8639_s4 + $0x60] sm:$0xff] }
 0x133   : > { %3098 = vperm.xlu0 %6102, %v7144_v51   ;;  %v7447_v51 = vsel %vm504_vm1, %v490_v14, %v491_v34  ;;  %v7456_v30 = vsel %vm504_vm1, %v492_v23, %v493_v60  ;;  %v7460_v41 = vsel %vm504_vm1, %v491_v34, %v492_v23  ;;  %v8955_v34 = vld [vmem:[#allocation16_spill] sm:$0xff] }
 0x134   : > { %3054 = vperm.xlu1 %6103, %v7438_v35   ;;  %v7441_v10 = vpop.permute.xlu1 %1506  ;;  %v7443_v44 = vpop.permute.xlu0 %1518  ;;  %8949 = vst [vmem:[#allocation11_spill] sm:$0xff] %v7447_v51  ;;  %8951 = vst [vmem:[#allocation13_spill] sm:$0xff] %v7456_v30  ;;  %v720_v37 = vmul.f32 %v8953_v0, %v7447_v51  ;;  %v722_v23 = vmul.f32 %v8955_v34, %v7456_v30  ;;  %v8957_v0 = vld [vmem:[#allocation46_spill] sm:$0xff] }
 0x135   : > { %8948 = vst [vmem:[#allocation10_spill] sm:$0xff] %v7443_v44  ;;  %5484 = vmatpush3.bf16.msra.mxu1 %v6175_v55  ;;  %8952 = vst [vmem:[#allocation94_spill] sm:$0xff] %v7460_v41  ;;  %v495_v44 = vrot.slane %v7110_v18, 7 }
 0x136   : > { %v740_v34 = vpack.c.bf16 %v720_v37, %v719_v5  ;;  %v8962_v37 = vld [vmem:[#allocation48_spill] sm:$0xff] }
 0x137   : > { %3106 = vperm.xlu0 %6102, %v7168_v59   ;;  %v8956_v59 = vld [vmem:[#allocation17_spill] sm:$0xff] }
 0x138   : > { %3062 = vperm.xlu1 %6103, %v7465_v32   ;;  %v7468_v55 = vpop.permute.xlu1 %1514  ;;  %5454 = vmatmul.mubr.bf16.gmra.mrb[16].mxu1 %v738_v1  ;;  %v7470_v14 = vpop.permute.xlu0 %1526  ;;  %v721_v26 = vmul.f32 %v8956_v59, %v7460_v41  ;;  %v497_v1 = vrot.slane %v7129_v48, 7  ;;  %v7492_v59 = vsel %vm504_vm1, %v494_v27, %v495_v44  ;;  %v7496_v41 = vsel %vm504_vm1, %v493_v60, %v494_v27  ;;  %v8964_v27 = vld [vmem:[#allocation22_spill] sm:$0xff] }
 0x139   : > { %5457 = vmatprep.mubr.bf16.mxu1 %v739_v6  ;;  %v496_v6 = vrot.slane %v7126_v11, 7  ;;  %8958 = vst [vmem:[#allocation14_spill] sm:$0xff] %v7492_v59  ;;  %8959 = vst [vmem:[#allocation15_spill] sm:$0xff] %v7496_v41  ;;  %v724_v60 = vmul.f32 %v8964_v27, %v7492_v59 }
 0x13a   : > { %v741_v30 = vpack.c.bf16 %v722_v23, %v721_v26  ;;  %v8965_v23 = vld [vmem:[#allocation23_spill] sm:$0xff] }
 0x13b   : > { %3114 = vperm.xlu0 %6102, %v7184_v7   ;;  %v7501_v7 = vsel %vm504_vm1, %v496_v6, %v497_v1  ;;  %v723_v3 = vmul.f32 %v8965_v23, %v7496_v41 }
 0x13c   : > { %3070 = vperm.xlu1 %6103, %v8957_v0   ;;  %v7486_v51 = vpop.permute.xlu1 %1522  ;;  %v7488_v53 = vpop.permute.xlu0 %1534  ;;  %8960 = vst [vmem:[#allocation16_spill] sm:$0xff] %v7501_v7  ;;  %v7505_v0 = vsel %vm504_vm1, %v495_v44, %v496_v6  ;;  %v8967_v44 = vld [vmem:[#allocation25_spill] sm:$0xff] }
 0x13d   : > { %8961 = vst [vmem:[#allocation17_spill] sm:$0xff] %v7505_v0  ;;  %v725_v6 = vmul.f32 %v8967_v44, %v7505_v0  ;;  %v742_v23 = vpack.c.bf16 %v724_v60, %v723_v3  ;;  %v8977_v3 = vld [vmem:[#allocation53_spill] sm:$0xff]  ;;  %v8980_v0 = vmov 3  }
 0x13f   : > { %3122 = vperm.xlu0 %6102, %v7215_v16   ;;  %v8966_v16 = vld [vmem:[#allocation24_spill] sm:$0xff] }
 0x140   : > { %3078 = vperm.xlu1 %6103, %v8962_v37   ;;  %v7508_v26 = vpop.permute.xlu1 %1530  ;;  %5458 = vmatmul.mubr.bf16.gmra.mrb[20].mxu1 %v740_v34  ;;  %v7510_v5 = vpop.permute.xlu0 %1542  ;;  %v726_v48 = vmul.f32 %v8966_v16, %v7501_v7  ;;  %v498_v37 = vrot.slane %v7157_v50, 7  ;;  %v8968_v34 = vld [vmem:[#allocation34_spill] sm:$0xff]  ;;  %v8970_v16 = vrot.slane %v6815_v42, 7  ;;  %v8981_v7 = vld [vmem:[#allocation57_spill] sm:$0xff] }
 0x141   : > { %8963 = vst [vmem:[#allocation46_spill] sm:$0xff] %v7510_v5  ;;  %5461 = vmatprep.mubr.bf16.mxu1 %v741_v30  ;;  %v1403_v11 = vrot.slane %v8968_v34, 1  ;;  %v1372_v30 = vrot.slane %v6761_v36, 1  ;;  %v8969_v5 = vld [vmem:[#allocation50_spill] sm:$0xff]  ;;  %v8973_v36 = vld [vmem:[#allocation33_spill] sm:$0xff] }
 0x142   : > { %v743_v41 = vpack.c.bf16 %v726_v48, %v725_v6  ;;  %v7533_v44 = vsel %vm504_vm1, %v498_v37, %v8970_v16  ;;  %v8979_v16 = vld [vmem:[#allocation32_spill] sm:$0xff] }
 0x143   : > { %3130 = vperm.xlu0 %6102, %v7241_v20   ;;  %8971 = vst [vmem:[#allocation48_spill] sm:$0xff] %v7533_v44  ;;  %v7537_v20 = vsel %vm504_vm1, %v497_v1, %v498_v37  ;;  %v7548_v48 = vsel %vm1404_vm0, %v1403_v11, %v1372_v30  ;;  %v8978_v1 = vld [vmem:[#allocation31_spill] sm:$0xff] }
 0x144   : > { %3086 = vperm.xlu1 %6103, %v8969_v5   ;;  %v7525_v27 = vpop.permute.xlu1 %1538  ;;  %v7527_v59 = vpop.permute.xlu0 %1550  ;;  %8972 = vst [vmem:[#allocation22_spill] sm:$0xff] %v7537_v20  ;;  %v8974_v5 = vrot.slane %v8973_v36, 1  ;;  %8976 = vst [vmem:[#allocation24_spill] sm:$0xff] %v7548_v48  ;;  %v728_v37 = vmul.f32 %v8978_v1, %v7533_v44  ;;  %v727_v36 = vmul.f32 %v8979_v16, %v7537_v20  ;;  %v1373_v16 = vrot.slane %v6763_v28, 1 }
 0x146   : > { %v7544_v34 = vsel %vm1404_vm0, %v8974_v5, %v1403_v11  ;;  %v1566_v11 = vmul.f32 %v7198_v25, %v7548_v48  ;;  %v744_v20 = vpack.c.bf16 %v728_v37, %v727_v36  ;;  %v7589_v36 = vsel %vm1404_vm0, %v1372_v30, %v1373_v16  ;;  %v8997_v48 = vld [vmem:[#allocation39_spill] sm:$0xff] }
 0x147   : > { %3138 = vperm.xlu0 %6102, %v7274_v39   ;;  %8975 = vst [vmem:[#allocation23_spill] sm:$0xff] %v7544_v34  ;;  %v1565_v5 = vmul.f32 %v7196_v58, %v7544_v34  ;;  %8986 = vst [vmem:[#allocation31_spill] sm:$0xff] %v7589_v36  ;;  %v1567_v30 = vmul.f32 %v7223_v49, %v7589_v36  ;;  %v1383_v34 = vrot.slane %v8997_v48, 1  ;;  %v8786_v39 = vmov 6  }
 0x148   : > { %3094 = vperm.xlu1 %6103, %v8977_v3   ;;  %v7551_v60 = vpop.permute.xlu1 %1546  ;;  %5462 = vmatmul.mubr.bf16.gmra.mrb[24].mxu1 %v742_v23  ;;  %v7553_v6 = vpop.permute.xlu0 %1558  ;;  %v1374_v3 = vrot.slane %v6769_v24, 1  ;;  %v1375_v23 = vrot.slane %v6771_v56, 1 }
 0x149   : > { %5465 = vmatprep.mubr.bf16.mxu1 %v743_v41  ;;  %v1376_v41 = vrot.slane %v6803_v63, 1  ;;  %v1597_v44 = vpack.c.bf16 %v1566_v11, %v1565_v5  ;;  %v8985_v63 = vld [vmem:[#allocation59_spill] sm:$0xff] }
 0x14a   : > { %v7574_v25 = vsel %vm1404_vm0, %v1373_v16, %v1374_v3  ;;  %v7578_v24 = vsel %vm1404_vm0, %v1374_v3, %v1375_v23  ;;  %v1378_v3 = vrot.slane %v6817_v61, 1  ;;  %v8987_v16 = vld [vmem:[#allocation63_spill] sm:$0xff] }
 0x14b   : > { %6104 = vset.pattern.permute.xlu0 %v8980_v0  ;;  %8982 = vst [vmem:[#allocation25_spill] sm:$0xff] %v7574_v25  ;;  %8983 = vst [vmem:[#allocation50_spill] sm:$0xff] %v7578_v24  ;;  %v1568_v5 = vmul.f32 %v7253_v43, %v7574_v25  ;;  %v1569_v11 = vmul.f32 %v7225_v22, %v7578_v24 }
 0x14c   : > { %3102 = vperm.xlu1 %6103, %v8981_v7   ;;  %v7568_v1 = vpop.permute.xlu1 %1554  ;;  %1872 = vperm.xlu0 %6104, %v6918_v9   ;;  %v7582_v7 = vsel %vm1404_vm0, %v1375_v23, %v1376_v41  ;;  %v1380_v23 = vrot.slane %v6849_v19, 1 }
 0x14d   : > { %v2585_v58 = vpop.permute.xlu0 %2584  ;;  %8984 = vst [vmem:[#allocation53_spill] sm:$0xff] %v7582_v7  ;;  %v1598_v22 = vpack.c.bf16 %v1568_v5, %v1567_v30  ;;  %v7631_v5 = vld [vmem:[%s8639_s4 + $0xe0] sm:$0xff]  ;;  %v8994_v30 = vld [vmem:[#allocation36_spill] sm:$0xff] }
 0x150   : > { %3110 = vperm.xlu1 %6103, %v8985_v63   ;;  %v7585_v56 = vpop.permute.xlu1 %1562  ;;  %5466 = vmatmul.mubr.bf16.gmra.mrb[28].mxu1 %v744_v20  ;;  %v1377_v63 = vrot.slane %v6805_v46, 1  ;;  %v1570_v20 = vmul.f32 %v7280_v47, %v7582_v7  ;;  %v8995_v46 = vld [vmem:[#allocation83_spill] sm:$0xff] }
 0x151   : > { %5485 = vmatprep.mubr.bf16.mxu1 %v1597_v44  ;;  %v7591_v37 = vpop.permute.xlu0 %2596  ;;  %1880 = vperm.xlu0 %6104, %v8927_v52   ;;  %v1379_v44 = vrot.slane %v6819_v21, 1 }
 0x152   : > { %v7614_v47 = vsel %vm1404_vm0, %v1376_v41, %v1377_v63  ;;  %v1599_v61 = vpack.c.bf16 %v1570_v20, %v1569_v11  ;;  %v7618_v49 = vsel %vm1404_vm0, %v1377_v63, %v1378_v3  ;;  %v2708_v41 = vmul.f32 %v2585_v58, %v7574_v25  ;;  %v8993_v20 = vld [vmem:[#allocation89_spill] sm:$0xff] }
 0x153   : > { %8989 = vst [vmem:[#allocation57_spill] sm:$0xff] %v7614_v47  ;;  %8990 = vst [vmem:[#allocation59_spill] sm:$0xff] %v7618_v49  ;;  %v7622_v19 = vsel %vm1404_vm0, %v1378_v3, %v1379_v44  ;;  %v1571_v63 = vmul.f32 %v7255_v15, %v7614_v47  ;;  %v1572_v3 = vmul.f32 %v8993_v20, %v7618_v49  ;;  %v1384_v15 = vrot.slane %v8924_v13, 1  ;;  %v7654_v20 = vld [vmem:[%s8639_s4 + $0xf0] sm:$0xff] }
 0x154   : > { %3118 = vperm.xlu1 %6103, %v8987_v16   ;;  %8991 = vst [vmem:[#allocation63_spill] sm:$0xff] %v7622_v19  ;;  %v7626_v16 = vsel %vm1404_vm0, %v1379_v44, %v1380_v23  ;;  %v1381_v44 = vrot.slane %v8994_v30, 1  ;;  %8998 = vst [vmem:[#allocation89_spill] sm:$0xff] %v7654_v20 }
 0x155   : > { %v7607_v43 = vpop.permute.xlu1 %1876  ;;  %v7609_v28 = vpop.permute.xlu0 %2604  ;;  %1896 = vperm.xlu0 %6104, %v7385_v54   ;;  %8992 = vst [vmem:[#allocation95_spill] sm:$0xff] %v7626_v16  ;;  %v1574_v58 = vmul.f32 %v7332_v17, %v7626_v16  ;;  %v1600_v17 = vpack.c.bf16 %v1572_v3, %v1571_v63 }
 0x156   : > { %8988 = vst [vmem:[#allocation32_spill] sm:$0xff] %v7607_v43  ;;  %v1573_v43 = vmul.f32 %v8995_v46, %v7622_v19 }
 0x158   : > { %3126 = vperm.xlu1 %6103, %v7631_v5   ;;  %5486 = vmatmul.mubr.bf16.vlgmr.msra.gmra.mrb[0].mxu1 %v1598_v22  ;;  %v1601_v13 = vpack.c.bf16 %v1574_v58, %v1573_v43  ;;  %v9004_v43 = vld [vmem:[#allocation90_spill] sm:$0xff]  ;;  %v9005_v58 = vld [vmem:[#allocation91_spill] sm:$0xff] }
 0x159   : > { %5489 = vmatprep.mubr.bf16.mxu1 %v1599_v61  ;;  %v7635_v11 = vpop.permute.xlu0 %2612  ;;  %1912 = vperm.xlu0 %6104, %v7438_v35   ;;  %v8996_v61 = vld [vmem:[#allocation38_spill] sm:$0xff] }
 0x15a   : > { %v2581_v21 = vpop.permute.xlu1 %2580  ;;  %v1382_v22 = vrot.slane %v8996_v61, 1 }
 0x15b   : > { %v2707_v25 = vmul.f32 %v2581_v21, %v7589_v36  ;;  %v8999_v21 = vld [vmem:[#allocation88_spill] sm:$0xff]  ;;  %v7663_v36 = vsel %vm1404_vm0, %v1380_v23, %v1381_v44 }
 0x15c   : > { %3134 = vperm.xlu1 %6103, %v7654_v20   ;;  %9000 = vst [vmem:[#allocation83_spill] sm:$0xff] %v7663_v36  ;;  %v7667_v48 = vsel %vm1404_vm0, %v1381_v44, %v1382_v22  ;;  %v1575_v63 = vmul.f32 %v9004_v43, %v7663_v36  ;;  %v1386_v44 = vrot.slane %v6906_v8, 1  ;;  %v9007_v43 = vld [vmem:[#allocation43_spill] sm:$0xff]  ;;  %v2711_v8 = vmul.f32 %v7591_v37, %v7614_v47 }
 0x15d   : > { %v2739_v30 = vpack.c.bf16 %v2708_v41, %v2707_v25  ;;  %v7657_v46 = vpop.permute.xlu0 %2620  ;;  %6114 = vset.pattern.permute.xlu0 %v8786_v39  ;;  %9001 = vst [vmem:[#allocation88_spill] sm:$0xff] %v7667_v48  ;;  %v7671_v25 = vsel %vm1404_vm0, %v1382_v22, %v1383_v34  ;;  %v7675_v41 = vsel %vm1404_vm0, %v1383_v34, %v1384_v15  ;;  %v9006_v22 = vld [vmem:[#allocation2_spill] sm:$0xff] }
 0x15e   : > { %v2589_v61 = vpop.permute.xlu1 %2588  ;;  %3452 = vperm.xlu0 %6114, %v8999_v21   ;;  %9002 = vst [vmem:[#allocation96_spill] sm:$0xff] %v7671_v25  ;;  %9003 = vst [vmem:[#allocation97_spill] sm:$0xff] %v7675_v41  ;;  %v1576_v3 = vmul.f32 %v7362_v33, %v7667_v48  ;;  %v1388_v33 = vrot.slane %v7024_v62, 1 }
 0x15f   : > { %5629 = vmatprep.mubr.bf16.mxu0 %v2739_v30  ;;  %v1385_v30 = vrot.slane %v8925_v57, 1 }
 0x160   : > { %6105 = vset.pattern.permute.xlu1 %v8786_v39  ;;  %5490 = vmatmul.mubr.bf16.gmra.mrb[4].mxu1 %v1600_v17  ;;  %v1577_v17 = vmul.f32 %v9006_v22, %v7671_v25  ;;  %v1387_v39 = vrot.slane %v9007_v43, 1  ;;  %v1602_v22 = vpack.c.bf16 %v1576_v3, %v1575_v63  ;;  %v9012_v3 = vld [vmem:[#allocation68_spill] sm:$0xff] }
 0x161   : > { %3448 = vperm.xlu1 %6105, %v6918_v9   ;;  %5493 = vmatprep.mubr.bf16.mxu1 %v1601_v13  ;;  %v7679_v23 = vpop.permute.xlu0 %2628  ;;  %v1578_v9 = vmul.f32 %v7388_v2, %v7675_v41  ;;  %v2709_v13 = vmul.f32 %v2589_v61, %v7578_v24  ;;  %v6181_v2 = vld [vmem:[%s8638_s3 + $0x188] sm:$0xff]   ;;  %v7707_v61 = vsel %vm1404_vm0, %v1384_v15, %v1385_v30 }
 0x162   : > { %v2593_v34 = vpop.permute.xlu1 %2592  ;;  %3464 = vperm.xlu0 %6114, %v9005_v58   ;;  %9008 = vst [vmem:[#allocation90_spill] sm:$0xff] %v7707_v61  ;;  %v7711_v37 = vsel %vm1404_vm0, %v1385_v30, %v1386_v44  ;;  %v7716_v63 = vsel %vm1404_vm0, %v1386_v44, %v1387_v39  ;;  %v2713_v15 = vmul.f32 %v7609_v28, %v7622_v19  ;;  %v9013_v30 = vld [vmem:[#allocation45_spill] sm:$0xff] }
 0x163   : > { %v2710_v21 = vmul.f32 %v2593_v34, %v7582_v7  ;;  %v1603_v34 = vpack.c.bf16 %v1578_v9, %v1577_v17  ;;  %9009 = vst [vmem:[#allocation2_spill] sm:$0xff] %v7711_v37  ;;  %9010 = vst [vmem:[#allocation43_spill] sm:$0xff] %v7716_v63  ;;  %v1580_v44 = vmul.f32 %v7418_v29, %v7711_v37  ;;  %v9014_v9 = vld [vmem:[#allocation52_spill] sm:$0xff]  ;;  %v9015_v28 = vld [vmem:[#allocation93_spill] sm:$0xff]  ;;  %v1392_v29 = vrot.slane %v7070_v12, 1 }
 0x164   : > { %v9019_v7 = vld [vmem:[#allocation47_spill] sm:$0xff] }
 0x165   : > { %v2740_v57 = vpack.c.bf16 %v2710_v21, %v2709_v13  ;;  %3456 = vperm.xlu1 %6105, %v8927_v52   ;;  %v7699_v20 = vpop.permute.xlu0 %2636  ;;  %v1389_v13 = vrot.slane %v9014_v9, 1 }
 0x166   : > { %v2601_v58 = vpop.permute.xlu1 %2600  ;;  %3472 = vperm.xlu0 %6114, %v7385_v54   ;;  %v7720_v54 = vsel %vm1404_vm0, %v1387_v39, %v1388_v33  ;;  %v1579_v39 = vmul.f32 %v7364_v40, %v7707_v61  ;;  %v9018_v40 = vld [vmem:[#allocation56_spill] sm:$0xff] }
 0x167   : > { %v2712_v52 = vmul.f32 %v2601_v58, %v7618_v49  ;;  %5630 = vmatmul.mubr.bf16.vlgmr.msra.gmra.mrb[0].mxu0 %v2740_v57  ;;  %9011 = vst [vmem:[#allocation98_spill] sm:$0xff] %v7720_v54  ;;  %v6182_v57 = vld [vmem:[%s8638_s3 + $0x190] sm:$0xff]   ;;  %v1391_v19 = vrot.slane %v9018_v40, 1  ;;  %v6196_v49 = vld [vmem:[%s8638_s3 + $0xc0] sm:$0xff]  }
 0x168   : > { %5494 = vmatmul.mubr.bf16.gmra.mrb[8].mxu1 %v1602_v22  ;;  %5662 = vmatpush3.bf16.msra.mxu0 %v9012_v3 }
 0x169   : > { %v2741_v17 = vpack.c.bf16 %v2712_v52, %v2711_v8  ;;  %3460 = vperm.xlu1 %6105, %v9013_v30   ;;  %5497 = vmatprep.mubr.bf16.mxu1 %v1603_v34  ;;  %v7726_v58 = vpop.permute.xlu0 %2644  ;;  %v9016_v8 = vld [vmem:[#allocation6_spill] sm:$0xff]  ;;  %v1582_v34 = vmul.f32 %v7441_v10, %v7720_v54  ;;  %v9017_v52 = vld [vmem:[#allocation55_spill] sm:$0xff] }
 0x16a   : > { %v2609_v21 = vpop.permute.xlu1 %2608  ;;  %3480 = vperm.xlu0 %6114, %v9015_v28   ;;  %5663 = vmatprep.subr.bf16.mxu0 %v6181_v2  ;;  %v1581_v22 = vmul.f32 %v9016_v8, %v7716_v63  ;;  %v1390_v3 = vrot.slane %v9017_v52, 1  ;;  %v2715_v8 = vmul.f32 %v7635_v11, %v7663_v36 }
 0x16b   : > { %v2714_v30 = vmul.f32 %v2609_v21, %v7626_v16  ;;  %5633 = vmatprep.mubr.bf16.mxu0 %v2741_v17  ;;  %v1604_v21 = vpack.c.bf16 %v1580_v44, %v1579_v39  ;;  %v7755_v17 = vsel %vm1404_vm0, %v1388_v33, %v1389_v13  ;;  %5517 = vmatprep.subr.bf16.mxu1 %v6196_v49  ;;  %v6197_v39 = vld [vmem:[%s8638_s3 + $0xc8] sm:$0xff]  }
 0x16c   : > { %5664 = vmatpush3.bf16.msra.mxu0 %v6181_v2  ;;  %9020 = vst [vmem:[#allocation68_spill] sm:$0xff] %v7755_v17  ;;  %v6183_v2 = vld [vmem:[%s8638_s3 + $0x198] sm:$0xff]   ;;  %v1605_v11 = vpack.c.bf16 %v1582_v34, %v1581_v22  ;;  %5518 = vmatpush3.bf16.msra.mxu1 %v6196_v49  ;;  %v7768_v33 = vsel %vm1404_vm0, %v1390_v3, %v1391_v19  ;;  %v1393_v22 = vrot.slane %v7072_v4, 1 }
 0x16d   : > { %v2742_v47 = vpack.c.bf16 %v2714_v30, %v2713_v15  ;;  %3468 = vperm.xlu1 %6105, %v9019_v7   ;;  %v7751_v10 = vpop.permute.xlu0 %2652  ;;  %5665 = vmatprep.subr.bf16.mxu0 %v6182_v57  ;;  %v7763_v7 = vsel %vm1404_vm0, %v1389_v13, %v1390_v3  ;;  %9022 = vst [vmem:[#allocation52_spill] sm:$0xff] %v7768_v33 }
 0x16e   : > { %v2617_v16 = vpop.permute.xlu1 %2616  ;;  %3488 = vperm.xlu0 %6114, %v7438_v35   ;;  %9021 = vst [vmem:[#allocation45_spill] sm:$0xff] %v7763_v7  ;;  %v7772_v35 = vsel %vm1404_vm0, %v1391_v19, %v1392_v29  ;;  %v2717_v44 = vmul.f32 %v7657_v46, %v7671_v25  ;;  %v6184_v19 = vld [vmem:[%s8638_s3 + $0x1a0] sm:$0xff]   ;;  %v1584_v13 = vmul.f32 %v7468_v55, %v7763_v7  ;;  %v9028_v25 = vld [vmem:[#allocation51_spill] sm:$0xff] }
 0x16f   : > { %v2716_v15 = vmul.f32 %v2617_v16, %v7667_v48  ;;  %5634 = vmatmul.mubr.bf16.gmra.mrb[4].mxu0 %v2742_v47  ;;  %9023 = vst [vmem:[#allocation93_spill] sm:$0xff] %v7772_v35  ;;  %v9024_v47 = vld [vmem:[#allocation49_spill] sm:$0xff]  ;;  %v9025_v46 = vld [vmem:[#allocation10_spill] sm:$0xff]  ;;  %v1586_v30 = vmul.f32 %v7486_v51, %v7772_v35  ;;  %5519 = vmatprep.subr.bf16.mxu1 %v6197_v39 }
 0x170   : > { %5498 = vmatmul.mubr.bf16.gmra.mrb[12].mxu1 %v1604_v21  ;;  %5666 = vmatpush3.bf16.msra.mxu0 %v6182_v57  ;;  %v1583_v57 = vmul.f32 %v7420_v38, %v7755_v17  ;;  %v1585_v3 = vmul.f32 %v9025_v46, %v7768_v33  ;;  %v9027_v38 = vld [vmem:[#allocation62_spill] sm:$0xff]  ;;  %v2719_v46 = vmul.f32 %v7679_v23, %v7707_v61 }
 0x171   : > { %v2743_v16 = vpack.c.bf16 %v2716_v15, %v2715_v8  ;;  %3476 = vperm.xlu1 %6105, %v9024_v47   ;;  %5501 = vmatprep.mubr.bf16.mxu1 %v1605_v11  ;;  %v7780_v49 = vpop.permute.xlu0 %2660  ;;  %v9026_v8 = vld [vmem:[#allocation61_spill] sm:$0xff]  ;;  %v1395_v55 = vrot.slane %v9027_v38, 1  ;;  %v1396_v15 = vrot.slane %v7107_v45, 1  ;;  %v6198_v47 = vld [vmem:[%s8638_s3 + $0xd0] sm:$0xff]   ;;  %v2723_v61 = vmul.f32 %v7726_v58, %v7755_v17  ;;  %v9071_v17 = vld [vmem:[#allocation7_spill] sm:$0xff] }
 0x172   : > { %v2625_v34 = vpop.permute.xlu1 %2624  ;;  %3496 = vperm.xlu0 %6114, %v7465_v32   ;;  %5667 = vmatprep.subr.bf16.mxu0 %v6183_v2  ;;  %v1394_v21 = vrot.slane %v9026_v8, 1  ;;  %v1607_v23 = vpack.c.bf16 %v1586_v30, %v1585_v3  ;;  %v9033_v30 = vld [vmem:[#allocation54_spill] sm:$0xff] }
 0x173   : > { %v2718_v11 = vmul.f32 %v2625_v34, %v7675_v41  ;;  %5637 = vmatprep.mubr.bf16.mxu0 %v2743_v16  ;;  %5520 = vmatpush3.bf16.msra.mxu1 %v6197_v39  ;;  %v1606_v16 = vpack.c.bf16 %v1584_v13, %v1583_v57  ;;  %v6185_v39 = vld [vmem:[%s8638_s3 + $0x1a8] sm:$0xff]  }
 0x174   : > { %5668 = vmatpush3.bf16.msra.mxu0 %v6183_v2  ;;  %v7810_v2 = vld [vmem:[%s8639_s4 + $0x70] sm:$0xff]  ;;  %5521 = vmatprep.subr.bf16.mxu1 %v6198_v47  ;;  %v7827_v13 = vsel %vm1404_vm0, %v1394_v21, %v1395_v55 }
 0x175   : > { %v2744_v51 = vpack.c.bf16 %v2718_v11, %v2717_v44  ;;  %3484 = vperm.xlu1 %6105, %v9028_v25   ;;  %v7805_v48 = vpop.permute.xlu0 %2668  ;;  %5669 = vmatprep.subr.bf16.mxu0 %v6184_v19  ;;  %v7818_v25 = vsel %vm1404_vm0, %v1392_v29, %v1393_v22  ;;  %v7822_v44 = vsel %vm1404_vm0, %v1393_v22, %v1394_v21  ;;  %v6199_v29 = vld [vmem:[%s8638_s3 + $0xd8] sm:$0xff]   ;;  %v6186_v21 = vld [vmem:[%s8638_s3 + $0x1b0] sm:$0xff]  }
 0x176   : > { %v2633_v34 = vpop.permute.xlu1 %2632  ;;  %3504 = vperm.xlu0 %6114, %v7810_v2   ;;  %9029 = vst [vmem:[#allocation6_spill] sm:$0xff] %v7818_v25  ;;  %9030 = vst [vmem:[#allocation55_spill] sm:$0xff] %v7822_v44  ;;  %v7831_v11 = vsel %vm1404_vm0, %v1395_v55, %v1396_v15  ;;  %v2721_v22 = vmul.f32 %v7699_v20, %v7716_v63  ;;  %v1588_v55 = vmul.f32 %v7508_v26, %v7822_v44  ;;  %v7852_v20 = vld [vmem:[%s8639_s4 + $0x80] sm:$0xff] }
 0x177   : > { %v2720_v57 = vmul.f32 %v2633_v34, %v7711_v37  ;;  %5638 = vmatmul.mubr.bf16.gmra.mrb[8].mxu0 %v2744_v51  ;;  %9031 = vst [vmem:[#allocation56_spill] sm:$0xff] %v7827_v13  ;;  %9032 = vst [vmem:[#allocation47_spill] sm:$0xff] %v7831_v11  ;;  %5522 = vmatpush3.bf16.msra.mxu1 %v6198_v47  ;;  %v1400_v37 = vrot.slane %v7157_v50, 1 }
 0x178   : > { %5502 = vmatmul.mubr.bf16.gmra.mrb[16].mxu1 %v1606_v16  ;;  %5670 = vmatpush3.bf16.msra.mxu0 %v6184_v19  ;;  %v1587_v19 = vmul.f32 %v7470_v14, %v7818_v25  ;;  %v1397_v16 = vrot.slane %v7110_v18, 1  ;;  %v1590_v14 = vmul.f32 %v7525_v27, %v7831_v11 }
 0x179   : > { %v2745_v3 = vpack.c.bf16 %v2720_v57, %v2719_v46  ;;  %3492 = vperm.xlu1 %6105, %v9033_v30   ;;  %5505 = vmatprep.mubr.bf16.mxu1 %v1607_v23  ;;  %v7839_v51 = vpop.permute.xlu0 %2676  ;;  %v1589_v46 = vmul.f32 %v7488_v53, %v7827_v13  ;;  %v9034_v23 = vld [vmem:[#allocation66_spill] sm:$0xff]  ;;  %v9035_v30 = vld [vmem:[#allocation67_spill] sm:$0xff] }
 0x17a   : > { %v2641_v34 = vpop.permute.xlu1 %2640  ;;  %3512 = vperm.xlu0 %6114, %v7852_v20   ;;  %5671 = vmatprep.subr.bf16.mxu0 %v6185_v39  ;;  %v1398_v57 = vrot.slane %v9034_v23, 1  ;;  %v1399_v63 = vrot.slane %v9035_v30, 1  ;;  %v9036_v53 = vld [vmem:[#allocation58_spill] sm:$0xff]  ;;  %v1608_v27 = vpack.c.bf16 %v1588_v55, %v1587_v19 }
 0x17b   : > { %v2722_v26 = vmul.f32 %v2641_v34, %v7720_v54  ;;  %5641 = vmatprep.mubr.bf16.mxu0 %v2745_v3  ;;  %5523 = vmatprep.subr.bf16.mxu1 %v6199_v29  ;;  %v7870_v3 = vsel %vm1404_vm0, %v1396_v15, %v1397_v16  ;;  %v9038_v34 = vld [vmem:[#allocation65_spill] sm:$0xff]  ;;  %v1609_v54 = vpack.c.bf16 %v1590_v14, %v1589_v46  ;;  %v6200_v15 = vld [vmem:[%s8638_s3 + $0xe0] sm:$0xff]  }
 0x17c   : > { %5672 = vmatpush3.bf16.msra.mxu0 %v6185_v39  ;;  %9037 = vst [vmem:[#allocation49_spill] sm:$0xff] %v7870_v3  ;;  %v6187_v39 = vld [vmem:[%s8638_s3 + $0x1b8] sm:$0xff]   ;;  %v7878_v58 = vsel %vm1404_vm0, %v1397_v16, %v1398_v57  ;;  %5524 = vmatpush3.bf16.msra.mxu1 %v6199_v29  ;;  %v7886_v19 = vsel %vm1404_vm0, %v1398_v57, %v1399_v63  ;;  %v7900_v14 = vld [vmem:[%s8638_s3 + $0x1c0] sm:$0xff]  }
 0x17d   : > { %v2746_v41 = vpack.c.bf16 %v2722_v26, %v2721_v22  ;;  %3500 = vperm.xlu1 %6105, %v9036_v53   ;;  %v7866_v36 = vpop.permute.xlu0 %2684  ;;  %5673 = vmatprep.subr.bf16.mxu0 %v6186_v21  ;;  %9039 = vst [vmem:[#allocation10_spill] sm:$0xff] %v7878_v58  ;;  %9040 = vst [vmem:[#allocation61_spill] sm:$0xff] %v7886_v19  ;;  %v7890_v55 = vsel %vm1404_vm0, %v1399_v63, %v1400_v37  ;;  %v9043_v57 = vld [vmem:[#allocation46_spill] sm:$0xff] }
 0x17e   : > { %v2649_v47 = vpop.permute.xlu1 %2648  ;;  %3524 = vperm.xlu0 %6114, %v9038_v34   ;;  %9041 = vst [vmem:[#allocation62_spill] sm:$0xff] %v7890_v55  ;;  %v2725_v16 = vmul.f32 %v7751_v10, %v7768_v33  ;;  %v1591_v63 = vmul.f32 %v9043_v57, %v7870_v3  ;;  %v1593_v10 = vmul.f32 %v7527_v59, %v7886_v19  ;;  %v9045_v34 = vld [vmem:[#allocation64_spill] sm:$0xff] }
 0x17f   : > { %v2724_v22 = vmul.f32 %v2649_v47, %v7763_v7  ;;  %5642 = vmatmul.mubr.bf16.gmra.mrb[12].mxu0 %v2746_v41  ;;  %v9042_v41 = vld [vmem:[#allocation60_spill] sm:$0xff]  ;;  %v1594_v53 = vmul.f32 %v7568_v1, %v7890_v55  ;;  %5525 = vmatprep.subr.bf16.mxu1 %v6200_v15  ;;  %v9047_v1 = vrot.slane %v6815_v42, 1 }
 0x180   : > { %5506 = vmatmul.mubr.bf16.gmra.mrb[20].mxu1 %v1608_v27  ;;  %5674 = vmatpush3.bf16.msra.mxu0 %v6186_v21  ;;  %v1592_v21 = vmul.f32 %v7551_v60, %v7878_v58  ;;  %v2727_v27 = vmul.f32 %v7780_v49, %v7818_v25  ;;  %v9046_v57 = vld [vmem:[#allocation72_spill] sm:$0xff] }
 0x181   : > { %v2747_v46 = vpack.c.bf16 %v2724_v22, %v2723_v61  ;;  %3508 = vperm.xlu1 %6105, %v9042_v41   ;;  %5509 = vmatprep.mubr.bf16.mxu1 %v1609_v54  ;;  %v7895_v29 = vpop.permute.xlu0 %2692  ;;  %v7909_v61 = vld [vmem:[%s8639_s4 + $0xa0] sm:$0xff]  ;;  %v6201_v54 = vld [vmem:[%s8638_s3 + $0xe8] sm:$0xff]   ;;  %v9070_v33 = vld [vmem:[#allocation44_spill] sm:$0xff] }
 0x182   : > { %v2657_v26 = vpop.permute.xlu1 %2656  ;;  %9044 = vst [vmem:[#allocation51_spill] sm:$0xff] %v7909_v61  ;;  %3528 = vperm.xlu0 %6114, %v7909_v61   ;;  %5675 = vmatprep.subr.bf16.mxu0 %v6187_v39  ;;  %v1610_v59 = vpack.c.bf16 %v1592_v21, %v1591_v63 }
 0x183   : > { %v2726_v60 = vmul.f32 %v2657_v26, %v7772_v35  ;;  %5645 = vmatprep.mubr.bf16.mxu0 %v2747_v46  ;;  %5526 = vmatpush3.bf16.msra.mxu1 %v6200_v15  ;;  %v1611_v15 = vpack.c.bf16 %v1594_v53, %v1593_v10  ;;  %v2729_v46 = vmul.f32 %v7805_v48, %v7827_v13  ;;  %v7947_v26 = vld [vmem:[%s8639_s4 + $0x18] sm:$0xff]  ;;  %v7953_v48 = vld [vmem:[%s8639_s4 + $0xc0] sm:$0xff] }
 0x184   : > { %5676 = vmatpush3.bf16.msra.mxu0 %v6187_v39  ;;  %5527 = vmatprep.subr.bf16.mxu1 %v6201_v54  ;;  %v7931_v39 = vsel %vm1404_vm0, %v1400_v37, %v9047_v1  ;;  %v9049_v37 = vld [vmem:[#allocation37_spill] sm:$0xff]  ;;  %9050 = vst [vmem:[#allocation66_spill] sm:$0xff] %v7953_v48 }
 0x185   : > { %v2748_v47 = vpack.c.bf16 %v2726_v60, %v2725_v16  ;;  %3516 = vperm.xlu1 %6105, %v9045_v34   ;;  %v7923_v22 = vpop.permute.xlu0 %2700  ;;  %5709 = vmatprep.subr.bf16.mxu0 %v7900_v14  ;;  %9048 = vst [vmem:[#allocation54_spill] sm:$0xff] %v7931_v39  ;;  %v6202_v16 = vld [vmem:[%s8638_s3 + $0xf0] sm:$0xff]   ;;  %v1595_v31 = vmul.f32 %v7553_v6, %v7931_v39 }
 0x186   : > { %v2665_v41 = vpop.permute.xlu1 %2664  ;;  %3540 = vperm.xlu0 %6114, %v9046_v57   ;;  %v1596_v21 = vmul.f32 %v7585_v56, %v9049_v37  ;;  %v2731_v56 = vmul.f32 %v7839_v51, %v7870_v3  ;;  %v6203_v57 = vld [vmem:[%s8638_s3 + $0xf8] sm:$0xff]   ;;  %v2733_v51 = vmul.f32 %v7866_v36, %v7886_v19 }
 0x187   : > { %v2728_v49 = vmul.f32 %v2665_v41, %v7822_v44  ;;  %5646 = vmatmul.mubr.bf16.gmra.mrb[16].mxu0 %v2748_v47  ;;  %5528 = vmatpush3.bf16.msra.mxu1 %v6201_v54  ;;  %v9051_v47 = vmov 6   ;;  %v9052_v41 = vld [vmem:[#allocation77_spill] sm:$0xff]  ;;  %v7968_v54 = vld [vmem:[%s8639_s4 + $0x90] sm:$0xff] }
 0x188   : > { %5510 = vmatmul.mubr.bf16.gmra.mrb[24].mxu1 %v1610_v59  ;;  %5529 = vmatprep.subr.bf16.mxu1 %v6202_v16  ;;  %v9068_v44 = vld [vmem:[#allocation4_spill] sm:$0xff] }
 0x189   : > { %v2749_v63 = vpack.c.bf16 %v2728_v49, %v2727_v27  ;;  %6106 = vset.pattern.permute.xlu1 %v8980_v0  ;;  %5513 = vmatprep.mubr.bf16.mxu1 %v1611_v15  ;;  %v1612_v27 = vpack.c.bf16 %v1596_v21, %v1595_v31  ;;  %v9053_v31 = vld [vmem:[#allocation91_spill] sm:$0xff]  ;;  %v2735_v21 = vmul.f32 %v7895_v29, %v7931_v39 }
 0x18a   : > { %1884 = vperm.xlu1 %6106, %v7947_v26   ;;  %v2673_v10 = vpop.permute.xlu1 %2672  ;;  %v3015_v53 = vpop.permute.xlu0 %3014  ;;  %3544 = vperm.xlu0 %6114, %v7953_v48   ;;  %v7990_v29 = vld [vmem:[%s8639_s4 + $0x28] sm:$0xff] }
 0x18b   : > { %v2730_v6 = vmul.f32 %v2673_v10, %v7831_v11  ;;  %5649 = vmatprep.mubr.bf16.mxu0 %v2749_v63  ;;  %5530 = vmatpush3.bf16.msra.mxu1 %v6202_v16  ;;  %v9054_v16 = vld [vmem:[#allocation82_spill] sm:$0xff]  ;;  %v9066_v11 = vld [vmem:[#allocation87_spill] sm:$0xff] }
 0x18c   : > { %5531 = vmatprep.subr.bf16.mxu1 %v6203_v57 }
 0x18d   : > { %v2750_v60 = vpack.c.bf16 %v2730_v6, %v2729_v46 }
 0x18e   : > { %6107 = vset.pattern.permute.xlu1 %v9051_v47  ;;  %v2681_v34 = vpop.permute.xlu1 %2680  ;;  %v3027_v59 = vpop.permute.xlu0 %3026  ;;  %3556 = vperm.xlu0 %6114, %v9052_v41  }
 0x18f   : > { %v2732_v1 = vmul.f32 %v2681_v34, %v7878_v58  ;;  %3520 = vperm.xlu1 %6107, %v7968_v54   ;;  %5650 = vmatmul.mubr.bf16.gmra.mrb[20].mxu0 %v2750_v60  ;;  %v9064_v58 = vld [vmem:[#allocation85_spill] sm:$0xff] }
 0x190   : > { %5514 = vmatmul.mubr.bf16.gmra.mrb[28].mxu1 %v1612_v27  ;;  %v9055_v27 = vld [vmem:[#allocation23_spill] sm:$0xff] }
 0x191   : > { %v2751_v15 = vpack.c.bf16 %v2732_v1, %v2731_v56  ;;  %5532 = vmatpush3.bf16.msra.mxu1 %v6203_v57  ;;  %v7983_v56 = vld [vmem:[%s8638_s3 + $0x100] sm:$0xff]   ;;  %v2737_v34 = vmul.f32 %v7923_v22, %v9055_v27  ;;  %v8004_v22 = vld [vmem:[%s8639_s4 + $0xa8] sm:$0xff] }
 0x192   : > { %v2689_v49 = vpop.permute.xlu1 %2688  ;;  %v3035_v46 = vpop.permute.xlu0 %3034  ;;  %3560 = vperm.xlu0 %6114, %v7631_v5   ;;  %5805 = vmatprep.subr.bf16.mxu1 %v7983_v56 }
 0x193   : > { %v2734_v63 = vmul.f32 %v2689_v49, %v7890_v55  ;;  %6108 = vset.pattern.permute.xlu1 %v8980_v0  ;;  %5653 = vmatprep.mubr.bf16.mxu0 %v2751_v15  ;;  %v9056_v15 = vld [vmem:[#allocation24_spill] sm:$0xff] }
 0x194   : > { %1888 = vperm.xlu1 %6108, %v9053_v31   ;;  %v6190_v55 = vld [vmem:[%s8638_s3 + $0x1d0] sm:$0xff]  }
 0x195   : > { %v2752_v10 = vpack.c.bf16 %v2734_v63, %v2733_v51  ;;  %v8804_v51 = vmov 7   ;;  %v6254_v63 = vld [vmem:[%s8639_s4] sm:$0xff] }
 0x196   : > { %v2697_v36 = vpop.permute.xlu1 %2696  ;;  %v3043_v6 = vpop.permute.xlu0 %3042  ;;  %3572 = vperm.xlu0 %6114, %v9054_v16  }
 0x197   : > { %v2736_v60 = vmul.f32 %v2697_v36, %v9049_v37  ;;  %5654 = vmatmul.mubr.bf16.gmra.mrb[24].mxu0 %v2752_v10 }
 0x198   : > { %1892 = vperm.xlu1 %6108, %v7990_v29  }
 0x199   : > { %v2753_v41 = vpack.c.bf16 %v2736_v60, %v2735_v21  ;;  %v9057_v21 = vld [vmem:[#allocation75_spill] sm:$0xff] }
 0x19a   : > { %v2705_v57 = vpop.permute.xlu1 %2704  ;;  %v3051_v1 = vpop.permute.xlu0 %3050  ;;  %6122 = vset.pattern.permute.xlu0 %v8804_v51  ;;  %v3141_v36 = vmul.f32 %v3015_v53, %v9057_v21  ;;  %v8015_v51 = vld [vmem:[%s8639_s4 + $0x38] sm:$0xff] }
 0x19b   : > { %v2738_v49 = vmul.f32 %v2705_v57, %v9056_v15  ;;  %5657 = vmatprep.mubr.bf16.mxu0 %v2753_v41  ;;  %3882 = vperm.xlu0 %6122, %v6254_v63   ;;  %v9058_v41 = vld [vmem:[#allocation74_spill] sm:$0xff] }
 0x19c   : > { %6109 = vset.pattern.permute.xlu1 %v9051_v47  ;;  %v9059_v63 = vld [vmem:[#allocation78_spill] sm:$0xff] }
 0x19d   : > { %v2754_v10 = vpack.c.bf16 %v2738_v49, %v2737_v34  ;;  %3532 = vperm.xlu1 %6109, %v8004_v22   ;;  %v3144_v34 = vmul.f32 %v3027_v59, %v9059_v63 }
 0x19e   : > { %v3059_v16 = vpop.permute.xlu0 %3058 }
 0x19f   : > { %v3019_v60 = vpop.permute.xlu1 %3018  ;;  %5658 = vmatmul.mubr.bf16.gmra.mrb[28].mxu0 %v2754_v10  ;;  %3898 = vperm.xlu0 %6122, %v9053_v31   ;;  %v9060_v10 = vld [vmem:[#allocation79_spill] sm:$0xff] }
 0x1a0   : > { %v3142_v57 = vmul.f32 %v3019_v60, %v9058_v41  ;;  %v9061_v60 = vld [vmem:[#allocation80_spill] sm:$0xff] }
 0x1a1   : > { %6110 = vset.pattern.permute.xlu1 %v8980_v0  ;;  %v3146_v15 = vmul.f32 %v3035_v46, %v9061_v60 }
 0x1a2   : > { %v3173_v49 = vpack.c.bf16 %v3142_v57, %v3141_v36  ;;  %1900 = vperm.xlu1 %6110, %v8015_v51   ;;  %v3067_v53 = vpop.permute.xlu0 %3066  ;;  %v6189_v36 = vld [vmem:[%s8638_s3 + $0x1c8] sm:$0xff]   ;;  %v8028_v57 = vld [vmem:[%s8639_s4 + $0xb0] sm:$0xff] }
 0x1a3   : > { %v3023_v27 = vpop.permute.xlu1 %3022  ;;  %3914 = vperm.xlu0 %6122, %v9015_v28  }
 0x1a4   : > { %v3143_v31 = vmul.f32 %v3023_v27, %v9060_v10  ;;  %5677 = vmatprep.mubr.bf16.mxu0 %v3173_v49  ;;  %v9062_v27 = vld [vmem:[#allocation81_spill] sm:$0xff] }
 0x1a6   : > { %v3174_v39 = vpack.c.bf16 %v3144_v34, %v3143_v31  ;;  %6111 = vset.pattern.permute.xlu1 %v9051_v47  ;;  %v3075_v59 = vpop.permute.xlu0 %3074  ;;  %v9063_v34 = vld [vmem:[#allocation84_spill] sm:$0xff] }
 0x1a7   : > { %3536 = vperm.xlu1 %6111, %v8028_v57   ;;  %v3031_v37 = vpop.permute.xlu1 %3030  ;;  %3930 = vperm.xlu0 %6122, %v7465_v32   ;;  %v3148_v49 = vmul.f32 %v3043_v6, %v9063_v34 }
 0x1a8   : > { %v3145_v46 = vmul.f32 %v3031_v37, %v9062_v27  ;;  %5678 = vmatmul.mubr.bf16.vlgmr.msra.gmra.mrb[0].mxu0 %v3174_v39 }
 0x1a9   : > { %5710 = vmatpush3.bf16.msra.mxu0 %v7900_v14  ;;  %v9065_v14 = vld [vmem:[#allocation86_spill] sm:$0xff] }
 0x1aa   : > { %v3175_v31 = vpack.c.bf16 %v3146_v15, %v3145_v46  ;;  %v3083_v19 = vpop.permute.xlu0 %3082  ;;  %5711 = vmatprep.subr.bf16.mxu0 %v6189_v36  ;;  %v3150_v39 = vmul.f32 %v3051_v1, %v9065_v14  ;;  %v6191_v15 = vld [vmem:[%s8638_s3 + $0x1d8] sm:$0xff]  }
 0x1ab   : > { %6112 = vset.pattern.permute.xlu1 %v8980_v0  ;;  %v3039_v3 = vpop.permute.xlu1 %3038  ;;  %6135 = vset.pattern.permute.xlu0 %v8980_v0 }
 0x1ac   : > { %v3147_v13 = vmul.f32 %v3039_v3, %v9064_v58  ;;  %1904 = vperm.xlu1 %6112, %v9015_v28   ;;  %5681 = vmatprep.mubr.bf16.mxu0 %v3175_v31  ;;  %v8051_v28 = vld [vmem:[%s8639_s4 + $0x48] sm:$0xff]  ;;  %v6192_v31 = vld [vmem:[%s8638_s3 + $0x1e0] sm:$0xff]  }
 0x1ad   : > { %1928 = vperm.xlu0 %6135, %v7810_v2   ;;  %5712 = vmatpush3.bf16.msra.mxu0 %v6189_v36  ;;  %v9067_v3 = vld [vmem:[#allocation3_spill] sm:$0xff] }
 0x1ae   : > { %v3176_v37 = vpack.c.bf16 %v3148_v49, %v3147_v13  ;;  %v3091_v6 = vpop.permute.xlu0 %3090  ;;  %5713 = vmatprep.subr.bf16.mxu0 %v6190_v55  ;;  %v8057_v13 = vld [vmem:[%s8639_s4 + $0x98] sm:$0xff]  ;;  %v3152_v1 = vmul.f32 %v3059_v16, %v9067_v3  ;;  %v8104_v3 = vld [vmem:[%s8639_s4 + $0xd0] sm:$0xff] }
 0x1af   : > { %v3047_v46 = vpop.permute.xlu1 %3046 }
 0x1b0   : > { %v3149_v25 = vmul.f32 %v3047_v46, %v9066_v11  ;;  %1908 = vperm.xlu1 %6112, %v8051_v28   ;;  %5682 = vmatmul.mubr.bf16.gmra.mrb[4].mxu0 %v3176_v37 }
 0x1b1   : > { %5714 = vmatpush3.bf16.msra.mxu0 %v6190_v55  ;;  %1948 = vperm.xlu0 %6135, %v8057_v13   ;;  %v8069_v55 = vld [vmem:[%s8639_s4 + $0xc8] sm:$0xff] }
 0x1b2   : > { %v3177_v36 = vpack.c.bf16 %v3150_v39, %v3149_v25  ;;  %v3099_v49 = vpop.permute.xlu0 %3098  ;;  %5715 = vmatprep.subr.bf16.mxu0 %v6191_v15  ;;  %v9069_v25 = vld [vmem:[#allocation5_spill] sm:$0xff] }
 0x1b3   : > { %v3055_v46 = vpop.permute.xlu1 %3054  ;;  %v3154_v16 = vmul.f32 %v3067_v53, %v9069_v25  ;;  %v8083_v53 = vld [vmem:[%s8639_s4 + $0x58] sm:$0xff] }
 0x1b4   : > { %v3151_v37 = vmul.f32 %v3055_v46, %v9068_v44  ;;  %6113 = vset.pattern.permute.xlu1 %v9051_v47  ;;  %5685 = vmatprep.mubr.bf16.mxu0 %v3177_v36  ;;  %v6193_v46 = vld [vmem:[%s8638_s3 + $0x1e8] sm:$0xff]   ;;  %v8114_v44 = vld [vmem:[%s8639_s4 + $0xd8] sm:$0xff] }
 0x1b5   : > { %3548 = vperm.xlu1 %6113, %v8069_v55   ;;  %5716 = vmatpush3.bf16.msra.mxu0 %v6191_v15  ;;  %v3156_v15 = vmul.f32 %v3075_v59, %v9071_v17 }
 0x1b6   : > { %v3178_v39 = vpack.c.bf16 %v3152_v1, %v3151_v37  ;;  %v3107_v35 = vpop.permute.xlu0 %3106  ;;  %5717 = vmatprep.subr.bf16.mxu0 %v6192_v31  ;;  %1952 = vperm.xlu0 %6135, %v7909_v61   ;;  %v6194_v37 = vld [vmem:[%s8638_s3 + $0x1f0] sm:$0xff]  }
 0x1b7   : > { %v3063_v36 = vpop.permute.xlu1 %3062 }
 0x1b8   : > { %v3153_v7 = vmul.f32 %v3063_v36, %v9070_v33  ;;  %5686 = vmatmul.mubr.bf16.gmra.mrb[8].mxu0 %v3178_v39  ;;  %v6195_v33 = vld [vmem:[%s8638_s3 + $0x1f8] sm:$0xff]  }
 0x1b9   : > { %6115 = vset.pattern.permute.xlu1 %v8980_v0  ;;  %5718 = vmatpush3.bf16.msra.mxu0 %v6192_v31  ;;  %v8092_v31 = vld [vmem:[%s8639_s4 + $0xb8] sm:$0xff] }
 0x1ba   : > { %v3179_v24 = vpack.c.bf16 %v3154_v16, %v3153_v7  ;;  %1916 = vperm.xlu1 %6115, %v8083_v53   ;;  %v3115_v1 = vpop.permute.xlu0 %3114  ;;  %5719 = vmatprep.subr.bf16.mxu0 %v6193_v46  ;;  %v9072_v7 = vld [vmem:[#allocation8_spill] sm:$0xff]  ;;  %v9073_v16 = vld [vmem:[#allocation9_spill] sm:$0xff] }
 0x1bb   : > { %v3071_v39 = vpop.permute.xlu1 %3070  ;;  %1964 = vperm.xlu0 %6135, %v8092_v31   ;;  %v3158_v36 = vmul.f32 %v3083_v19, %v9073_v16  ;;  %v9074_v19 = vld [vmem:[#allocation92_spill] sm:$0xff] }
 0x1bc   : > { %v3155_v59 = vmul.f32 %v3071_v39, %v9072_v7  ;;  %5689 = vmatprep.mubr.bf16.mxu0 %v3179_v24 }
 0x1bd   : > { %5720 = vmatpush3.bf16.msra.mxu0 %v6193_v46 }
 0x1be   : > { %v3180_v17 = vpack.c.bf16 %v3156_v15, %v3155_v59  ;;  %6116 = vset.pattern.permute.xlu1 %v9051_v47  ;;  %v3123_v25 = vpop.permute.xlu0 %3122  ;;  %5721 = vmatprep.subr.bf16.mxu0 %v6194_v37  ;;  %v9075_v15 = vld [vmem:[#allocation11_spill] sm:$0xff] }
 0x1bf   : > { %3552 = vperm.xlu1 %6116, %v8104_v3   ;;  %v3079_v24 = vpop.permute.xlu1 %3078  ;;  %1968 = vperm.xlu0 %6135, %v7953_v48   ;;  %v3160_v39 = vmul.f32 %v3091_v6, %v9075_v15  ;;  %v9076_v48 = vld [vmem:[#allocation12_spill] sm:$0xff] }
 0x1c0   : > { %v3157_v46 = vmul.f32 %v3079_v24, %v9074_v19  ;;  %5690 = vmatmul.mubr.bf16.gmra.mrb[12].mxu0 %v3180_v17  ;;  %v9077_v17 = vld [vmem:[#allocation13_spill] sm:$0xff]  ;;  %v8125_v19 = vld [vmem:[%s8639_s4 + $0x68] sm:$0xff] }
 0x1c1   : > { %5722 = vmatpush3.bf16.msra.mxu0 %v6194_v37  ;;  %v3162_v6 = vmul.f32 %v3099_v49, %v9077_v17 }
 0x1c2   : > { %v3181_v59 = vpack.c.bf16 %v3158_v36, %v3157_v46  ;;  %v3131_v16 = vpop.permute.xlu0 %3130  ;;  %5723 = vmatprep.subr.bf16.mxu0 %v6195_v33  ;;  %v9078_v46 = vld [vmem:[#allocation94_spill] sm:$0xff] }
 0x1c3   : > { %6117 = vset.pattern.permute.xlu1 %v8980_v0  ;;  %v3087_v7 = vpop.permute.xlu1 %3086  ;;  %1980 = vperm.xlu0 %6135, %v8114_v44  }
 0x1c4   : > { %v3159_v61 = vmul.f32 %v3087_v7, %v9076_v48  ;;  %1920 = vperm.xlu1 %6117, %v7465_v32   ;;  %5693 = vmatprep.mubr.bf16.mxu0 %v3181_v59  ;;  %v9079_v32 = vld [vmem:[#allocation14_spill] sm:$0xff]  ;;  %v9083_v48 = vld [vmem:[#allocation76_spill] sm:$0xff] }
 0x1c5   : > { %5724 = vmatpush3.bf16.msra.mxu0 %v6195_v33  ;;  %v3164_v7 = vmul.f32 %v3107_v35, %v9079_v32  ;;  %v8143_v35 = vld [vmem:[%s8639_s4 + $0xe8] sm:$0xff] }
 0x1c6   : > { %v3182_v37 = vpack.c.bf16 %v3160_v39, %v3159_v61  ;;  %v3139_v36 = vpop.permute.xlu0 %3138  ;;  %v8132_v61 = vld [vmem:[%s8639_s4 + $0xf8] sm:$0xff]  ;;  %v9081_v39 = vld [vmem:[#allocation32_spill] sm:$0xff] }
 0x1c7   : > { %v3095_v24 = vpop.permute.xlu1 %3094  ;;  %1984 = vperm.xlu0 %6135, %v7631_v5   ;;  %v9080_v5 = vld [vmem:[#allocation73_spill] sm:$0xff] }
 0x1c8   : > { %v3161_v15 = vmul.f32 %v3095_v24, %v9078_v46  ;;  %1924 = vperm.xlu1 %6117, %v8125_v19   ;;  %5694 = vmatmul.mubr.bf16.gmra.mrb[16].mxu0 %v3182_v37  ;;  %v2000_v24 = vmul.f32 %v9081_v39, %v9080_v5  ;;  %v9082_v46 = vld [vmem:[#allocation15_spill] sm:$0xff]  ;;  %v9085_v39 = vmov 7  }
 0x1ca   : > { %v3183_v33 = vpack.c.bf16 %v3162_v6, %v3161_v15  ;;  %v9084_v15 = vld [vmem:[#allocation16_spill] sm:$0xff] }
 0x1cb   : > { %v3103_v59 = vpop.permute.xlu1 %3102  ;;  %v1873_v49 = vpop.permute.xlu0 %1872  ;;  %1996 = vperm.xlu0 %6135, %v8132_v61   ;;  %v3166_v6 = vmul.f32 %v3115_v1, %v9084_v15 }
 0x1cc   : > { %v3163_v17 = vmul.f32 %v3103_v59, %v9082_v46  ;;  %v1999_v50 = vmul.f32 %v1873_v49, %v9083_v48  ;;  %6118 = vset.pattern.permute.xlu1 %v9051_v47  ;;  %5697 = vmatprep.mubr.bf16.mxu0 %v3183_v33  ;;  %v9086_v59 = vld [vmem:[#allocation17_spill] sm:$0xff]  ;;  %v9087_v33 = vld [vmem:[#allocation48_spill] sm:$0xff] }
 0x1cd   : > { %3564 = vperm.xlu1 %6118, %v8143_v35   ;;  %v3168_v14 = vmul.f32 %v3123_v25, %v9087_v33  ;;  %v6204_v25 = vld [vmem:[%s8638_s3 + $0x200] sm:$0xff]  }
 0x1ce   : > { %v3184_v37 = vpack.c.bf16 %v3164_v7, %v3163_v17  ;;  %v2031_v32 = vpack.c.bf16 %v2000_v24, %v1999_v50  ;;  %v8157_v50 = vld [vmem:[%s8639_s4 + $0x78] sm:$0xff]  ;;  %5757 = vmatprep.subr.bf16.mxu0 %v6204_v25  ;;  %v9091_v33 = vld [vmem:[#allocation70_spill] sm:$0xff] }
 0x1cf   : > { %v3111_v42 = vpop.permute.xlu1 %3110  ;;  %6139 = vset.pattern.permute.xlu0 %v9085_v39 }
 0x1d0   : > { %v3165_v46 = vmul.f32 %v3111_v42, %v9086_v59  ;;  %5533 = vmatprep.mubr.bf16.mxu1 %v2031_v32  ;;  %5698 = vmatmul.mubr.bf16.gmra.mrb[20].mxu0 %v3184_v37  ;;  %v8149_v49 = vpop.permute.xlu0 %1880  ;;  %v9088_v42 = vld [vmem:[#allocation22_spill] sm:$0xff] }
 0x1d1   : > { %6119 = vset.pattern.permute.xlu1 %v8980_v0  ;;  %3946 = vperm.xlu0 %6139, %v7852_v20  }
 0x1d2   : > { %v3185_v11 = vpack.c.bf16 %v3166_v6, %v3165_v46  ;;  %1932 = vperm.xlu1 %6119, %v8157_v50   ;;  %v9089_v46 = vld [vmem:[#allocation69_spill] sm:$0xff] }
 0x1d3   : > { %v3119_v1 = vpop.permute.xlu1 %3118  ;;  %v3170_v7 = vmul.f32 %v3131_v16, %v9089_v46  ;;  %v9090_v6 = vld [vmem:[#allocation89_spill] sm:$0xff] }
 0x1d4   : > { %v3167_v17 = vmul.f32 %v3119_v1, %v9088_v42  ;;  %5701 = vmatprep.mubr.bf16.mxu0 %v3185_v11  ;;  %v8161_v32 = vpop.permute.xlu0 %1896 }
 0x1d5   : > { %3958 = vperm.xlu0 %6139, %v8057_v13   ;;  %v3172_v13 = vmul.f32 %v3139_v36, %v9080_v5  ;;  %v9093_v5 = vld [vmem:[#allocation20_spill] sm:$0xff] }
 0x1d6   : > { %v3186_v24 = vpack.c.bf16 %v3168_v14, %v3167_v17  ;;  %6120 = vset.pattern.permute.xlu1 %v9051_v47 }
 0x1d7   : > { %3568 = vperm.xlu1 %6120, %v9090_v6   ;;  %v3127_v37 = vpop.permute.xlu1 %3126 }
 0x1d8   : > { %v3169_v1 = vmul.f32 %v3127_v37, %v9091_v33  ;;  %5702 = vmatmul.mubr.bf16.gmra.mrb[24].mxu0 %v3186_v24  ;;  %v8171_v11 = vpop.permute.xlu0 %1912  ;;  %v9092_v24 = vld [vmem:[#allocation21_spill] sm:$0xff]  ;;  %v8183_v37 = vld [vmem:[%s8639_s4 + $0x88] sm:$0xff] }
 0x1d9   : > { %3966 = vperm.xlu0 %6139, %v8004_v22  }
 0x1da   : > { %v3187_v42 = vpack.c.bf16 %v3170_v7, %v3169_v1 }
 0x1db   : > { %6121 = vset.pattern.permute.xlu1 %v8980_v0  ;;  %v3135_v16 = vpop.permute.xlu1 %3134 }
 0x1dc   : > { %v3171_v14 = vmul.f32 %v3135_v16, %v9083_v48  ;;  %1936 = vperm.xlu1 %6121, %v7852_v20   ;;  %5705 = vmatprep.mubr.bf16.mxu0 %v3187_v42  ;;  %v6270_v42 = vld [vmem:[%s8639_s4 + $0x8] sm:$0xff]  ;;  %v9094_v16 = vld [vmem:[#allocation26_spill] sm:$0xff] }
 0x1dd   : > { %v3453_v47 = vpop.permute.xlu0 %3452  ;;  %3974 = vperm.xlu0 %6139, %v8092_v31  }
 0x1de   : > { %v3188_v17 = vpack.c.bf16 %v3172_v13, %v3171_v14  ;;  %v3576_v6 = vmul.f32 %v3453_v47, %v9092_v24  ;;  %v9095_v47 = vld [vmem:[#allocation27_spill] sm:$0xff] }
 0x1e0   : > { %1940 = vperm.xlu1 %6121, %v8183_v37   ;;  %v3449_v36 = vpop.permute.xlu1 %3448  ;;  %5706 = vmatmul.mubr.bf16.gmra.mrb[28].mxu0 %v3188_v17 }
 0x1e1   : > { %v3575_v48 = vmul.f32 %v3449_v36, %v9093_v5  ;;  %v3465_v7 = vpop.permute.xlu0 %3464  ;;  %3982 = vperm.xlu0 %6139, %v8069_v55   ;;  %v9096_v36 = vld [vmem:[#allocation29_spill] sm:$0xff] }
 0x1e2   : > { %v3579_v5 = vmul.f32 %v3465_v7, %v9096_v36  ;;  %v9098_v7 = vld [vmem:[#allocation35_spill] sm:$0xff] }
 0x1e3   : > { %v3607_v20 = vpack.c.bf16 %v3576_v6, %v3575_v48 }
 0x1e4   : > { %6123 = vset.pattern.permute.xlu1 %v9085_v39  ;;  %v3457_v31 = vpop.permute.xlu1 %3456 }
 0x1e5   : > { %3886 = vperm.xlu1 %6123, %v6270_v42   ;;  %5725 = vmatprep.mubr.bf16.mxu0 %v3607_v20  ;;  %v3473_v1 = vpop.permute.xlu0 %3472  ;;  %v3577_v14 = vmul.f32 %v3457_v31, %v9094_v16  ;;  %v9097_v20 = vld [vmem:[#allocation30_spill] sm:$0xff]  ;;  %v6271_v16 = vld [vmem:[%s8639_s4 + $0x10] sm:$0xff] }
 0x1e6   : > { %3990 = vperm.xlu0 %6139, %v8114_v44   ;;  %v6205_v44 = vld [vmem:[%s8638_s3 + $0x208] sm:$0xff]  }
 0x1e8   : > { %v3461_v13 = vpop.permute.xlu1 %3460 }
 0x1e9   : > { %v3578_v17 = vmul.f32 %v3461_v13, %v9095_v47  ;;  %6124 = vset.pattern.permute.xlu1 %v8980_v0  ;;  %v3481_v24 = vpop.permute.xlu0 %3480 }
 0x1ea   : > { %1944 = vperm.xlu1 %6124, %v7968_v54   ;;  %3998 = vperm.xlu0 %6139, %v8143_v35  }
 0x1eb   : > { %v3608_v6 = vpack.c.bf16 %v3578_v17, %v3577_v14  ;;  %v3581_v14 = vmul.f32 %v3473_v1, %v9098_v7  ;;  %v6206_v17 = vld [vmem:[%s8638_s3 + $0x210] sm:$0xff]   ;;  %v9101_v1 = vld [vmem:[#allocation39_spill] sm:$0xff] }
 0x1ec   : > { %v3469_v48 = vpop.permute.xlu1 %3468 }
 0x1ed   : > { %v3580_v42 = vmul.f32 %v3469_v48, %v9097_v20  ;;  %5726 = vmatmul.mubr.bf16.vlgmr.msra.gmra.mrb[0].mxu0 %v3608_v6  ;;  %v3489_v31 = vpop.permute.xlu0 %3488  ;;  %v9099_v6 = vld [vmem:[#allocation36_spill] sm:$0xff] }
 0x1ee   : > { %6125 = vset.pattern.permute.xlu1 %v9085_v39  ;;  %4006 = vperm.xlu0 %6139, %v8132_v61   ;;  %v9100_v61 = vld [vmem:[#allocation38_spill] sm:$0xff] }
 0x1ef   : > { %v3609_v13 = vpack.c.bf16 %v3580_v42, %v3579_v5  ;;  %3890 = vperm.xlu1 %6125, %v6271_v16   ;;  %5758 = vmatpush3.bf16.msra.mxu0 %v6204_v25  ;;  %v3583_v5 = vmul.f32 %v3481_v24, %v9100_v61  ;;  %v6207_v25 = vld [vmem:[%s8638_s3 + $0x218] sm:$0xff]   ;;  %v6208_v24 = vld [vmem:[%s8638_s3 + $0x220] sm:$0xff]  }
 0x1f0   : > { %v3477_v47 = vpop.permute.xlu1 %3476  ;;  %5759 = vmatprep.subr.bf16.mxu0 %v6205_v44 }
 0x1f1   : > { %v3582_v36 = vmul.f32 %v3477_v47, %v9099_v6  ;;  %5729 = vmatprep.mubr.bf16.mxu0 %v3609_v13  ;;  %v3497_v42 = vpop.permute.xlu0 %3496  ;;  %v9102_v13 = vld [vmem:[#allocation40_spill] sm:$0xff] }
 0x1f3   : > { %v3610_v48 = vpack.c.bf16 %v3582_v36, %v3581_v14  ;;  %3894 = vperm.xlu1 %6125, %v7947_v26   ;;  %5760 = vmatpush3.bf16.msra.mxu0 %v6205_v44  ;;  %v3585_v14 = vmul.f32 %v3489_v31, %v9102_v13  ;;  %v9103_v44 = vld [vmem:[#allocation41_spill] sm:$0xff] }
 0x1f4   : > { %v3485_v20 = vpop.permute.xlu1 %3484  ;;  %5761 = vmatprep.subr.bf16.mxu0 %v6206_v17  ;;  %v6211_v13 = vld [vmem:[%s8638_s3 + $0x238] sm:$0xff]  }
 0x1f5   : > { %v3584_v16 = vmul.f32 %v3485_v20, %v9101_v1  ;;  %5730 = vmatmul.mubr.bf16.gmra.mrb[4].mxu0 %v3610_v48  ;;  %v3505_v6 = vpop.permute.xlu0 %3504  ;;  %v9104_v48 = vld [vmem:[#allocation42_spill] sm:$0xff] }
 0x1f6   : > { %v3587_v61 = vmul.f32 %v3497_v42, %v9104_v48  ;;  %v3589_v20 = vmul.f32 %v3505_v6, %v7024_v62 }
 0x1f7   : > { %v3611_v7 = vpack.c.bf16 %v3584_v16, %v3583_v5  ;;  %6126 = vset.pattern.permute.xlu1 %v8980_v0  ;;  %5762 = vmatpush3.bf16.msra.mxu0 %v6206_v17 }
 0x1f8   : > { %1956 = vperm.xlu1 %6126, %v8004_v22   ;;  %v3493_v26 = vpop.permute.xlu1 %3492  ;;  %5763 = vmatprep.subr.bf16.mxu0 %v6207_v25  ;;  %v6209_v22 = vld [vmem:[%s8638_s3 + $0x228] sm:$0xff]  }
 0x1f9   : > { %v3586_v47 = vmul.f32 %v3493_v26, %v9103_v44  ;;  %5733 = vmatprep.mubr.bf16.mxu0 %v3611_v7  ;;  %v3513_v42 = vpop.permute.xlu0 %3512  ;;  %v2001_v44 = vmul.f32 %v8149_v49, %v9057_v21  ;;  %v6273_v21 = vld [vmem:[%s8638_s3 + $0x108] sm:$0xff]   ;;  %v6274_v49 = vld [vmem:[%s8638_s3 + $0x110] sm:$0xff]  }
 0x1fb   : > { %v3612_v36 = vpack.c.bf16 %v3586_v47, %v3585_v14  ;;  %5764 = vmatpush3.bf16.msra.mxu0 %v6207_v25  ;;  %v6210_v25 = vld [vmem:[%s8638_s3 + $0x230] sm:$0xff]  }
 0x1fc   : > { %6127 = vset.pattern.permute.xlu1 %v9085_v39  ;;  %v3501_v31 = vpop.permute.xlu1 %3500  ;;  %5765 = vmatprep.subr.bf16.mxu0 %v6208_v24 }
 0x1fd   : > { %v3588_v17 = vmul.f32 %v3501_v31, %v9007_v43  ;;  %3902 = vperm.xlu1 %6127, %v7990_v29   ;;  %5734 = vmatmul.mubr.bf16.gmra.mrb[8].mxu0 %v3612_v36  ;;  %v3591_v29 = vmul.f32 %v3513_v42, %v9017_v52  ;;  %v3525_v36 = vpop.permute.xlu0 %3524 }
 0x1ff   : > { %v3613_v5 = vpack.c.bf16 %v3588_v17, %v3587_v61  ;;  %5766 = vmatpush3.bf16.msra.mxu0 %v6208_v24  ;;  %v6272_v24 = vld [vmem:[%s8639_s4 + $0x30] sm:$0xff]  ;;  %v3594_v61 = vmul.f32 %v3525_v36, %v7072_v4 }
 0x200   : > { %v3509_v1 = vpop.permute.xlu1 %3508  ;;  %5767 = vmatprep.subr.bf16.mxu0 %v6209_v22 }
 0x201   : > { %v3590_v16 = vmul.f32 %v3509_v1, %v9014_v9  ;;  %6128 = vset.pattern.permute.xlu1 %v8980_v0  ;;  %5737 = vmatprep.mubr.bf16.mxu0 %v3613_v5 }
 0x202   : > { %1960 = vperm.xlu1 %6128, %v8028_v57  }
 0x203   : > { %v3614_v43 = vpack.c.bf16 %v3590_v16, %v3589_v20  ;;  %5768 = vmatpush3.bf16.msra.mxu0 %v6209_v22  ;;  %v6275_v20 = vld [vmem:[%s8638_s3 + $0x118] sm:$0xff]  }
 0x204   : > { %v3517_v7 = vpop.permute.xlu1 %3516  ;;  %5769 = vmatprep.subr.bf16.mxu0 %v6210_v25 }
 0x205   : > { %v3592_v14 = vmul.f32 %v3517_v7, %v9018_v40  ;;  %5738 = vmatmul.mubr.bf16.gmra.mrb[12].mxu0 %v3614_v43  ;;  %v2005_v7 = vmul.f32 %v8161_v32, %v9062_v27 }
 0x206   : > { %6129 = vset.pattern.permute.xlu1 %v9085_v39 }
 0x207   : > { %v3615_v26 = vpack.c.bf16 %v3592_v14, %v3591_v29  ;;  %3906 = vperm.xlu1 %6129, %v6272_v24   ;;  %5770 = vmatpush3.bf16.msra.mxu0 %v6210_v25  ;;  %v6277_v29 = vld [vmem:[%s8639_s4 + $0x50] sm:$0xff] }
 0x208   : > { %5771 = vmatprep.subr.bf16.mxu0 %v6211_v13 }
 0x209   : > { %v1885_v47 = vpop.permute.xlu1 %1884  ;;  %5741 = vmatprep.mubr.bf16.mxu0 %v3615_v26 }
 0x20a   : > { %v2002_v6 = vmul.f32 %v1885_v47, %v9058_v41  ;;  %v6279_v47 = vld [vmem:[%s8638_s3 + $0x130] sm:$0xff]  }
 0x20b   : > { %3910 = vperm.xlu1 %6129, %v8015_v51   ;;  %5772 = vmatpush3.bf16.msra.mxu0 %v6211_v13  ;;  %v6278_v13 = vld [vmem:[%s8638_s3 + $0x128] sm:$0xff]  }
 0x20c   : > { %v2032_v48 = vpack.c.bf16 %v2002_v6, %v2001_v44 }
 0x20e   : > { %v3521_v31 = vpop.permute.xlu1 %3520  ;;  %5534 = vmatmul.mubr.bf16.vlgmr.msra.gmra.mrb[0].mxu1 %v2032_v48 }
 0x20f   : > { %v3593_v22 = vmul.f32 %v3521_v31, %v7070_v12  ;;  %6130 = vset.pattern.permute.xlu1 %v8980_v0  ;;  %5813 = vmatpush3.bf16.msra.mxu1 %v7983_v56  ;;  %v3529_v56 = vpop.permute.xlu0 %3528 }
 0x210   : > { %1972 = vperm.xlu1 %6130, %v8069_v55   ;;  %5806 = vmatprep.subr.bf16.mxu1 %v6273_v21 }
 0x211   : > { %v3616_v51 = vpack.c.bf16 %v3594_v61, %v3593_v22 }
 0x213   : > { %v1889_v41 = vpop.permute.xlu1 %1888  ;;  %5742 = vmatmul.mubr.bf16.gmra.mrb[16].mxu0 %v3616_v51  ;;  %5814 = vmatpush3.bf16.msra.mxu1 %v6273_v21  ;;  %v3541_v1 = vpop.permute.xlu0 %3540  ;;  %v6281_v51 = vld [vmem:[%s8639_s4 + $0xf0] sm:$0xff] }
 0x214   : > { %6131 = vset.pattern.permute.xlu1 %v9085_v39  ;;  %5807 = vmatprep.subr.bf16.mxu1 %v6274_v49  ;;  %v2003_v17 = vmul.f32 %v1889_v41, %v9060_v10  ;;  %v3598_v27 = vmul.f32 %v3541_v1, %v7110_v18 }
 0x215   : > { %3918 = vperm.xlu1 %6131, %v8051_v28   ;;  %v3595_v28 = vmul.f32 %v3529_v56, %v9026_v8 }
 0x217   : > { %v1893_v55 = vpop.permute.xlu1 %1892  ;;  %5815 = vmatpush3.bf16.msra.mxu1 %v6274_v49  ;;  %v3545_v16 = vpop.permute.xlu0 %3544 }
 0x218   : > { %v2004_v5 = vmul.f32 %v1893_v55, %v9059_v63  ;;  %5808 = vmatprep.subr.bf16.mxu1 %v6275_v20  ;;  %v6276_v63 = vld [vmem:[%s8638_s3 + $0x120] sm:$0xff]   ;;  %v3599_v41 = vmul.f32 %v3545_v16, %v9034_v23  ;;  %v9109_v16 = vld [vmem:[#allocation51_spill] sm:$0xff] }
 0x219   : > { %6132 = vset.pattern.permute.xlu1 %v8980_v0 }
 0x21a   : > { %v2033_v42 = vpack.c.bf16 %v2004_v5, %v2003_v17  ;;  %1976 = vperm.xlu1 %6132, %v8104_v3   ;;  %v9106_v17 = vld [vmem:[#allocation86_spill] sm:$0xff] }
 0x21b   : > { %5816 = vmatpush3.bf16.msra.mxu1 %v6275_v20  ;;  %v3557_v24 = vpop.permute.xlu0 %3556 }
 0x21c   : > { %v3533_v25 = vpop.permute.xlu1 %3532  ;;  %5537 = vmatprep.mubr.bf16.mxu1 %v2033_v42  ;;  %5809 = vmatprep.subr.bf16.mxu1 %v6276_v63  ;;  %v9107_v42 = vld [vmem:[#allocation28_spill] sm:$0xff] }
 0x21d   : > { %v3596_v10 = vmul.f32 %v3533_v25, %v9027_v38 }
 0x21e   : > { %6133 = vset.pattern.permute.xlu1 %v9085_v39 }
 0x21f   : > { %v3617_v43 = vpack.c.bf16 %v3596_v10, %v3595_v28  ;;  %3922 = vperm.xlu1 %6133, %v6277_v29   ;;  %5817 = vmatpush3.bf16.msra.mxu1 %v6276_v63  ;;  %v3561_v36 = vpop.permute.xlu0 %3560  ;;  %v3602_v28 = vmul.f32 %v3557_v24, %v9107_v42  ;;  %v9110_v29 = vld [vmem:[#allocation4_spill] sm:$0xff]  ;;  %v9112_v24 = vld [vmem:[#allocation33_spill] sm:$0xff] }
 0x220   : > { %5810 = vmatprep.subr.bf16.mxu1 %v6278_v13 }
 0x221   : > { %v1901_v14 = vpop.permute.xlu1 %1900  ;;  %5745 = vmatprep.mubr.bf16.mxu0 %v3617_v43 }
 0x222   : > { %v2006_v26 = vmul.f32 %v1901_v14, %v9061_v60  ;;  %v6280_v60 = vld [vmem:[%s8638_s3 + $0x138] sm:$0xff]  }
 0x223   : > { %3926 = vperm.xlu1 %6133, %v8083_v53   ;;  %5818 = vmatpush3.bf16.msra.mxu1 %v6278_v13  ;;  %v3573_v31 = vpop.permute.xlu0 %3572  ;;  %v9111_v13 = vld [vmem:[#allocation3_spill] sm:$0xff] }
 0x224   : > { %v2034_v44 = vpack.c.bf16 %v2006_v26, %v2005_v7  ;;  %5811 = vmatprep.subr.bf16.mxu1 %v6279_v47 }
 0x226   : > { %v3537_v32 = vpop.permute.xlu1 %3536  ;;  %5538 = vmatmul.mubr.bf16.gmra.mrb[4].mxu1 %v2034_v44  ;;  %v3603_v44 = vmul.f32 %v3561_v36, %v9112_v24 }
 0x227   : > { %v3597_v6 = vmul.f32 %v3537_v32, %v7107_v45  ;;  %6134 = vset.pattern.permute.xlu1 %v8980_v0  ;;  %5819 = vmatpush3.bf16.msra.mxu1 %v6279_v47  ;;  %v3883_v56 = vpop.permute.xlu0 %3882  ;;  %v9113_v47 = vld [vmem:[#allocation34_spill] sm:$0xff] }
 0x228   : > { %1988 = vperm.xlu1 %6134, %v8143_v35   ;;  %5812 = vmatprep.subr.bf16.mxu1 %v6280_v60 }
 0x229   : > { %v3618_v53 = vpack.c.bf16 %v3598_v27, %v3597_v6  ;;  %v9114_v6 = vld [vmem:[#allocation66_spill] sm:$0xff] }
 0x22b   : > { %v1905_v48 = vpop.permute.xlu1 %1904  ;;  %5746 = vmatmul.mubr.bf16.gmra.mrb[20].mxu0 %v3618_v53  ;;  %5820 = vmatpush3.bf16.msra.mxu1 %v6280_v60  ;;  %v8315_v20 = vpop.permute.xlu0 %3898  ;;  %v9115_v60 = vld [vmem:[#allocation44_spill] sm:$0xff] }
 0x22c   : > { %6136 = vset.pattern.permute.xlu1 %v9085_v39  ;;  %v2007_v22 = vmul.f32 %v1905_v48, %v9064_v58 }
 0x22d   : > { %3934 = vperm.xlu1 %6136, %v8125_v19  }
 0x22f   : > { %v1909_v61 = vpop.permute.xlu1 %1908  ;;  %v8320_v10 = vpop.permute.xlu0 %3914 }
 0x230   : > { %v2008_v35 = vmul.f32 %v1909_v61, %v9063_v34  ;;  %v9105_v34 = vld [vmem:[#allocation87_spill] sm:$0xff]  ;;  %v9116_v61 = vld [vmem:[#allocation5_spill] sm:$0xff] }
 0x231   : > { %6137 = vset.pattern.permute.xlu1 %v8980_v0  ;;  %v2009_v0 = vmul.f32 %v8171_v11, %v9105_v34 }
 0x232   : > { %v2035_v21 = vpack.c.bf16 %v2008_v35, %v2007_v22  ;;  %1992 = vperm.xlu1 %6137, %v6281_v51  }
 0x233   : > { %v8324_v43 = vpop.permute.xlu0 %3930 }
 0x234   : > { %v3549_v49 = vpop.permute.xlu1 %3548  ;;  %5541 = vmatprep.mubr.bf16.mxu1 %v2035_v21 }
 0x235   : > { %v3600_v19 = vmul.f32 %v3549_v49, %v9035_v30 }
 0x236   : > { %6138 = vset.pattern.permute.xlu1 %v9085_v39  ;;  %v9108_v39 = vld [vmem:[#allocation71_spill] sm:$0xff] }
 0x237   : > { %v3619_v58 = vpack.c.bf16 %v3600_v19, %v3599_v41  ;;  %3938 = vperm.xlu1 %6138, %v7810_v2   ;;  %v1929_v27 = vpop.permute.xlu0 %1928  ;;  %v9118_v41 = vld [vmem:[#allocation18_spill] sm:$0xff] }
 0x238   : > { %v2013_v53 = vmul.f32 %v1929_v27, %v9115_v60  ;;  %v6282_v19 = vld [vmem:[%s8639_s4 + $0xe0] sm:$0xff]  ;;  %v9126_v27 = vld [vmem:[#allocation59_spill] sm:$0xff]  ;;  %v9127_v60 = vld [vmem:[#allocation12_spill] sm:$0xff] }
 0x239   : > { %v1917_v55 = vpop.permute.xlu1 %1916  ;;  %5749 = vmatprep.mubr.bf16.mxu0 %v3619_v58 }
 0x23a   : > { %v2010_v5 = vmul.f32 %v1917_v55, %v9106_v17  ;;  %v9119_v55 = vld [vmem:[#allocation8_spill] sm:$0xff] }
 0x23b   : > { %3942 = vperm.xlu1 %6138, %v8157_v50  }
 0x23c   : > { %v2036_v1 = vpack.c.bf16 %v2010_v5, %v2009_v0 }
 0x23e   : > { %v3553_v25 = vpop.permute.xlu1 %3552  ;;  %5542 = vmatmul.mubr.bf16.gmra.mrb[8].mxu1 %v2036_v1 }
 0x23f   : > { %v3601_v63 = vmul.f32 %v3553_v25, %v9108_v39  ;;  %3950 = vperm.xlu1 %6138, %v8183_v37  }
 0x241   : > { %v3620_v2 = vpack.c.bf16 %v3602_v28, %v3601_v63  ;;  %v9121_v28 = vld [vmem:[#allocation50_spill] sm:$0xff]  ;;  %v9122_v63 = vld [vmem:[#allocation53_spill] sm:$0xff] }
 0x242   : > { %v4009_v25 = vmul.f32 %v3883_v56, %v9121_v28 }
 0x243   : > { %3954 = vperm.xlu1 %6138, %v7968_v54   ;;  %v1921_v11 = vpop.permute.xlu1 %1920  ;;  %5750 = vmatmul.mubr.bf16.gmra.mrb[24].mxu0 %v3620_v2 }
 0x244   : > { %v2011_v7 = vmul.f32 %v1921_v11, %v9110_v29  ;;  %v1949_v11 = vpop.permute.xlu0 %1948 }
 0x247   : > { %3962 = vperm.xlu1 %6138, %v9109_v16   ;;  %v1925_v50 = vpop.permute.xlu1 %1924 }
 0x248   : > { %v2012_v14 = vmul.f32 %v1925_v50, %v9111_v13  ;;  %v9123_v50 = vld [vmem:[#allocation9_spill] sm:$0xff] }
 0x249   : > { %v2018_v29 = vmul.f32 %v1949_v11, %v9123_v50 }
 0x24a   : > { %v2037_v26 = vpack.c.bf16 %v2012_v14, %v2011_v7 }
 0x24b   : > { %3970 = vperm.xlu1 %6138, %v8028_v57   ;;  %v9117_v57 = vld [vmem:[#allocation19_spill] sm:$0xff] }
 0x24c   : > { %v3565_v37 = vpop.permute.xlu1 %3564  ;;  %5545 = vmatprep.mubr.bf16.mxu1 %v2037_v26  ;;  %v3606_v21 = vmul.f32 %v3573_v31, %v9117_v57 }
 0x24d   : > { %v3604_v54 = vmul.f32 %v3565_v37, %v9113_v47  ;;  %v9125_v37 = vld [vmem:[#allocation57_spill] sm:$0xff] }
 0x24f   : > { %v3621_v32 = vpack.c.bf16 %v3604_v54, %v3603_v44  ;;  %3978 = vperm.xlu1 %6138, %v9114_v6  }
 0x251   : > { %v1933_v48 = vpop.permute.xlu1 %1932  ;;  %5753 = vmatprep.mubr.bf16.mxu0 %v3621_v32  ;;  %v1953_v32 = vpop.permute.xlu0 %1952 }
 0x252   : > { %v2014_v22 = vmul.f32 %v1933_v48, %v9116_v61  ;;  %v9128_v61 = vld [vmem:[#allocation11_spill] sm:$0xff] }
 0x253   : > { %3986 = vperm.xlu1 %6138, %v8104_v3   ;;  %v9120_v3 = vld [vmem:[#allocation7_spill] sm:$0xff] }
 0x254   : > { %v2038_v35 = vpack.c.bf16 %v2014_v22, %v2013_v53  ;;  %v2019_v53 = vmul.f32 %v1953_v32, %v9127_v60 }
 0x256   : > { %v3569_v36 = vpop.permute.xlu1 %3568  ;;  %5546 = vmatmul.mubr.bf16.gmra.mrb[12].mxu1 %v2038_v35 }
 0x257   : > { %v3605_v49 = vmul.f32 %v3569_v36, %v9118_v41  ;;  %3994 = vperm.xlu1 %6138, %v6282_v19   ;;  %v9129_v36 = vld [vmem:[#allocation63_spill] sm:$0xff]  ;;  %v1965_v19 = vpop.permute.xlu0 %1964 }
 0x258   : > { %v4013_v57 = vmul.f32 %v8315_v20, %v9129_v36  ;;  %v9130_v41 = vld [vmem:[#allocation95_spill] sm:$0xff]  ;;  %v9140_v36 = vld [vmem:[#allocation2_spill] sm:$0xff] }
 0x259   : > { %v3622_v58 = vpack.c.bf16 %v3606_v21, %v3605_v49 }
 0x25b   : > { %4002 = vperm.xlu1 %6138, %v6281_v51   ;;  %v1937_v34 = vpop.permute.xlu1 %1936  ;;  %5754 = vmatmul.mubr.bf16.gmra.mrb[28].mxu0 %v3622_v58  ;;  %v9124_v51 = vld [vmem:[#allocation92_spill] sm:$0xff] }
 0x25c   : > { %v2015_v17 = vmul.f32 %v1937_v34, %v9119_v55  ;;  %v9131_v34 = vld [vmem:[#allocation13_spill] sm:$0xff] }
 0x25f   : > { %v1941_v0 = vpop.permute.xlu1 %1940 }
 0x260   : > { %v2016_v5 = vmul.f32 %v1941_v0, %v9120_v3  ;;  %v2022_v0 = vmul.f32 %v1965_v19, %v9131_v34 }
 0x262   : > { %v2039_v1 = vpack.c.bf16 %v2016_v5, %v2015_v17  ;;  %v9132_v17 = vld [vmem:[#allocation94_spill] sm:$0xff] }
 0x264   : > { %v3887_v31 = vpop.permute.xlu1 %3886  ;;  %5549 = vmatprep.mubr.bf16.mxu1 %v2039_v1 }
 0x265   : > { %v4010_v2 = vmul.f32 %v3887_v31, %v9122_v63  ;;  %v9134_v63 = vld [vmem:[#allocation88_spill] sm:$0xff] }
 0x267   : > { %v4041_v16 = vpack.c.bf16 %v4010_v2, %v4009_v25  ;;  %v9133_v25 = vld [vmem:[#allocation83_spill] sm:$0xff]  ;;  %v1969_v2 = vpop.permute.xlu0 %1968 }
 0x269   : > { %v1945_v7 = vpop.permute.xlu1 %1944  ;;  %5773 = vmatprep.mubr.bf16.mxu0 %v4041_v16  ;;  %v9135_v16 = vld [vmem:[#allocation15_spill] sm:$0xff] }
 0x26a   : > { %v2017_v13 = vmul.f32 %v1945_v7, %v9124_v51  ;;  %v2023_v50 = vmul.f32 %v1969_v2, %v9135_v16  ;;  %v9136_v7 = vld [vmem:[#allocation14_spill] sm:$0xff] }
 0x26c   : > { %v2040_v14 = vpack.c.bf16 %v2018_v29, %v2017_v13 }
 0x26e   : > { %v3891_v26 = vpop.permute.xlu1 %3890  ;;  %5550 = vmatmul.mubr.bf16.gmra.mrb[16].mxu1 %v2040_v14 }
 0x26f   : > { %v4011_v54 = vmul.f32 %v3891_v26, %v9125_v37  ;;  %v9137_v26 = vld [vmem:[#allocation96_spill] sm:$0xff]  ;;  %v9138_v37 = vld [vmem:[#allocation97_spill] sm:$0xff] }
 0x272   : > { %v3895_v44 = vpop.permute.xlu1 %3894 }
 0x273   : > { %v4012_v56 = vmul.f32 %v3895_v44, %v9126_v27  ;;  %v4017_v44 = vmul.f32 %v8320_v10, %v9137_v26  ;;  %v1981_v27 = vpop.permute.xlu0 %1980 }
 0x274   : > { %v2026_v32 = vmul.f32 %v1981_v27, %v9084_v15 }
 0x275   : > { %v4042_v6 = vpack.c.bf16 %v4012_v56, %v4011_v54 }
 0x277   : > { %v1957_v48 = vpop.permute.xlu1 %1956  ;;  %5774 = vmatmul.mubr.bf16.vlgmr.msra.gmra.mrb[0].mxu0 %v4042_v6 }
 0x278   : > { %v2020_v22 = vmul.f32 %v1957_v48, %v9128_v61 }
 0x27a   : > { %v2041_v35 = vpack.c.bf16 %v2020_v22, %v2019_v53  ;;  %v9139_v22 = vld [vmem:[#allocation90_spill] sm:$0xff] }
 0x27c   : > { %v3903_v21 = vpop.permute.xlu1 %3902  ;;  %5553 = vmatprep.mubr.bf16.mxu1 %v2041_v35 }
 0x27d   : > { %v4014_v49 = vmul.f32 %v3903_v21, %v9130_v41  ;;  %v1985_v21 = vpop.permute.xlu0 %1984 }
 0x27f   : > { %v4043_v58 = vpack.c.bf16 %v4014_v49, %v4013_v57  ;;  %v9141_v49 = vld [vmem:[#allocation22_spill] sm:$0xff] }
 0x280   : > { %v2027_v19 = vmul.f32 %v1985_v21, %v9141_v49  ;;  %v9153_v21 = vld [vmem:[#allocation10_spill] sm:$0xff] }
 0x281   : > { %v1961_v55 = vpop.permute.xlu1 %1960  ;;  %5777 = vmatprep.mubr.bf16.mxu0 %v4043_v58  ;;  %v9142_v58 = vld [vmem:[#allocation48_spill] sm:$0xff]  ;;  %v1997_v34 = vpop.permute.xlu0 %1996 }
 0x282   : > { %v2021_v3 = vmul.f32 %v1961_v55, %v9132_v17 }
 0x284   : > { %v2042_v5 = vpack.c.bf16 %v2022_v0, %v2021_v3  ;;  %v9144_v3 = vld [vmem:[#allocation98_spill] sm:$0xff] }
 0x286   : > { %v3907_v1 = vpop.permute.xlu1 %3906  ;;  %5554 = vmatmul.mubr.bf16.gmra.mrb[20].mxu1 %v2042_v5 }
 0x287   : > { %v4015_v31 = vmul.f32 %v3907_v1, %v9133_v25  ;;  %v3947_v1 = vpop.permute.xlu0 %3946 }
 0x28a   : > { %v3911_v28 = vpop.permute.xlu1 %3910 }
 0x28b   : > { %v4016_v20 = vmul.f32 %v3911_v28, %v9134_v63  ;;  %v3959_v2 = vpop.permute.xlu0 %3958 }
 0x28d   : > { %v4044_v11 = vpack.c.bf16 %v4016_v20, %v4015_v31  ;;  %v2030_v31 = vmul.f32 %v1997_v34, %v9089_v46  ;;  %v2313_v20 = vpack.c.bf16 %v9014_v9, %v7024_v62  ;;  %v9147_v46 = vld [vmem:[#allocation52_spill] sm:$0xff] }
 0x28e   : > { %v4025_v26 = vmul.f32 %v3947_v1, %v9147_v46  ;;  %v9158_v1 = vld [vmem:[#allocation54_spill] sm:$0xff] }
 0x28f   : > { %v1973_v29 = vpop.permute.xlu1 %1972  ;;  %5778 = vmatmul.mubr.bf16.gmra.mrb[4].mxu0 %v4044_v11 }
 0x290   : > { %v2024_v51 = vmul.f32 %v1973_v29, %v9136_v7  ;;  %v2314_v29 = vpack.c.bf16 %v9018_v40, %v9017_v52  ;;  %v9145_v7 = vld [vmem:[#allocation68_spill] sm:$0xff]  ;;  %v2316_v52 = vpack.c.bf16 %v9027_v38, %v9026_v8  ;;  %v9149_v40 = vld [vmem:[#allocation55_spill] sm:$0xff]  ;;  %v2318_v38 = vpack.c.bf16 %v9035_v30, %v9034_v23 }
 0x292   : > { %v2043_v13 = vpack.c.bf16 %v2024_v51, %v2023_v50  ;;  %v3967_v50 = vpop.permute.xlu0 %3966 }
 0x294   : > { %v3919_v14 = vpop.permute.xlu1 %3918  ;;  %5557 = vmatprep.mubr.bf16.mxu1 %v2043_v13  ;;  %v9146_v13 = vld [vmem:[#allocation45_spill] sm:$0xff] }
 0x295   : > { %v4018_v54 = vmul.f32 %v3919_v14, %v9138_v37 }
 0x297   : > { %v4045_v56 = vpack.c.bf16 %v4018_v54, %v4017_v44  ;;  %v9148_v44 = vld [vmem:[#allocation93_spill] sm:$0xff]  ;;  %v3975_v54 = vpop.permute.xlu0 %3974 }
 0x299   : > { %v1977_v6 = vpop.permute.xlu1 %1976  ;;  %5781 = vmatprep.mubr.bf16.mxu0 %v4045_v56 }
 0x29a   : > { %v2025_v60 = vmul.f32 %v1977_v6, %v9086_v59  ;;  %v9143_v59 = vld [vmem:[#allocation43_spill] sm:$0xff]  ;;  %v9150_v6 = vld [vmem:[#allocation6_spill] sm:$0xff] }
 0x29b   : > { %v4021_v17 = vmul.f32 %v8324_v43, %v9143_v59 }
 0x29c   : > { %v2044_v53 = vpack.c.bf16 %v2026_v32, %v2025_v60  ;;  %v4028_v32 = vmul.f32 %v3959_v2, %v9149_v40 }
 0x29e   : > { %v3923_v48 = vpop.permute.xlu1 %3922  ;;  %5558 = vmatmul.mubr.bf16.gmra.mrb[24].mxu1 %v2044_v53  ;;  %v3983_v53 = vpop.permute.xlu0 %3982 }
 0x29f   : > { %v4019_v35 = vmul.f32 %v3923_v48, %v9139_v22 }
 0x2a2   : > { %v3927_v61 = vpop.permute.xlu1 %3926 }
 0x2a3   : > { %v4020_v57 = vmul.f32 %v3927_v61, %v9140_v36  ;;  %v9151_v61 = vld [vmem:[#allocation47_spill] sm:$0xff] }
 0x2a4   : > { %v4030_v22 = vmul.f32 %v3967_v50, %v9151_v61  ;;  %v9161_v50 = vld [vmem:[#allocation25_spill] sm:$0xff] }
 0x2a5   : > { %v4046_v10 = vpack.c.bf16 %v4020_v57, %v4019_v35  ;;  %v9152_v35 = vld [vmem:[#allocation56_spill] sm:$0xff] }
 0x2a7   : > { %v1989_v41 = vpop.permute.xlu1 %1988  ;;  %5782 = vmatmul.mubr.bf16.gmra.mrb[8].mxu0 %v4046_v10  ;;  %v4032_v10 = vmul.f32 %v3975_v54, %v9153_v21 }
 0x2a8   : > { %v2028_v15 = vmul.f32 %v1989_v41, %v9142_v58  ;;  %v9154_v41 = vld [vmem:[#allocation49_spill] sm:$0xff] }
 0x2aa   : > { %v2045_v0 = vpack.c.bf16 %v2028_v15, %v2027_v19  ;;  %v9155_v15 = vld [vmem:[#allocation62_spill] sm:$0xff] }
 0x2ab   : > { %v4034_v34 = vmul.f32 %v3983_v53, %v9155_v15 }
 0x2ac   : > { %v3935_v55 = vpop.permute.xlu1 %3934  ;;  %5561 = vmatprep.mubr.bf16.mxu1 %v2045_v0  ;;  %v9156_v0 = vld [vmem:[#allocation61_spill] sm:$0xff] }
 0x2ad   : > { %v4022_v5 = vmul.f32 %v3935_v55, %v9144_v3  ;;  %v9157_v3 = vld [vmem:[#allocation37_spill] sm:$0xff] }
 0x2af   : > { %v4047_v28 = vpack.c.bf16 %v4022_v5, %v4021_v17  ;;  %v2320_v17 = vpack.c.bf16 %v9113_v47, %v9112_v24 }
 0x2b1   : > { %v1993_v25 = vpop.permute.xlu1 %1992  ;;  %5785 = vmatprep.mubr.bf16.mxu0 %v4047_v28 }
 0x2b2   : > { %v2029_v63 = vmul.f32 %v1993_v25, %v9091_v33  ;;  %v2315_v33 = vpack.c.bf16 %v7072_v4, %v7070_v12  ;;  %v2317_v12 = vpack.c.bf16 %v7110_v18, %v7107_v45  ;;  %v2319_v45 = vpack.c.bf16 %v9107_v42, %v9108_v39  ;;  %v3991_v18 = vpop.permute.xlu0 %3990  ;;  %v9159_v25 = vld [vmem:[#allocation24_spill] sm:$0xff] }
 0x2b3   : > { %v4036_v5 = vmul.f32 %v3991_v18, %v9157_v3 }
 0x2b4   : > { %v2046_v11 = vpack.c.bf16 %v2030_v31, %v2029_v63  ;;  %v9160_v63 = vld [vmem:[#allocation23_spill] sm:$0xff] }
 0x2b6   : > { %v3939_v16 = vpop.permute.xlu1 %3938  ;;  %5562 = vmatmul.mubr.bf16.gmra.mrb[28].mxu1 %v2046_v11  ;;  %v3999_v23 = vpop.permute.xlu0 %3998 }
 0x2b7   : > { %5597 = vmatprep.mubr.bf16.mxu1 %v2313_v20  ;;  %v4023_v51 = vmul.f32 %v3939_v16, %v9145_v7  ;;  %v4038_v31 = vmul.f32 %v3999_v23, %v9159_v25 }
 0x2ba   : > { %v3943_v43 = vpop.permute.xlu1 %3942  ;;  %v4007_v2 = vpop.permute.xlu0 %4006 }
 0x2bb   : > { %v4024_v14 = vmul.f32 %v3943_v43, %v9146_v13  ;;  %v4040_v43 = vmul.f32 %v4007_v2, %v9161_v50 }
 0x2bd   : > { %v4048_v62 = vpack.c.bf16 %v4024_v14, %v4023_v51 }
 0x2be   : > { %v3951_v9 = vpop.permute.xlu1 %3950  ;;  %5598 = vmatmul.mubr.bf16.vlgmr.msra.gmra.mrb[16].mxu1 %v2314_v29  ;;  %v9162_v29 = vld [vmem:[#allocation31_spill] sm:$0xff] }
 0x2bf   : > { %v4026_v37 = vmul.f32 %v3951_v9, %v9148_v44  ;;  %5786 = vmatmul.mubr.bf16.gmra.mrb[12].mxu0 %v4048_v62  ;;  %5601 = vmatprep.mubr.bf16.mxu1 %v2315_v33 }
 0x2c1   : > { %v4049_v27 = vpack.c.bf16 %v4026_v37, %v4025_v26 }
 0x2c2   : > { %v3955_v56 = vpop.permute.xlu1 %3954 }
 0x2c3   : > { %v4027_v60 = vmul.f32 %v3955_v56, %v9150_v6  ;;  %5789 = vmatprep.mubr.bf16.mxu0 %v4049_v27 }
 0x2c5   : > { %v4050_v4 = vpack.c.bf16 %v4028_v32, %v4027_v60 }
 0x2c6   : > { %v3963_v48 = vpop.permute.xlu1 %3962  ;;  %5602 = vmatmul.mubr.bf16.gmra.mrb[20].mxu1 %v2316_v52 }
 0x2c7   : > { %v4029_v36 = vmul.f32 %v3963_v48, %v9152_v35  ;;  %5790 = vmatmul.mubr.bf16.gmra.mrb[16].mxu0 %v4050_v4  ;;  %5605 = vmatprep.mubr.bf16.mxu1 %v2317_v12 }
 0x2c9   : > { %v4051_v57 = vpack.c.bf16 %v4030_v22, %v4029_v36 }
 0x2ca   : > { %v3971_v8 = vpop.permute.xlu1 %3970 }
 0x2cb   : > { %v4031_v49 = vmul.f32 %v3971_v8, %v9154_v41  ;;  %5793 = vmatprep.mubr.bf16.mxu0 %v4051_v57 }
 0x2cd   : > { %v4052_v19 = vpack.c.bf16 %v4032_v10, %v4031_v49 }
 0x2ce   : > { %v3979_v58 = vpop.permute.xlu1 %3978  ;;  %5606 = vmatmul.mubr.bf16.gmra.mrb[24].mxu1 %v2318_v38 }
 0x2cf   : > { %v4033_v55 = vmul.f32 %v3979_v58, %v9156_v0  ;;  %5794 = vmatmul.mubr.bf16.gmra.mrb[20].mxu0 %v4052_v19  ;;  %5609 = vmatprep.mubr.bf16.mxu1 %v2319_v45 }
 0x2d1   : > { %v4053_v59 = vpack.c.bf16 %v4034_v34, %v4033_v55 }
 0x2d2   : > { %v3987_v30 = vpop.permute.xlu1 %3986 }
 0x2d3   : > { %v4035_v42 = vmul.f32 %v3987_v30, %v9158_v1  ;;  %5797 = vmatprep.mubr.bf16.mxu0 %v4053_v59 }
 0x2d5   : > { %v4054_v39 = vpack.c.bf16 %v4036_v5, %v4035_v42 }
 0x2d6   : > { %v3995_v28 = vpop.permute.xlu1 %3994  ;;  %5610 = vmatmul.mubr.bf16.gmra.mrb[28].mxu1 %v2320_v17 }
 0x2d7   : > { %v4037_v20 = vmul.f32 %v3995_v28, %v9160_v63  ;;  %5798 = vmatmul.mubr.bf16.gmra.mrb[24].mxu0 %v4054_v39 }
 0x2d9   : > { %v4055_v11 = vpack.c.bf16 %v4038_v31, %v4037_v20 }
 0x2da   : > { %v4003_v16 = vpop.permute.xlu1 %4002 }
 0x2db   : > { %v4039_v24 = vmul.f32 %v4003_v16, %v9162_v29  ;;  %5801 = vmatprep.mubr.bf16.mxu0 %v4055_v11 }
 0x2dd   : > { %v4056_v47 = vpack.c.bf16 %v4040_v43, %v4039_v24 }
 0x2df   : > { %5802 = vmatmul.mubr.bf16.gmra.mrb[28].mxu0 %v4056_v47 }
 0x2e1   : > { %v5535_v7 = vpop.f32.mrb[0].mxu1 }
 0x2e2   : > { %v2146_v51 = vpop.f32.mrb[1].mxu1 }
 0x2e3   : > { %v5536_v13 = vpop.f32.mrb[2].mxu1 }
 0x2e4   : > { %v2149_v14 = vpop.f32.mrb[3].mxu1 }
 0x2f9   : > { %v5539_v33 = vpop.f32.mrb[4].mxu1 }
 0x2fa   : > { %v2162_v46 = vpop.f32.mrb[5].mxu1 }
 0x2fb   : > { %v5540_v26 = vpop.f32.mrb[6].mxu1 }
 0x2fc   : > { %v2165_v62 = vpop.f32.mrb[7].mxu1 }
 0x311   : > { %v5543_v9 = vpop.f32.mrb[8].mxu1 }
 0x312   : > { %v2178_v44 = vpop.f32.mrb[9].mxu1 }
 0x313   : > { %v5544_v37 = vpop.f32.mrb[10].mxu1 }
 0x314   : > { %v2181_v54 = vpop.f32.mrb[11].mxu1 }
 0x329   : > { %v5547_v27 = vpop.f32.mrb[12].mxu1 }
 0x32a   : > { %v2194_v56 = vpop.f32.mrb[13].mxu1 }
 0x32b   : > { %v5548_v52 = vpop.f32.mrb[14].mxu1 }
 0x32c   : > { %v2197_v40 = vpop.f32.mrb[15].mxu1 }
 0x34a   : > { %v5775_v32 = vpop.f32.mrb[0].mxu0 }
 0x34b   : > { %v8407_v6 = vadd.f32 %v5775_v32, %v5535_v7  ;;  %v4156_v60 = vpop.f32.mrb[1].mxu0 }
 0x34c   : > { %v8409_v12 = vadd.f32 %v4156_v60, %v2146_v51  ;;  %v5776_v4 = vpop.f32.mrb[2].mxu0 }
 0x34d   : > { %v8411_v53 = vadd.f32 %v5776_v4, %v5536_v13  ;;  %v4159_v48 = vpop.f32.mrb[3].mxu0 }
 0x34e   : > { %v8420_v61 = vadd.f32 %v4159_v48, %v2149_v14 }
 0x34f   : > { %v5055_v22 = vpack.c.bf16 %v8411_v53, %v8407_v6 }
 0x350   : > { %v5050_v35 = vpack.c.bf16 %v8420_v61, %v8409_v12  ;;  %v4475_v19 = vadd.f32 %v8420_v61, %v8409_v12 }
 0x351   : > { %5142 = vst [vmem:[%s8418_s7 + $0x8] sm:$0xff] %v5055_v22  }
 0x352   : > { %5051 = vst [vmem:[%s8418_s7] sm:$0xff] %v5050_v35   ;;  %v4476_v58 = vadd.f32 %v8407_v6, %v4475_v19 }
 0x354   : > { %v4477_v15 = vadd.f32 %v8411_v53, %v4476_v58 }
 0x362   : > { %v5779_v36 = vpop.f32.mrb[4].mxu0 }
 0x363   : > { %v8428_v57 = vadd.f32 %v5779_v36, %v5539_v33  ;;  %v4172_v8 = vpop.f32.mrb[5].mxu0 }
 0x364   : > { %v8430_v38 = vadd.f32 %v4172_v8, %v2162_v46  ;;  %v5780_v21 = vpop.f32.mrb[6].mxu0 }
 0x365   : > { %v8432_v10 = vadd.f32 %v5780_v21, %v5540_v26  ;;  %v4175_v41 = vpop.f32.mrb[7].mxu0 }
 0x366   : > { %v8434_v49 = vadd.f32 %v4175_v41, %v2165_v62  ;;  %v4478_v34 = vadd.f32 %v8430_v38, %v4477_v15 }
 0x367   : > { %v5065_v45 = vpack.c.bf16 %v8432_v10, %v8428_v57 }
 0x368   : > { %v5060_v18 = vpack.c.bf16 %v8434_v49, %v8430_v38  ;;  %v4479_v5 = vadd.f32 %v8434_v49, %v4478_v34 }
 0x369   : > { %5144 = vst [vmem:[%s8418_s7 + $0x18] sm:$0xff] %v5065_v45  }
 0x36a   : > { %5143 = vst [vmem:[%s8418_s7 + $0x10] sm:$0xff] %v5060_v18   ;;  %v4480_v28 = vadd.f32 %v8428_v57, %v4479_v5 }
 0x36c   : > { %v4481_v25 = vadd.f32 %v8432_v10, %v4480_v28 }
 0x37a   : > { %v5783_v0 = vpop.f32.mrb[8].mxu0 }
 0x37b   : > { %v8447_v55 = vadd.f32 %v5783_v0, %v5543_v9  ;;  %v4188_v59 = vpop.f32.mrb[9].mxu0 }
 0x37c   : > { %v8449_v23 = vadd.f32 %v4188_v59, %v2178_v44  ;;  %v5784_v30 = vpop.f32.mrb[10].mxu0 }
 0x37d   : > { %v8451_v17 = vadd.f32 %v5784_v30, %v5544_v37  ;;  %v4191_v3 = vpop.f32.mrb[11].mxu0 }
 0x37e   : > { %v8454_v1 = vadd.f32 %v4191_v3, %v2181_v54  ;;  %v4482_v31 = vadd.f32 %v8449_v23, %v4481_v25 }
 0x37f   : > { %v5075_v42 = vpack.c.bf16 %v8451_v17, %v8447_v55 }
 0x380   : > { %v5070_v39 = vpack.c.bf16 %v8454_v1, %v8449_v23  ;;  %v4483_v63 = vadd.f32 %v8454_v1, %v4482_v31 }
 0x381   : > { %5146 = vst [vmem:[%s8418_s7 + $0x28] sm:$0xff] %v5075_v42  }
 0x382   : > { %5145 = vst [vmem:[%s8418_s7 + $0x20] sm:$0xff] %v5070_v39   ;;  %v4484_v20 = vadd.f32 %v8447_v55, %v4483_v63 }
 0x384   : > { %v4485_v47 = vadd.f32 %v8451_v17, %v4484_v20 }
 0x391   : > { %v5599_v2 = vpop.f32.mrb[16].mxu1 }
 0x392   : > { %v2484_v11 = vpop.f32.mrb[17].mxu1  ;;  %v5787_v16 = vpop.f32.mrb[12].mxu0 }
 0x393   : > { %v8467_v50 = vadd.f32 %v5787_v16, %v5547_v27  ;;  %v5600_v43 = vpop.f32.mrb[18].mxu1  ;;  %v4204_v29 = vpop.f32.mrb[13].mxu0 }
 0x394   : > { %v8469_v24 = vadd.f32 %v4204_v29, %v2194_v56  ;;  %v2487_v7 = vpop.f32.mrb[19].mxu1  ;;  %v5788_v51 = vpop.f32.mrb[14].mxu0 }
 0x395   : > { %v8472_v13 = vadd.f32 %v5788_v51, %v5548_v52  ;;  %v4207_v14 = vpop.f32.mrb[15].mxu0 }
 0x396   : > { %v4486_v33 = vadd.f32 %v8469_v24, %v4485_v47  ;;  %v8475_v46 = vadd.f32 %v4207_v14, %v2197_v40 }
 0x397   : > { %v5085_v26 = vpack.c.bf16 %v8472_v13, %v8467_v50 }
 0x398   : > { %v5080_v62 = vpack.c.bf16 %v8475_v46, %v8469_v24  ;;  %v4487_v9 = vadd.f32 %v8475_v46, %v4486_v33 }
 0x399   : > { %5148 = vst [vmem:[%s8418_s7 + $0x38] sm:$0xff] %v5085_v26   ;;  %v5603_v44 = vpop.f32.mrb[20].mxu1 }
 0x39a   : > { %5147 = vst [vmem:[%s8418_s7 + $0x30] sm:$0xff] %v5080_v62   ;;  %v4488_v37 = vadd.f32 %v8467_v50, %v4487_v9  ;;  %v2500_v54 = vpop.f32.mrb[21].mxu1  ;;  %v5791_v27 = vpop.f32.mrb[16].mxu0 }
 0x39b   : > { %v8485_v56 = vadd.f32 %v5791_v27, %v5599_v2  ;;  %v5604_v52 = vpop.f32.mrb[22].mxu1  ;;  %v4220_v40 = vpop.f32.mrb[17].mxu0 }
 0x39c   : > { %v8487_v32 = vadd.f32 %v4220_v40, %v2484_v11  ;;  %v4489_v60 = vadd.f32 %v8472_v13, %v4488_v37  ;;  %v2503_v4 = vpop.f32.mrb[23].mxu1  ;;  %v5792_v48 = vpop.f32.mrb[18].mxu0 }
 0x39d   : > { %v8490_v22 = vadd.f32 %v5792_v48, %v5600_v43  ;;  %v4223_v35 = vpop.f32.mrb[19].mxu0 }
 0x39e   : > { %v4490_v36 = vadd.f32 %v8487_v32, %v4489_v60  ;;  %v8493_v8 = vadd.f32 %v4223_v35, %v2487_v7 }
 0x39f   : > { %v5095_v21 = vpack.c.bf16 %v8490_v22, %v8485_v56 }
 0x3a0   : > { %v5090_v41 = vpack.c.bf16 %v8493_v8, %v8487_v32  ;;  %v4491_v45 = vadd.f32 %v8493_v8, %v4490_v36 }
 0x3a1   : > { %5150 = vst [vmem:[%s8418_s7 + $0x48] sm:$0xff] %v5095_v21   ;;  %v5607_v18 = vpop.f32.mrb[24].mxu1 }
 0x3a2   : > { %5149 = vst [vmem:[%s8418_s7 + $0x40] sm:$0xff] %v5090_v41   ;;  %v4492_v19 = vadd.f32 %v8485_v56, %v4491_v45  ;;  %v2516_v58 = vpop.f32.mrb[25].mxu1  ;;  %v5795_v15 = vpop.f32.mrb[20].mxu0 }
 0x3a3   : > { %v8503_v34 = vadd.f32 %v5795_v15, %v5603_v44  ;;  %v5608_v0 = vpop.f32.mrb[26].mxu1  ;;  %v4236_v59 = vpop.f32.mrb[21].mxu0 }
 0x3a4   : > { %v8505_v30 = vadd.f32 %v4236_v59, %v2500_v54  ;;  %v4493_v3 = vadd.f32 %v8490_v22, %v4492_v19  ;;  %v2519_v5 = vpop.f32.mrb[27].mxu1  ;;  %v5796_v42 = vpop.f32.mrb[22].mxu0 }
 0x3a5   : > { %v8508_v39 = vadd.f32 %v5796_v42, %v5604_v52  ;;  %v4239_v28 = vpop.f32.mrb[23].mxu0 }
 0x3a6   : > { %v4494_v25 = vadd.f32 %v8505_v30, %v4493_v3  ;;  %v8511_v31 = vadd.f32 %v4239_v28, %v2503_v4 }
 0x3a7   : > { %v5105_v63 = vpack.c.bf16 %v8508_v39, %v8503_v34 }
 0x3a8   : > { %v5100_v20 = vpack.c.bf16 %v8511_v31, %v8505_v30  ;;  %v4495_v2 = vadd.f32 %v8511_v31, %v4494_v25 }
 0x3a9   : > { %5152 = vst [vmem:[%s8418_s7 + $0x58] sm:$0xff] %v5105_v63   ;;  %v5611_v11 = vpop.f32.mrb[28].mxu1 }
 0x3aa   : > { %5151 = vst [vmem:[%s8418_s7 + $0x50] sm:$0xff] %v5100_v20   ;;  %v4496_v16 = vadd.f32 %v8503_v34, %v4495_v2  ;;  %v2532_v43 = vpop.f32.mrb[29].mxu1  ;;  %v5799_v29 = vpop.f32.mrb[24].mxu0 }
 0x3ab   : > { %v8521_v47 = vadd.f32 %v5799_v29, %v5607_v18  ;;  %v5612_v7 = vpop.f32.mrb[30].mxu1  ;;  %v4252_v51 = vpop.f32.mrb[25].mxu0 }
 0x3ac   : > { %v8523_v14 = vadd.f32 %v4252_v51, %v2516_v58  ;;  %v4497_v33 = vadd.f32 %v8508_v39, %v4496_v16  ;;  %v2535_v26 = vpop.f32.mrb[31].mxu1  ;;  %v5800_v62 = vpop.f32.mrb[26].mxu0 }
 0x3ad   : > { %v8526_v9 = vadd.f32 %v5800_v62, %v5608_v0  ;;  %v4255_v44 = vpop.f32.mrb[27].mxu0 }
 0x3ae   : > { %v4498_v37 = vadd.f32 %v8523_v14, %v4497_v33  ;;  %v8529_v54 = vadd.f32 %v4255_v44, %v2519_v5 }
 0x3af   : > { %v5115_v27 = vpack.c.bf16 %v8526_v9, %v8521_v47 }
 0x3b0   : > { %v5110_v52 = vpack.c.bf16 %v8529_v54, %v8523_v14  ;;  %v4499_v40 = vadd.f32 %v8529_v54, %v4498_v37 }
 0x3b1   : > { %5154 = vst [vmem:[%s8418_s7 + $0x68] sm:$0xff] %v5115_v27  }
 0x3b2   : > { %5153 = vst [vmem:[%s8418_s7 + $0x60] sm:$0xff] %v5110_v52   ;;  %v4500_v60 = vadd.f32 %v8521_v47, %v4499_v40  ;;  %v5803_v4 = vpop.f32.mrb[28].mxu0 }
 0x3b3   : > { %v8539_v48 = vadd.f32 %v5803_v4, %v5611_v11  ;;  %v4268_v35 = vpop.f32.mrb[29].mxu0 }
 0x3b4   : > { %v8541_v36 = vadd.f32 %v4268_v35, %v2532_v43  ;;  %v4501_v21 = vadd.f32 %v8526_v9, %v4500_v60  ;;  %v5804_v41 = vpop.f32.mrb[30].mxu0 }
 0x3b5   : > { %v8544_v45 = vadd.f32 %v5804_v41, %v5612_v7  ;;  %v4271_v18 = vpop.f32.mrb[31].mxu0 }
 0x3b6   : > { %v4502_v19 = vadd.f32 %v8541_v36, %v4501_v21  ;;  %v8547_v58 = vadd.f32 %v4271_v18, %v2535_v26 }
 0x3b7   : > { %v5125_v15 = vpack.c.bf16 %v8544_v45, %v8539_v48 }
 0x3b8   : > { %v5120_v0 = vpack.c.bf16 %v8547_v58, %v8541_v36  ;;  %v4503_v59 = vadd.f32 %v8547_v58, %v4502_v19 }
 0x3b9   : > { %5156 = vst [vmem:[%s8418_s7 + $0x78] sm:$0xff] %v5125_v15  }
 0x3ba   : > { %5155 = vst [vmem:[%s8418_s7 + $0x70] sm:$0xff] %v5120_v0   ;;  %v4504_v3 = vadd.f32 %v8539_v48, %v4503_v59 }
 0x3bc   : > { %v4505_v5 = vadd.f32 %v8544_v45, %v4504_v3 }
 0x3be   : > { %v4506_v42 = vrot.slane %v4505_v5, 4 }
 0x3c0   : > { %v4507_v28 = vadd.f32 %v4506_v42, %v4505_v5 }
 0x3c2   : > { %v4508_v25 = vrot.slane %v4507_v28, 2 }
 0x3c4   : > { %v4509_v63 = vadd.f32 %v4508_v25, %v4507_v28 }
 0x3c6   : > { %v4510_v20 = vrot.slane %v4509_v63, 1 }
 0x3c8   : > { %v8558_v2 = vadd.f32 %v4510_v20, %v4509_v63 }
 0x3ca   : > { %v8561_v11 = vmul.f32 0.00390625, %v8558_v2 }
 0x3cc   : > { %v4513_v16 = vsub.f32 %v8409_v12, %v8561_v11  ;;  %v4514_v43 = vsub.f32 %v8420_v61, %v8561_v11  ;;  %v4515_v29 = vsub.f32 %v8407_v6, %v8561_v11  ;;  %v4516_v33 = vsub.f32 %v8411_v53, %v8561_v11 }
 0x3cd   : > { %v4517_v26 = vsub.f32 %v8430_v38, %v8561_v11  ;;  %v4518_v37 = vsub.f32 %v8434_v49, %v8561_v11  ;;  %v4519_v61 = vsub.f32 %v8428_v57, %v8561_v11  ;;  %v4520_v40 = vsub.f32 %v8432_v10, %v8561_v11 }
 0x3ce   : > { %v4545_v7 = vmul.f32 %v4513_v16, %v4513_v16  ;;  %v4546_v51 = vmul.f32 %v4514_v43, %v4514_v43  ;;  %v4547_v62 = vmul.f32 %v4515_v29, %v4515_v29  ;;  %v4548_v12 = vmul.f32 %v4516_v33, %v4516_v33 }
 0x3cf   : > { %v4549_v52 = vmul.f32 %v4517_v26, %v4517_v26  ;;  %v4550_v60 = vmul.f32 %v4518_v37, %v4518_v37  ;;  %v4521_v38 = vsub.f32 %v8449_v23, %v8561_v11  ;;  %v4551_v4 = vmul.f32 %v4519_v61, %v4519_v61 }
 0x3d0   : > { %v4577_v44 = vadd.f32 %v4546_v51, %v4545_v7  ;;  %v4522_v49 = vsub.f32 %v8454_v1, %v8561_v11  ;;  %v4552_v21 = vmul.f32 %v4520_v40, %v4520_v40  ;;  %v4523_v57 = vsub.f32 %v8447_v55, %v8561_v11 }
 0x3d1   : > { %v4553_v18 = vmul.f32 %v4521_v38, %v4521_v38  ;;  %v4524_v10 = vsub.f32 %v8451_v17, %v8561_v11  ;;  %v4525_v23 = vsub.f32 %v8469_v24, %v8561_v11  ;;  %v4526_v1 = vsub.f32 %v8475_v46, %v8561_v11 }
 0x3d2   : > { %v4578_v27 = vadd.f32 %v4577_v44, %v4547_v62  ;;  %v4554_v15 = vmul.f32 %v4522_v49, %v4522_v49  ;;  %v4555_v59 = vmul.f32 %v4523_v57, %v4523_v57  ;;  %v4527_v55 = vsub.f32 %v8467_v50, %v8561_v11 }
 0x3d3   : > { %v4556_v5 = vmul.f32 %v4524_v10, %v4524_v10  ;;  %v4557_v28 = vmul.f32 %v4525_v23, %v4525_v23  ;;  %v4528_v17 = vsub.f32 %v8472_v13, %v8561_v11  ;;  %v4558_v63 = vmul.f32 %v4526_v1, %v4526_v1 }
 0x3d4   : > { %v4579_v6 = vadd.f32 %v4578_v27, %v4548_v12  ;;  %v4529_v24 = vsub.f32 %v8487_v32, %v8561_v11  ;;  %v4559_v16 = vmul.f32 %v4527_v55, %v4527_v55  ;;  %v4530_v46 = vsub.f32 %v8493_v8, %v8561_v11 }
 0x3d5   : > { %v4560_v29 = vmul.f32 %v4528_v17, %v4528_v17  ;;  %v4531_v50 = vsub.f32 %v8485_v56, %v8561_v11  ;;  %v4532_v13 = vsub.f32 %v8490_v22, %v8561_v11  ;;  %v4533_v32 = vsub.f32 %v8505_v30, %v8561_v11 }
 0x3d6   : > { %v4580_v53 = vadd.f32 %v4579_v6, %v4549_v52  ;;  %v4561_v51 = vmul.f32 %v4529_v24, %v4529_v24  ;;  %v4562_v26 = vmul.f32 %v4530_v46, %v4530_v46  ;;  %v4534_v8 = vsub.f32 %v8511_v31, %v8561_v11 }
 0x3d7   : > { %v4563_v44 = vmul.f32 %v4531_v50, %v4531_v50  ;;  %v4564_v12 = vmul.f32 %v4532_v13, %v4532_v13  ;;  %v4535_v56 = vsub.f32 %v8503_v34, %v8561_v11  ;;  %v4565_v61 = vmul.f32 %v4533_v32, %v4533_v32 }
 0x3d8   : > { %v4581_v35 = vadd.f32 %v4580_v53, %v4550_v60  ;;  %v4536_v22 = vsub.f32 %v8508_v39, %v8561_v11  ;;  %v4566_v6 = vmul.f32 %v4534_v8, %v4534_v8  ;;  %v4537_v30 = vsub.f32 %v8523_v14, %v8561_v11 }
 0x3d9   : > { %v4567_v60 = vmul.f32 %v4535_v56, %v4535_v56  ;;  %v4538_v31 = vsub.f32 %v8529_v54, %v8561_v11  ;;  %v4539_v34 = vsub.f32 %v8521_v47, %v8561_v11  ;;  %v4540_v39 = vsub.f32 %v8526_v9, %v8561_v11 }
 0x3da   : > { %v4582_v41 = vadd.f32 %v4581_v35, %v4551_v4  ;;  %v4568_v38 = vmul.f32 %v4536_v22, %v4536_v22  ;;  %v4569_v35 = vmul.f32 %v4537_v30, %v4537_v30  ;;  %v4541_v14 = vsub.f32 %v8541_v36, %v8561_v11 }
 0x3db   : > { %v4571_v57 = vmul.f32 %v4539_v34, %v4539_v34  ;;  %v4542_v54 = vsub.f32 %v8547_v58, %v8561_v11  ;;  %v4543_v47 = vsub.f32 %v8539_v48, %v8561_v11  ;;  %v4544_v9 = vsub.f32 %v8544_v45, %v8561_v11 }
 0x3dc   : > { %v4583_v19 = vadd.f32 %v4582_v41, %v4552_v21  ;;  %v4570_v21 = vmul.f32 %v4538_v31, %v4538_v31 }
 0x3dd   : > { %v4574_v23 = vmul.f32 %v4542_v54, %v4542_v54  ;;  %v4576_v1 = vmul.f32 %v4544_v9, %v4544_v9 }
 0x3de   : > { %v4584_v0 = vadd.f32 %v4583_v19, %v4553_v18  ;;  %v4572_v19 = vmul.f32 %v4540_v39, %v4540_v39 }
 0x3e0   : > { %v4585_v3 = vadd.f32 %v4584_v0, %v4554_v15  ;;  %v4573_v15 = vmul.f32 %v4541_v14, %v4541_v14 }
 0x3e2   : > { %v4586_v42 = vadd.f32 %v4585_v3, %v4555_v59  ;;  %v4575_v3 = vmul.f32 %v4543_v47, %v4543_v47 }
 0x3e4   : > { %v4587_v25 = vadd.f32 %v4586_v42, %v4556_v5 }
 0x3e6   : > { %v4588_v20 = vadd.f32 %v4587_v25, %v4557_v28 }
 0x3e8   : > { %v4589_v43 = vadd.f32 %v4588_v20, %v4558_v63 }
 0x3ea   : > { %v4590_v7 = vadd.f32 %v4589_v43, %v4559_v16 }
 0x3ec   : > { %v4591_v33 = vadd.f32 %v4590_v7, %v4560_v29 }
 0x3ee   : > { %v4592_v62 = vadd.f32 %v4591_v33, %v4561_v51 }
 0x3f0   : > { %v4593_v37 = vadd.f32 %v4592_v62, %v4562_v26 }
 0x3f2   : > { %v4594_v27 = vadd.f32 %v4593_v37, %v4563_v44 }
 0x3f4   : > { %v4595_v52 = vadd.f32 %v4594_v27, %v4564_v12 }
 0x3f6   : > { %v4596_v40 = vadd.f32 %v4595_v52, %v4565_v61 }
 0x3f8   : > { %v4597_v53 = vadd.f32 %v4596_v40, %v4566_v6 }
 0x3fa   : > { %v4598_v4 = vadd.f32 %v4597_v53, %v4567_v60 }
 0x3fc   : > { %v4599_v49 = vadd.f32 %v4598_v4, %v4568_v38 }
 0x3fe   : > { %v4600_v41 = vadd.f32 %v4599_v49, %v4569_v35 }
 0x400   : > { %v4601_v18 = vadd.f32 %v4600_v41, %v4570_v21 }
 0x402   : > { %v4602_v10 = vadd.f32 %v4601_v18, %v4571_v57 }
 0x404   : > { %v4603_v0 = vadd.f32 %v4602_v10, %v4572_v19 }
 0x406   : > { %v4604_v59 = vadd.f32 %v4603_v0, %v4573_v15 }
 0x408   : > { %v4605_v36 = vadd.f32 %v4604_v59, %v4574_v23 }
 0x40a   : > { %v4606_v5 = vadd.f32 %v4605_v36, %v4575_v3 }
 0x40c   : > { %v4607_v42 = vadd.f32 %v4606_v5, %v4576_v1 }
 0x40e   : > { %v4608_v55 = vrot.slane %v4607_v42, 4 }
 0x410   : > { %v4609_v58 = vadd.f32 %v4608_v55, %v4607_v42 }
 0x412   : > { %v4610_v28 = vrot.slane %v4609_v58, 2 }
 0x414   : > { %v4611_v25 = vadd.f32 %v4610_v28, %v4609_v58 }
 0x416   : > { %v4612_v17 = vrot.slane %v4611_v25, 1 }
 0x418   : > { %v4613_v48 = vadd.f32 %v4612_v17, %v4611_v25 }
 0x41a   : > { %v4615_v45 = vsel %vm4614_vm2, %v8558_v2, %v4613_v48 }
 0x41b   : > { %4616 = vst [vmem:[%s262_s10] sm:$0x3] %v4615_v45 }
 0x41c PF: > { %s17_s21 = sadd.s32 1, %s6289_s21  }
 0x41d   : > { %p14_p4 = scmp.ge.s32.totalorder %s17_s21, 4  }
 0x41f   :  { %16 = sbr.rel (!%p14_p4) target bundleno = 1 (0x1), region = 90 }

</bundles_post_ra>
